<compile_context>
chip_gen: v6e
topology: v6e:2x2x1
jax: 0.10.0
libtpu: 0.0.40
codegen_flags: <defaults>
</compile_context>

<pallas_src>
import functools
import operator

import numpy as np

import jax
import jax.numpy as jnp
from jax.experimental import pallas as pl
from jax.experimental.pallas import tpu as pltpu

LRELU_SLOPE = 0.1
COMPUTE_DTYPE = jnp.bfloat16     # MXU operand / weight dtype
RES_DTYPE = jnp.float32          # residual-carrier activations (branch sums etc.)


def get_padding(kernel_size, dilation=1):
    return (kernel_size * dilation - dilation) // 2


def _round_up(x, m):
    return ((x + m - 1) // m) * m


def _tpu_budget():
    """(max L tile, scoped vmem limit) per TPU generation."""
    try:
        info = pltpu.get_tpu_info()
        vmem = getattr(info, "vmem_capacity_bytes", 128 * 1024 * 1024)
    except Exception:  # pragma: no cover - query failure fallback
        vmem = 128 * 1024 * 1024
    if vmem >= 100 * 1024 * 1024:           # v5e / v6e: 128 MiB physical VMEM
        return 512, 64 * 1024 * 1024
    return 256, 32 * 1024 * 1024            # v7x: 64 MiB physical VMEM


MAX_TILE_L, VMEM_LIMIT_BYTES = _tpu_budget()


def _pick_tile_l(l_out):
    """Lane tile: multiple of 128 (lane-dense stores); remainder tiles are masked."""
    if l_out <= 128:
        return l_out
    return min(MAX_TILE_L, (l_out // 128) * 128)


@functools.lru_cache(maxsize=None)
def _single_buffering_supported():
    """Probe once whether pl.Buffered(1) (single-buffered blocks) lowers and runs."""
    try:
        with jax.ensure_compile_time_eval():
            def _k(x_ref, o_ref):
                o_ref[...] = x_ref[...] + 1.0

            f = pl.pallas_call(
                _k,
                out_shape=jax.ShapeDtypeStruct((8, 128), jnp.float32),
                grid=(2, 2),
                in_specs=[pl.BlockSpec((8, 128), lambda i, j: (i, 0),
                                       pipeline_mode=pl.Buffered(1))],
                out_specs=pl.BlockSpec((8, 128), lambda i, j: (0, 0)),
            )
            jax.block_until_ready(f(jnp.zeros((16, 128), jnp.float32)))
        return True
    except Exception:  # pragma: no cover - fall back to default double buffering
        return False


def _maybe_single(shape, index_map):
    """BlockSpec for grid-invariant / per-batch-resident blocks: request a single
    pipeline buffer (halves their VMEM footprint) when the runtime supports it."""
    if _single_buffering_supported():
        return pl.BlockSpec(shape, index_map, pipeline_mode=pl.Buffered(1))
    return pl.BlockSpec(shape, index_map)


# ----------------------------------------------------------------------------
# Pallas kernels
# ----------------------------------------------------------------------------
def _conv_kernel(*refs, K1, d1, K2, tile_l, x_start, win_len, L_in, L_out, nt,
                 in_slope, in_scale, mid_slope, n_adds, out_scale, out_slope):
    """One (batch, L-tile) grid step of a (optionally fused pair of) dilated Conv1d.

    Ref order: x, w1, b1, [w2, b2,] *adds, out, xpad(scratch).
      x    : (1, Cin, L_in)   resident per-batch input sequence
      w1   : (C1, K1*Cin)     b1: (C1, 1) f32   flattened conv weight / bias
      w2   : (C2, K2*C1)      b2: (C2, 1) f32   optional fused second (SAME) conv
      adds : (1, Cout, tile_l) each             fused epilogue additions (f32 add)
      out  : (1, Cout, tile_l)                  lane-dense output tile
      xpad : (nt, Cin, win_len) VMEM scratch    per-tile halo windows of the
                                                activated input, staged at t == 0.
    """
    it = iter(refs)
    x_ref = next(it)
    w1_ref = next(it)
    b1_ref = next(it)
    if K2 is not None:
        w2_ref = next(it)
        b2_ref = next(it)
    add_refs = [next(it) for _ in range(n_adds)]
    o_ref = next(it)
    xpad = next(it)

    t = pl.program_id(1)
    cin = x_ref.shape[1]
    ext = 0 if K2 is None else (K2 - 1) // 2
    w1_len = tile_l + 2 * ext                 # conv-1 output window width

    @pl.when(t == 0)
    def _stage():
        # Stage the (scaled / activated) zero-padded input as per-tile halo windows.
        # NOTE: this makes the L-tile axis sequential, so it must stay "arbitrary"
        # in dimension_semantics (see the wrapper).
        for tt in range(nt):
            lo = tt * tile_l - x_start               # window start in x coordinates
            zl = min(max(-lo, 0), win_len)
            a = min(max(lo, 0), L_in)
            b = max(min(lo + win_len, L_in), a)
            body = b - a
            zr = win_len - zl - body
            parts = []
            if zl > 0:
                parts.append(jnp.zeros((cin, zl), xpad.dtype))
            if body > 0:
                seg = x_ref[0, :, a:b]               # static slice
                if in_scale is not None:
                    seg = seg * in_scale
                if in_slope is not None:
                    seg = jnp.where(seg > 0, seg, seg * in_slope)
                parts.append(seg.astype(xpad.dtype))
            if zr > 0:
                parts.append(jnp.zeros((cin, zr), xpad.dtype))
            xpad[tt, :, :] = (parts[0] if len(parts) == 1
                              else jnp.concatenate(parts, axis=1))

    win = xpad[t]                                    # (Cin, win_len) aligned load
    # im2col: K1 statically-shifted views stacked on sublanes -> one MXU matmul.
    if K1 > 1:
        slab1 = jnp.concatenate(
            [win[:, k * d1:k * d1 + w1_len] for k in range(K1)], axis=0)
    else:
        slab1 = win[:, :w1_len]
    h = jnp.dot(w1_ref[...], slab1, preferred_element_type=jnp.float32)
    h = h + b1_ref[...].astype(jnp.float32)          # (C1, w1_len) f32

    if K2 is None:
        acc = h
    else:
        if mid_slope is not None:                    # fused leaky_relu between convs
            h = jnp.where(h > 0, h, h * mid_slope)
        # conv-2's own zero padding: positions outside [0, L_out) contribute 0.
        pos = jax.lax.broadcasted_iota(jnp.int32, h.shape, 1) + (t * tile_l - ext)
        h = jnp.where((pos >= 0) & (pos < L_out), h, 0.0)
        hb = h.astype(w2_ref.dtype)
        if K2 > 1:
            slab2 = jnp.concatenate([hb[:, k:k + tile_l] for k in range(K2)], axis=0)
        else:
            slab2 = hb[:, :tile_l]
        acc = jnp.dot(w2_ref[...], slab2, preferred_element_type=jnp.float32)
        acc = acc + b2_ref[...].astype(jnp.float32)  # (C2, tile_l) f32

    for r in add_refs:                               # residual / branch-sum fusion
        acc = acc + r[0].astype(jnp.float32)
    if out_scale is not None:                        # fused 1/num_kernels
        acc = acc * out_scale
    if out_slope is not None:                        # fused downstream leaky_relu
        acc = jnp.where(acc > 0, acc, acc * out_slope)
    o_ref[0] = acc.astype(o_ref.dtype)


def _linear_kernel(x_ref, w_ref, b_ref, o_ref, acc_ref):
    kt = pl.program_id(1)

    @pl.when(kt == 0)
    def _init():
        acc_ref[...] = jnp.zeros_like(acc_ref)

    acc_ref[...] += jnp.dot(x_ref[...], w_ref[...],
                            preferred_element_type=jnp.float32)

    @pl.when(kt == pl.num_programs(1) - 1)
    def _fin():
        o_ref[...] = (acc_ref[...] + b_ref[...].astype(jnp.float32)).astype(o_ref.dtype)


# ----------------------------------------------------------------------------
# Wrappers (pallas_call setup)
# ----------------------------------------------------------------------------
def conv1d_ncl(x, w1, b1, *, kernel_size, dilation=1, pad_l, pad_r=None,
               conv2=None, extra_adds=(), in_slope=None, in_scale=None,
               mid_slope=None, out_scale=None, out_slope=None, out_dtype=None):
    """(Optionally fused pair of) dilated Conv1d over (B, Cin, L) activations.

    w1: (C1, kernel_size*Cin) flattened bf16 weight, b1: (C1,) f32.
    conv2 = (w2, b2, kernel_size2): fuse a second SAME conv (dilation 1) applied to
        leaky_relu(conv1(...)) without the intermediate touching HBM.
    extra_adds: arrays of shape (B, Cout, L_out) added (in f32) in the epilogue.
    """
    B, Cin, L_in = x.shape
    C1 = w1.shape[0]
    assert w1.shape[1] == kernel_size * Cin, (w1.shape, kernel_size, Cin)
    if pad_r is None:
        pad_r = pad_l
    if conv2 is None:
        K2 = None
        ext = 0
        Cout = C1
        L_out = L_in + pad_l + pad_r - dilation * (kernel_size - 1)
    else:
        w2, b2, K2 = conv2
        ext = (K2 - 1) // 2
        Cout = w2.shape[0]
        assert w2.shape[1] == K2 * C1
        L_out = L_in                       # both convs are SAME-padded
    assert L_out > 0
    if out_dtype is None:
        out_dtype = COMPUTE_DTYPE

    tile_l = _pick_tile_l(L_out)
    nt = pl.cdiv(L_out, tile_l)            # remainder tiles handled by masked blocks
    x_start = pad_l + ext                  # offset of x[0] inside the padded window
    win_len = tile_l + 2 * ext + dilation * (kernel_size - 1)

    kern = functools.partial(
        _conv_kernel, K1=kernel_size, d1=dilation, K2=K2, tile_l=tile_l,
        x_start=x_start, win_len=win_len, L_in=L_in, L_out=L_out, nt=nt,
        in_slope=in_slope, in_scale=in_scale, mid_slope=mid_slope,
        n_adds=len(extra_adds), out_scale=out_scale, out_slope=out_slope)

    args = [x, w1, b1.reshape(C1, 1)]
    in_specs = [
        _maybe_single((1, Cin, L_in), lambda bb, tt: (bb, 0, 0)),
        _maybe_single((C1, kernel_size * Cin), lambda bb, tt: (0, 0)),
        _maybe_single((C1, 1), lambda bb, tt: (0, 0)),
    ]
    if conv2 is not None:
        args += [w2, b2.reshape(Cout, 1)]
        in_specs += [_maybe_single((Cout, K2 * C1), lambda bb, tt: (0, 0)),
                     _maybe_single((Cout, 1), lambda bb, tt: (0, 0))]
    for a in extra_adds:
        assert a.shape == (B, Cout, L_out), (a.shape, (B, Cout, L_out))
        args.append(a)
        in_specs.append(pl.BlockSpec((1, Cout, tile_l), lambda bb, tt: (bb, 0, tt)))

    return pl.pallas_call(
        kern,
        out_shape=jax.ShapeDtypeStruct((B, Cout, L_out), out_dtype),
        grid=(B, nt),
        in_specs=in_specs,
        out_specs=pl.BlockSpec((1, Cout, tile_l), lambda bb, tt: (bb, 0, tt)),
        scratch_shapes=[pltpu.VMEM((nt, Cin, win_len), COMPUTE_DTYPE)],
        compiler_params=pltpu.CompilerParams(
            # L-tile axis must stay "arbitrary": per-tile windows are staged into
            # the persistent scratch at t == 0 (sequential dependency).
            # TODO(synk): per-tile halo DMA (memory_space=pl.ANY) would bound VMEM
            # independently of L and allow a parallel L axis (v7x second core).
            dimension_semantics=("parallel", "arbitrary"),
            vmem_limit_bytes=VMEM_LIMIT_BYTES),
    )(*args)


def linear_rows(x, w, b, *, max_tile_t=1024, max_tile_r=256):
    """x: (R, T) @ w: (T, V) + b -> (R, V) f32, with the T (contraction) axis tiled."""
    R, T = x.shape
    Tw, V = w.shape
    assert Tw == T
    tile_r = R if R <= max_tile_r else max_tile_r
    tile_t = T
    if T > max_tile_t:
        for cand in range(max_tile_t, 127, -128):
            if T % cand == 0:
                tile_t = cand
                break
    grid = (pl.cdiv(R, tile_r), T // tile_t)
    w_spec = (_maybe_single((tile_t, V), lambda r, k: (k, 0)) if grid[1] == 1
              else pl.BlockSpec((tile_t, V), lambda r, k: (k, 0)))
    return pl.pallas_call(
        _linear_kernel,
        out_shape=jax.ShapeDtypeStruct((R, V), jnp.float32),
        grid=grid,
        in_specs=[pl.BlockSpec((tile_r, tile_t), lambda r, k: (r, k)),
                  w_spec,
                  _maybe_single((1, V), lambda r, k: (0, 0))],
        out_specs=pl.BlockSpec((tile_r, V), lambda r, k: (r, 0)),
        scratch_shapes=[pltpu.VMEM((tile_r, V), jnp.float32)],
        compiler_params=pltpu.CompilerParams(
            dimension_semantics=("parallel", "arbitrary"),
            vmem_limit_bytes=VMEM_LIMIT_BYTES),
    )(x, w, b.reshape(1, V))


# ----------------------------------------------------------------------------
# Polyphase ConvTranspose1d preparation
# ----------------------------------------------------------------------------
def _polyphase_geometry(K, stride, padding):
    """y[stride*m + r] = sum over taps (d, k): x[m + d] @ w[:, :, k]."""
    per_phase = []
    all_d = []
    for r in range(stride):
        c = (r + padding) % stride
        q = (r + padding) // stride
        taps = []
        j = 0
        while stride * j + c < K:
            taps.append((q - j, stride * j + c))
            j += 1
        per_phase.append(taps)
        all_d.extend(d for d, _ in taps)
    return per_phase, min(all_d), max(all_d)


def _polyphase_weights(w_pt, stride, padding):
    """PyTorch ConvTranspose1d weight (Cin, Cout, K) -> flattened dense conv weight
    (stride*Cout, T*Cin); the (stride*Cout, L) output interleaves to (Cout, L*stride)."""
    w = np.asarray(w_pt)
    Cin, Cout, K = w.shape
    per_phase, dmin, dmax = _polyphase_geometry(K, stride, padding)
    T = dmax - dmin + 1
    W = np.zeros((T, Cin, stride * Cout), w.dtype)
    for r, taps in enumerate(per_phase):
        for d, k in taps:
            W[d - dmin, :, r * Cout:(r + 1) * Cout] = w[:, :, k]
    Wf = np.transpose(W, (2, 0, 1)).reshape(stride * Cout, T * Cin)
    return Wf, -dmin, dmax               # flat weight, pad_l, pad_r


# ----------------------------------------------------------------------------
# ResBlocks + Generator forward
# ----------------------------------------------------------------------------
def _run_branch(x, rb, ksize, dilations, resblock_type, xs_prev, stage_tail):
    """One ResBlock on x.  The running branch sum (xs_prev) and the stage-closing
    (1/num_kernels, leaky_relu) are fused into the epilogue of its last conv."""
    out = x
    n = len(dilations)
    for di, d in enumerate(dilations):
        last = di == n - 1
        extra = (out, xs_prev) if (last and xs_prev is not None) else (out,)
        o_scale = o_slope = None
        o_dtype = RES_DTYPE
        if last and stage_tail is not None:
            o_scale, o_slope, o_dtype = stage_tail
        if resblock_type == "1":
            w1, b1 = rb["convs1"][di]
            w2, b2 = rb["convs2"][di]
            out = conv1d_ncl(out, w1, b1, kernel_size=ksize, dilation=d,
                             pad_l=get_padding(ksize, d), conv2=(w2, b2, ksize),
                             extra_adds=extra, in_slope=LRELU_SLOPE,
                             mid_slope=LRELU_SLOPE, out_scale=o_scale,
                             out_slope=o_slope, out_dtype=o_dtype)
        else:
            w1, b1 = rb["convs"][di]
            out = conv1d_ncl(out, w1, b1, kernel_size=ksize, dilation=d,
                             pad_l=get_padding(ksize, d), extra_adds=extra,
                             in_slope=LRELU_SLOPE, out_scale=o_scale,
                             out_slope=o_slope, out_dtype=o_dtype)
    return out


def generator_forward(params, x_ncl, h):
    num_kernels = len(h["resblock_kernel_sizes"])
    num_up = len(h["upsample_rates"])

    # Pad mel channels to a sublane multiple (conv_pre weight padded to match).
    cin0 = x_ncl.shape[1]
    cin0p = _round_up(cin0, 8)
    x = x_ncl
    if cin0p != cin0:
        x = jnp.pad(x, ((0, 0), (0, cin0p - cin0), (0, 0)))

    w, b = params["conv_pre"]
    # conv_pre with the first stage's F.leaky_relu(., 0.1) fused into its epilogue.
    x = conv1d_ncl(x, w, b, kernel_size=3, dilation=1, pad_l=1,
                   out_slope=LRELU_SLOPE, out_dtype=COMPUTE_DTYPE)

    for i in range(num_up):
        u = h["upsample_rates"][i]
        ku = h["upsample_kernel_sizes"][i]
        wu, bu = params["ups"][i]
        cin = x.shape[1]
        t_poly = wu.shape[1] // cin
        _, dmin, dmax = _polyphase_geometry(ku, u, (ku - u) // 2)
        assert t_poly == dmax - dmin + 1
        # Polyphase ConvTranspose1d: dense conv over frames, no zero-insertion.
        y = conv1d_ncl(x, wu, bu, kernel_size=t_poly, dilation=1,
                       pad_l=-dmin, pad_r=dmax, out_dtype=RES_DTYPE)
        bq, sc, lf = y.shape
        cout = sc // u
        # Phase interleave: row r*Cout+co at frame m -> channel co at time m*u+r.
        # TODO(synk): absorb this per-stage transpose into the consumers' staging.
        x = y.reshape(bq, u, cout, lf).transpose(0, 2, 3, 1).reshape(bq, cout, lf * u)

        last_stage = i == num_up - 1
        stage_tail = (1.0 / num_kernels,
                      0.01 if last_stage else LRELU_SLOPE,   # F.leaky_relu defaults
                      COMPUTE_DTYPE)
        xs = None
        for j in range(num_kernels):
            tail = stage_tail if j == num_kernels - 1 else None
            xs = _run_branch(x, params["resblocks"][i * num_kernels + j],
                             h["resblock_kernel_sizes"][j],
                             h["resblock_dilation_sizes"][j],
                             h["resblock"], xs, tail)
        x = xs

    # Final Linear over the time axis; (B, C) flattened into MXU rows.  The
    # leaky_relu(0.01) and the pending 1/num_kernels were fused upstream.
    wp, bp = params["post"]
    bq, c_last, t_len = x.shape
    out = linear_rows(x.reshape(bq * c_last, t_len), wp, bp)
    return out.reshape(bq, c_last, -1)


# ----------------------------------------------------------------------------
# Parameter init (PyTorch layouts, init_weights ~ normal(0, 0.01)) and one-time
# param preparation (layout flatten / polyphase / bf16 cast) done OUTSIDE jit.
# Weight-norm is identity at init, so plain weights are used (folded at prep time).
# ----------------------------------------------------------------------------
def init_params(h, key):
    keys = iter(jax.random.split(key, 512))

    def normal(shape):
        return 0.01 * jax.random.normal(next(keys), shape, jnp.float32)

    params = {}
    # Conv1d weight layout: (Cout, Cin, K)
    params["conv_pre"] = (normal((h["upsample_initial_channel"], h["init_channel"], 3)),
                          normal((h["upsample_initial_channel"],)))

    ups = []
    for i, (u, k) in enumerate(zip(h["upsample_rates"], h["upsample_kernel_sizes"])):
        cin = h["upsample_initial_channel"] // 2 ** i
        cout = h["upsample_initial_channel"] // 2 ** (i + 1)
        # ConvTranspose1d weight layout: (Cin, Cout, K)
        ups.append((normal((cin, cout, k)), normal((cout,))))
    params["ups"] = ups

    resblocks = []
    for i in range(len(h["upsample_rates"])):
        ch = h["upsample_initial_channel"] // 2 ** (i + 1)
        for kk, dd in zip(h["resblock_kernel_sizes"], h["resblock_dilation_sizes"]):
            if h["resblock"] == "1":
                rb = {"convs1": [(normal((ch, ch, kk)), normal((ch,))) for _ in dd],
                      "convs2": [(normal((ch, ch, kk)), normal((ch,))) for _ in dd]}
            else:
                rb = {"convs": [(normal((ch, ch, kk)), normal((ch,))) for _ in dd]}
            resblocks.append(rb)
    params["resblocks"] = resblocks

    last_features = h["init_feature_size"] * functools.reduce(
        operator.mul, h["upsample_rates"])
    # Linear weight layout: (V, T)
    params["post"] = (normal((h["vocab_size"], last_features)),
                      normal((h["vocab_size"],)))
    return params


def prepare_params(raw, h):
    cdt = COMPUTE_DTYPE

    def flat_conv(w_pt, pad_cin_to=None):
        w = np.asarray(w_pt)                       # (Cout, Cin, K)
        if pad_cin_to is not None and pad_cin_to > w.shape[1]:
            w = np.pad(w, ((0, 0), (0, pad_cin_to - w.shape[1]), (0, 0)))
        co, ci, k = w.shape
        return jnp.asarray(np.transpose(w, (0, 2, 1)).reshape(co, k * ci), dtype=cdt)

    prep = {}
    w, b = raw["conv_pre"]
    prep["conv_pre"] = (flat_conv(w, _round_up(np.asarray(w).shape[1], 8)),
                        jnp.asarray(b, jnp.float32))

    ups = []
    for (w_pt, b), u, k in zip(raw["ups"], h["upsample_rates"],
                               h["upsample_kernel_sizes"]):
        # TODO(synk): odd (kernel - stride) transposed convs (output len L*stride+1)
        # are not supported by the polyphase path.
        assert (k - u) % 2 == 0
        wf, _, _ = _polyphase_weights(w_pt, u, (k - u) // 2)
        ups.append((jnp.asarray(wf, dtype=cdt),
                    jnp.asarray(np.tile(np.asarray(b), u), jnp.float32)))
    prep["ups"] = ups

    prep["resblocks"] = [
        {name: [(flat_conv(wb[0]), jnp.asarray(wb[1], jnp.float32)) for wb in lst]
         for name, lst in rb.items()}
        for rb in raw["resblocks"]]

    wp, bp = raw["post"]
    prep["post"] = (jnp.asarray(np.transpose(np.asarray(wp), (1, 0)), dtype=cdt),
                    jnp.asarray(bp, jnp.float32))
    return prep


# ----------------------------------------------------------------------------
if __name__ == "__main__":
    h = dict(
        init_channel=4,
        upsample_initial_channel=32,
        upsample_rates=(2, 2),
        upsample_kernel_sizes=(4, 4),
        resblock="1",
        resblock_kernel_sizes=(3, 5),
        resblock_dilation_sizes=((1, 3, 5), (1, 3, 5)),
        init_feature_size=8,
        vocab_size=16,
    )
    key = jax.random.PRNGKey(0)
    pkey, xkey = jax.random.split(key)
    raw_params = init_params(h, pkey)
    params = prepare_params(raw_params, h)        # layout / polyphase / bf16 prep
    # x matches PyTorch Conv1d input layout NCL: (batch, init_channel, init_feature_size)
    x = jax.random.normal(xkey, (2, h["init_channel"], h["init_feature_size"]),
                          jnp.float32)

    _single_buffering_supported()                 # run the Buffered(1) probe eagerly

    @jax.jit
    def run(params, x):
        return generator_forward(params, x, h)

    out = run(params, x)
    jax.block_until_ready(out)

    c_last = h["upsample_initial_channel"] // 2 ** len(h["upsample_rates"])
    assert out.shape == (2, c_last, h["vocab_size"]), out.shape
    assert bool(jnp.all(jnp.isfinite(out)))
    print("KERNEL_OK")
</pallas_src>

<mosaic_0001>
module attributes {stable_mosaic.version = 11 : i64} {
  func.func @_k(%arg0: i32, %arg1: i32, %arg2: memref<8x128xf32, #tpu.memory_space<vmem>>, %arg3: memref<8x128xf32, #tpu.memory_space<vmem>>) attributes {dimension_semantics = [#tpu.dimension_semantics<arbitrary>, #tpu.dimension_semantics<arbitrary>], iteration_bounds = array<i64: 2, 2>, scalar_prefetch = 0 : i64, scratch_operands = 0 : i64, tpu.core_type = #tpu.core_type<tc>, window_params = [{pipeline_mode = #tpu.pipeline_mode<synchronous>, transform_indices = @transform_0, window_bounds = array<i64: 8, 128>}, {pipeline_mode = #tpu.pipeline_mode<synchronous>, transform_indices = @transform_1, window_bounds = array<i64: 8, 128>}]} {
    %c0 = arith.constant 0 : index
    %c0_0 = arith.constant 0 : index
    %0 = vector.load %arg2[%c0, %c0_0] : memref<8x128xf32, #tpu.memory_space<vmem>>, vector<8x128xf32>
    %cst = arith.constant 1.000000e+00 : f32
    %1 = vector.broadcast %cst : f32 to vector<8x128xf32>
    %2 = arith.addf %0, %1 : vector<8x128xf32>
    %c0_1 = arith.constant 0 : index
    %c0_2 = arith.constant 0 : index
    %3 = vector.load %arg3[%c0_1, %c0_2] : memref<8x128xf32, #tpu.memory_space<vmem>>, vector<8x128xf32>
    tpu.vector_store %arg3[%c0_1, %c0_2], %2 {strides = array<i32>} : memref<8x128xf32, #tpu.memory_space<vmem>>, vector<8x128xf32>,
    return
  }
  func.func @transform_0(%arg0: i32, %arg1: i32) -> (i32, i32) {
    %c0_i32 = arith.constant 0 : i32
    %c0_i32_0 = arith.constant 0 : i32
    return %arg0, %c0_i32 : i32, i32
  }
  func.func @transform_1(%arg0: i32, %arg1: i32) -> (i32, i32) {
    %c0_i32 = arith.constant 0 : i32
    %c0_i32_0 = arith.constant 0 : i32
    %c0_i32_1 = arith.constant 0 : i32
    return %c0_i32, %c0_i32_0 : i32, i32
  }
}

module attributes {stable_mosaic.version = 11 : i64} {
  func.func @_conv_kernel(%arg0: i32, %arg1: i32, %arg2: memref<1x8x8xf32, #tpu.memory_space<vmem>>, %arg3: memref<32x24xbf16, #tpu.memory_space<vmem>>, %arg4: memref<32x1xf32, #tpu.memory_space<vmem>>, %arg5: memref<1x32x8xbf16, #tpu.memory_space<vmem>>, %arg6: memref<1x8x10xbf16, #tpu.memory_space<vmem>>) attributes {dimension_semantics = [#tpu.dimension_semantics<parallel>, #tpu.dimension_semantics<arbitrary>], iteration_bounds = array<i64: 2, 1>, scalar_prefetch = 0 : i64, scratch_operands = 1 : i64, tpu.core_type = #tpu.core_type<tc>, window_params = [{transform_indices = @transform_0, window_bounds = array<i64: 1, 8, 8>}, {pipeline_mode = #tpu.pipeline_mode<synchronous>, transform_indices = @transform_1, window_bounds = array<i64: 32, 24>}, {pipeline_mode = #tpu.pipeline_mode<synchronous>, transform_indices = @transform_2, window_bounds = array<i64: 32, 1>}, {transform_indices = @transform_3, window_bounds = array<i64: 1, 32, 8>}]} {
    %c0_i32 = arith.constant 0 : i32
    %0 = arith.cmpi eq, %arg1, %c0_i32 : i32
    %1 = arith.extui %0 : i1 to i32
    %c0_i32_0 = arith.constant 0 : i32
    %2 = arith.cmpi ne, %1, %c0_i32_0 : i32
    scf.if %2 {
      %cst_11 = arith.constant 0.000000e+00 : bf16
      %24 = vector.broadcast %cst_11 : bf16 to vector<8x1xbf16>
      %c0_12 = arith.constant 0 : index
      %c0_13 = arith.constant 0 : index
      %c0_14 = arith.constant 0 : index
      %25 = vector.load %arg2[%c0_12, %c0_13, %c0_14] : memref<1x8x8xf32, #tpu.memory_space<vmem>>, vector<1x8x8xf32>
      %26 = vector.shape_cast %25 : vector<1x8x8xf32> to vector<8x8xf32>
      %27 = arith.truncf %26 : vector<8x8xf32> to vector<8x8xbf16>
      %cst_15 = arith.constant 0.000000e+00 : bf16
      %28 = vector.broadcast %cst_15 : bf16 to vector<8x1xbf16>
      %29 = tpu.concatenate %24, %27, %28 in 1 : vector<8x1xbf16>, vector<8x8xbf16>, vector<8x1xbf16> -> vector<8x10xbf16>
      %c0_16 = arith.constant 0 : index
      %c0_17 = arith.constant 0 : index
      %c0_18 = arith.constant 0 : index
      %30 = vector.load %arg6[%c0_16, %c0_17, %c0_18] : memref<1x8x10xbf16, #tpu.memory_space<vmem>>, vector<1x8x10xbf16>
      %31 = vector.shape_cast %30 : vector<1x8x10xbf16> to vector<8x10xbf16>
      %32 = vector.shape_cast %29 : vector<8x10xbf16> to vector<1x8x10xbf16>
      tpu.vector_store %arg6[%c0_16, %c0_17, %c0_18], %32 {strides = array<i32>} : memref<1x8x10xbf16, #tpu.memory_space<vmem>>, vector<1x8x10xbf16>,
    } else {
    }
    %3 = arith.index_cast %arg1 : i32 to index
    %c0 = arith.constant 0 : index
    %c0_1 = arith.constant 0 : index
    %4 = vector.load %arg6[%3, %c0, %c0_1] : memref<1x8x10xbf16, #tpu.memory_space<vmem>>, vector<1x8x10xbf16>
    %5 = vector.shape_cast %4 : vector<1x8x10xbf16> to vector<8x10xbf16>
    %6 = vector.extract_strided_slice %5 {offsets = [0, 0], sizes = [8, 8], strides = [1, 1]} : vector<8x10xbf16> to vector<8x8xbf16>
    %7 = vector.extract_strided_slice %5 {offsets = [0, 1], sizes = [8, 8], strides = [1, 1]} : vector<8x10xbf16> to vector<8x8xbf16>
    %8 = vector.extract_strided_slice %5 {offsets = [0, 2], sizes = [8, 8], strides = [1, 1]} : vector<8x10xbf16> to vector<8x8xbf16>
    %9 = tpu.concatenate %6, %7, %8 in 0 : vector<8x8xbf16>, vector<8x8xbf16>, vector<8x8xbf16> -> vector<24x8xbf16>
    %c0_2 = arith.constant 0 : index
    %c0_3 = arith.constant 0 : index
    %10 = vector.load %arg3[%c0_2, %c0_3] : memref<32x24xbf16, #tpu.memory_space<vmem>>, vector<32x24xbf16>
    %cst = arith.constant dense<0.000000e+00> : vector<32x8xf32>
    %11 = tpu.matmul %10, %9, %cst {dimension_numbers = #tpu.dot_dimension_numbers<[1], [0], [0], [1], [0, 0, 1, 1], [], []>} : vector<32x24xbf16>, vector<24x8xbf16>, vector<32x8xf32> -> vector<32x8xf32>
    %c0_4 = arith.constant 0 : index
    %c0_5 = arith.constant 0 : index
    %12 = vector.load %arg4[%c0_4, %c0_5] : memref<32x1xf32, #tpu.memory_space<vmem>>, vector<32x1xf32>
    %13 = vector.broadcast %12 : vector<32x1xf32> to vector<32x8xf32>
    %14 = arith.addf %11, %13 : vector<32x8xf32>
    %cst_6 = arith.constant 0.000000e+00 : f32
    %15 = vector.broadcast %cst_6 : f32 to vector<32x8xf32>
    %16 = arith.cmpf ogt, %14, %15 : vector<32x8xf32>
    %cst_7 = arith.constant 1.000000e-01 : f32
    %17 = vector.broadcast %cst_7 : f32 to vector<32x8xf32>
    %18 = arith.mulf %14, %17 : vector<32x8xf32>
    %19 = arith.select %16, %14, %18 : vector<32x8xi1>, vector<32x8xf32>
    %20 = arith.truncf %19 : vector<32x8xf32> to vector<32x8xbf16>
    %c0_8 = arith.constant 0 : index
    %c0_9 = arith.constant 0 : index
    %c0_10 = arith.constant 0 : index
    %21 = vector.load %arg5[%c0_8, %c0_9, %c0_10] : memref<1x32x8xbf16, #tpu.memory_space<vmem>>, vector<1x32x8xbf16>
    %22 = vector.shape_cast %21 : vector<1x32x8xbf16> to vector<32x8xbf16>
    %23 = vector.shape_cast %20 : vector<32x8xbf16> to vector<1x32x8xbf16>
    tpu.vector_store %arg5[%c0_8, %c0_9, %c0_10], %23 {strides = array<i32>} : memref<1x32x8xbf16, #tpu.memory_space<vmem>>, vector<1x32x8xbf16>,
    return
  }
  func.func @transform_0(%arg0: i32, %arg1: i32) -> (i32, i32, i32) {
    %c0_i32 = arith.constant 0 : i32
    %c0_i32_0 = arith.constant 0 : i32
    %c0_i32_1 = arith.constant 0 : i32
    return %arg0, %c0_i32, %c0_i32_0 : i32, i32, i32
  }
  func.func @transform_1(%arg0: i32, %arg1: i32) -> (i32, i32) {
    %c0_i32 = arith.constant 0 : i32
    %c0_i32_0 = arith.constant 0 : i32
    %c0_i32_1 = arith.constant 0 : i32
    return %c0_i32, %c0_i32_0 : i32, i32
  }
  func.func @transform_2(%arg0: i32, %arg1: i32) -> (i32, i32) {
    %c0_i32 = arith.constant 0 : i32
    %c0_i32_0 = arith.constant 0 : i32
    %c0_i32_1 = arith.constant 0 : i32
    return %c0_i32, %c0_i32_0 : i32, i32
  }
  func.func @transform_3(%arg0: i32, %arg1: i32) -> (i32, i32, i32) {
    %c0_i32 = arith.constant 0 : i32
    %c0_i32_0 = arith.constant 0 : i32
    return %arg0, %c0_i32, %arg1 : i32, i32, i32
  }
}

module attributes {stable_mosaic.version = 11 : i64} {
  func.func @_conv_kernel(%arg0: i32, %arg1: i32, %arg2: memref<1x32x8xbf16, #tpu.memory_space<vmem>>, %arg3: memref<32x96xbf16, #tpu.memory_space<vmem>>, %arg4: memref<32x1xf32, #tpu.memory_space<vmem>>, %arg5: memref<1x32x8xf32, #tpu.memory_space<vmem>>, %arg6: memref<1x32x10xbf16, #tpu.memory_space<vmem>>) attributes {dimension_semantics = [#tpu.dimension_semantics<parallel>, #tpu.dimension_semantics<arbitrary>], iteration_bounds = array<i64: 2, 1>, scalar_prefetch = 0 : i64, scratch_operands = 1 : i64, tpu.core_type = #tpu.core_type<tc>, window_params = [{transform_indices = @transform_0, window_bounds = array<i64: 1, 32, 8>}, {pipeline_mode = #tpu.pipeline_mode<synchronous>, transform_indices = @transform_1, window_bounds = array<i64: 32, 96>}, {pipeline_mode = #tpu.pipeline_mode<synchronous>, transform_indices = @transform_2, window_bounds = array<i64: 32, 1>}, {transform_indices = @transform_3, window_bounds = array<i64: 1, 32, 8>}]} {
    %c0_i32 = arith.constant 0 : i32
    %0 = arith.cmpi eq, %arg1, %c0_i32 : i32
    %1 = arith.extui %0 : i1 to i32
    %c0_i32_0 = arith.constant 0 : i32
    %2 = arith.cmpi ne, %1, %c0_i32_0 : i32
    scf.if %2 {
      %cst_9 = arith.constant 0.000000e+00 : bf16
      %18 = vector.broadcast %cst_9 : bf16 to vector<32x1xbf16>
      %c0_10 = arith.constant 0 : index
      %c0_11 = arith.constant 0 : index
      %c0_12 = arith.constant 0 : index
      %19 = vector.load %arg2[%c0_10, %c0_11, %c0_12] : memref<1x32x8xbf16, #tpu.memory_space<vmem>>, vector<1x32x8xbf16>
      %20 = vector.shape_cast %19 : vector<1x32x8xbf16> to vector<32x8xbf16>
      %cst_13 = arith.constant 0.000000e+00 : bf16
      %21 = vector.broadcast %cst_13 : bf16 to vector<32x1xbf16>
      %22 = tpu.concatenate %18, %20, %21 in 1 : vector<32x1xbf16>, vector<32x8xbf16>, vector<32x1xbf16> -> vector<32x10xbf16>
      %c0_14 = arith.constant 0 : index
      %c0_15 = arith.constant 0 : index
      %c0_16 = arith.constant 0 : index
      %23 = vector.load %arg6[%c0_14, %c0_15, %c0_16] : memref<1x32x10xbf16, #tpu.memory_space<vmem>>, vector<1x32x10xbf16>
      %24 = vector.shape_cast %23 : vector<1x32x10xbf16> to vector<32x10xbf16>
      %25 = vector.shape_cast %22 : vector<32x10xbf16> to vector<1x32x10xbf16>
      tpu.vector_store %arg6[%c0_14, %c0_15, %c0_16], %25 {strides = array<i32>} : memref<1x32x10xbf16, #tpu.memory_space<vmem>>, vector<1x32x10xbf16>,
    } else {
    }
    %3 = arith.index_cast %arg1 : i32 to index
    %c0 = arith.constant 0 : index
    %c0_1 = arith.constant 0 : index
    %4 = vector.load %arg6[%3, %c0, %c0_1] : memref<1x32x10xbf16, #tpu.memory_space<vmem>>, vector<1x32x10xbf16>
    %5 = vector.shape_cast %4 : vector<1x32x10xbf16> to vector<32x10xbf16>
    %6 = vector.extract_strided_slice %5 {offsets = [0, 0], sizes = [32, 8], strides = [1, 1]} : vector<32x10xbf16> to vector<32x8xbf16>
    %7 = vector.extract_strided_slice %5 {offsets = [0, 1], sizes = [32, 8], strides = [1, 1]} : vector<32x10xbf16> to vector<32x8xbf16>
    %8 = vector.extract_strided_slice %5 {offsets = [0, 2], sizes = [32, 8], strides = [1, 1]} : vector<32x10xbf16> to vector<32x8xbf16>
    %9 = tpu.concatenate %6, %7, %8 in 0 : vector<32x8xbf16>, vector<32x8xbf16>, vector<32x8xbf16> -> vector<96x8xbf16>
    %c0_2 = arith.constant 0 : index
    %c0_3 = arith.constant 0 : index
    %10 = vector.load %arg3[%c0_2, %c0_3] : memref<32x96xbf16, #tpu.memory_space<vmem>>, vector<32x96xbf16>
    %cst = arith.constant dense<0.000000e+00> : vector<32x8xf32>
    %11 = tpu.matmul %10, %9, %cst {dimension_numbers = #tpu.dot_dimension_numbers<[1], [0], [0], [1], [0, 0, 1, 1], [], []>} : vector<32x96xbf16>, vector<96x8xbf16>, vector<32x8xf32> -> vector<32x8xf32>
    %c0_4 = arith.constant 0 : index
    %c0_5 = arith.constant 0 : index
    %12 = vector.load %arg4[%c0_4, %c0_5] : memref<32x1xf32, #tpu.memory_space<vmem>>, vector<32x1xf32>
    %13 = vector.broadcast %12 : vector<32x1xf32> to vector<32x8xf32>
    %14 = arith.addf %11, %13 : vector<32x8xf32>
    %c0_6 = arith.constant 0 : index
    %c0_7 = arith.constant 0 : index
    %c0_8 = arith.constant 0 : index
    %15 = vector.load %arg5[%c0_6, %c0_7, %c0_8] : memref<1x32x8xf32, #tpu.memory_space<vmem>>, vector<1x32x8xf32>
    %16 = vector.shape_cast %15 : vector<1x32x8xf32> to vector<32x8xf32>
    %17 = vector.shape_cast %14 : vector<32x8xf32> to vector<1x32x8xf32>
    tpu.vector_store %arg5[%c0_6, %c0_7, %c0_8], %17 {strides = array<i32>} : memref<1x32x8xf32, #tpu.memory_space<vmem>>, vector<1x32x8xf32>,
    return
  }
  func.func @transform_0(%arg0: i32, %arg1: i32) -> (i32, i32, i32) {
    %c0_i32 = arith.constant 0 : i32
    %c0_i32_0 = arith.constant 0 : i32
    %c0_i32_1 = arith.constant 0 : i32
    return %arg0, %c0_i32, %c0_i32_0 : i32, i32, i32
  }
  func.func @transform_1(%arg0: i32, %arg1: i32) -> (i32, i32) {
    %c0_i32 = arith.constant 0 : i32
    %c0_i32_0 = arith.constant 0 : i32
    %c0_i32_1 = arith.constant 0 : i32
    return %c0_i32, %c0_i32_0 : i32, i32
  }
  func.func @transform_2(%arg0: i32, %arg1: i32) -> (i32, i32) {
    %c0_i32 = arith.constant 0 : i32
    %c0_i32_0 = arith.constant 0 : i32
    %c0_i32_1 = arith.constant 0 : i32
    return %c0_i32, %c0_i32_0 : i32, i32
  }
  func.func @transform_3(%arg0: i32, %arg1: i32) -> (i32, i32, i32) {
    %c0_i32 = arith.constant 0 : i32
    %c0_i32_0 = arith.constant 0 : i32
    return %arg0, %c0_i32, %arg1 : i32, i32, i32
  }
}

module attributes {stable_mosaic.version = 11 : i64} {
  func.func @_conv_kernel(%arg0: i32, %arg1: i32, %arg2: memref<1x16x16xf32, #tpu.memory_space<vmem>>, %arg3: memref<16x48xbf16, #tpu.memory_space<vmem>>, %arg4: memref<16x1xf32, #tpu.memory_space<vmem>>, %arg5: memref<16x48xbf16, #tpu.memory_space<vmem>>, %arg6: memref<16x1xf32, #tpu.memory_space<vmem>>, %arg7: memref<1x16x16xf32, #tpu.memory_space<vmem>>, %arg8: memref<1x16x16xf32, #tpu.memory_space<vmem>>, %arg9: memref<1x16x20xbf16, #tpu.memory_space<vmem>>) attributes {dimension_semantics = [#tpu.dimension_semantics<parallel>, #tpu.dimension_semantics<arbitrary>], iteration_bounds = array<i64: 2, 1>, scalar_prefetch = 0 : i64, scratch_operands = 1 : i64, tpu.core_type = #tpu.core_type<tc>, window_params = [{transform_indices = @transform_0, window_bounds = array<i64: 1, 16, 16>}, {pipeline_mode = #tpu.pipeline_mode<synchronous>, transform_indices = @transform_1, window_bounds = array<i64: 16, 48>}, {pipeline_mode = #tpu.pipeline_mode<synchronous>, transform_indices = @transform_2, window_bounds = array<i64: 16, 1>}, {pipeline_mode = #tpu.pipeline_mode<synchronous>, transform_indices = @transform_3, window_bounds = array<i64: 16, 48>}, {pipeline_mode = #tpu.pipeline_mode<synchronous>, transform_indices = @transform_4, window_bounds = array<i64: 16, 1>}, {transform_indices = @transform_5, window_bounds = array<i64: 1, 16, 16>}, {transform_indices = @transform_6, window_bounds = array<i64: 1, 16, 16>}]} {
    %c0_i32 = arith.constant 0 : i32
    %0 = arith.cmpi eq, %arg1, %c0_i32 : i32
    %1 = arith.extui %0 : i1 to i32
    %c0_i32_0 = arith.constant 0 : i32
    %2 = arith.cmpi ne, %1, %c0_i32_0 : i32
    scf.if %2 {
      %cst_22 = arith.constant 0.000000e+00 : bf16
      %48 = vector.broadcast %cst_22 : bf16 to vector<16x2xbf16>
      %c0_23 = arith.constant 0 : index
      %c0_24 = arith.constant 0 : index
      %c0_25 = arith.constant 0 : index
      %49 = vector.load %arg2[%c0_23, %c0_24, %c0_25] : memref<1x16x16xf32, #tpu.memory_space<vmem>>, vector<1x16x16xf32>
      %50 = vector.shape_cast %49 : vector<1x16x16xf32> to vector<16x16xf32>
      %cst_26 = arith.constant 0.000000e+00 : f32
      %51 = vector.broadcast %cst_26 : f32 to vector<16x16xf32>
      %52 = arith.cmpf ogt, %50, %51 : vector<16x16xf32>
      %cst_27 = arith.constant 1.000000e-01 : f32
      %53 = vector.broadcast %cst_27 : f32 to vector<16x16xf32>
      %54 = arith.mulf %50, %53 : vector<16x16xf32>
      %55 = arith.select %52, %50, %54 : vector<16x16xi1>, vector<16x16xf32>
      %56 = arith.truncf %55 : vector<16x16xf32> to vector<16x16xbf16>
      %cst_28 = arith.constant 0.000000e+00 : bf16
      %57 = vector.broadcast %cst_28 : bf16 to vector<16x2xbf16>
      %58 = tpu.concatenate %48, %56, %57 in 1 : vector<16x2xbf16>, vector<16x16xbf16>, vector<16x2xbf16> -> vector<16x20xbf16>
      %c0_29 = arith.constant 0 : index
      %c0_30 = arith.constant 0 : index
      %c0_31 = arith.constant 0 : index
      %59 = vector.load %arg9[%c0_29, %c0_30, %c0_31] : memref<1x16x20xbf16, #tpu.memory_space<vmem>>, vector<1x16x20xbf16>
      %60 = vector.shape_cast %59 : vector<1x16x20xbf16> to vector<16x20xbf16>
      %61 = vector.shape_cast %58 : vector<16x20xbf16> to vector<1x16x20xbf16>
      tpu.vector_store %arg9[%c0_29, %c0_30, %c0_31], %61 {strides = array<i32>} : memref<1x16x20xbf16, #tpu.memory_space<vmem>>, vector<1x16x20xbf16>,
    } else {
    }
    %3 = arith.index_cast %arg1 : i32 to index
    %c0 = arith.constant 0 : index
    %c0_1 = arith.constant 0 : index
    %4 = vector.load %arg9[%3, %c0, %c0_1] : memref<1x16x20xbf16, #tpu.memory_space<vmem>>, vector<1x16x20xbf16>
    %5 = vector.shape_cast %4 : vector<1x16x20xbf16> to vector<16x20xbf16>
    %6 = vector.extract_strided_slice %5 {offsets = [0, 0], sizes = [16, 18], strides = [1, 1]} : vector<16x20xbf16> to vector<16x18xbf16>
    %7 = vector.extract_strided_slice %5 {offsets = [0, 1], sizes = [16, 18], strides = [1, 1]} : vector<16x20xbf16> to vector<16x18xbf16>
    %8 = vector.extract_strided_slice %5 {offsets = [0, 2], sizes = [16, 18], strides = [1, 1]} : vector<16x20xbf16> to vector<16x18xbf16>
    %9 = tpu.concatenate %6, %7, %8 in 0 : vector<16x18xbf16>, vector<16x18xbf16>, vector<16x18xbf16> -> vector<48x18xbf16>
    %c0_2 = arith.constant 0 : index
    %c0_3 = arith.constant 0 : index
    %10 = vector.load %arg3[%c0_2, %c0_3] : memref<16x48xbf16, #tpu.memory_space<vmem>>, vector<16x48xbf16>
    %cst = arith.constant dense<0.000000e+00> : vector<16x18xf32>
    %11 = tpu.matmul %10, %9, %cst {dimension_numbers = #tpu.dot_dimension_numbers<[1], [0], [0], [1], [0, 0, 1, 1], [], []>} : vector<16x48xbf16>, vector<48x18xbf16>, vector<16x18xf32> -> vector<16x18xf32>
    %c0_4 = arith.constant 0 : index
    %c0_5 = arith.constant 0 : index
    %12 = vector.load %arg4[%c0_4, %c0_5] : memref<16x1xf32, #tpu.memory_space<vmem>>, vector<16x1xf32>
    %13 = vector.broadcast %12 : vector<16x1xf32> to vector<16x18xf32>
    %14 = arith.addf %11, %13 : vector<16x18xf32>
    %cst_6 = arith.constant 0.000000e+00 : f32
    %15 = vector.broadcast %cst_6 : f32 to vector<16x18xf32>
    %16 = arith.cmpf ogt, %14, %15 : vector<16x18xf32>
    %cst_7 = arith.constant 1.000000e-01 : f32
    %17 = vector.broadcast %cst_7 : f32 to vector<16x18xf32>
    %18 = arith.mulf %14, %17 : vector<16x18xf32>
    %19 = arith.select %16, %14, %18 : vector<16x18xi1>, vector<16x18xf32>
    %20 = tpu.iota {dimensions = array<i32: 1>} : vector<16x18xi32>
    %c16_i32 = arith.constant 16 : i32
    %21 = arith.muli %arg1, %c16_i32 : i32
    %c1_i32 = arith.constant 1 : i32
    %22 = arith.subi %21, %c1_i32 : i32
    %23 = vector.broadcast %22 : i32 to vector<16x18xi32>
    %24 = arith.addi %20, %23 : vector<16x18xi32>
    %c0_i32_8 = arith.constant 0 : i32
    %25 = vector.broadcast %c0_i32_8 : i32 to vector<16x18xi32>
    %26 = arith.cmpi sge, %24, %25 : vector<16x18xi32>
    %c16_i32_9 = arith.constant 16 : i32
    %27 = vector.broadcast %c16_i32_9 : i32 to vector<16x18xi32>
    %28 = arith.cmpi slt, %24, %27 : vector<16x18xi32>
    %29 = arith.andi %26, %28 : vector<16x18xi1>
    %cst_10 = arith.constant 0.000000e+00 : f32
    %30 = vector.broadcast %cst_10 : f32 to vector<16x18xf32>
    %31 = arith.select %29, %19, %30 : vector<16x18xi1>, vector<16x18xf32>
    %32 = arith.truncf %31 : vector<16x18xf32> to vector<16x18xbf16>
    %33 = vector.extract_strided_slice %32 {offsets = [0, 0], sizes = [16, 16], strides = [1, 1]} : vector<16x18xbf16> to vector<16x16xbf16>
    %34 = vector.extract_strided_slice %32 {offsets = [0, 1], sizes = [16, 16], strides = [1, 1]} : vector<16x18xbf16> to vector<16x16xbf16>
    %35 = vector.extract_strided_slice %32 {offsets = [0, 2], sizes = [16, 16], strides = [1, 1]} : vector<16x18xbf16> to vector<16x16xbf16>
    %36 = tpu.concatenate %33, %34, %35 in 0 : vector<16x16xbf16>, vector<16x16xbf16>, vector<16x16xbf16> -> vector<48x16xbf16>
    %c0_11 = arith.constant 0 : index
    %c0_12 = arith.constant 0 : index
    %37 = vector.load %arg5[%c0_11, %c0_12] : memref<16x48xbf16, #tpu.memory_space<vmem>>, vector<16x48xbf16>
    %cst_13 = arith.constant dense<0.000000e+00> : vector<16x16xf32>
    %38 = tpu.matmul %37, %36, %cst_13 {dimension_numbers = #tpu.dot_dimension_numbers<[1], [0], [0], [1], [0, 0, 1, 1], [], []>} : vector<16x48xbf16>, vector<48x16xbf16>, vector<16x16xf32> -> vector<16x16xf32>
    %c0_14 = arith.constant 0 : index
    %c0_15 = arith.constant 0 : index
    %39 = vector.load %arg6[%c0_14, %c0_15] : memref<16x1xf32, #tpu.memory_space<vmem>>, vector<16x1xf32>
    %40 = vector.broadcast %39 : vector<16x1xf32> to vector<16x16xf32>
    %41 = arith.addf %38, %40 : vector<16x16xf32>
    %c0_16 = arith.constant 0 : index
    %c0_17 = arith.constant 0 : index
    %c0_18 = arith.constant 0 : index
    %42 = vector.load %arg7[%c0_16, %c0_17, %c0_18] : memref<1x16x16xf32, #tpu.memory_space<vmem>>, vector<1x16x16xf32>
    %43 = vector.shape_cast %42 : vector<1x16x16xf32> to vector<16x16xf32>
    %44 = arith.addf %41, %43 : vector<16x16xf32>
    %c0_19 = arith.constant 0 : index
    %c0_20 = arith.constant 0 : index
    %c0_21 = arith.constant 0 : index
    %45 = vector.load %arg8[%c0_19, %c0_20, %c0_21] : memref<1x16x16xf32, #tpu.memory_space<vmem>>, vector<1x16x16xf32>
    %46 = vector.shape_cast %45 : vector<1x16x16xf32> to vector<16x16xf32>
    %47 = vector.shape_cast %44 : vector<16x16xf32> to vector<1x16x16xf32>
    tpu.vector_store %arg8[%c0_19, %c0_20, %c0_21], %47 {strides = array<i32>} : memref<1x16x16xf32, #tpu.memory_space<vmem>>, vector<1x16x16xf32>,
    return
  }
  func.func @transform_0(%arg0: i32, %arg1: i32) -> (i32, i32, i32) {
    %c0_i32 = arith.constant 0 : i32
    %c0_i32_0 = arith.constant 0 : i32
    %c0_i32_1 = arith.constant 0 : i32
    return %arg0, %c0_i32, %c0_i32_0 : i32, i32, i32
  }
  func.func @transform_1(%arg0: i32, %arg1: i32) -> (i32, i32) {
    %c0_i32 = arith.constant 0 : i32
    %c0_i32_0 = arith.constant 0 : i32
    %c0_i32_1 = arith.constant 0 : i32
    return %c0_i32, %c0_i32_0 : i32, i32
  }
  func.func @transform_2(%arg0: i32, %arg1: i32) -> (i32, i32) {
    %c0_i32 = arith.constant 0 : i32
    %c0_i32_0 = arith.constant 0 : i32
    %c0_i32_1 = arith.constant 0 : i32
    return %c0_i32, %c0_i32_0 : i32, i32
  }
  func.func @transform_3(%arg0: i32, %arg1: i32) -> (i32, i32) {
    %c0_i32 = arith.constant 0 : i32
    %c0_i32_0 = arith.constant 0 : i32
    %c0_i32_1 = arith.constant 0 : i32
    return %c0_i32, %c0_i32_0 : i32, i32
  }
  func.func @transform_4(%arg0: i32, %arg1: i32) -> (i32, i32) {
    %c0_i32 = arith.constant 0 : i32
    %c0_i32_0 = arith.constant 0 : i32
    %c0_i32_1 = arith.constant 0 : i32
    return %c0_i32, %c0_i32_0 : i32, i32
  }
  func.func @transform_5(%arg0: i32, %arg1: i32) -> (i32, i32, i32) {
    %c0_i32 = arith.constant 0 : i32
    %c0_i32_0 = arith.constant 0 : i32
    return %arg0, %c0_i32, %arg1 : i32, i32, i32
  }
  func.func @transform_6(%arg0: i32, %arg1: i32) -> (i32, i32, i32) {
    %c0_i32 = arith.constant 0 : i32
    %c0_i32_0 = arith.constant 0 : i32
    return %arg0, %c0_i32, %arg1 : i32, i32, i32
  }
}

module attributes {stable_mosaic.version = 11 : i64} {
  func.func @_conv_kernel(%arg0: i32, %arg1: i32, %arg2: memref<1x16x16xf32, #tpu.memory_space<vmem>>, %arg3: memref<16x48xbf16, #tpu.memory_space<vmem>>, %arg4: memref<16x1xf32, #tpu.memory_space<vmem>>, %arg5: memref<16x48xbf16, #tpu.memory_space<vmem>>, %arg6: memref<16x1xf32, #tpu.memory_space<vmem>>, %arg7: memref<1x16x16xf32, #tpu.memory_space<vmem>>, %arg8: memref<1x16x16xf32, #tpu.memory_space<vmem>>, %arg9: memref<1x16x24xbf16, #tpu.memory_space<vmem>>) attributes {dimension_semantics = [#tpu.dimension_semantics<parallel>, #tpu.dimension_semantics<arbitrary>], iteration_bounds = array<i64: 2, 1>, scalar_prefetch = 0 : i64, scratch_operands = 1 : i64, tpu.core_type = #tpu.core_type<tc>, window_params = [{transform_indices = @transform_0, window_bounds = array<i64: 1, 16, 16>}, {pipeline_mode = #tpu.pipeline_mode<synchronous>, transform_indices = @transform_1, window_bounds = array<i64: 16, 48>}, {pipeline_mode = #tpu.pipeline_mode<synchronous>, transform_indices = @transform_2, window_bounds = array<i64: 16, 1>}, {pipeline_mode = #tpu.pipeline_mode<synchronous>, transform_indices = @transform_3, window_bounds = array<i64: 16, 48>}, {pipeline_mode = #tpu.pipeline_mode<synchronous>, transform_indices = @transform_4, window_bounds = array<i64: 16, 1>}, {transform_indices = @transform_5, window_bounds = array<i64: 1, 16, 16>}, {transform_indices = @transform_6, window_bounds = array<i64: 1, 16, 16>}]} {
    %c0_i32 = arith.constant 0 : i32
    %0 = arith.cmpi eq, %arg1, %c0_i32 : i32
    %1 = arith.extui %0 : i1 to i32
    %c0_i32_0 = arith.constant 0 : i32
    %2 = arith.cmpi ne, %1, %c0_i32_0 : i32
    scf.if %2 {
      %cst_22 = arith.constant 0.000000e+00 : bf16
      %48 = vector.broadcast %cst_22 : bf16 to vector<16x4xbf16>
      %c0_23 = arith.constant 0 : index
      %c0_24 = arith.constant 0 : index
      %c0_25 = arith.constant 0 : index
      %49 = vector.load %arg2[%c0_23, %c0_24, %c0_25] : memref<1x16x16xf32, #tpu.memory_space<vmem>>, vector<1x16x16xf32>
      %50 = vector.shape_cast %49 : vector<1x16x16xf32> to vector<16x16xf32>
      %cst_26 = arith.constant 0.000000e+00 : f32
      %51 = vector.broadcast %cst_26 : f32 to vector<16x16xf32>
      %52 = arith.cmpf ogt, %50, %51 : vector<16x16xf32>
      %cst_27 = arith.constant 1.000000e-01 : f32
      %53 = vector.broadcast %cst_27 : f32 to vector<16x16xf32>
      %54 = arith.mulf %50, %53 : vector<16x16xf32>
      %55 = arith.select %52, %50, %54 : vector<16x16xi1>, vector<16x16xf32>
      %56 = arith.truncf %55 : vector<16x16xf32> to vector<16x16xbf16>
      %cst_28 = arith.constant 0.000000e+00 : bf16
      %57 = vector.broadcast %cst_28 : bf16 to vector<16x4xbf16>
      %58 = tpu.concatenate %48, %56, %57 in 1 : vector<16x4xbf16>, vector<16x16xbf16>, vector<16x4xbf16> -> vector<16x24xbf16>
      %c0_29 = arith.constant 0 : index
      %c0_30 = arith.constant 0 : index
      %c0_31 = arith.constant 0 : index
      %59 = vector.load %arg9[%c0_29, %c0_30, %c0_31] : memref<1x16x24xbf16, #tpu.memory_space<vmem>>, vector<1x16x24xbf16>
      %60 = vector.shape_cast %59 : vector<1x16x24xbf16> to vector<16x24xbf16>
      %61 = vector.shape_cast %58 : vector<16x24xbf16> to vector<1x16x24xbf16>
      tpu.vector_store %arg9[%c0_29, %c0_30, %c0_31], %61 {strides = array<i32>} : memref<1x16x24xbf16, #tpu.memory_space<vmem>>, vector<1x16x24xbf16>,
    } else {
    }
    %3 = arith.index_cast %arg1 : i32 to index
    %c0 = arith.constant 0 : index
    %c0_1 = arith.constant 0 : index
    %4 = vector.load %arg9[%3, %c0, %c0_1] : memref<1x16x24xbf16, #tpu.memory_space<vmem>>, vector<1x16x24xbf16>
    %5 = vector.shape_cast %4 : vector<1x16x24xbf16> to vector<16x24xbf16>
    %6 = vector.extract_strided_slice %5 {offsets = [0, 0], sizes = [16, 18], strides = [1, 1]} : vector<16x24xbf16> to vector<16x18xbf16>
    %7 = vector.extract_strided_slice %5 {offsets = [0, 3], sizes = [16, 18], strides = [1, 1]} : vector<16x24xbf16> to vector<16x18xbf16>
    %8 = vector.extract_strided_slice %5 {offsets = [0, 6], sizes = [16, 18], strides = [1, 1]} : vector<16x24xbf16> to vector<16x18xbf16>
    %9 = tpu.concatenate %6, %7, %8 in 0 : vector<16x18xbf16>, vector<16x18xbf16>, vector<16x18xbf16> -> vector<48x18xbf16>
    %c0_2 = arith.constant 0 : index
    %c0_3 = arith.constant 0 : index
    %10 = vector.load %arg3[%c0_2, %c0_3] : memref<16x48xbf16, #tpu.memory_space<vmem>>, vector<16x48xbf16>
    %cst = arith.constant dense<0.000000e+00> : vector<16x18xf32>
    %11 = tpu.matmul %10, %9, %cst {dimension_numbers = #tpu.dot_dimension_numbers<[1], [0], [0], [1], [0, 0, 1, 1], [], []>} : vector<16x48xbf16>, vector<48x18xbf16>, vector<16x18xf32> -> vector<16x18xf32>
    %c0_4 = arith.constant 0 : index
    %c0_5 = arith.constant 0 : index
    %12 = vector.load %arg4[%c0_4, %c0_5] : memref<16x1xf32, #tpu.memory_space<vmem>>, vector<16x1xf32>
    %13 = vector.broadcast %12 : vector<16x1xf32> to vector<16x18xf32>
    %14 = arith.addf %11, %13 : vector<16x18xf32>
    %cst_6 = arith.constant 0.000000e+00 : f32
    %15 = vector.broadcast %cst_6 : f32 to vector<16x18xf32>
    %16 = arith.cmpf ogt, %14, %15 : vector<16x18xf32>
    %cst_7 = arith.constant 1.000000e-01 : f32
    %17 = vector.broadcast %cst_7 : f32 to vector<16x18xf32>
    %18 = arith.mulf %14, %17 : vector<16x18xf32>
    %19 = arith.select %16, %14, %18 : vector<16x18xi1>, vector<16x18xf32>
    %20 = tpu.iota {dimensions = array<i32: 1>} : vector<16x18xi32>
    %c16_i32 = arith.constant 16 : i32
    %21 = arith.muli %arg1, %c16_i32 : i32
    %c1_i32 = arith.constant 1 : i32
    %22 = arith.subi %21, %c1_i32 : i32
    %23 = vector.broadcast %22 : i32 to vector<16x18xi32>
    %24 = arith.addi %20, %23 : vector<16x18xi32>
    %c0_i32_8 = arith.constant 0 : i32
    %25 = vector.broadcast %c0_i32_8 : i32 to vector<16x18xi32>
    %26 = arith.cmpi sge, %24, %25 : vector<16x18xi32>
    %c16_i32_9 = arith.constant 16 : i32
    %27 = vector.broadcast %c16_i32_9 : i32 to vector<16x18xi32>
    %28 = arith.cmpi slt, %24, %27 : vector<16x18xi32>
    %29 = arith.andi %26, %28 : vector<16x18xi1>
    %cst_10 = arith.constant 0.000000e+00 : f32
    %30 = vector.broadcast %cst_10 : f32 to vector<16x18xf32>
    %31 = arith.select %29, %19, %30 : vector<16x18xi1>, vector<16x18xf32>
    %32 = arith.truncf %31 : vector<16x18xf32> to vector<16x18xbf16>
    %33 = vector.extract_strided_slice %32 {offsets = [0, 0], sizes = [16, 16], strides = [1, 1]} : vector<16x18xbf16> to vector<16x16xbf16>
    %34 = vector.extract_strided_slice %32 {offsets = [0, 1], sizes = [16, 16], strides = [1, 1]} : vector<16x18xbf16> to vector<16x16xbf16>
    %35 = vector.extract_strided_slice %32 {offsets = [0, 2], sizes = [16, 16], strides = [1, 1]} : vector<16x18xbf16> to vector<16x16xbf16>
    %36 = tpu.concatenate %33, %34, %35 in 0 : vector<16x16xbf16>, vector<16x16xbf16>, vector<16x16xbf16> -> vector<48x16xbf16>
    %c0_11 = arith.constant 0 : index
    %c0_12 = arith.constant 0 : index
    %37 = vector.load %arg5[%c0_11, %c0_12] : memref<16x48xbf16, #tpu.memory_space<vmem>>, vector<16x48xbf16>
    %cst_13 = arith.constant dense<0.000000e+00> : vector<16x16xf32>
    %38 = tpu.matmul %37, %36, %cst_13 {dimension_numbers = #tpu.dot_dimension_numbers<[1], [0], [0], [1], [0, 0, 1, 1], [], []>} : vector<16x48xbf16>, vector<48x16xbf16>, vector<16x16xf32> -> vector<16x16xf32>
    %c0_14 = arith.constant 0 : index
    %c0_15 = arith.constant 0 : index
    %39 = vector.load %arg6[%c0_14, %c0_15] : memref<16x1xf32, #tpu.memory_space<vmem>>, vector<16x1xf32>
    %40 = vector.broadcast %39 : vector<16x1xf32> to vector<16x16xf32>
    %41 = arith.addf %38, %40 : vector<16x16xf32>
    %c0_16 = arith.constant 0 : index
    %c0_17 = arith.constant 0 : index
    %c0_18 = arith.constant 0 : index
    %42 = vector.load %arg7[%c0_16, %c0_17, %c0_18] : memref<1x16x16xf32, #tpu.memory_space<vmem>>, vector<1x16x16xf32>
    %43 = vector.shape_cast %42 : vector<1x16x16xf32> to vector<16x16xf32>
    %44 = arith.addf %41, %43 : vector<16x16xf32>
    %c0_19 = arith.constant 0 : index
    %c0_20 = arith.constant 0 : index
    %c0_21 = arith.constant 0 : index
    %45 = vector.load %arg8[%c0_19, %c0_20, %c0_21] : memref<1x16x16xf32, #tpu.memory_space<vmem>>, vector<1x16x16xf32>
    %46 = vector.shape_cast %45 : vector<1x16x16xf32> to vector<16x16xf32>
    %47 = vector.shape_cast %44 : vector<16x16xf32> to vector<1x16x16xf32>
    tpu.vector_store %arg8[%c0_19, %c0_20, %c0_21], %47 {strides = array<i32>} : memref<1x16x16xf32, #tpu.memory_space<vmem>>, vector<1x16x16xf32>,
    return
  }
  func.func @transform_0(%arg0: i32, %arg1: i32) -> (i32, i32, i32) {
    %c0_i32 = arith.constant 0 : i32
    %c0_i32_0 = arith.constant 0 : i32
    %c0_i32_1 = arith.constant 0 : i32
    return %arg0, %c0_i32, %c0_i32_0 : i32, i32, i32
  }
  func.func @transform_1(%arg0: i32, %arg1: i32) -> (i32, i32) {
    %c0_i32 = arith.constant 0 : i32
    %c0_i32_0 = arith.constant 0 : i32
    %c0_i32_1 = arith.constant 0 : i32
    return %c0_i32, %c0_i32_0 : i32, i32
  }
  func.func @transform_2(%arg0: i32, %arg1: i32) -> (i32, i32) {
    %c0_i32 = arith.constant 0 : i32
    %c0_i32_0 = arith.constant 0 : i32
    %c0_i32_1 = arith.constant 0 : i32
    return %c0_i32, %c0_i32_0 : i32, i32
  }
  func.func @transform_3(%arg0: i32, %arg1: i32) -> (i32, i32) {
    %c0_i32 = arith.constant 0 : i32
    %c0_i32_0 = arith.constant 0 : i32
    %c0_i32_1 = arith.constant 0 : i32
    return %c0_i32, %c0_i32_0 : i32, i32
  }
  func.func @transform_4(%arg0: i32, %arg1: i32) -> (i32, i32) {
    %c0_i32 = arith.constant 0 : i32
    %c0_i32_0 = arith.constant 0 : i32
    %c0_i32_1 = arith.constant 0 : i32
    return %c0_i32, %c0_i32_0 : i32, i32
  }
  func.func @transform_5(%arg0: i32, %arg1: i32) -> (i32, i32, i32) {
    %c0_i32 = arith.constant 0 : i32
    %c0_i32_0 = arith.constant 0 : i32
    return %arg0, %c0_i32, %arg1 : i32, i32, i32
  }
  func.func @transform_6(%arg0: i32, %arg1: i32) -> (i32, i32, i32) {
    %c0_i32 = arith.constant 0 : i32
    %c0_i32_0 = arith.constant 0 : i32
    return %arg0, %c0_i32, %arg1 : i32, i32, i32
  }
}

module attributes {stable_mosaic.version = 11 : i64} {
  func.func @_conv_kernel(%arg0: i32, %arg1: i32, %arg2: memref<1x16x16xf32, #tpu.memory_space<vmem>>, %arg3: memref<16x48xbf16, #tpu.memory_space<vmem>>, %arg4: memref<16x1xf32, #tpu.memory_space<vmem>>, %arg5: memref<16x48xbf16, #tpu.memory_space<vmem>>, %arg6: memref<16x1xf32, #tpu.memory_space<vmem>>, %arg7: memref<1x16x16xf32, #tpu.memory_space<vmem>>, %arg8: memref<1x16x16xf32, #tpu.memory_space<vmem>>, %arg9: memref<1x16x28xbf16, #tpu.memory_space<vmem>>) attributes {dimension_semantics = [#tpu.dimension_semantics<parallel>, #tpu.dimension_semantics<arbitrary>], iteration_bounds = array<i64: 2, 1>, scalar_prefetch = 0 : i64, scratch_operands = 1 : i64, tpu.core_type = #tpu.core_type<tc>, window_params = [{transform_indices = @transform_0, window_bounds = array<i64: 1, 16, 16>}, {pipeline_mode = #tpu.pipeline_mode<synchronous>, transform_indices = @transform_1, window_bounds = array<i64: 16, 48>}, {pipeline_mode = #tpu.pipeline_mode<synchronous>, transform_indices = @transform_2, window_bounds = array<i64: 16, 1>}, {pipeline_mode = #tpu.pipeline_mode<synchronous>, transform_indices = @transform_3, window_bounds = array<i64: 16, 48>}, {pipeline_mode = #tpu.pipeline_mode<synchronous>, transform_indices = @transform_4, window_bounds = array<i64: 16, 1>}, {transform_indices = @transform_5, window_bounds = array<i64: 1, 16, 16>}, {transform_indices = @transform_6, window_bounds = array<i64: 1, 16, 16>}]} {
    %c0_i32 = arith.constant 0 : i32
    %0 = arith.cmpi eq, %arg1, %c0_i32 : i32
    %1 = arith.extui %0 : i1 to i32
    %c0_i32_0 = arith.constant 0 : i32
    %2 = arith.cmpi ne, %1, %c0_i32_0 : i32
    scf.if %2 {
      %cst_22 = arith.constant 0.000000e+00 : bf16
      %48 = vector.broadcast %cst_22 : bf16 to vector<16x6xbf16>
      %c0_23 = arith.constant 0 : index
      %c0_24 = arith.constant 0 : index
      %c0_25 = arith.constant 0 : index
      %49 = vector.load %arg2[%c0_23, %c0_24, %c0_25] : memref<1x16x16xf32, #tpu.memory_space<vmem>>, vector<1x16x16xf32>
      %50 = vector.shape_cast %49 : vector<1x16x16xf32> to vector<16x16xf32>
      %cst_26 = arith.constant 0.000000e+00 : f32
      %51 = vector.broadcast %cst_26 : f32 to vector<16x16xf32>
      %52 = arith.cmpf ogt, %50, %51 : vector<16x16xf32>
      %cst_27 = arith.constant 1.000000e-01 : f32
      %53 = vector.broadcast %cst_27 : f32 to vector<16x16xf32>
      %54 = arith.mulf %50, %53 : vector<16x16xf32>
      %55 = arith.select %52, %50, %54 : vector<16x16xi1>, vector<16x16xf32>
      %56 = arith.truncf %55 : vector<16x16xf32> to vector<16x16xbf16>
      %cst_28 = arith.constant 0.000000e+00 : bf16
      %57 = vector.broadcast %cst_28 : bf16 to vector<16x6xbf16>
      %58 = tpu.concatenate %48, %56, %57 in 1 : vector<16x6xbf16>, vector<16x16xbf16>, vector<16x6xbf16> -> vector<16x28xbf16>
      %c0_29 = arith.constant 0 : index
      %c0_30 = arith.constant 0 : index
      %c0_31 = arith.constant 0 : index
      %59 = vector.load %arg9[%c0_29, %c0_30, %c0_31] : memref<1x16x28xbf16, #tpu.memory_space<vmem>>, vector<1x16x28xbf16>
      %60 = vector.shape_cast %59 : vector<1x16x28xbf16> to vector<16x28xbf16>
      %61 = vector.shape_cast %58 : vector<16x28xbf16> to vector<1x16x28xbf16>
      tpu.vector_store %arg9[%c0_29, %c0_30, %c0_31], %61 {strides = array<i32>} : memref<1x16x28xbf16, #tpu.memory_space<vmem>>, vector<1x16x28xbf16>,
    } else {
    }
    %3 = arith.index_cast %arg1 : i32 to index
    %c0 = arith.constant 0 : index
    %c0_1 = arith.constant 0 : index
    %4 = vector.load %arg9[%3, %c0, %c0_1] : memref<1x16x28xbf16, #tpu.memory_space<vmem>>, vector<1x16x28xbf16>
    %5 = vector.shape_cast %4 : vector<1x16x28xbf16> to vector<16x28xbf16>
    %6 = vector.extract_strided_slice %5 {offsets = [0, 0], sizes = [16, 18], strides = [1, 1]} : vector<16x28xbf16> to vector<16x18xbf16>
    %7 = vector.extract_strided_slice %5 {offsets = [0, 5], sizes = [16, 18], strides = [1, 1]} : vector<16x28xbf16> to vector<16x18xbf16>
    %8 = vector.extract_strided_slice %5 {offsets = [0, 10], sizes = [16, 18], strides = [1, 1]} : vector<16x28xbf16> to vector<16x18xbf16>
    %9 = tpu.concatenate %6, %7, %8 in 0 : vector<16x18xbf16>, vector<16x18xbf16>, vector<16x18xbf16> -> vector<48x18xbf16>
    %c0_2 = arith.constant 0 : index
    %c0_3 = arith.constant 0 : index
    %10 = vector.load %arg3[%c0_2, %c0_3] : memref<16x48xbf16, #tpu.memory_space<vmem>>, vector<16x48xbf16>
    %cst = arith.constant dense<0.000000e+00> : vector<16x18xf32>
    %11 = tpu.matmul %10, %9, %cst {dimension_numbers = #tpu.dot_dimension_numbers<[1], [0], [0], [1], [0, 0, 1, 1], [], []>} : vector<16x48xbf16>, vector<48x18xbf16>, vector<16x18xf32> -> vector<16x18xf32>
    %c0_4 = arith.constant 0 : index
    %c0_5 = arith.constant 0 : index
    %12 = vector.load %arg4[%c0_4, %c0_5] : memref<16x1xf32, #tpu.memory_space<vmem>>, vector<16x1xf32>
    %13 = vector.broadcast %12 : vector<16x1xf32> to vector<16x18xf32>
    %14 = arith.addf %11, %13 : vector<16x18xf32>
    %cst_6 = arith.constant 0.000000e+00 : f32
    %15 = vector.broadcast %cst_6 : f32 to vector<16x18xf32>
    %16 = arith.cmpf ogt, %14, %15 : vector<16x18xf32>
    %cst_7 = arith.constant 1.000000e-01 : f32
    %17 = vector.broadcast %cst_7 : f32 to vector<16x18xf32>
    %18 = arith.mulf %14, %17 : vector<16x18xf32>
    %19 = arith.select %16, %14, %18 : vector<16x18xi1>, vector<16x18xf32>
    %20 = tpu.iota {dimensions = array<i32: 1>} : vector<16x18xi32>
    %c16_i32 = arith.constant 16 : i32
    %21 = arith.muli %arg1, %c16_i32 : i32
    %c1_i32 = arith.constant 1 : i32
    %22 = arith.subi %21, %c1_i32 : i32
    %23 = vector.broadcast %22 : i32 to vector<16x18xi32>
    %24 = arith.addi %20, %23 : vector<16x18xi32>
    %c0_i32_8 = arith.constant 0 : i32
    %25 = vector.broadcast %c0_i32_8 : i32 to vector<16x18xi32>
    %26 = arith.cmpi sge, %24, %25 : vector<16x18xi32>
    %c16_i32_9 = arith.constant 16 : i32
    %27 = vector.broadcast %c16_i32_9 : i32 to vector<16x18xi32>
    %28 = arith.cmpi slt, %24, %27 : vector<16x18xi32>
    %29 = arith.andi %26, %28 : vector<16x18xi1>
    %cst_10 = arith.constant 0.000000e+00 : f32
    %30 = vector.broadcast %cst_10 : f32 to vector<16x18xf32>
    %31 = arith.select %29, %19, %30 : vector<16x18xi1>, vector<16x18xf32>
    %32 = arith.truncf %31 : vector<16x18xf32> to vector<16x18xbf16>
    %33 = vector.extract_strided_slice %32 {offsets = [0, 0], sizes = [16, 16], strides = [1, 1]} : vector<16x18xbf16> to vector<16x16xbf16>
    %34 = vector.extract_strided_slice %32 {offsets = [0, 1], sizes = [16, 16], strides = [1, 1]} : vector<16x18xbf16> to vector<16x16xbf16>
    %35 = vector.extract_strided_slice %32 {offsets = [0, 2], sizes = [16, 16], strides = [1, 1]} : vector<16x18xbf16> to vector<16x16xbf16>
    %36 = tpu.concatenate %33, %34, %35 in 0 : vector<16x16xbf16>, vector<16x16xbf16>, vector<16x16xbf16> -> vector<48x16xbf16>
    %c0_11 = arith.constant 0 : index
    %c0_12 = arith.constant 0 : index
    %37 = vector.load %arg5[%c0_11, %c0_12] : memref<16x48xbf16, #tpu.memory_space<vmem>>, vector<16x48xbf16>
    %cst_13 = arith.constant dense<0.000000e+00> : vector<16x16xf32>
    %38 = tpu.matmul %37, %36, %cst_13 {dimension_numbers = #tpu.dot_dimension_numbers<[1], [0], [0], [1], [0, 0, 1, 1], [], []>} : vector<16x48xbf16>, vector<48x16xbf16>, vector<16x16xf32> -> vector<16x16xf32>
    %c0_14 = arith.constant 0 : index
    %c0_15 = arith.constant 0 : index
    %39 = vector.load %arg6[%c0_14, %c0_15] : memref<16x1xf32, #tpu.memory_space<vmem>>, vector<16x1xf32>
    %40 = vector.broadcast %39 : vector<16x1xf32> to vector<16x16xf32>
    %41 = arith.addf %38, %40 : vector<16x16xf32>
    %c0_16 = arith.constant 0 : index
    %c0_17 = arith.constant 0 : index
    %c0_18 = arith.constant 0 : index
    %42 = vector.load %arg7[%c0_16, %c0_17, %c0_18] : memref<1x16x16xf32, #tpu.memory_space<vmem>>, vector<1x16x16xf32>
    %43 = vector.shape_cast %42 : vector<1x16x16xf32> to vector<16x16xf32>
    %44 = arith.addf %41, %43 : vector<16x16xf32>
    %c0_19 = arith.constant 0 : index
    %c0_20 = arith.constant 0 : index
    %c0_21 = arith.constant 0 : index
    %45 = vector.load %arg8[%c0_19, %c0_20, %c0_21] : memref<1x16x16xf32, #tpu.memory_space<vmem>>, vector<1x16x16xf32>
    %46 = vector.shape_cast %45 : vector<1x16x16xf32> to vector<16x16xf32>
    %47 = vector.shape_cast %44 : vector<16x16xf32> to vector<1x16x16xf32>
    tpu.vector_store %arg8[%c0_19, %c0_20, %c0_21], %47 {strides = array<i32>} : memref<1x16x16xf32, #tpu.memory_space<vmem>>, vector<1x16x16xf32>,
    return
  }
  func.func @transform_0(%arg0: i32, %arg1: i32) -> (i32, i32, i32) {
    %c0_i32 = arith.constant 0 : i32
    %c0_i32_0 = arith.constant 0 : i32
    %c0_i32_1 = arith.constant 0 : i32
    return %arg0, %c0_i32, %c0_i32_0 : i32, i32, i32
  }
  func.func @transform_1(%arg0: i32, %arg1: i32) -> (i32, i32) {
    %c0_i32 = arith.constant 0 : i32
    %c0_i32_0 = arith.constant 0 : i32
    %c0_i32_1 = arith.constant 0 : i32
    return %c0_i32, %c0_i32_0 : i32, i32
  }
  func.func @transform_2(%arg0: i32, %arg1: i32) -> (i32, i32) {
    %c0_i32 = arith.constant 0 : i32
    %c0_i32_0 = arith.constant 0 : i32
    %c0_i32_1 = arith.constant 0 : i32
    return %c0_i32, %c0_i32_0 : i32, i32
  }
  func.func @transform_3(%arg0: i32, %arg1: i32) -> (i32, i32) {
    %c0_i32 = arith.constant 0 : i32
    %c0_i32_0 = arith.constant 0 : i32
    %c0_i32_1 = arith.constant 0 : i32
    return %c0_i32, %c0_i32_0 : i32, i32
  }
  func.func @transform_4(%arg0: i32, %arg1: i32) -> (i32, i32) {
    %c0_i32 = arith.constant 0 : i32
    %c0_i32_0 = arith.constant 0 : i32
    %c0_i32_1 = arith.constant 0 : i32
    return %c0_i32, %c0_i32_0 : i32, i32
  }
  func.func @transform_5(%arg0: i32, %arg1: i32) -> (i32, i32, i32) {
    %c0_i32 = arith.constant 0 : i32
    %c0_i32_0 = arith.constant 0 : i32
    return %arg0, %c0_i32, %arg1 : i32, i32, i32
  }
  func.func @transform_6(%arg0: i32, %arg1: i32) -> (i32, i32, i32) {
    %c0_i32 = arith.constant 0 : i32
    %c0_i32_0 = arith.constant 0 : i32
    return %arg0, %c0_i32, %arg1 : i32, i32, i32
  }
}

module attributes {stable_mosaic.version = 11 : i64} {
  func.func @_conv_kernel(%arg0: i32, %arg1: i32, %arg2: memref<1x16x16xf32, #tpu.memory_space<vmem>>, %arg3: memref<16x80xbf16, #tpu.memory_space<vmem>>, %arg4: memref<16x1xf32, #tpu.memory_space<vmem>>, %arg5: memref<16x80xbf16, #tpu.memory_space<vmem>>, %arg6: memref<16x1xf32, #tpu.memory_space<vmem>>, %arg7: memref<1x16x16xf32, #tpu.memory_space<vmem>>, %arg8: memref<1x16x16xf32, #tpu.memory_space<vmem>>, %arg9: memref<1x16x24xbf16, #tpu.memory_space<vmem>>) attributes {dimension_semantics = [#tpu.dimension_semantics<parallel>, #tpu.dimension_semantics<arbitrary>], iteration_bounds = array<i64: 2, 1>, scalar_prefetch = 0 : i64, scratch_operands = 1 : i64, tpu.core_type = #tpu.core_type<tc>, window_params = [{transform_indices = @transform_0, window_bounds = array<i64: 1, 16, 16>}, {pipeline_mode = #tpu.pipeline_mode<synchronous>, transform_indices = @transform_1, window_bounds = array<i64: 16, 80>}, {pipeline_mode = #tpu.pipeline_mode<synchronous>, transform_indices = @transform_2, window_bounds = array<i64: 16, 1>}, {pipeline_mode = #tpu.pipeline_mode<synchronous>, transform_indices = @transform_3, window_bounds = array<i64: 16, 80>}, {pipeline_mode = #tpu.pipeline_mode<synchronous>, transform_indices = @transform_4, window_bounds = array<i64: 16, 1>}, {transform_indices = @transform_5, window_bounds = array<i64: 1, 16, 16>}, {transform_indices = @transform_6, window_bounds = array<i64: 1, 16, 16>}]} {
    %c0_i32 = arith.constant 0 : i32
    %0 = arith.cmpi eq, %arg1, %c0_i32 : i32
    %1 = arith.extui %0 : i1 to i32
    %c0_i32_0 = arith.constant 0 : i32
    %2 = arith.cmpi ne, %1, %c0_i32_0 : i32
    scf.if %2 {
      %cst_22 = arith.constant 0.000000e+00 : bf16
      %52 = vector.broadcast %cst_22 : bf16 to vector<16x4xbf16>
      %c0_23 = arith.constant 0 : index
      %c0_24 = arith.constant 0 : index
      %c0_25 = arith.constant 0 : index
      %53 = vector.load %arg2[%c0_23, %c0_24, %c0_25] : memref<1x16x16xf32, #tpu.memory_space<vmem>>, vector<1x16x16xf32>
      %54 = vector.shape_cast %53 : vector<1x16x16xf32> to vector<16x16xf32>
      %cst_26 = arith.constant 0.000000e+00 : f32
      %55 = vector.broadcast %cst_26 : f32 to vector<16x16xf32>
      %56 = arith.cmpf ogt, %54, %55 : vector<16x16xf32>
      %cst_27 = arith.constant 1.000000e-01 : f32
      %57 = vector.broadcast %cst_27 : f32 to vector<16x16xf32>
      %58 = arith.mulf %54, %57 : vector<16x16xf32>
      %59 = arith.select %56, %54, %58 : vector<16x16xi1>, vector<16x16xf32>
      %60 = arith.truncf %59 : vector<16x16xf32> to vector<16x16xbf16>
      %cst_28 = arith.constant 0.000000e+00 : bf16
      %61 = vector.broadcast %cst_28 : bf16 to vector<16x4xbf16>
      %62 = tpu.concatenate %52, %60, %61 in 1 : vector<16x4xbf16>, vector<16x16xbf16>, vector<16x4xbf16> -> vector<16x24xbf16>
      %c0_29 = arith.constant 0 : index
      %c0_30 = arith.constant 0 : index
      %c0_31 = arith.constant 0 : index
      %63 = vector.load %arg9[%c0_29, %c0_30, %c0_31] : memref<1x16x24xbf16, #tpu.memory_space<vmem>>, vector<1x16x24xbf16>
      %64 = vector.shape_cast %63 : vector<1x16x24xbf16> to vector<16x24xbf16>
      %65 = vector.shape_cast %62 : vector<16x24xbf16> to vector<1x16x24xbf16>
      tpu.vector_store %arg9[%c0_29, %c0_30, %c0_31], %65 {strides = array<i32>} : memref<1x16x24xbf16, #tpu.memory_space<vmem>>, vector<1x16x24xbf16>,
    } else {
    }
    %3 = arith.index_cast %arg1 : i32 to index
    %c0 = arith.constant 0 : index
    %c0_1 = arith.constant 0 : index
    %4 = vector.load %arg9[%3, %c0, %c0_1] : memref<1x16x24xbf16, #tpu.memory_space<vmem>>, vector<1x16x24xbf16>
    %5 = vector.shape_cast %4 : vector<1x16x24xbf16> to vector<16x24xbf16>
    %6 = vector.extract_strided_slice %5 {offsets = [0, 0], sizes = [16, 20], strides = [1, 1]} : vector<16x24xbf16> to vector<16x20xbf16>
    %7 = vector.extract_strided_slice %5 {offsets = [0, 1], sizes = [16, 20], strides = [1, 1]} : vector<16x24xbf16> to vector<16x20xbf16>
    %8 = vector.extract_strided_slice %5 {offsets = [0, 2], sizes = [16, 20], strides = [1, 1]} : vector<16x24xbf16> to vector<16x20xbf16>
    %9 = vector.extract_strided_slice %5 {offsets = [0, 3], sizes = [16, 20], strides = [1, 1]} : vector<16x24xbf16> to vector<16x20xbf16>
    %10 = vector.extract_strided_slice %5 {offsets = [0, 4], sizes = [16, 20], strides = [1, 1]} : vector<16x24xbf16> to vector<16x20xbf16>
    %11 = tpu.concatenate %6, %7, %8, %9, %10 in 0 : vector<16x20xbf16>, vector<16x20xbf16>, vector<16x20xbf16>, vector<16x20xbf16>, vector<16x20xbf16> -> vector<80x20xbf16>
    %c0_2 = arith.constant 0 : index
    %c0_3 = arith.constant 0 : index
    %12 = vector.load %arg3[%c0_2, %c0_3] : memref<16x80xbf16, #tpu.memory_space<vmem>>, vector<16x80xbf16>
    %cst = arith.constant dense<0.000000e+00> : vector<16x20xf32>
    %13 = tpu.matmul %12, %11, %cst {dimension_numbers = #tpu.dot_dimension_numbers<[1], [0], [0], [1], [0, 0, 1, 1], [], []>} : vector<16x80xbf16>, vector<80x20xbf16>, vector<16x20xf32> -> vector<16x20xf32>
    %c0_4 = arith.constant 0 : index
    %c0_5 = arith.constant 0 : index
    %14 = vector.load %arg4[%c0_4, %c0_5] : memref<16x1xf32, #tpu.memory_space<vmem>>, vector<16x1xf32>
    %15 = vector.broadcast %14 : vector<16x1xf32> to vector<16x20xf32>
    %16 = arith.addf %13, %15 : vector<16x20xf32>
    %cst_6 = arith.constant 0.000000e+00 : f32
    %17 = vector.broadcast %cst_6 : f32 to vector<16x20xf32>
    %18 = arith.cmpf ogt, %16, %17 : vector<16x20xf32>
    %cst_7 = arith.constant 1.000000e-01 : f32
    %19 = vector.broadcast %cst_7 : f32 to vector<16x20xf32>
    %20 = arith.mulf %16, %19 : vector<16x20xf32>
    %21 = arith.select %18, %16, %20 : vector<16x20xi1>, vector<16x20xf32>
    %22 = tpu.iota {dimensions = array<i32: 1>} : vector<16x20xi32>
    %c16_i32 = arith.constant 16 : i32
    %23 = arith.muli %arg1, %c16_i32 : i32
    %c2_i32 = arith.constant 2 : i32
    %24 = arith.subi %23, %c2_i32 : i32
    %25 = vector.broadcast %24 : i32 to vector<16x20xi32>
    %26 = arith.addi %22, %25 : vector<16x20xi32>
    %c0_i32_8 = arith.constant 0 : i32
    %27 = vector.broadcast %c0_i32_8 : i32 to vector<16x20xi32>
    %28 = arith.cmpi sge, %26, %27 : vector<16x20xi32>
    %c16_i32_9 = arith.constant 16 : i32
    %29 = vector.broadcast %c16_i32_9 : i32 to vector<16x20xi32>
    %30 = arith.cmpi slt, %26, %29 : vector<16x20xi32>
    %31 = arith.andi %28, %30 : vector<16x20xi1>
    %cst_10 = arith.constant 0.000000e+00 : f32
    %32 = vector.broadcast %cst_10 : f32 to vector<16x20xf32>
    %33 = arith.select %31, %21, %32 : vector<16x20xi1>, vector<16x20xf32>
    %34 = arith.truncf %33 : vector<16x20xf32> to vector<16x20xbf16>
    %35 = vector.extract_strided_slice %34 {offsets = [0, 0], sizes = [16, 16], strides = [1, 1]} : vector<16x20xbf16> to vector<16x16xbf16>
    %36 = vector.extract_strided_slice %34 {offsets = [0, 1], sizes = [16, 16], strides = [1, 1]} : vector<16x20xbf16> to vector<16x16xbf16>
    %37 = vector.extract_strided_slice %34 {offsets = [0, 2], sizes = [16, 16], strides = [1, 1]} : vector<16x20xbf16> to vector<16x16xbf16>
    %38 = vector.extract_strided_slice %34 {offsets = [0, 3], sizes = [16, 16], strides = [1, 1]} : vector<16x20xbf16> to vector<16x16xbf16>
    %39 = vector.extract_strided_slice %34 {offsets = [0, 4], sizes = [16, 16], strides = [1, 1]} : vector<16x20xbf16> to vector<16x16xbf16>
    %40 = tpu.concatenate %35, %36, %37, %38, %39 in 0 : vector<16x16xbf16>, vector<16x16xbf16>, vector<16x16xbf16>, vector<16x16xbf16>, vector<16x16xbf16> -> vector<80x16xbf16>
    %c0_11 = arith.constant 0 : index
    %c0_12 = arith.constant 0 : index
    %41 = vector.load %arg5[%c0_11, %c0_12] : memref<16x80xbf16, #tpu.memory_space<vmem>>, vector<16x80xbf16>
    %cst_13 = arith.constant dense<0.000000e+00> : vector<16x16xf32>
    %42 = tpu.matmul %41, %40, %cst_13 {dimension_numbers = #tpu.dot_dimension_numbers<[1], [0], [0], [1], [0, 0, 1, 1], [], []>} : vector<16x80xbf16>, vector<80x16xbf16>, vector<16x16xf32> -> vector<16x16xf32>
    %c0_14 = arith.constant 0 : index
    %c0_15 = arith.constant 0 : index
    %43 = vector.load %arg6[%c0_14, %c0_15] : memref<16x1xf32, #tpu.memory_space<vmem>>, vector<16x1xf32>
    %44 = vector.broadcast %43 : vector<16x1xf32> to vector<16x16xf32>
    %45 = arith.addf %42, %44 : vector<16x16xf32>
    %c0_16 = arith.constant 0 : index
    %c0_17 = arith.constant 0 : index
    %c0_18 = arith.constant 0 : index
    %46 = vector.load %arg7[%c0_16, %c0_17, %c0_18] : memref<1x16x16xf32, #tpu.memory_space<vmem>>, vector<1x16x16xf32>
    %47 = vector.shape_cast %46 : vector<1x16x16xf32> to vector<16x16xf32>
    %48 = arith.addf %45, %47 : vector<16x16xf32>
    %c0_19 = arith.constant 0 : index
    %c0_20 = arith.constant 0 : index
    %c0_21 = arith.constant 0 : index
    %49 = vector.load %arg8[%c0_19, %c0_20, %c0_21] : memref<1x16x16xf32, #tpu.memory_space<vmem>>, vector<1x16x16xf32>
    %50 = vector.shape_cast %49 : vector<1x16x16xf32> to vector<16x16xf32>
    %51 = vector.shape_cast %48 : vector<16x16xf32> to vector<1x16x16xf32>
    tpu.vector_store %arg8[%c0_19, %c0_20, %c0_21], %51 {strides = array<i32>} : memref<1x16x16xf32, #tpu.memory_space<vmem>>, vector<1x16x16xf32>,
    return
  }
  func.func @transform_0(%arg0: i32, %arg1: i32) -> (i32, i32, i32) {
    %c0_i32 = arith.constant 0 : i32
    %c0_i32_0 = arith.constant 0 : i32
    %c0_i32_1 = arith.constant 0 : i32
    return %arg0, %c0_i32, %c0_i32_0 : i32, i32, i32
  }
  func.func @transform_1(%arg0: i32, %arg1: i32) -> (i32, i32) {
    %c0_i32 = arith.constant 0 : i32
    %c0_i32_0 = arith.constant 0 : i32
    %c0_i32_1 = arith.constant 0 : i32
    return %c0_i32, %c0_i32_0 : i32, i32
  }
  func.func @transform_2(%arg0: i32, %arg1: i32) -> (i32, i32) {
    %c0_i32 = arith.constant 0 : i32
    %c0_i32_0 = arith.constant 0 : i32
    %c0_i32_1 = arith.constant 0 : i32
    return %c0_i32, %c0_i32_0 : i32, i32
  }
  func.func @transform_3(%arg0: i32, %arg1: i32) -> (i32, i32) {
    %c0_i32 = arith.constant 0 : i32
    %c0_i32_0 = arith.constant 0 : i32
    %c0_i32_1 = arith.constant 0 : i32
    return %c0_i32, %c0_i32_0 : i32, i32
  }
  func.func @transform_4(%arg0: i32, %arg1: i32) -> (i32, i32) {
    %c0_i32 = arith.constant 0 : i32
    %c0_i32_0 = arith.constant 0 : i32
    %c0_i32_1 = arith.constant 0 : i32
    return %c0_i32, %c0_i32_0 : i32, i32
  }
  func.func @transform_5(%arg0: i32, %arg1: i32) -> (i32, i32, i32) {
    %c0_i32 = arith.constant 0 : i32
    %c0_i32_0 = arith.constant 0 : i32
    return %arg0, %c0_i32, %arg1 : i32, i32, i32
  }
  func.func @transform_6(%arg0: i32, %arg1: i32) -> (i32, i32, i32) {
    %c0_i32 = arith.constant 0 : i32
    %c0_i32_0 = arith.constant 0 : i32
    return %arg0, %c0_i32, %arg1 : i32, i32, i32
  }
}

module attributes {stable_mosaic.version = 11 : i64} {
  func.func @_conv_kernel(%arg0: i32, %arg1: i32, %arg2: memref<1x16x16xf32, #tpu.memory_space<vmem>>, %arg3: memref<16x80xbf16, #tpu.memory_space<vmem>>, %arg4: memref<16x1xf32, #tpu.memory_space<vmem>>, %arg5: memref<16x80xbf16, #tpu.memory_space<vmem>>, %arg6: memref<16x1xf32, #tpu.memory_space<vmem>>, %arg7: memref<1x16x16xf32, #tpu.memory_space<vmem>>, %arg8: memref<1x16x16xf32, #tpu.memory_space<vmem>>, %arg9: memref<1x16x32xbf16, #tpu.memory_space<vmem>>) attributes {dimension_semantics = [#tpu.dimension_semantics<parallel>, #tpu.dimension_semantics<arbitrary>], iteration_bounds = array<i64: 2, 1>, scalar_prefetch = 0 : i64, scratch_operands = 1 : i64, tpu.core_type = #tpu.core_type<tc>, window_params = [{transform_indices = @transform_0, window_bounds = array<i64: 1, 16, 16>}, {pipeline_mode = #tpu.pipeline_mode<synchronous>, transform_indices = @transform_1, window_bounds = array<i64: 16, 80>}, {pipeline_mode = #tpu.pipeline_mode<synchronous>, transform_indices = @transform_2, window_bounds = array<i64: 16, 1>}, {pipeline_mode = #tpu.pipeline_mode<synchronous>, transform_indices = @transform_3, window_bounds = array<i64: 16, 80>}, {pipeline_mode = #tpu.pipeline_mode<synchronous>, transform_indices = @transform_4, window_bounds = array<i64: 16, 1>}, {transform_indices = @transform_5, window_bounds = array<i64: 1, 16, 16>}, {transform_indices = @transform_6, window_bounds = array<i64: 1, 16, 16>}]} {
    %c0_i32 = arith.constant 0 : i32
    %0 = arith.cmpi eq, %arg1, %c0_i32 : i32
    %1 = arith.extui %0 : i1 to i32
    %c0_i32_0 = arith.constant 0 : i32
    %2 = arith.cmpi ne, %1, %c0_i32_0 : i32
    scf.if %2 {
      %cst_22 = arith.constant 0.000000e+00 : bf16
      %52 = vector.broadcast %cst_22 : bf16 to vector<16x8xbf16>
      %c0_23 = arith.constant 0 : index
      %c0_24 = arith.constant 0 : index
      %c0_25 = arith.constant 0 : index
      %53 = vector.load %arg2[%c0_23, %c0_24, %c0_25] : memref<1x16x16xf32, #tpu.memory_space<vmem>>, vector<1x16x16xf32>
      %54 = vector.shape_cast %53 : vector<1x16x16xf32> to vector<16x16xf32>
      %cst_26 = arith.constant 0.000000e+00 : f32
      %55 = vector.broadcast %cst_26 : f32 to vector<16x16xf32>
      %56 = arith.cmpf ogt, %54, %55 : vector<16x16xf32>
      %cst_27 = arith.constant 1.000000e-01 : f32
      %57 = vector.broadcast %cst_27 : f32 to vector<16x16xf32>
      %58 = arith.mulf %54, %57 : vector<16x16xf32>
      %59 = arith.select %56, %54, %58 : vector<16x16xi1>, vector<16x16xf32>
      %60 = arith.truncf %59 : vector<16x16xf32> to vector<16x16xbf16>
      %cst_28 = arith.constant 0.000000e+00 : bf16
      %61 = vector.broadcast %cst_28 : bf16 to vector<16x8xbf16>
      %62 = tpu.concatenate %52, %60, %61 in 1 : vector<16x8xbf16>, vector<16x16xbf16>, vector<16x8xbf16> -> vector<16x32xbf16>
      %c0_29 = arith.constant 0 : index
      %c0_30 = arith.constant 0 : index
      %c0_31 = arith.constant 0 : index
      %63 = vector.load %arg9[%c0_29, %c0_30, %c0_31] : memref<1x16x32xbf16, #tpu.memory_space<vmem>>, vector<1x16x32xbf16>
      %64 = vector.shape_cast %63 : vector<1x16x32xbf16> to vector<16x32xbf16>
      %65 = vector.shape_cast %62 : vector<16x32xbf16> to vector<1x16x32xbf16>
      tpu.vector_store %arg9[%c0_29, %c0_30, %c0_31], %65 {strides = array<i32>} : memref<1x16x32xbf16, #tpu.memory_space<vmem>>, vector<1x16x32xbf16>,
    } else {
    }
    %3 = arith.index_cast %arg1 : i32 to index
    %c0 = arith.constant 0 : index
    %c0_1 = arith.constant 0 : index
    %4 = vector.load %arg9[%3, %c0, %c0_1] : memref<1x16x32xbf16, #tpu.memory_space<vmem>>, vector<1x16x32xbf16>
    %5 = vector.shape_cast %4 : vector<1x16x32xbf16> to vector<16x32xbf16>
    %6 = vector.extract_strided_slice %5 {offsets = [0, 0], sizes = [16, 20], strides = [1, 1]} : vector<16x32xbf16> to vector<16x20xbf16>
    %7 = vector.extract_strided_slice %5 {offsets = [0, 3], sizes = [16, 20], strides = [1, 1]} : vector<16x32xbf16> to vector<16x20xbf16>
    %8 = vector.extract_strided_slice %5 {offsets = [0, 6], sizes = [16, 20], strides = [1, 1]} : vector<16x32xbf16> to vector<16x20xbf16>
    %9 = vector.extract_strided_slice %5 {offsets = [0, 9], sizes = [16, 20], strides = [1, 1]} : vector<16x32xbf16> to vector<16x20xbf16>
    %10 = vector.extract_strided_slice %5 {offsets = [0, 12], sizes = [16, 20], strides = [1, 1]} : vector<16x32xbf16> to vector<16x20xbf16>
    %11 = tpu.concatenate %6, %7, %8, %9, %10 in 0 : vector<16x20xbf16>, vector<16x20xbf16>, vector<16x20xbf16>, vector<16x20xbf16>, vector<16x20xbf16> -> vector<80x20xbf16>
    %c0_2 = arith.constant 0 : index
    %c0_3 = arith.constant 0 : index
    %12 = vector.load %arg3[%c0_2, %c0_3] : memref<16x80xbf16, #tpu.memory_space<vmem>>, vector<16x80xbf16>
    %cst = arith.constant dense<0.000000e+00> : vector<16x20xf32>
    %13 = tpu.matmul %12, %11, %cst {dimension_numbers = #tpu.dot_dimension_numbers<[1], [0], [0], [1], [0, 0, 1, 1], [], []>} : vector<16x80xbf16>, vector<80x20xbf16>, vector<16x20xf32> -> vector<16x20xf32>
    %c0_4 = arith.constant 0 : index
    %c0_5 = arith.constant 0 : index
    %14 = vector.load %arg4[%c0_4, %c0_5] : memref<16x1xf32, #tpu.memory_space<vmem>>, vector<16x1xf32>
    %15 = vector.broadcast %14 : vector<16x1xf32> to vector<16x20xf32>
    %16 = arith.addf %13, %15 : vector<16x20xf32>
    %cst_6 = arith.constant 0.000000e+00 : f32
    %17 = vector.broadcast %cst_6 : f32 to vector<16x20xf32>
    %18 = arith.cmpf ogt, %16, %17 : vector<16x20xf32>
    %cst_7 = arith.constant 1.000000e-01 : f32
    %19 = vector.broadcast %cst_7 : f32 to vector<16x20xf32>
    %20 = arith.mulf %16, %19 : vector<16x20xf32>
    %21 = arith.select %18, %16, %20 : vector<16x20xi1>, vector<16x20xf32>
    %22 = tpu.iota {dimensions = array<i32: 1>} : vector<16x20xi32>
    %c16_i32 = arith.constant 16 : i32
    %23 = arith.muli %arg1, %c16_i32 : i32
    %c2_i32 = arith.constant 2 : i32
    %24 = arith.subi %23, %c2_i32 : i32
    %25 = vector.broadcast %24 : i32 to vector<16x20xi32>
    %26 = arith.addi %22, %25 : vector<16x20xi32>
    %c0_i32_8 = arith.constant 0 : i32
    %27 = vector.broadcast %c0_i32_8 : i32 to vector<16x20xi32>
    %28 = arith.cmpi sge, %26, %27 : vector<16x20xi32>
    %c16_i32_9 = arith.constant 16 : i32
    %29 = vector.broadcast %c16_i32_9 : i32 to vector<16x20xi32>
    %30 = arith.cmpi slt, %26, %29 : vector<16x20xi32>
    %31 = arith.andi %28, %30 : vector<16x20xi1>
    %cst_10 = arith.constant 0.000000e+00 : f32
    %32 = vector.broadcast %cst_10 : f32 to vector<16x20xf32>
    %33 = arith.select %31, %21, %32 : vector<16x20xi1>, vector<16x20xf32>
    %34 = arith.truncf %33 : vector<16x20xf32> to vector<16x20xbf16>
    %35 = vector.extract_strided_slice %34 {offsets = [0, 0], sizes = [16, 16], strides = [1, 1]} : vector<16x20xbf16> to vector<16x16xbf16>
    %36 = vector.extract_strided_slice %34 {offsets = [0, 1], sizes = [16, 16], strides = [1, 1]} : vector<16x20xbf16> to vector<16x16xbf16>
    %37 = vector.extract_strided_slice %34 {offsets = [0, 2], sizes = [16, 16], strides = [1, 1]} : vector<16x20xbf16> to vector<16x16xbf16>
    %38 = vector.extract_strided_slice %34 {offsets = [0, 3], sizes = [16, 16], strides = [1, 1]} : vector<16x20xbf16> to vector<16x16xbf16>
    %39 = vector.extract_strided_slice %34 {offsets = [0, 4], sizes = [16, 16], strides = [1, 1]} : vector<16x20xbf16> to vector<16x16xbf16>
    %40 = tpu.concatenate %35, %36, %37, %38, %39 in 0 : vector<16x16xbf16>, vector<16x16xbf16>, vector<16x16xbf16>, vector<16x16xbf16>, vector<16x16xbf16> -> vector<80x16xbf16>
    %c0_11 = arith.constant 0 : index
    %c0_12 = arith.constant 0 : index
    %41 = vector.load %arg5[%c0_11, %c0_12] : memref<16x80xbf16, #tpu.memory_space<vmem>>, vector<16x80xbf16>
    %cst_13 = arith.constant dense<0.000000e+00> : vector<16x16xf32>
    %42 = tpu.matmul %41, %40, %cst_13 {dimension_numbers = #tpu.dot_dimension_numbers<[1], [0], [0], [1], [0, 0, 1, 1], [], []>} : vector<16x80xbf16>, vector<80x16xbf16>, vector<16x16xf32> -> vector<16x16xf32>
    %c0_14 = arith.constant 0 : index
    %c0_15 = arith.constant 0 : index
    %43 = vector.load %arg6[%c0_14, %c0_15] : memref<16x1xf32, #tpu.memory_space<vmem>>, vector<16x1xf32>
    %44 = vector.broadcast %43 : vector<16x1xf32> to vector<16x16xf32>
    %45 = arith.addf %42, %44 : vector<16x16xf32>
    %c0_16 = arith.constant 0 : index
    %c0_17 = arith.constant 0 : index
    %c0_18 = arith.constant 0 : index
    %46 = vector.load %arg7[%c0_16, %c0_17, %c0_18] : memref<1x16x16xf32, #tpu.memory_space<vmem>>, vector<1x16x16xf32>
    %47 = vector.shape_cast %46 : vector<1x16x16xf32> to vector<16x16xf32>
    %48 = arith.addf %45, %47 : vector<16x16xf32>
    %c0_19 = arith.constant 0 : index
    %c0_20 = arith.constant 0 : index
    %c0_21 = arith.constant 0 : index
    %49 = vector.load %arg8[%c0_19, %c0_20, %c0_21] : memref<1x16x16xf32, #tpu.memory_space<vmem>>, vector<1x16x16xf32>
    %50 = vector.shape_cast %49 : vector<1x16x16xf32> to vector<16x16xf32>
    %51 = vector.shape_cast %48 : vector<16x16xf32> to vector<1x16x16xf32>
    tpu.vector_store %arg8[%c0_19, %c0_20, %c0_21], %51 {strides = array<i32>} : memref<1x16x16xf32, #tpu.memory_space<vmem>>, vector<1x16x16xf32>,
    return
  }
  func.func @transform_0(%arg0: i32, %arg1: i32) -> (i32, i32, i32) {
    %c0_i32 = arith.constant 0 : i32
    %c0_i32_0 = arith.constant 0 : i32
    %c0_i32_1 = arith.constant 0 : i32
    return %arg0, %c0_i32, %c0_i32_0 : i32, i32, i32
  }
  func.func @transform_1(%arg0: i32, %arg1: i32) -> (i32, i32) {
    %c0_i32 = arith.constant 0 : i32
    %c0_i32_0 = arith.constant 0 : i32
    %c0_i32_1 = arith.constant 0 : i32
    return %c0_i32, %c0_i32_0 : i32, i32
  }
  func.func @transform_2(%arg0: i32, %arg1: i32) -> (i32, i32) {
    %c0_i32 = arith.constant 0 : i32
    %c0_i32_0 = arith.constant 0 : i32
    %c0_i32_1 = arith.constant 0 : i32
    return %c0_i32, %c0_i32_0 : i32, i32
  }
  func.func @transform_3(%arg0: i32, %arg1: i32) -> (i32, i32) {
    %c0_i32 = arith.constant 0 : i32
    %c0_i32_0 = arith.constant 0 : i32
    %c0_i32_1 = arith.constant 0 : i32
    return %c0_i32, %c0_i32_0 : i32, i32
  }
  func.func @transform_4(%arg0: i32, %arg1: i32) -> (i32, i32) {
    %c0_i32 = arith.constant 0 : i32
    %c0_i32_0 = arith.constant 0 : i32
    %c0_i32_1 = arith.constant 0 : i32
    return %c0_i32, %c0_i32_0 : i32, i32
  }
  func.func @transform_5(%arg0: i32, %arg1: i32) -> (i32, i32, i32) {
    %c0_i32 = arith.constant 0 : i32
    %c0_i32_0 = arith.constant 0 : i32
    return %arg0, %c0_i32, %arg1 : i32, i32, i32
  }
  func.func @transform_6(%arg0: i32, %arg1: i32) -> (i32, i32, i32) {
    %c0_i32 = arith.constant 0 : i32
    %c0_i32_0 = arith.constant 0 : i32
    return %arg0, %c0_i32, %arg1 : i32, i32, i32
  }
}

module attributes {stable_mosaic.version = 11 : i64} {
  func.func @_conv_kernel(%arg0: i32, %arg1: i32, %arg2: memref<1x16x16xf32, #tpu.memory_space<vmem>>, %arg3: memref<16x80xbf16, #tpu.memory_space<vmem>>, %arg4: memref<16x1xf32, #tpu.memory_space<vmem>>, %arg5: memref<16x80xbf16, #tpu.memory_space<vmem>>, %arg6: memref<16x1xf32, #tpu.memory_space<vmem>>, %arg7: memref<1x16x16xf32, #tpu.memory_space<vmem>>, %arg8: memref<1x16x16xf32, #tpu.memory_space<vmem>>, %arg9: memref<1x16x16xbf16, #tpu.memory_space<vmem>>, %arg10: memref<1x16x40xbf16, #tpu.memory_space<vmem>>) attributes {dimension_semantics = [#tpu.dimension_semantics<parallel>, #tpu.dimension_semantics<arbitrary>], iteration_bounds = array<i64: 2, 1>, scalar_prefetch = 0 : i64, scratch_operands = 1 : i64, tpu.core_type = #tpu.core_type<tc>, window_params = [{transform_indices = @transform_0, window_bounds = array<i64: 1, 16, 16>}, {pipeline_mode = #tpu.pipeline_mode<synchronous>, transform_indices = @transform_1, window_bounds = array<i64: 16, 80>}, {pipeline_mode = #tpu.pipeline_mode<synchronous>, transform_indices = @transform_2, window_bounds = array<i64: 16, 1>}, {pipeline_mode = #tpu.pipeline_mode<synchronous>, transform_indices = @transform_3, window_bounds = array<i64: 16, 80>}, {pipeline_mode = #tpu.pipeline_mode<synchronous>, transform_indices = @transform_4, window_bounds = array<i64: 16, 1>}, {transform_indices = @transform_5, window_bounds = array<i64: 1, 16, 16>}, {transform_indices = @transform_6, window_bounds = array<i64: 1, 16, 16>}, {transform_indices = @transform_7, window_bounds = array<i64: 1, 16, 16>}]} {
    %c0_i32 = arith.constant 0 : i32
    %0 = arith.cmpi eq, %arg1, %c0_i32 : i32
    %1 = arith.extui %0 : i1 to i32
    %c0_i32_0 = arith.constant 0 : i32
    %2 = arith.cmpi ne, %1, %c0_i32_0 : i32
    scf.if %2 {
      %cst_28 = arith.constant 0.000000e+00 : bf16
      %63 = vector.broadcast %cst_28 : bf16 to vector<16x12xbf16>
      %c0_29 = arith.constant 0 : index
      %c0_30 = arith.constant 0 : index
      %c0_31 = arith.constant 0 : index
      %64 = vector.load %arg2[%c0_29, %c0_30, %c0_31] : memref<1x16x16xf32, #tpu.memory_space<vmem>>, vector<1x16x16xf32>
      %65 = vector.shape_cast %64 : vector<1x16x16xf32> to vector<16x16xf32>
      %cst_32 = arith.constant 0.000000e+00 : f32
      %66 = vector.broadcast %cst_32 : f32 to vector<16x16xf32>
      %67 = arith.cmpf ogt, %65, %66 : vector<16x16xf32>
      %cst_33 = arith.constant 1.000000e-01 : f32
      %68 = vector.broadcast %cst_33 : f32 to vector<16x16xf32>
      %69 = arith.mulf %65, %68 : vector<16x16xf32>
      %70 = arith.select %67, %65, %69 : vector<16x16xi1>, vector<16x16xf32>
      %71 = arith.truncf %70 : vector<16x16xf32> to vector<16x16xbf16>
      %cst_34 = arith.constant 0.000000e+00 : bf16
      %72 = vector.broadcast %cst_34 : bf16 to vector<16x12xbf16>
      %73 = tpu.concatenate %63, %71, %72 in 1 : vector<16x12xbf16>, vector<16x16xbf16>, vector<16x12xbf16> -> vector<16x40xbf16>
      %c0_35 = arith.constant 0 : index
      %c0_36 = arith.constant 0 : index
      %c0_37 = arith.constant 0 : index
      %74 = vector.load %arg10[%c0_35, %c0_36, %c0_37] : memref<1x16x40xbf16, #tpu.memory_space<vmem>>, vector<1x16x40xbf16>
      %75 = vector.shape_cast %74 : vector<1x16x40xbf16> to vector<16x40xbf16>
      %76 = vector.shape_cast %73 : vector<16x40xbf16> to vector<1x16x40xbf16>
      tpu.vector_store %arg10[%c0_35, %c0_36, %c0_37], %76 {strides = array<i32>} : memref<1x16x40xbf16, #tpu.memory_space<vmem>>, vector<1x16x40xbf16>,
    } else {
    }
    %3 = arith.index_cast %arg1 : i32 to index
    %c0 = arith.constant 0 : index
    %c0_1 = arith.constant 0 : index
    %4 = vector.load %arg10[%3, %c0, %c0_1] : memref<1x16x40xbf16, #tpu.memory_space<vmem>>, vector<1x16x40xbf16>
    %5 = vector.shape_cast %4 : vector<1x16x40xbf16> to vector<16x40xbf16>
    %6 = vector.extract_strided_slice %5 {offsets = [0, 0], sizes = [16, 20], strides = [1, 1]} : vector<16x40xbf16> to vector<16x20xbf16>
    %7 = vector.extract_strided_slice %5 {offsets = [0, 5], sizes = [16, 20], strides = [1, 1]} : vector<16x40xbf16> to vector<16x20xbf16>
    %8 = vector.extract_strided_slice %5 {offsets = [0, 10], sizes = [16, 20], strides = [1, 1]} : vector<16x40xbf16> to vector<16x20xbf16>
    %9 = vector.extract_strided_slice %5 {offsets = [0, 15], sizes = [16, 20], strides = [1, 1]} : vector<16x40xbf16> to vector<16x20xbf16>
    %10 = vector.extract_strided_slice %5 {offsets = [0, 20], sizes = [16, 20], strides = [1, 1]} : vector<16x40xbf16> to vector<16x20xbf16>
    %11 = tpu.concatenate %6, %7, %8, %9, %10 in 0 : vector<16x20xbf16>, vector<16x20xbf16>, vector<16x20xbf16>, vector<16x20xbf16>, vector<16x20xbf16> -> vector<80x20xbf16>
    %c0_2 = arith.constant 0 : index
    %c0_3 = arith.constant 0 : index
    %12 = vector.load %arg3[%c0_2, %c0_3] : memref<16x80xbf16, #tpu.memory_space<vmem>>, vector<16x80xbf16>
    %cst = arith.constant dense<0.000000e+00> : vector<16x20xf32>
    %13 = tpu.matmul %12, %11, %cst {dimension_numbers = #tpu.dot_dimension_numbers<[1], [0], [0], [1], [0, 0, 1, 1], [], []>} : vector<16x80xbf16>, vector<80x20xbf16>, vector<16x20xf32> -> vector<16x20xf32>
    %c0_4 = arith.constant 0 : index
    %c0_5 = arith.constant 0 : index
    %14 = vector.load %arg4[%c0_4, %c0_5] : memref<16x1xf32, #tpu.memory_space<vmem>>, vector<16x1xf32>
    %15 = vector.broadcast %14 : vector<16x1xf32> to vector<16x20xf32>
    %16 = arith.addf %13, %15 : vector<16x20xf32>
    %cst_6 = arith.constant 0.000000e+00 : f32
    %17 = vector.broadcast %cst_6 : f32 to vector<16x20xf32>
    %18 = arith.cmpf ogt, %16, %17 : vector<16x20xf32>
    %cst_7 = arith.constant 1.000000e-01 : f32
    %19 = vector.broadcast %cst_7 : f32 to vector<16x20xf32>
    %20 = arith.mulf %16, %19 : vector<16x20xf32>
    %21 = arith.select %18, %16, %20 : vector<16x20xi1>, vector<16x20xf32>
    %22 = tpu.iota {dimensions = array<i32: 1>} : vector<16x20xi32>
    %c16_i32 = arith.constant 16 : i32
    %23 = arith.muli %arg1, %c16_i32 : i32
    %c2_i32 = arith.constant 2 : i32
    %24 = arith.subi %23, %c2_i32 : i32
    %25 = vector.broadcast %24 : i32 to vector<16x20xi32>
    %26 = arith.addi %22, %25 : vector<16x20xi32>
    %c0_i32_8 = arith.constant 0 : i32
    %27 = vector.broadcast %c0_i32_8 : i32 to vector<16x20xi32>
    %28 = arith.cmpi sge, %26, %27 : vector<16x20xi32>
    %c16_i32_9 = arith.constant 16 : i32
    %29 = vector.broadcast %c16_i32_9 : i32 to vector<16x20xi32>
    %30 = arith.cmpi slt, %26, %29 : vector<16x20xi32>
    %31 = arith.andi %28, %30 : vector<16x20xi1>
    %cst_10 = arith.constant 0.000000e+00 : f32
    %32 = vector.broadcast %cst_10 : f32 to vector<16x20xf32>
    %33 = arith.select %31, %21, %32 : vector<16x20xi1>, vector<16x20xf32>
    %34 = arith.truncf %33 : vector<16x20xf32> to vector<16x20xbf16>
    %35 = vector.extract_strided_slice %34 {offsets = [0, 0], sizes = [16, 16], strides = [1, 1]} : vector<16x20xbf16> to vector<16x16xbf16>
    %36 = vector.extract_strided_slice %34 {offsets = [0, 1], sizes = [16, 16], strides = [1, 1]} : vector<16x20xbf16> to vector<16x16xbf16>
    %37 = vector.extract_strided_slice %34 {offsets = [0, 2], sizes = [16, 16], strides = [1, 1]} : vector<16x20xbf16> to vector<16x16xbf16>
    %38 = vector.extract_strided_slice %34 {offsets = [0, 3], sizes = [16, 16], strides = [1, 1]} : vector<16x20xbf16> to vector<16x16xbf16>
    %39 = vector.extract_strided_slice %34 {offsets = [0, 4], sizes = [16, 16], strides = [1, 1]} : vector<16x20xbf16> to vector<16x16xbf16>
    %40 = tpu.concatenate %35, %36, %37, %38, %39 in 0 : vector<16x16xbf16>, vector<16x16xbf16>, vector<16x16xbf16>, vector<16x16xbf16>, vector<16x16xbf16> -> vector<80x16xbf16>
    %c0_11 = arith.constant 0 : index
    %c0_12 = arith.constant 0 : index
    %41 = vector.load %arg5[%c0_11, %c0_12] : memref<16x80xbf16, #tpu.memory_space<vmem>>, vector<16x80xbf16>
    %cst_13 = arith.constant dense<0.000000e+00> : vector<16x16xf32>
    %42 = tpu.matmul %41, %40, %cst_13 {dimension_numbers = #tpu.dot_dimension_numbers<[1], [0], [0], [1], [0, 0, 1, 1], [], []>} : vector<16x80xbf16>, vector<80x16xbf16>, vector<16x16xf32> -> vector<16x16xf32>
    %c0_14 = arith.constant 0 : index
    %c0_15 = arith.constant 0 : index
    %43 = vector.load %arg6[%c0_14, %c0_15] : memref<16x1xf32, #tpu.memory_space<vmem>>, vector<16x1xf32>
    %44 = vector.broadcast %43 : vector<16x1xf32> to vector<16x16xf32>
    %45 = arith.addf %42, %44 : vector<16x16xf32>
    %c0_16 = arith.constant 0 : index
    %c0_17 = arith.constant 0 : index
    %c0_18 = arith.constant 0 : index
    %46 = vector.load %arg7[%c0_16, %c0_17, %c0_18] : memref<1x16x16xf32, #tpu.memory_space<vmem>>, vector<1x16x16xf32>
    %47 = vector.shape_cast %46 : vector<1x16x16xf32> to vector<16x16xf32>
    %48 = arith.addf %45, %47 : vector<16x16xf32>
    %c0_19 = arith.constant 0 : index
    %c0_20 = arith.constant 0 : index
    %c0_21 = arith.constant 0 : index
    %49 = vector.load %arg8[%c0_19, %c0_20, %c0_21] : memref<1x16x16xf32, #tpu.memory_space<vmem>>, vector<1x16x16xf32>
    %50 = vector.shape_cast %49 : vector<1x16x16xf32> to vector<16x16xf32>
    %51 = arith.addf %48, %50 : vector<16x16xf32>
    %cst_22 = arith.constant 5.000000e-01 : f32
    %52 = vector.broadcast %cst_22 : f32 to vector<16x16xf32>
    %53 = arith.mulf %51, %52 : vector<16x16xf32>
    %cst_23 = arith.constant 0.000000e+00 : f32
    %54 = vector.broadcast %cst_23 : f32 to vector<16x16xf32>
    %55 = arith.cmpf ogt, %53, %54 : vector<16x16xf32>
    %cst_24 = arith.constant 1.000000e-01 : f32
    %56 = vector.broadcast %cst_24 : f32 to vector<16x16xf32>
    %57 = arith.mulf %53, %56 : vector<16x16xf32>
    %58 = arith.select %55, %53, %57 : vector<16x16xi1>, vector<16x16xf32>
    %59 = arith.truncf %58 : vector<16x16xf32> to vector<16x16xbf16>
    %c0_25 = arith.constant 0 : index
    %c0_26 = arith.constant 0 : index
    %c0_27 = arith.constant 0 : index
    %60 = vector.load %arg9[%c0_25, %c0_26, %c0_27] : memref<1x16x16xbf16, #tpu.memory_space<vmem>>, vector<1x16x16xbf16>
    %61 = vector.shape_cast %60 : vector<1x16x16xbf16> to vector<16x16xbf16>
    %62 = vector.shape_cast %59 : vector<16x16xbf16> to vector<1x16x16xbf16>
    tpu.vector_store %arg9[%c0_25, %c0_26, %c0_27], %62 {strides = array<i32>} : memref<1x16x16xbf16, #tpu.memory_space<vmem>>, vector<1x16x16xbf16>,
    return
  }
  func.func @transform_0(%arg0: i32, %arg1: i32) -> (i32, i32, i32) {
    %c0_i32 = arith.constant 0 : i32
    %c0_i32_0 = arith.constant 0 : i32
    %c0_i32_1 = arith.constant 0 : i32
    return %arg0, %c0_i32, %c0_i32_0 : i32, i32, i32
  }
  func.func @transform_1(%arg0: i32, %arg1: i32) -> (i32, i32) {
    %c0_i32 = arith.constant 0 : i32
    %c0_i32_0 = arith.constant 0 : i32
    %c0_i32_1 = arith.constant 0 : i32
    return %c0_i32, %c0_i32_0 : i32, i32
  }
  func.func @transform_2(%arg0: i32, %arg1: i32) -> (i32, i32) {
    %c0_i32 = arith.constant 0 : i32
    %c0_i32_0 = arith.constant 0 : i32
    %c0_i32_1 = arith.constant 0 : i32
    return %c0_i32, %c0_i32_0 : i32, i32
  }
  func.func @transform_3(%arg0: i32, %arg1: i32) -> (i32, i32) {
    %c0_i32 = arith.constant 0 : i32
    %c0_i32_0 = arith.constant 0 : i32
    %c0_i32_1 = arith.constant 0 : i32
    return %c0_i32, %c0_i32_0 : i32, i32
  }
  func.func @transform_4(%arg0: i32, %arg1: i32) -> (i32, i32) {
    %c0_i32 = arith.constant 0 : i32
    %c0_i32_0 = arith.constant 0 : i32
    %c0_i32_1 = arith.constant 0 : i32
    return %c0_i32, %c0_i32_0 : i32, i32
  }
  func.func @transform_5(%arg0: i32, %arg1: i32) -> (i32, i32, i32) {
    %c0_i32 = arith.constant 0 : i32
    %c0_i32_0 = arith.constant 0 : i32
    return %arg0, %c0_i32, %arg1 : i32, i32, i32
  }
  func.func @transform_6(%arg0: i32, %arg1: i32) -> (i32, i32, i32) {
    %c0_i32 = arith.constant 0 : i32
    %c0_i32_0 = arith.constant 0 : i32
    return %arg0, %c0_i32, %arg1 : i32, i32, i32
  }
  func.func @transform_7(%arg0: i32, %arg1: i32) -> (i32, i32, i32) {
    %c0_i32 = arith.constant 0 : i32
    %c0_i32_0 = arith.constant 0 : i32
    return %arg0, %c0_i32, %arg1 : i32, i32, i32
  }
}

module attributes {stable_mosaic.version = 11 : i64} {
  func.func @_conv_kernel(%arg0: i32, %arg1: i32, %arg2: memref<1x16x16xbf16, #tpu.memory_space<vmem>>, %arg3: memref<16x48xbf16, #tpu.memory_space<vmem>>, %arg4: memref<16x1xf32, #tpu.memory_space<vmem>>, %arg5: memref<1x16x16xf32, #tpu.memory_space<vmem>>, %arg6: memref<1x16x18xbf16, #tpu.memory_space<vmem>>) attributes {dimension_semantics = [#tpu.dimension_semantics<parallel>, #tpu.dimension_semantics<arbitrary>], iteration_bounds = array<i64: 2, 1>, scalar_prefetch = 0 : i64, scratch_operands = 1 : i64, tpu.core_type = #tpu.core_type<tc>, window_params = [{transform_indices = @transform_0, window_bounds = array<i64: 1, 16, 16>}, {pipeline_mode = #tpu.pipeline_mode<synchronous>, transform_indices = @transform_1, window_bounds = array<i64: 16, 48>}, {pipeline_mode = #tpu.pipeline_mode<synchronous>, transform_indices = @transform_2, window_bounds = array<i64: 16, 1>}, {transform_indices = @transform_3, window_bounds = array<i64: 1, 16, 16>}]} {
    %c0_i32 = arith.constant 0 : i32
    %0 = arith.cmpi eq, %arg1, %c0_i32 : i32
    %1 = arith.extui %0 : i1 to i32
    %c0_i32_0 = arith.constant 0 : i32
    %2 = arith.cmpi ne, %1, %c0_i32_0 : i32
    scf.if %2 {
      %cst_9 = arith.constant 0.000000e+00 : bf16
      %18 = vector.broadcast %cst_9 : bf16 to vector<16x1xbf16>
      %c0_10 = arith.constant 0 : index
      %c0_11 = arith.constant 0 : index
      %c0_12 = arith.constant 0 : index
      %19 = vector.load %arg2[%c0_10, %c0_11, %c0_12] : memref<1x16x16xbf16, #tpu.memory_space<vmem>>, vector<1x16x16xbf16>
      %20 = vector.shape_cast %19 : vector<1x16x16xbf16> to vector<16x16xbf16>
      %cst_13 = arith.constant 0.000000e+00 : bf16
      %21 = vector.broadcast %cst_13 : bf16 to vector<16x1xbf16>
      %22 = tpu.concatenate %18, %20, %21 in 1 : vector<16x1xbf16>, vector<16x16xbf16>, vector<16x1xbf16> -> vector<16x18xbf16>
      %c0_14 = arith.constant 0 : index
      %c0_15 = arith.constant 0 : index
      %c0_16 = arith.constant 0 : index
      %23 = vector.load %arg6[%c0_14, %c0_15, %c0_16] : memref<1x16x18xbf16, #tpu.memory_space<vmem>>, vector<1x16x18xbf16>
      %24 = vector.shape_cast %23 : vector<1x16x18xbf16> to vector<16x18xbf16>
      %25 = vector.shape_cast %22 : vector<16x18xbf16> to vector<1x16x18xbf16>
      tpu.vector_store %arg6[%c0_14, %c0_15, %c0_16], %25 {strides = array<i32>} : memref<1x16x18xbf16, #tpu.memory_space<vmem>>, vector<1x16x18xbf16>,
    } else {
    }
    %3 = arith.index_cast %arg1 : i32 to index
    %c0 = arith.constant 0 : index
    %c0_1 = arith.constant 0 : index
    %4 = vector.load %arg6[%3, %c0, %c0_1] : memref<1x16x18xbf16, #tpu.memory_space<vmem>>, vector<1x16x18xbf16>
    %5 = vector.shape_cast %4 : vector<1x16x18xbf16> to vector<16x18xbf16>
    %6 = vector.extract_strided_slice %5 {offsets = [0, 0], sizes = [16, 16], strides = [1, 1]} : vector<16x18xbf16> to vector<16x16xbf16>
    %7 = vector.extract_strided_slice %5 {offsets = [0, 1], sizes = [16, 16], strides = [1, 1]} : vector<16x18xbf16> to vector<16x16xbf16>
    %8 = vector.extract_strided_slice %5 {offsets = [0, 2], sizes = [16, 16], strides = [1, 1]} : vector<16x18xbf16> to vector<16x16xbf16>
    %9 = tpu.concatenate %6, %7, %8 in 0 : vector<16x16xbf16>, vector<16x16xbf16>, vector<16x16xbf16> -> vector<48x16xbf16>
    %c0_2 = arith.constant 0 : index
    %c0_3 = arith.constant 0 : index
    %10 = vector.load %arg3[%c0_2, %c0_3] : memref<16x48xbf16, #tpu.memory_space<vmem>>, vector<16x48xbf16>
    %cst = arith.constant dense<0.000000e+00> : vector<16x16xf32>
    %11 = tpu.matmul %10, %9, %cst {dimension_numbers = #tpu.dot_dimension_numbers<[1], [0], [0], [1], [0, 0, 1, 1], [], []>} : vector<16x48xbf16>, vector<48x16xbf16>, vector<16x16xf32> -> vector<16x16xf32>
    %c0_4 = arith.constant 0 : index
    %c0_5 = arith.constant 0 : index
    %12 = vector.load %arg4[%c0_4, %c0_5] : memref<16x1xf32, #tpu.memory_space<vmem>>, vector<16x1xf32>
    %13 = vector.broadcast %12 : vector<16x1xf32> to vector<16x16xf32>
    %14 = arith.addf %11, %13 : vector<16x16xf32>
    %c0_6 = arith.constant 0 : index
    %c0_7 = arith.constant 0 : index
    %c0_8 = arith.constant 0 : index
    %15 = vector.load %arg5[%c0_6, %c0_7, %c0_8] : memref<1x16x16xf32, #tpu.memory_space<vmem>>, vector<1x16x16xf32>
    %16 = vector.shape_cast %15 : vector<1x16x16xf32> to vector<16x16xf32>
    %17 = vector.shape_cast %14 : vector<16x16xf32> to vector<1x16x16xf32>
    tpu.vector_store %arg5[%c0_6, %c0_7, %c0_8], %17 {strides = array<i32>} : memref<1x16x16xf32, #tpu.memory_space<vmem>>, vector<1x16x16xf32>,
    return
  }
  func.func @transform_0(%arg0: i32, %arg1: i32) -> (i32, i32, i32) {
    %c0_i32 = arith.constant 0 : i32
    %c0_i32_0 = arith.constant 0 : i32
    %c0_i32_1 = arith.constant 0 : i32
    return %arg0, %c0_i32, %c0_i32_0 : i32, i32, i32
  }
  func.func @transform_1(%arg0: i32, %arg1: i32) -> (i32, i32) {
    %c0_i32 = arith.constant 0 : i32
    %c0_i32_0 = arith.constant 0 : i32
    %c0_i32_1 = arith.constant 0 : i32
    return %c0_i32, %c0_i32_0 : i32, i32
  }
  func.func @transform_2(%arg0: i32, %arg1: i32) -> (i32, i32) {
    %c0_i32 = arith.constant 0 : i32
    %c0_i32_0 = arith.constant 0 : i32
    %c0_i32_1 = arith.constant 0 : i32
    return %c0_i32, %c0_i32_0 : i32, i32
  }
  func.func @transform_3(%arg0: i32, %arg1: i32) -> (i32, i32, i32) {
    %c0_i32 = arith.constant 0 : i32
    %c0_i32_0 = arith.constant 0 : i32
    return %arg0, %c0_i32, %arg1 : i32, i32, i32
  }
}

module attributes {stable_mosaic.version = 11 : i64} {
  func.func @_conv_kernel(%arg0: i32, %arg1: i32, %arg2: memref<1x8x32xf32, #tpu.memory_space<vmem>>, %arg3: memref<8x24xbf16, #tpu.memory_space<vmem>>, %arg4: memref<8x1xf32, #tpu.memory_space<vmem>>, %arg5: memref<8x24xbf16, #tpu.memory_space<vmem>>, %arg6: memref<8x1xf32, #tpu.memory_space<vmem>>, %arg7: memref<1x8x32xf32, #tpu.memory_space<vmem>>, %arg8: memref<1x8x32xf32, #tpu.memory_space<vmem>>, %arg9: memref<1x8x36xbf16, #tpu.memory_space<vmem>>) attributes {dimension_semantics = [#tpu.dimension_semantics<parallel>, #tpu.dimension_semantics<arbitrary>], iteration_bounds = array<i64: 2, 1>, scalar_prefetch = 0 : i64, scratch_operands = 1 : i64, tpu.core_type = #tpu.core_type<tc>, window_params = [{transform_indices = @transform_0, window_bounds = array<i64: 1, 8, 32>}, {pipeline_mode = #tpu.pipeline_mode<synchronous>, transform_indices = @transform_1, window_bounds = array<i64: 8, 24>}, {pipeline_mode = #tpu.pipeline_mode<synchronous>, transform_indices = @transform_2, window_bounds = array<i64: 8, 1>}, {pipeline_mode = #tpu.pipeline_mode<synchronous>, transform_indices = @transform_3, window_bounds = array<i64: 8, 24>}, {pipeline_mode = #tpu.pipeline_mode<synchronous>, transform_indices = @transform_4, window_bounds = array<i64: 8, 1>}, {transform_indices = @transform_5, window_bounds = array<i64: 1, 8, 32>}, {transform_indices = @transform_6, window_bounds = array<i64: 1, 8, 32>}]} {
    %c0_i32 = arith.constant 0 : i32
    %0 = arith.cmpi eq, %arg1, %c0_i32 : i32
    %1 = arith.extui %0 : i1 to i32
    %c0_i32_0 = arith.constant 0 : i32
    %2 = arith.cmpi ne, %1, %c0_i32_0 : i32
    scf.if %2 {
      %cst_22 = arith.constant 0.000000e+00 : bf16
      %48 = vector.broadcast %cst_22 : bf16 to vector<8x2xbf16>
      %c0_23 = arith.constant 0 : index
      %c0_24 = arith.constant 0 : index
      %c0_25 = arith.constant 0 : index
      %49 = vector.load %arg2[%c0_23, %c0_24, %c0_25] : memref<1x8x32xf32, #tpu.memory_space<vmem>>, vector<1x8x32xf32>
      %50 = vector.shape_cast %49 : vector<1x8x32xf32> to vector<8x32xf32>
      %cst_26 = arith.constant 0.000000e+00 : f32
      %51 = vector.broadcast %cst_26 : f32 to vector<8x32xf32>
      %52 = arith.cmpf ogt, %50, %51 : vector<8x32xf32>
      %cst_27 = arith.constant 1.000000e-01 : f32
      %53 = vector.broadcast %cst_27 : f32 to vector<8x32xf32>
      %54 = arith.mulf %50, %53 : vector<8x32xf32>
      %55 = arith.select %52, %50, %54 : vector<8x32xi1>, vector<8x32xf32>
      %56 = arith.truncf %55 : vector<8x32xf32> to vector<8x32xbf16>
      %cst_28 = arith.constant 0.000000e+00 : bf16
      %57 = vector.broadcast %cst_28 : bf16 to vector<8x2xbf16>
      %58 = tpu.concatenate %48, %56, %57 in 1 : vector<8x2xbf16>, vector<8x32xbf16>, vector<8x2xbf16> -> vector<8x36xbf16>
      %c0_29 = arith.constant 0 : index
      %c0_30 = arith.constant 0 : index
      %c0_31 = arith.constant 0 : index
      %59 = vector.load %arg9[%c0_29, %c0_30, %c0_31] : memref<1x8x36xbf16, #tpu.memory_space<vmem>>, vector<1x8x36xbf16>
      %60 = vector.shape_cast %59 : vector<1x8x36xbf16> to vector<8x36xbf16>
      %61 = vector.shape_cast %58 : vector<8x36xbf16> to vector<1x8x36xbf16>
      tpu.vector_store %arg9[%c0_29, %c0_30, %c0_31], %61 {strides = array<i32>} : memref<1x8x36xbf16, #tpu.memory_space<vmem>>, vector<1x8x36xbf16>,
    } else {
    }
    %3 = arith.index_cast %arg1 : i32 to index
    %c0 = arith.constant 0 : index
    %c0_1 = arith.constant 0 : index
    %4 = vector.load %arg9[%3, %c0, %c0_1] : memref<1x8x36xbf16, #tpu.memory_space<vmem>>, vector<1x8x36xbf16>
    %5 = vector.shape_cast %4 : vector<1x8x36xbf16> to vector<8x36xbf16>
    %6 = vector.extract_strided_slice %5 {offsets = [0, 0], sizes = [8, 34], strides = [1, 1]} : vector<8x36xbf16> to vector<8x34xbf16>
    %7 = vector.extract_strided_slice %5 {offsets = [0, 1], sizes = [8, 34], strides = [1, 1]} : vector<8x36xbf16> to vector<8x34xbf16>
    %8 = vector.extract_strided_slice %5 {offsets = [0, 2], sizes = [8, 34], strides = [1, 1]} : vector<8x36xbf16> to vector<8x34xbf16>
    %9 = tpu.concatenate %6, %7, %8 in 0 : vector<8x34xbf16>, vector<8x34xbf16>, vector<8x34xbf16> -> vector<24x34xbf16>
    %c0_2 = arith.constant 0 : index
    %c0_3 = arith.constant 0 : index
    %10 = vector.load %arg3[%c0_2, %c0_3] : memref<8x24xbf16, #tpu.memory_space<vmem>>, vector<8x24xbf16>
    %cst = arith.constant dense<0.000000e+00> : vector<8x34xf32>
    %11 = tpu.matmul %10, %9, %cst {dimension_numbers = #tpu.dot_dimension_numbers<[1], [0], [0], [1], [0, 0, 1, 1], [], []>} : vector<8x24xbf16>, vector<24x34xbf16>, vector<8x34xf32> -> vector<8x34xf32>
    %c0_4 = arith.constant 0 : index
    %c0_5 = arith.constant 0 : index
    %12 = vector.load %arg4[%c0_4, %c0_5] : memref<8x1xf32, #tpu.memory_space<vmem>>, vector<8x1xf32>
    %13 = vector.broadcast %12 : vector<8x1xf32> to vector<8x34xf32>
    %14 = arith.addf %11, %13 : vector<8x34xf32>
    %cst_6 = arith.constant 0.000000e+00 : f32
    %15 = vector.broadcast %cst_6 : f32 to vector<8x34xf32>
    %16 = arith.cmpf ogt, %14, %15 : vector<8x34xf32>
    %cst_7 = arith.constant 1.000000e-01 : f32
    %17 = vector.broadcast %cst_7 : f32 to vector<8x34xf32>
    %18 = arith.mulf %14, %17 : vector<8x34xf32>
    %19 = arith.select %16, %14, %18 : vector<8x34xi1>, vector<8x34xf32>
    %20 = tpu.iota {dimensions = array<i32: 1>} : vector<8x34xi32>
    %c32_i32 = arith.constant 32 : i32
    %21 = arith.muli %arg1, %c32_i32 : i32
    %c1_i32 = arith.constant 1 : i32
    %22 = arith.subi %21, %c1_i32 : i32
    %23 = vector.broadcast %22 : i32 to vector<8x34xi32>
    %24 = arith.addi %20, %23 : vector<8x34xi32>
    %c0_i32_8 = arith.constant 0 : i32
    %25 = vector.broadcast %c0_i32_8 : i32 to vector<8x34xi32>
    %26 = arith.cmpi sge, %24, %25 : vector<8x34xi32>
    %c32_i32_9 = arith.constant 32 : i32
    %27 = vector.broadcast %c32_i32_9 : i32 to vector<8x34xi32>
    %28 = arith.cmpi slt, %24, %27 : vector<8x34xi32>
    %29 = arith.andi %26, %28 : vector<8x34xi1>
    %cst_10 = arith.constant 0.000000e+00 : f32
    %30 = vector.broadcast %cst_10 : f32 to vector<8x34xf32>
    %31 = arith.select %29, %19, %30 : vector<8x34xi1>, vector<8x34xf32>
    %32 = arith.truncf %31 : vector<8x34xf32> to vector<8x34xbf16>
    %33 = vector.extract_strided_slice %32 {offsets = [0, 0], sizes = [8, 32], strides = [1, 1]} : vector<8x34xbf16> to vector<8x32xbf16>
    %34 = vector.extract_strided_slice %32 {offsets = [0, 1], sizes = [8, 32], strides = [1, 1]} : vector<8x34xbf16> to vector<8x32xbf16>
    %35 = vector.extract_strided_slice %32 {offsets = [0, 2], sizes = [8, 32], strides = [1, 1]} : vector<8x34xbf16> to vector<8x32xbf16>
    %36 = tpu.concatenate %33, %34, %35 in 0 : vector<8x32xbf16>, vector<8x32xbf16>, vector<8x32xbf16> -> vector<24x32xbf16>
    %c0_11 = arith.constant 0 : index
    %c0_12 = arith.constant 0 : index
    %37 = vector.load %arg5[%c0_11, %c0_12] : memref<8x24xbf16, #tpu.memory_space<vmem>>, vector<8x24xbf16>
    %cst_13 = arith.constant dense<0.000000e+00> : vector<8x32xf32>
    %38 = tpu.matmul %37, %36, %cst_13 {dimension_numbers = #tpu.dot_dimension_numbers<[1], [0], [0], [1], [0, 0, 1, 1], [], []>} : vector<8x24xbf16>, vector<24x32xbf16>, vector<8x32xf32> -> vector<8x32xf32>
    %c0_14 = arith.constant 0 : index
    %c0_15 = arith.constant 0 : index
    %39 = vector.load %arg6[%c0_14, %c0_15] : memref<8x1xf32, #tpu.memory_space<vmem>>, vector<8x1xf32>
    %40 = vector.broadcast %39 : vector<8x1xf32> to vector<8x32xf32>
    %41 = arith.addf %38, %40 : vector<8x32xf32>
    %c0_16 = arith.constant 0 : index
    %c0_17 = arith.constant 0 : index
    %c0_18 = arith.constant 0 : index
    %42 = vector.load %arg7[%c0_16, %c0_17, %c0_18] : memref<1x8x32xf32, #tpu.memory_space<vmem>>, vector<1x8x32xf32>
    %43 = vector.shape_cast %42 : vector<1x8x32xf32> to vector<8x32xf32>
    %44 = arith.addf %41, %43 : vector<8x32xf32>
    %c0_19 = arith.constant 0 : index
    %c0_20 = arith.constant 0 : index
    %c0_21 = arith.constant 0 : index
    %45 = vector.load %arg8[%c0_19, %c0_20, %c0_21] : memref<1x8x32xf32, #tpu.memory_space<vmem>>, vector<1x8x32xf32>
    %46 = vector.shape_cast %45 : vector<1x8x32xf32> to vector<8x32xf32>
    %47 = vector.shape_cast %44 : vector<8x32xf32> to vector<1x8x32xf32>
    tpu.vector_store %arg8[%c0_19, %c0_20, %c0_21], %47 {strides = array<i32>} : memref<1x8x32xf32, #tpu.memory_space<vmem>>, vector<1x8x32xf32>,
    return
  }
  func.func @transform_0(%arg0: i32, %arg1: i32) -> (i32, i32, i32) {
    %c0_i32 = arith.constant 0 : i32
    %c0_i32_0 = arith.constant 0 : i32
    %c0_i32_1 = arith.constant 0 : i32
    return %arg0, %c0_i32, %c0_i32_0 : i32, i32, i32
  }
  func.func @transform_1(%arg0: i32, %arg1: i32) -> (i32, i32) {
    %c0_i32 = arith.constant 0 : i32
    %c0_i32_0 = arith.constant 0 : i32
    %c0_i32_1 = arith.constant 0 : i32
    return %c0_i32, %c0_i32_0 : i32, i32
  }
  func.func @transform_2(%arg0: i32, %arg1: i32) -> (i32, i32) {
    %c0_i32 = arith.constant 0 : i32
    %c0_i32_0 = arith.constant 0 : i32
    %c0_i32_1 = arith.constant 0 : i32
    return %c0_i32, %c0_i32_0 : i32, i32
  }
  func.func @transform_3(%arg0: i32, %arg1: i32) -> (i32, i32) {
    %c0_i32 = arith.constant 0 : i32
    %c0_i32_0 = arith.constant 0 : i32
    %c0_i32_1 = arith.constant 0 : i32
    return %c0_i32, %c0_i32_0 : i32, i32
  }
  func.func @transform_4(%arg0: i32, %arg1: i32) -> (i32, i32) {
    %c0_i32 = arith.constant 0 : i32
    %c0_i32_0 = arith.constant 0 : i32
    %c0_i32_1 = arith.constant 0 : i32
    return %c0_i32, %c0_i32_0 : i32, i32
  }
  func.func @transform_5(%arg0: i32, %arg1: i32) -> (i32, i32, i32) {
    %c0_i32 = arith.constant 0 : i32
    %c0_i32_0 = arith.constant 0 : i32
    return %arg0, %c0_i32, %arg1 : i32, i32, i32
  }
  func.func @transform_6(%arg0: i32, %arg1: i32) -> (i32, i32, i32) {
    %c0_i32 = arith.constant 0 : i32
    %c0_i32_0 = arith.constant 0 : i32
    return %arg0, %c0_i32, %arg1 : i32, i32, i32
  }
}

module attributes {stable_mosaic.version = 11 : i64} {
  func.func @_conv_kernel(%arg0: i32, %arg1: i32, %arg2: memref<1x8x32xf32, #tpu.memory_space<vmem>>, %arg3: memref<8x24xbf16, #tpu.memory_space<vmem>>, %arg4: memref<8x1xf32, #tpu.memory_space<vmem>>, %arg5: memref<8x24xbf16, #tpu.memory_space<vmem>>, %arg6: memref<8x1xf32, #tpu.memory_space<vmem>>, %arg7: memref<1x8x32xf32, #tpu.memory_space<vmem>>, %arg8: memref<1x8x32xf32, #tpu.memory_space<vmem>>, %arg9: memref<1x8x40xbf16, #tpu.memory_space<vmem>>) attributes {dimension_semantics = [#tpu.dimension_semantics<parallel>, #tpu.dimension_semantics<arbitrary>], iteration_bounds = array<i64: 2, 1>, scalar_prefetch = 0 : i64, scratch_operands = 1 : i64, tpu.core_type = #tpu.core_type<tc>, window_params = [{transform_indices = @transform_0, window_bounds = array<i64: 1, 8, 32>}, {pipeline_mode = #tpu.pipeline_mode<synchronous>, transform_indices = @transform_1, window_bounds = array<i64: 8, 24>}, {pipeline_mode = #tpu.pipeline_mode<synchronous>, transform_indices = @transform_2, window_bounds = array<i64: 8, 1>}, {pipeline_mode = #tpu.pipeline_mode<synchronous>, transform_indices = @transform_3, window_bounds = array<i64: 8, 24>}, {pipeline_mode = #tpu.pipeline_mode<synchronous>, transform_indices = @transform_4, window_bounds = array<i64: 8, 1>}, {transform_indices = @transform_5, window_bounds = array<i64: 1, 8, 32>}, {transform_indices = @transform_6, window_bounds = array<i64: 1, 8, 32>}]} {
    %c0_i32 = arith.constant 0 : i32
    %0 = arith.cmpi eq, %arg1, %c0_i32 : i32
    %1 = arith.extui %0 : i1 to i32
    %c0_i32_0 = arith.constant 0 : i32
    %2 = arith.cmpi ne, %1, %c0_i32_0 : i32
    scf.if %2 {
      %cst_22 = arith.constant 0.000000e+00 : bf16
      %48 = vector.broadcast %cst_22 : bf16 to vector<8x4xbf16>
      %c0_23 = arith.constant 0 : index
      %c0_24 = arith.constant 0 : index
      %c0_25 = arith.constant 0 : index
      %49 = vector.load %arg2[%c0_23, %c0_24, %c0_25] : memref<1x8x32xf32, #tpu.memory_space<vmem>>, vector<1x8x32xf32>
      %50 = vector.shape_cast %49 : vector<1x8x32xf32> to vector<8x32xf32>
      %cst_26 = arith.constant 0.000000e+00 : f32
      %51 = vector.broadcast %cst_26 : f32 to vector<8x32xf32>
      %52 = arith.cmpf ogt, %50, %51 : vector<8x32xf32>
      %cst_27 = arith.constant 1.000000e-01 : f32
      %53 = vector.broadcast %cst_27 : f32 to vector<8x32xf32>
      %54 = arith.mulf %50, %53 : vector<8x32xf32>
      %55 = arith.select %52, %50, %54 : vector<8x32xi1>, vector<8x32xf32>
      %56 = arith.truncf %55 : vector<8x32xf32> to vector<8x32xbf16>
      %cst_28 = arith.constant 0.000000e+00 : bf16
      %57 = vector.broadcast %cst_28 : bf16 to vector<8x4xbf16>
      %58 = tpu.concatenate %48, %56, %57 in 1 : vector<8x4xbf16>, vector<8x32xbf16>, vector<8x4xbf16> -> vector<8x40xbf16>
      %c0_29 = arith.constant 0 : index
      %c0_30 = arith.constant 0 : index
      %c0_31 = arith.constant 0 : index
      %59 = vector.load %arg9[%c0_29, %c0_30, %c0_31] : memref<1x8x40xbf16, #tpu.memory_space<vmem>>, vector<1x8x40xbf16>
      %60 = vector.shape_cast %59 : vector<1x8x40xbf16> to vector<8x40xbf16>
      %61 = vector.shape_cast %58 : vector<8x40xbf16> to vector<1x8x40xbf16>
      tpu.vector_store %arg9[%c0_29, %c0_30, %c0_31], %61 {strides = array<i32>} : memref<1x8x40xbf16, #tpu.memory_space<vmem>>, vector<1x8x40xbf16>,
    } else {
    }
    %3 = arith.index_cast %arg1 : i32 to index
    %c0 = arith.constant 0 : index
    %c0_1 = arith.constant 0 : index
    %4 = vector.load %arg9[%3, %c0, %c0_1] : memref<1x8x40xbf16, #tpu.memory_space<vmem>>, vector<1x8x40xbf16>
    %5 = vector.shape_cast %4 : vector<1x8x40xbf16> to vector<8x40xbf16>
    %6 = vector.extract_strided_slice %5 {offsets = [0, 0], sizes = [8, 34], strides = [1, 1]} : vector<8x40xbf16> to vector<8x34xbf16>
    %7 = vector.extract_strided_slice %5 {offsets = [0, 3], sizes = [8, 34], strides = [1, 1]} : vector<8x40xbf16> to vector<8x34xbf16>
    %8 = vector.extract_strided_slice %5 {offsets = [0, 6], sizes = [8, 34], strides = [1, 1]} : vector<8x40xbf16> to vector<8x34xbf16>
    %9 = tpu.concatenate %6, %7, %8 in 0 : vector<8x34xbf16>, vector<8x34xbf16>, vector<8x34xbf16> -> vector<24x34xbf16>
    %c0_2 = arith.constant 0 : index
    %c0_3 = arith.constant 0 : index
    %10 = vector.load %arg3[%c0_2, %c0_3] : memref<8x24xbf16, #tpu.memory_space<vmem>>, vector<8x24xbf16>
    %cst = arith.constant dense<0.000000e+00> : vector<8x34xf32>
    %11 = tpu.matmul %10, %9, %cst {dimension_numbers = #tpu.dot_dimension_numbers<[1], [0], [0], [1], [0, 0, 1, 1], [], []>} : vector<8x24xbf16>, vector<24x34xbf16>, vector<8x34xf32> -> vector<8x34xf32>
    %c0_4 = arith.constant 0 : index
    %c0_5 = arith.constant 0 : index
    %12 = vector.load %arg4[%c0_4, %c0_5] : memref<8x1xf32, #tpu.memory_space<vmem>>, vector<8x1xf32>
    %13 = vector.broadcast %12 : vector<8x1xf32> to vector<8x34xf32>
    %14 = arith.addf %11, %13 : vector<8x34xf32>
    %cst_6 = arith.constant 0.000000e+00 : f32
    %15 = vector.broadcast %cst_6 : f32 to vector<8x34xf32>
    %16 = arith.cmpf ogt, %14, %15 : vector<8x34xf32>
    %cst_7 = arith.constant 1.000000e-01 : f32
    %17 = vector.broadcast %cst_7 : f32 to vector<8x34xf32>
    %18 = arith.mulf %14, %17 : vector<8x34xf32>
    %19 = arith.select %16, %14, %18 : vector<8x34xi1>, vector<8x34xf32>
    %20 = tpu.iota {dimensions = array<i32: 1>} : vector<8x34xi32>
    %c32_i32 = arith.constant 32 : i32
    %21 = arith.muli %arg1, %c32_i32 : i32
    %c1_i32 = arith.constant 1 : i32
    %22 = arith.subi %21, %c1_i32 : i32
    %23 = vector.broadcast %22 : i32 to vector<8x34xi32>
    %24 = arith.addi %20, %23 : vector<8x34xi32>
    %c0_i32_8 = arith.constant 0 : i32
    %25 = vector.broadcast %c0_i32_8 : i32 to vector<8x34xi32>
    %26 = arith.cmpi sge, %24, %25 : vector<8x34xi32>
    %c32_i32_9 = arith.constant 32 : i32
    %27 = vector.broadcast %c32_i32_9 : i32 to vector<8x34xi32>
    %28 = arith.cmpi slt, %24, %27 : vector<8x34xi32>
    %29 = arith.andi %26, %28 : vector<8x34xi1>
    %cst_10 = arith.constant 0.000000e+00 : f32
    %30 = vector.broadcast %cst_10 : f32 to vector<8x34xf32>
    %31 = arith.select %29, %19, %30 : vector<8x34xi1>, vector<8x34xf32>
    %32 = arith.truncf %31 : vector<8x34xf32> to vector<8x34xbf16>
    %33 = vector.extract_strided_slice %32 {offsets = [0, 0], sizes = [8, 32], strides = [1, 1]} : vector<8x34xbf16> to vector<8x32xbf16>
    %34 = vector.extract_strided_slice %32 {offsets = [0, 1], sizes = [8, 32], strides = [1, 1]} : vector<8x34xbf16> to vector<8x32xbf16>
    %35 = vector.extract_strided_slice %32 {offsets = [0, 2], sizes = [8, 32], strides = [1, 1]} : vector<8x34xbf16> to vector<8x32xbf16>
    %36 = tpu.concatenate %33, %34, %35 in 0 : vector<8x32xbf16>, vector<8x32xbf16>, vector<8x32xbf16> -> vector<24x32xbf16>
    %c0_11 = arith.constant 0 : index
    %c0_12 = arith.constant 0 : index
    %37 = vector.load %arg5[%c0_11, %c0_12] : memref<8x24xbf16, #tpu.memory_space<vmem>>, vector<8x24xbf16>
    %cst_13 = arith.constant dense<0.000000e+00> : vector<8x32xf32>
    %38 = tpu.matmul %37, %36, %cst_13 {dimension_numbers = #tpu.dot_dimension_numbers<[1], [0], [0], [1], [0, 0, 1, 1], [], []>} : vector<8x24xbf16>, vector<24x32xbf16>, vector<8x32xf32> -> vector<8x32xf32>
    %c0_14 = arith.constant 0 : index
    %c0_15 = arith.constant 0 : index
    %39 = vector.load %arg6[%c0_14, %c0_15] : memref<8x1xf32, #tpu.memory_space<vmem>>, vector<8x1xf32>
    %40 = vector.broadcast %39 : vector<8x1xf32> to vector<8x32xf32>
    %41 = arith.addf %38, %40 : vector<8x32xf32>
    %c0_16 = arith.constant 0 : index
    %c0_17 = arith.constant 0 : index
    %c0_18 = arith.constant 0 : index
    %42 = vector.load %arg7[%c0_16, %c0_17, %c0_18] : memref<1x8x32xf32, #tpu.memory_space<vmem>>, vector<1x8x32xf32>
    %43 = vector.shape_cast %42 : vector<1x8x32xf32> to vector<8x32xf32>
    %44 = arith.addf %41, %43 : vector<8x32xf32>
    %c0_19 = arith.constant 0 : index
    %c0_20 = arith.constant 0 : index
    %c0_21 = arith.constant 0 : index
    %45 = vector.load %arg8[%c0_19, %c0_20, %c0_21] : memref<1x8x32xf32, #tpu.memory_space<vmem>>, vector<1x8x32xf32>
    %46 = vector.shape_cast %45 : vector<1x8x32xf32> to vector<8x32xf32>
    %47 = vector.shape_cast %44 : vector<8x32xf32> to vector<1x8x32xf32>
    tpu.vector_store %arg8[%c0_19, %c0_20, %c0_21], %47 {strides = array<i32>} : memref<1x8x32xf32, #tpu.memory_space<vmem>>, vector<1x8x32xf32>,
    return
  }
  func.func @transform_0(%arg0: i32, %arg1: i32) -> (i32, i32, i32) {
    %c0_i32 = arith.constant 0 : i32
    %c0_i32_0 = arith.constant 0 : i32
    %c0_i32_1 = arith.constant 0 : i32
    return %arg0, %c0_i32, %c0_i32_0 : i32, i32, i32
  }
  func.func @transform_1(%arg0: i32, %arg1: i32) -> (i32, i32) {
    %c0_i32 = arith.constant 0 : i32
    %c0_i32_0 = arith.constant 0 : i32
    %c0_i32_1 = arith.constant 0 : i32
    return %c0_i32, %c0_i32_0 : i32, i32
  }
  func.func @transform_2(%arg0: i32, %arg1: i32) -> (i32, i32) {
    %c0_i32 = arith.constant 0 : i32
    %c0_i32_0 = arith.constant 0 : i32
    %c0_i32_1 = arith.constant 0 : i32
    return %c0_i32, %c0_i32_0 : i32, i32
  }
  func.func @transform_3(%arg0: i32, %arg1: i32) -> (i32, i32) {
    %c0_i32 = arith.constant 0 : i32
    %c0_i32_0 = arith.constant 0 : i32
    %c0_i32_1 = arith.constant 0 : i32
    return %c0_i32, %c0_i32_0 : i32, i32
  }
  func.func @transform_4(%arg0: i32, %arg1: i32) -> (i32, i32) {
    %c0_i32 = arith.constant 0 : i32
    %c0_i32_0 = arith.constant 0 : i32
    %c0_i32_1 = arith.constant 0 : i32
    return %c0_i32, %c0_i32_0 : i32, i32
  }
  func.func @transform_5(%arg0: i32, %arg1: i32) -> (i32, i32, i32) {
    %c0_i32 = arith.constant 0 : i32
    %c0_i32_0 = arith.constant 0 : i32
    return %arg0, %c0_i32, %arg1 : i32, i32, i32
  }
  func.func @transform_6(%arg0: i32, %arg1: i32) -> (i32, i32, i32) {
    %c0_i32 = arith.constant 0 : i32
    %c0_i32_0 = arith.constant 0 : i32
    return %arg0, %c0_i32, %arg1 : i32, i32, i32
  }
}

module attributes {stable_mosaic.version = 11 : i64} {
  func.func @_conv_kernel(%arg0: i32, %arg1: i32, %arg2: memref<1x8x32xf32, #tpu.memory_space<vmem>>, %arg3: memref<8x24xbf16, #tpu.memory_space<vmem>>, %arg4: memref<8x1xf32, #tpu.memory_space<vmem>>, %arg5: memref<8x24xbf16, #tpu.memory_space<vmem>>, %arg6: memref<8x1xf32, #tpu.memory_space<vmem>>, %arg7: memref<1x8x32xf32, #tpu.memory_space<vmem>>, %arg8: memref<1x8x32xf32, #tpu.memory_space<vmem>>, %arg9: memref<1x8x44xbf16, #tpu.memory_space<vmem>>) attributes {dimension_semantics = [#tpu.dimension_semantics<parallel>, #tpu.dimension_semantics<arbitrary>], iteration_bounds = array<i64: 2, 1>, scalar_prefetch = 0 : i64, scratch_operands = 1 : i64, tpu.core_type = #tpu.core_type<tc>, window_params = [{transform_indices = @transform_0, window_bounds = array<i64: 1, 8, 32>}, {pipeline_mode = #tpu.pipeline_mode<synchronous>, transform_indices = @transform_1, window_bounds = array<i64: 8, 24>}, {pipeline_mode = #tpu.pipeline_mode<synchronous>, transform_indices = @transform_2, window_bounds = array<i64: 8, 1>}, {pipeline_mode = #tpu.pipeline_mode<synchronous>, transform_indices = @transform_3, window_bounds = array<i64: 8, 24>}, {pipeline_mode = #tpu.pipeline_mode<synchronous>, transform_indices = @transform_4, window_bounds = array<i64: 8, 1>}, {transform_indices = @transform_5, window_bounds = array<i64: 1, 8, 32>}, {transform_indices = @transform_6, window_bounds = array<i64: 1, 8, 32>}]} {
    %c0_i32 = arith.constant 0 : i32
    %0 = arith.cmpi eq, %arg1, %c0_i32 : i32
    %1 = arith.extui %0 : i1 to i32
    %c0_i32_0 = arith.constant 0 : i32
    %2 = arith.cmpi ne, %1, %c0_i32_0 : i32
    scf.if %2 {
      %cst_22 = arith.constant 0.000000e+00 : bf16
      %48 = vector.broadcast %cst_22 : bf16 to vector<8x6xbf16>
      %c0_23 = arith.constant 0 : index
      %c0_24 = arith.constant 0 : index
      %c0_25 = arith.constant 0 : index
      %49 = vector.load %arg2[%c0_23, %c0_24, %c0_25] : memref<1x8x32xf32, #tpu.memory_space<vmem>>, vector<1x8x32xf32>
      %50 = vector.shape_cast %49 : vector<1x8x32xf32> to vector<8x32xf32>
      %cst_26 = arith.constant 0.000000e+00 : f32
      %51 = vector.broadcast %cst_26 : f32 to vector<8x32xf32>
      %52 = arith.cmpf ogt, %50, %51 : vector<8x32xf32>
      %cst_27 = arith.constant 1.000000e-01 : f32
      %53 = vector.broadcast %cst_27 : f32 to vector<8x32xf32>
      %54 = arith.mulf %50, %53 : vector<8x32xf32>
      %55 = arith.select %52, %50, %54 : vector<8x32xi1>, vector<8x32xf32>
      %56 = arith.truncf %55 : vector<8x32xf32> to vector<8x32xbf16>
      %cst_28 = arith.constant 0.000000e+00 : bf16
      %57 = vector.broadcast %cst_28 : bf16 to vector<8x6xbf16>
      %58 = tpu.concatenate %48, %56, %57 in 1 : vector<8x6xbf16>, vector<8x32xbf16>, vector<8x6xbf16> -> vector<8x44xbf16>
      %c0_29 = arith.constant 0 : index
      %c0_30 = arith.constant 0 : index
      %c0_31 = arith.constant 0 : index
      %59 = vector.load %arg9[%c0_29, %c0_30, %c0_31] : memref<1x8x44xbf16, #tpu.memory_space<vmem>>, vector<1x8x44xbf16>
      %60 = vector.shape_cast %59 : vector<1x8x44xbf16> to vector<8x44xbf16>
      %61 = vector.shape_cast %58 : vector<8x44xbf16> to vector<1x8x44xbf16>
      tpu.vector_store %arg9[%c0_29, %c0_30, %c0_31], %61 {strides = array<i32>} : memref<1x8x44xbf16, #tpu.memory_space<vmem>>, vector<1x8x44xbf16>,
    } else {
    }
    %3 = arith.index_cast %arg1 : i32 to index
    %c0 = arith.constant 0 : index
    %c0_1 = arith.constant 0 : index
    %4 = vector.load %arg9[%3, %c0, %c0_1] : memref<1x8x44xbf16, #tpu.memory_space<vmem>>, vector<1x8x44xbf16>
    %5 = vector.shape_cast %4 : vector<1x8x44xbf16> to vector<8x44xbf16>
    %6 = vector.extract_strided_slice %5 {offsets = [0, 0], sizes = [8, 34], strides = [1, 1]} : vector<8x44xbf16> to vector<8x34xbf16>
    %7 = vector.extract_strided_slice %5 {offsets = [0, 5], sizes = [8, 34], strides = [1, 1]} : vector<8x44xbf16> to vector<8x34xbf16>
    %8 = vector.extract_strided_slice %5 {offsets = [0, 10], sizes = [8, 34], strides = [1, 1]} : vector<8x44xbf16> to vector<8x34xbf16>
    %9 = tpu.concatenate %6, %7, %8 in 0 : vector<8x34xbf16>, vector<8x34xbf16>, vector<8x34xbf16> -> vector<24x34xbf16>
    %c0_2 = arith.constant 0 : index
    %c0_3 = arith.constant 0 : index
    %10 = vector.load %arg3[%c0_2, %c0_3] : memref<8x24xbf16, #tpu.memory_space<vmem>>, vector<8x24xbf16>
    %cst = arith.constant dense<0.000000e+00> : vector<8x34xf32>
    %11 = tpu.matmul %10, %9, %cst {dimension_numbers = #tpu.dot_dimension_numbers<[1], [0], [0], [1], [0, 0, 1, 1], [], []>} : vector<8x24xbf16>, vector<24x34xbf16>, vector<8x34xf32> -> vector<8x34xf32>
    %c0_4 = arith.constant 0 : index
    %c0_5 = arith.constant 0 : index
    %12 = vector.load %arg4[%c0_4, %c0_5] : memref<8x1xf32, #tpu.memory_space<vmem>>, vector<8x1xf32>
    %13 = vector.broadcast %12 : vector<8x1xf32> to vector<8x34xf32>
    %14 = arith.addf %11, %13 : vector<8x34xf32>
    %cst_6 = arith.constant 0.000000e+00 : f32
    %15 = vector.broadcast %cst_6 : f32 to vector<8x34xf32>
    %16 = arith.cmpf ogt, %14, %15 : vector<8x34xf32>
    %cst_7 = arith.constant 1.000000e-01 : f32
    %17 = vector.broadcast %cst_7 : f32 to vector<8x34xf32>
    %18 = arith.mulf %14, %17 : vector<8x34xf32>
    %19 = arith.select %16, %14, %18 : vector<8x34xi1>, vector<8x34xf32>
    %20 = tpu.iota {dimensions = array<i32: 1>} : vector<8x34xi32>
    %c32_i32 = arith.constant 32 : i32
    %21 = arith.muli %arg1, %c32_i32 : i32
    %c1_i32 = arith.constant 1 : i32
    %22 = arith.subi %21, %c1_i32 : i32
    %23 = vector.broadcast %22 : i32 to vector<8x34xi32>
    %24 = arith.addi %20, %23 : vector<8x34xi32>
    %c0_i32_8 = arith.constant 0 : i32
    %25 = vector.broadcast %c0_i32_8 : i32 to vector<8x34xi32>
    %26 = arith.cmpi sge, %24, %25 : vector<8x34xi32>
    %c32_i32_9 = arith.constant 32 : i32
    %27 = vector.broadcast %c32_i32_9 : i32 to vector<8x34xi32>
    %28 = arith.cmpi slt, %24, %27 : vector<8x34xi32>
    %29 = arith.andi %26, %28 : vector<8x34xi1>
    %cst_10 = arith.constant 0.000000e+00 : f32
    %30 = vector.broadcast %cst_10 : f32 to vector<8x34xf32>
    %31 = arith.select %29, %19, %30 : vector<8x34xi1>, vector<8x34xf32>
    %32 = arith.truncf %31 : vector<8x34xf32> to vector<8x34xbf16>
    %33 = vector.extract_strided_slice %32 {offsets = [0, 0], sizes = [8, 32], strides = [1, 1]} : vector<8x34xbf16> to vector<8x32xbf16>
    %34 = vector.extract_strided_slice %32 {offsets = [0, 1], sizes = [8, 32], strides = [1, 1]} : vector<8x34xbf16> to vector<8x32xbf16>
    %35 = vector.extract_strided_slice %32 {offsets = [0, 2], sizes = [8, 32], strides = [1, 1]} : vector<8x34xbf16> to vector<8x32xbf16>
    %36 = tpu.concatenate %33, %34, %35 in 0 : vector<8x32xbf16>, vector<8x32xbf16>, vector<8x32xbf16> -> vector<24x32xbf16>
    %c0_11 = arith.constant 0 : index
    %c0_12 = arith.constant 0 : index
    %37 = vector.load %arg5[%c0_11, %c0_12] : memref<8x24xbf16, #tpu.memory_space<vmem>>, vector<8x24xbf16>
    %cst_13 = arith.constant dense<0.000000e+00> : vector<8x32xf32>
    %38 = tpu.matmul %37, %36, %cst_13 {dimension_numbers = #tpu.dot_dimension_numbers<[1], [0], [0], [1], [0, 0, 1, 1], [], []>} : vector<8x24xbf16>, vector<24x32xbf16>, vector<8x32xf32> -> vector<8x32xf32>
    %c0_14 = arith.constant 0 : index
    %c0_15 = arith.constant 0 : index
    %39 = vector.load %arg6[%c0_14, %c0_15] : memref<8x1xf32, #tpu.memory_space<vmem>>, vector<8x1xf32>
    %40 = vector.broadcast %39 : vector<8x1xf32> to vector<8x32xf32>
    %41 = arith.addf %38, %40 : vector<8x32xf32>
    %c0_16 = arith.constant 0 : index
    %c0_17 = arith.constant 0 : index
    %c0_18 = arith.constant 0 : index
    %42 = vector.load %arg7[%c0_16, %c0_17, %c0_18] : memref<1x8x32xf32, #tpu.memory_space<vmem>>, vector<1x8x32xf32>
    %43 = vector.shape_cast %42 : vector<1x8x32xf32> to vector<8x32xf32>
    %44 = arith.addf %41, %43 : vector<8x32xf32>
    %c0_19 = arith.constant 0 : index
    %c0_20 = arith.constant 0 : index
    %c0_21 = arith.constant 0 : index
    %45 = vector.load %arg8[%c0_19, %c0_20, %c0_21] : memref<1x8x32xf32, #tpu.memory_space<vmem>>, vector<1x8x32xf32>
    %46 = vector.shape_cast %45 : vector<1x8x32xf32> to vector<8x32xf32>
    %47 = vector.shape_cast %44 : vector<8x32xf32> to vector<1x8x32xf32>
    tpu.vector_store %arg8[%c0_19, %c0_20, %c0_21], %47 {strides = array<i32>} : memref<1x8x32xf32, #tpu.memory_space<vmem>>, vector<1x8x32xf32>,
    return
  }
  func.func @transform_0(%arg0: i32, %arg1: i32) -> (i32, i32, i32) {
    %c0_i32 = arith.constant 0 : i32
    %c0_i32_0 = arith.constant 0 : i32
    %c0_i32_1 = arith.constant 0 : i32
    return %arg0, %c0_i32, %c0_i32_0 : i32, i32, i32
  }
  func.func @transform_1(%arg0: i32, %arg1: i32) -> (i32, i32) {
    %c0_i32 = arith.constant 0 : i32
    %c0_i32_0 = arith.constant 0 : i32
    %c0_i32_1 = arith.constant 0 : i32
    return %c0_i32, %c0_i32_0 : i32, i32
  }
  func.func @transform_2(%arg0: i32, %arg1: i32) -> (i32, i32) {
    %c0_i32 = arith.constant 0 : i32
    %c0_i32_0 = arith.constant 0 : i32
    %c0_i32_1 = arith.constant 0 : i32
    return %c0_i32, %c0_i32_0 : i32, i32
  }
  func.func @transform_3(%arg0: i32, %arg1: i32) -> (i32, i32) {
    %c0_i32 = arith.constant 0 : i32
    %c0_i32_0 = arith.constant 0 : i32
    %c0_i32_1 = arith.constant 0 : i32
    return %c0_i32, %c0_i32_0 : i32, i32
  }
  func.func @transform_4(%arg0: i32, %arg1: i32) -> (i32, i32) {
    %c0_i32 = arith.constant 0 : i32
    %c0_i32_0 = arith.constant 0 : i32
    %c0_i32_1 = arith.constant 0 : i32
    return %c0_i32, %c0_i32_0 : i32, i32
  }
  func.func @transform_5(%arg0: i32, %arg1: i32) -> (i32, i32, i32) {
    %c0_i32 = arith.constant 0 : i32
    %c0_i32_0 = arith.constant 0 : i32
    return %arg0, %c0_i32, %arg1 : i32, i32, i32
  }
  func.func @transform_6(%arg0: i32, %arg1: i32) -> (i32, i32, i32) {
    %c0_i32 = arith.constant 0 : i32
    %c0_i32_0 = arith.constant 0 : i32
    return %arg0, %c0_i32, %arg1 : i32, i32, i32
  }
}

module attributes {stable_mosaic.version = 11 : i64} {
  func.func @_conv_kernel(%arg0: i32, %arg1: i32, %arg2: memref<1x8x32xf32, #tpu.memory_space<vmem>>, %arg3: memref<8x40xbf16, #tpu.memory_space<vmem>>, %arg4: memref<8x1xf32, #tpu.memory_space<vmem>>, %arg5: memref<8x40xbf16, #tpu.memory_space<vmem>>, %arg6: memref<8x1xf32, #tpu.memory_space<vmem>>, %arg7: memref<1x8x32xf32, #tpu.memory_space<vmem>>, %arg8: memref<1x8x32xf32, #tpu.memory_space<vmem>>, %arg9: memref<1x8x40xbf16, #tpu.memory_space<vmem>>) attributes {dimension_semantics = [#tpu.dimension_semantics<parallel>, #tpu.dimension_semantics<arbitrary>], iteration_bounds = array<i64: 2, 1>, scalar_prefetch = 0 : i64, scratch_operands = 1 : i64, tpu.core_type = #tpu.core_type<tc>, window_params = [{transform_indices = @transform_0, window_bounds = array<i64: 1, 8, 32>}, {pipeline_mode = #tpu.pipeline_mode<synchronous>, transform_indices = @transform_1, window_bounds = array<i64: 8, 40>}, {pipeline_mode = #tpu.pipeline_mode<synchronous>, transform_indices = @transform_2, window_bounds = array<i64: 8, 1>}, {pipeline_mode = #tpu.pipeline_mode<synchronous>, transform_indices = @transform_3, window_bounds = array<i64: 8, 40>}, {pipeline_mode = #tpu.pipeline_mode<synchronous>, transform_indices = @transform_4, window_bounds = array<i64: 8, 1>}, {transform_indices = @transform_5, window_bounds = array<i64: 1, 8, 32>}, {transform_indices = @transform_6, window_bounds = array<i64: 1, 8, 32>}]} {
    %c0_i32 = arith.constant 0 : i32
    %0 = arith.cmpi eq, %arg1, %c0_i32 : i32
    %1 = arith.extui %0 : i1 to i32
    %c0_i32_0 = arith.constant 0 : i32
    %2 = arith.cmpi ne, %1, %c0_i32_0 : i32
    scf.if %2 {
      %cst_22 = arith.constant 0.000000e+00 : bf16
      %52 = vector.broadcast %cst_22 : bf16 to vector<8x4xbf16>
      %c0_23 = arith.constant 0 : index
      %c0_24 = arith.constant 0 : index
      %c0_25 = arith.constant 0 : index
      %53 = vector.load %arg2[%c0_23, %c0_24, %c0_25] : memref<1x8x32xf32, #tpu.memory_space<vmem>>, vector<1x8x32xf32>
      %54 = vector.shape_cast %53 : vector<1x8x32xf32> to vector<8x32xf32>
      %cst_26 = arith.constant 0.000000e+00 : f32
      %55 = vector.broadcast %cst_26 : f32 to vector<8x32xf32>
      %56 = arith.cmpf ogt, %54, %55 : vector<8x32xf32>
      %cst_27 = arith.constant 1.000000e-01 : f32
      %57 = vector.broadcast %cst_27 : f32 to vector<8x32xf32>
      %58 = arith.mulf %54, %57 : vector<8x32xf32>
      %59 = arith.select %56, %54, %58 : vector<8x32xi1>, vector<8x32xf32>
      %60 = arith.truncf %59 : vector<8x32xf32> to vector<8x32xbf16>
      %cst_28 = arith.constant 0.000000e+00 : bf16
      %61 = vector.broadcast %cst_28 : bf16 to vector<8x4xbf16>
      %62 = tpu.concatenate %52, %60, %61 in 1 : vector<8x4xbf16>, vector<8x32xbf16>, vector<8x4xbf16> -> vector<8x40xbf16>
      %c0_29 = arith.constant 0 : index
      %c0_30 = arith.constant 0 : index
      %c0_31 = arith.constant 0 : index
      %63 = vector.load %arg9[%c0_29, %c0_30, %c0_31] : memref<1x8x40xbf16, #tpu.memory_space<vmem>>, vector<1x8x40xbf16>
      %64 = vector.shape_cast %63 : vector<1x8x40xbf16> to vector<8x40xbf16>
      %65 = vector.shape_cast %62 : vector<8x40xbf16> to vector<1x8x40xbf16>
      tpu.vector_store %arg9[%c0_29, %c0_30, %c0_31], %65 {strides = array<i32>} : memref<1x8x40xbf16, #tpu.memory_space<vmem>>, vector<1x8x40xbf16>,
    } else {
    }
    %3 = arith.index_cast %arg1 : i32 to index
    %c0 = arith.constant 0 : index
    %c0_1 = arith.constant 0 : index
    %4 = vector.load %arg9[%3, %c0, %c0_1] : memref<1x8x40xbf16, #tpu.memory_space<vmem>>, vector<1x8x40xbf16>
    %5 = vector.shape_cast %4 : vector<1x8x40xbf16> to vector<8x40xbf16>
    %6 = vector.extract_strided_slice %5 {offsets = [0, 0], sizes = [8, 36], strides = [1, 1]} : vector<8x40xbf16> to vector<8x36xbf16>
    %7 = vector.extract_strided_slice %5 {offsets = [0, 1], sizes = [8, 36], strides = [1, 1]} : vector<8x40xbf16> to vector<8x36xbf16>
    %8 = vector.extract_strided_slice %5 {offsets = [0, 2], sizes = [8, 36], strides = [1, 1]} : vector<8x40xbf16> to vector<8x36xbf16>
    %9 = vector.extract_strided_slice %5 {offsets = [0, 3], sizes = [8, 36], strides = [1, 1]} : vector<8x40xbf16> to vector<8x36xbf16>
    %10 = vector.extract_strided_slice %5 {offsets = [0, 4], sizes = [8, 36], strides = [1, 1]} : vector<8x40xbf16> to vector<8x36xbf16>
    %11 = tpu.concatenate %6, %7, %8, %9, %10 in 0 : vector<8x36xbf16>, vector<8x36xbf16>, vector<8x36xbf16>, vector<8x36xbf16>, vector<8x36xbf16> -> vector<40x36xbf16>
    %c0_2 = arith.constant 0 : index
    %c0_3 = arith.constant 0 : index
    %12 = vector.load %arg3[%c0_2, %c0_3] : memref<8x40xbf16, #tpu.memory_space<vmem>>, vector<8x40xbf16>
    %cst = arith.constant dense<0.000000e+00> : vector<8x36xf32>
    %13 = tpu.matmul %12, %11, %cst {dimension_numbers = #tpu.dot_dimension_numbers<[1], [0], [0], [1], [0, 0, 1, 1], [], []>} : vector<8x40xbf16>, vector<40x36xbf16>, vector<8x36xf32> -> vector<8x36xf32>
    %c0_4 = arith.constant 0 : index
    %c0_5 = arith.constant 0 : index
    %14 = vector.load %arg4[%c0_4, %c0_5] : memref<8x1xf32, #tpu.memory_space<vmem>>, vector<8x1xf32>
    %15 = vector.broadcast %14 : vector<8x1xf32> to vector<8x36xf32>
    %16 = arith.addf %13, %15 : vector<8x36xf32>
    %cst_6 = arith.constant 0.000000e+00 : f32
    %17 = vector.broadcast %cst_6 : f32 to vector<8x36xf32>
    %18 = arith.cmpf ogt, %16, %17 : vector<8x36xf32>
    %cst_7 = arith.constant 1.000000e-01 : f32
    %19 = vector.broadcast %cst_7 : f32 to vector<8x36xf32>
    %20 = arith.mulf %16, %19 : vector<8x36xf32>
    %21 = arith.select %18, %16, %20 : vector<8x36xi1>, vector<8x36xf32>
    %22 = tpu.iota {dimensions = array<i32: 1>} : vector<8x36xi32>
    %c32_i32 = arith.constant 32 : i32
    %23 = arith.muli %arg1, %c32_i32 : i32
    %c2_i32 = arith.constant 2 : i32
    %24 = arith.subi %23, %c2_i32 : i32
    %25 = vector.broadcast %24 : i32 to vector<8x36xi32>
    %26 = arith.addi %22, %25 : vector<8x36xi32>
    %c0_i32_8 = arith.constant 0 : i32
    %27 = vector.broadcast %c0_i32_8 : i32 to vector<8x36xi32>
    %28 = arith.cmpi sge, %26, %27 : vector<8x36xi32>
    %c32_i32_9 = arith.constant 32 : i32
    %29 = vector.broadcast %c32_i32_9 : i32 to vector<8x36xi32>
    %30 = arith.cmpi slt, %26, %29 : vector<8x36xi32>
    %31 = arith.andi %28, %30 : vector<8x36xi1>
    %cst_10 = arith.constant 0.000000e+00 : f32
    %32 = vector.broadcast %cst_10 : f32 to vector<8x36xf32>
    %33 = arith.select %31, %21, %32 : vector<8x36xi1>, vector<8x36xf32>
    %34 = arith.truncf %33 : vector<8x36xf32> to vector<8x36xbf16>
    %35 = vector.extract_strided_slice %34 {offsets = [0, 0], sizes = [8, 32], strides = [1, 1]} : vector<8x36xbf16> to vector<8x32xbf16>
    %36 = vector.extract_strided_slice %34 {offsets = [0, 1], sizes = [8, 32], strides = [1, 1]} : vector<8x36xbf16> to vector<8x32xbf16>
    %37 = vector.extract_strided_slice %34 {offsets = [0, 2], sizes = [8, 32], strides = [1, 1]} : vector<8x36xbf16> to vector<8x32xbf16>
    %38 = vector.extract_strided_slice %34 {offsets = [0, 3], sizes = [8, 32], strides = [1, 1]} : vector<8x36xbf16> to vector<8x32xbf16>
    %39 = vector.extract_strided_slice %34 {offsets = [0, 4], sizes = [8, 32], strides = [1, 1]} : vector<8x36xbf16> to vector<8x32xbf16>
    %40 = tpu.concatenate %35, %36, %37, %38, %39 in 0 : vector<8x32xbf16>, vector<8x32xbf16>, vector<8x32xbf16>, vector<8x32xbf16>, vector<8x32xbf16> -> vector<40x32xbf16>
    %c0_11 = arith.constant 0 : index
    %c0_12 = arith.constant 0 : index
    %41 = vector.load %arg5[%c0_11, %c0_12] : memref<8x40xbf16, #tpu.memory_space<vmem>>, vector<8x40xbf16>
    %cst_13 = arith.constant dense<0.000000e+00> : vector<8x32xf32>
    %42 = tpu.matmul %41, %40, %cst_13 {dimension_numbers = #tpu.dot_dimension_numbers<[1], [0], [0], [1], [0, 0, 1, 1], [], []>} : vector<8x40xbf16>, vector<40x32xbf16>, vector<8x32xf32> -> vector<8x32xf32>
    %c0_14 = arith.constant 0 : index
    %c0_15 = arith.constant 0 : index
    %43 = vector.load %arg6[%c0_14, %c0_15] : memref<8x1xf32, #tpu.memory_space<vmem>>, vector<8x1xf32>
    %44 = vector.broadcast %43 : vector<8x1xf32> to vector<8x32xf32>
    %45 = arith.addf %42, %44 : vector<8x32xf32>
    %c0_16 = arith.constant 0 : index
    %c0_17 = arith.constant 0 : index
    %c0_18 = arith.constant 0 : index
    %46 = vector.load %arg7[%c0_16, %c0_17, %c0_18] : memref<1x8x32xf32, #tpu.memory_space<vmem>>, vector<1x8x32xf32>
    %47 = vector.shape_cast %46 : vector<1x8x32xf32> to vector<8x32xf32>
    %48 = arith.addf %45, %47 : vector<8x32xf32>
    %c0_19 = arith.constant 0 : index
    %c0_20 = arith.constant 0 : index
    %c0_21 = arith.constant 0 : index
    %49 = vector.load %arg8[%c0_19, %c0_20, %c0_21] : memref<1x8x32xf32, #tpu.memory_space<vmem>>, vector<1x8x32xf32>
    %50 = vector.shape_cast %49 : vector<1x8x32xf32> to vector<8x32xf32>
    %51 = vector.shape_cast %48 : vector<8x32xf32> to vector<1x8x32xf32>
    tpu.vector_store %arg8[%c0_19, %c0_20, %c0_21], %51 {strides = array<i32>} : memref<1x8x32xf32, #tpu.memory_space<vmem>>, vector<1x8x32xf32>,
    return
  }
  func.func @transform_0(%arg0: i32, %arg1: i32) -> (i32, i32, i32) {
    %c0_i32 = arith.constant 0 : i32
    %c0_i32_0 = arith.constant 0 : i32
    %c0_i32_1 = arith.constant 0 : i32
    return %arg0, %c0_i32, %c0_i32_0 : i32, i32, i32
  }
  func.func @transform_1(%arg0: i32, %arg1: i32) -> (i32, i32) {
    %c0_i32 = arith.constant 0 : i32
    %c0_i32_0 = arith.constant 0 : i32
    %c0_i32_1 = arith.constant 0 : i32
    return %c0_i32, %c0_i32_0 : i32, i32
  }
  func.func @transform_2(%arg0: i32, %arg1: i32) -> (i32, i32) {
    %c0_i32 = arith.constant 0 : i32
    %c0_i32_0 = arith.constant 0 : i32
    %c0_i32_1 = arith.constant 0 : i32
    return %c0_i32, %c0_i32_0 : i32, i32
  }
  func.func @transform_3(%arg0: i32, %arg1: i32) -> (i32, i32) {
    %c0_i32 = arith.constant 0 : i32
    %c0_i32_0 = arith.constant 0 : i32
    %c0_i32_1 = arith.constant 0 : i32
    return %c0_i32, %c0_i32_0 : i32, i32
  }
  func.func @transform_4(%arg0: i32, %arg1: i32) -> (i32, i32) {
    %c0_i32 = arith.constant 0 : i32
    %c0_i32_0 = arith.constant 0 : i32
    %c0_i32_1 = arith.constant 0 : i32
    return %c0_i32, %c0_i32_0 : i32, i32
  }
  func.func @transform_5(%arg0: i32, %arg1: i32) -> (i32, i32, i32) {
    %c0_i32 = arith.constant 0 : i32
    %c0_i32_0 = arith.constant 0 : i32
    return %arg0, %c0_i32, %arg1 : i32, i32, i32
  }
  func.func @transform_6(%arg0: i32, %arg1: i32) -> (i32, i32, i32) {
    %c0_i32 = arith.constant 0 : i32
    %c0_i32_0 = arith.constant 0 : i32
    return %arg0, %c0_i32, %arg1 : i32, i32, i32
  }
}

module attributes {stable_mosaic.version = 11 : i64} {
  func.func @_conv_kernel(%arg0: i32, %arg1: i32, %arg2: memref<1x8x32xf32, #tpu.memory_space<vmem>>, %arg3: memref<8x40xbf16, #tpu.memory_space<vmem>>, %arg4: memref<8x1xf32, #tpu.memory_space<vmem>>, %arg5: memref<8x40xbf16, #tpu.memory_space<vmem>>, %arg6: memref<8x1xf32, #tpu.memory_space<vmem>>, %arg7: memref<1x8x32xf32, #tpu.memory_space<vmem>>, %arg8: memref<1x8x32xf32, #tpu.memory_space<vmem>>, %arg9: memref<1x8x48xbf16, #tpu.memory_space<vmem>>) attributes {dimension_semantics = [#tpu.dimension_semantics<parallel>, #tpu.dimension_semantics<arbitrary>], iteration_bounds = array<i64: 2, 1>, scalar_prefetch = 0 : i64, scratch_operands = 1 : i64, tpu.core_type = #tpu.core_type<tc>, window_params = [{transform_indices = @transform_0, window_bounds = array<i64: 1, 8, 32>}, {pipeline_mode = #tpu.pipeline_mode<synchronous>, transform_indices = @transform_1, window_bounds = array<i64: 8, 40>}, {pipeline_mode = #tpu.pipeline_mode<synchronous>, transform_indices = @transform_2, window_bounds = array<i64: 8, 1>}, {pipeline_mode = #tpu.pipeline_mode<synchronous>, transform_indices = @transform_3, window_bounds = array<i64: 8, 40>}, {pipeline_mode = #tpu.pipeline_mode<synchronous>, transform_indices = @transform_4, window_bounds = array<i64: 8, 1>}, {transform_indices = @transform_5, window_bounds = array<i64: 1, 8, 32>}, {transform_indices = @transform_6, window_bounds = array<i64: 1, 8, 32>}]} {
    %c0_i32 = arith.constant 0 : i32
    %0 = arith.cmpi eq, %arg1, %c0_i32 : i32
    %1 = arith.extui %0 : i1 to i32
    %c0_i32_0 = arith.constant 0 : i32
    %2 = arith.cmpi ne, %1, %c0_i32_0 : i32
    scf.if %2 {
      %cst_22 = arith.constant 0.000000e+00 : bf16
      %52 = vector.broadcast %cst_22 : bf16 to vector<8x8xbf16>
      %c0_23 = arith.constant 0 : index
      %c0_24 = arith.constant 0 : index
      %c0_25 = arith.constant 0 : index
      %53 = vector.load %arg2[%c0_23, %c0_24, %c0_25] : memref<1x8x32xf32, #tpu.memory_space<vmem>>, vector<1x8x32xf32>
      %54 = vector.shape_cast %53 : vector<1x8x32xf32> to vector<8x32xf32>
      %cst_26 = arith.constant 0.000000e+00 : f32
      %55 = vector.broadcast %cst_26 : f32 to vector<8x32xf32>
      %56 = arith.cmpf ogt, %54, %55 : vector<8x32xf32>
      %cst_27 = arith.constant 1.000000e-01 : f32
      %57 = vector.broadcast %cst_27 : f32 to vector<8x32xf32>
      %58 = arith.mulf %54, %57 : vector<8x32xf32>
      %59 = arith.select %56, %54, %58 : vector<8x32xi1>, vector<8x32xf32>
      %60 = arith.truncf %59 : vector<8x32xf32> to vector<8x32xbf16>
      %cst_28 = arith.constant 0.000000e+00 : bf16
      %61 = vector.broadcast %cst_28 : bf16 to vector<8x8xbf16>
      %62 = tpu.concatenate %52, %60, %61 in 1 : vector<8x8xbf16>, vector<8x32xbf16>, vector<8x8xbf16> -> vector<8x48xbf16>
      %c0_29 = arith.constant 0 : index
      %c0_30 = arith.constant 0 : index
      %c0_31 = arith.constant 0 : index
      %63 = vector.load %arg9[%c0_29, %c0_30, %c0_31] : memref<1x8x48xbf16, #tpu.memory_space<vmem>>, vector<1x8x48xbf16>
      %64 = vector.shape_cast %63 : vector<1x8x48xbf16> to vector<8x48xbf16>
      %65 = vector.shape_cast %62 : vector<8x48xbf16> to vector<1x8x48xbf16>
      tpu.vector_store %arg9[%c0_29, %c0_30, %c0_31], %65 {strides = array<i32>} : memref<1x8x48xbf16, #tpu.memory_space<vmem>>, vector<1x8x48xbf16>,
    } else {
    }
    %3 = arith.index_cast %arg1 : i32 to index
    %c0 = arith.constant 0 : index
    %c0_1 = arith.constant 0 : index
    %4 = vector.load %arg9[%3, %c0, %c0_1] : memref<1x8x48xbf16, #tpu.memory_space<vmem>>, vector<1x8x48xbf16>
    %5 = vector.shape_cast %4 : vector<1x8x48xbf16> to vector<8x48xbf16>
    %6 = vector.extract_strided_slice %5 {offsets = [0, 0], sizes = [8, 36], strides = [1, 1]} : vector<8x48xbf16> to vector<8x36xbf16>
    %7 = vector.extract_strided_slice %5 {offsets = [0, 3], sizes = [8, 36], strides = [1, 1]} : vector<8x48xbf16> to vector<8x36xbf16>
    %8 = vector.extract_strided_slice %5 {offsets = [0, 6], sizes = [8, 36], strides = [1, 1]} : vector<8x48xbf16> to vector<8x36xbf16>
    %9 = vector.extract_strided_slice %5 {offsets = [0, 9], sizes = [8, 36], strides = [1, 1]} : vector<8x48xbf16> to vector<8x36xbf16>
    %10 = vector.extract_strided_slice %5 {offsets = [0, 12], sizes = [8, 36], strides = [1, 1]} : vector<8x48xbf16> to vector<8x36xbf16>
    %11 = tpu.concatenate %6, %7, %8, %9, %10 in 0 : vector<8x36xbf16>, vector<8x36xbf16>, vector<8x36xbf16>, vector<8x36xbf16>, vector<8x36xbf16> -> vector<40x36xbf16>
    %c0_2 = arith.constant 0 : index
    %c0_3 = arith.constant 0 : index
    %12 = vector.load %arg3[%c0_2, %c0_3] : memref<8x40xbf16, #tpu.memory_space<vmem>>, vector<8x40xbf16>
    %cst = arith.constant dense<0.000000e+00> : vector<8x36xf32>
    %13 = tpu.matmul %12, %11, %cst {dimension_numbers = #tpu.dot_dimension_numbers<[1], [0], [0], [1], [0, 0, 1, 1], [], []>} : vector<8x40xbf16>, vector<40x36xbf16>, vector<8x36xf32> -> vector<8x36xf32>
    %c0_4 = arith.constant 0 : index
    %c0_5 = arith.constant 0 : index
    %14 = vector.load %arg4[%c0_4, %c0_5] : memref<8x1xf32, #tpu.memory_space<vmem>>, vector<8x1xf32>
    %15 = vector.broadcast %14 : vector<8x1xf32> to vector<8x36xf32>
    %16 = arith.addf %13, %15 : vector<8x36xf32>
    %cst_6 = arith.constant 0.000000e+00 : f32
    %17 = vector.broadcast %cst_6 : f32 to vector<8x36xf32>
    %18 = arith.cmpf ogt, %16, %17 : vector<8x36xf32>
    %cst_7 = arith.constant 1.000000e-01 : f32
    %19 = vector.broadcast %cst_7 : f32 to vector<8x36xf32>
    %20 = arith.mulf %16, %19 : vector<8x36xf32>
    %21 = arith.select %18, %16, %20 : vector<8x36xi1>, vector<8x36xf32>
    %22 = tpu.iota {dimensions = array<i32: 1>} : vector<8x36xi32>
    %c32_i32 = arith.constant 32 : i32
    %23 = arith.muli %arg1, %c32_i32 : i32
    %c2_i32 = arith.constant 2 : i32
    %24 = arith.subi %23, %c2_i32 : i32
    %25 = vector.broadcast %24 : i32 to vector<8x36xi32>
    %26 = arith.addi %22, %25 : vector<8x36xi32>
    %c0_i32_8 = arith.constant 0 : i32
    %27 = vector.broadcast %c0_i32_8 : i32 to vector<8x36xi32>
    %28 = arith.cmpi sge, %26, %27 : vector<8x36xi32>
    %c32_i32_9 = arith.constant 32 : i32
    %29 = vector.broadcast %c32_i32_9 : i32 to vector<8x36xi32>
    %30 = arith.cmpi slt, %26, %29 : vector<8x36xi32>
    %31 = arith.andi %28, %30 : vector<8x36xi1>
    %cst_10 = arith.constant 0.000000e+00 : f32
    %32 = vector.broadcast %cst_10 : f32 to vector<8x36xf32>
    %33 = arith.select %31, %21, %32 : vector<8x36xi1>, vector<8x36xf32>
    %34 = arith.truncf %33 : vector<8x36xf32> to vector<8x36xbf16>
    %35 = vector.extract_strided_slice %34 {offsets = [0, 0], sizes = [8, 32], strides = [1, 1]} : vector<8x36xbf16> to vector<8x32xbf16>
    %36 = vector.extract_strided_slice %34 {offsets = [0, 1], sizes = [8, 32], strides = [1, 1]} : vector<8x36xbf16> to vector<8x32xbf16>
    %37 = vector.extract_strided_slice %34 {offsets = [0, 2], sizes = [8, 32], strides = [1, 1]} : vector<8x36xbf16> to vector<8x32xbf16>
    %38 = vector.extract_strided_slice %34 {offsets = [0, 3], sizes = [8, 32], strides = [1, 1]} : vector<8x36xbf16> to vector<8x32xbf16>
    %39 = vector.extract_strided_slice %34 {offsets = [0, 4], sizes = [8, 32], strides = [1, 1]} : vector<8x36xbf16> to vector<8x32xbf16>
    %40 = tpu.concatenate %35, %36, %37, %38, %39 in 0 : vector<8x32xbf16>, vector<8x32xbf16>, vector<8x32xbf16>, vector<8x32xbf16>, vector<8x32xbf16> -> vector<40x32xbf16>
    %c0_11 = arith.constant 0 : index
    %c0_12 = arith.constant 0 : index
    %41 = vector.load %arg5[%c0_11, %c0_12] : memref<8x40xbf16, #tpu.memory_space<vmem>>, vector<8x40xbf16>
    %cst_13 = arith.constant dense<0.000000e+00> : vector<8x32xf32>
    %42 = tpu.matmul %41, %40, %cst_13 {dimension_numbers = #tpu.dot_dimension_numbers<[1], [0], [0], [1], [0, 0, 1, 1], [], []>} : vector<8x40xbf16>, vector<40x32xbf16>, vector<8x32xf32> -> vector<8x32xf32>
    %c0_14 = arith.constant 0 : index
    %c0_15 = arith.constant 0 : index
    %43 = vector.load %arg6[%c0_14, %c0_15] : memref<8x1xf32, #tpu.memory_space<vmem>>, vector<8x1xf32>
    %44 = vector.broadcast %43 : vector<8x1xf32> to vector<8x32xf32>
    %45 = arith.addf %42, %44 : vector<8x32xf32>
    %c0_16 = arith.constant 0 : index
    %c0_17 = arith.constant 0 : index
    %c0_18 = arith.constant 0 : index
    %46 = vector.load %arg7[%c0_16, %c0_17, %c0_18] : memref<1x8x32xf32, #tpu.memory_space<vmem>>, vector<1x8x32xf32>
    %47 = vector.shape_cast %46 : vector<1x8x32xf32> to vector<8x32xf32>
    %48 = arith.addf %45, %47 : vector<8x32xf32>
    %c0_19 = arith.constant 0 : index
    %c0_20 = arith.constant 0 : index
    %c0_21 = arith.constant 0 : index
    %49 = vector.load %arg8[%c0_19, %c0_20, %c0_21] : memref<1x8x32xf32, #tpu.memory_space<vmem>>, vector<1x8x32xf32>
    %50 = vector.shape_cast %49 : vector<1x8x32xf32> to vector<8x32xf32>
    %51 = vector.shape_cast %48 : vector<8x32xf32> to vector<1x8x32xf32>
    tpu.vector_store %arg8[%c0_19, %c0_20, %c0_21], %51 {strides = array<i32>} : memref<1x8x32xf32, #tpu.memory_space<vmem>>, vector<1x8x32xf32>,
    return
  }
  func.func @transform_0(%arg0: i32, %arg1: i32) -> (i32, i32, i32) {
    %c0_i32 = arith.constant 0 : i32
    %c0_i32_0 = arith.constant 0 : i32
    %c0_i32_1 = arith.constant 0 : i32
    return %arg0, %c0_i32, %c0_i32_0 : i32, i32, i32
  }
  func.func @transform_1(%arg0: i32, %arg1: i32) -> (i32, i32) {
    %c0_i32 = arith.constant 0 : i32
    %c0_i32_0 = arith.constant 0 : i32
    %c0_i32_1 = arith.constant 0 : i32
    return %c0_i32, %c0_i32_0 : i32, i32
  }
  func.func @transform_2(%arg0: i32, %arg1: i32) -> (i32, i32) {
    %c0_i32 = arith.constant 0 : i32
    %c0_i32_0 = arith.constant 0 : i32
    %c0_i32_1 = arith.constant 0 : i32
    return %c0_i32, %c0_i32_0 : i32, i32
  }
  func.func @transform_3(%arg0: i32, %arg1: i32) -> (i32, i32) {
    %c0_i32 = arith.constant 0 : i32
    %c0_i32_0 = arith.constant 0 : i32
    %c0_i32_1 = arith.constant 0 : i32
    return %c0_i32, %c0_i32_0 : i32, i32
  }
  func.func @transform_4(%arg0: i32, %arg1: i32) -> (i32, i32) {
    %c0_i32 = arith.constant 0 : i32
    %c0_i32_0 = arith.constant 0 : i32
    %c0_i32_1 = arith.constant 0 : i32
    return %c0_i32, %c0_i32_0 : i32, i32
  }
  func.func @transform_5(%arg0: i32, %arg1: i32) -> (i32, i32, i32) {
    %c0_i32 = arith.constant 0 : i32
    %c0_i32_0 = arith.constant 0 : i32
    return %arg0, %c0_i32, %arg1 : i32, i32, i32
  }
  func.func @transform_6(%arg0: i32, %arg1: i32) -> (i32, i32, i32) {
    %c0_i32 = arith.constant 0 : i32
    %c0_i32_0 = arith.constant 0 : i32
    return %arg0, %c0_i32, %arg1 : i32, i32, i32
  }
}

module attributes {stable_mosaic.version = 11 : i64} {
  func.func @_conv_kernel(%arg0: i32, %arg1: i32, %arg2: memref<1x8x32xf32, #tpu.memory_space<vmem>>, %arg3: memref<8x40xbf16, #tpu.memory_space<vmem>>, %arg4: memref<8x1xf32, #tpu.memory_space<vmem>>, %arg5: memref<8x40xbf16, #tpu.memory_space<vmem>>, %arg6: memref<8x1xf32, #tpu.memory_space<vmem>>, %arg7: memref<1x8x32xf32, #tpu.memory_space<vmem>>, %arg8: memref<1x8x32xf32, #tpu.memory_space<vmem>>, %arg9: memref<1x8x32xbf16, #tpu.memory_space<vmem>>, %arg10: memref<1x8x56xbf16, #tpu.memory_space<vmem>>) attributes {dimension_semantics = [#tpu.dimension_semantics<parallel>, #tpu.dimension_semantics<arbitrary>], iteration_bounds = array<i64: 2, 1>, scalar_prefetch = 0 : i64, scratch_operands = 1 : i64, tpu.core_type = #tpu.core_type<tc>, window_params = [{transform_indices = @transform_0, window_bounds = array<i64: 1, 8, 32>}, {pipeline_mode = #tpu.pipeline_mode<synchronous>, transform_indices = @transform_1, window_bounds = array<i64: 8, 40>}, {pipeline_mode = #tpu.pipeline_mode<synchronous>, transform_indices = @transform_2, window_bounds = array<i64: 8, 1>}, {pipeline_mode = #tpu.pipeline_mode<synchronous>, transform_indices = @transform_3, window_bounds = array<i64: 8, 40>}, {pipeline_mode = #tpu.pipeline_mode<synchronous>, transform_indices = @transform_4, window_bounds = array<i64: 8, 1>}, {transform_indices = @transform_5, window_bounds = array<i64: 1, 8, 32>}, {transform_indices = @transform_6, window_bounds = array<i64: 1, 8, 32>}, {transform_indices = @transform_7, window_bounds = array<i64: 1, 8, 32>}]} {
    %c0_i32 = arith.constant 0 : i32
    %0 = arith.cmpi eq, %arg1, %c0_i32 : i32
    %1 = arith.extui %0 : i1 to i32
    %c0_i32_0 = arith.constant 0 : i32
    %2 = arith.cmpi ne, %1, %c0_i32_0 : i32
    scf.if %2 {
      %cst_28 = arith.constant 0.000000e+00 : bf16
      %63 = vector.broadcast %cst_28 : bf16 to vector<8x12xbf16>
      %c0_29 = arith.constant 0 : index
      %c0_30 = arith.constant 0 : index
      %c0_31 = arith.constant 0 : index
      %64 = vector.load %arg2[%c0_29, %c0_30, %c0_31] : memref<1x8x32xf32, #tpu.memory_space<vmem>>, vector<1x8x32xf32>
      %65 = vector.shape_cast %64 : vector<1x8x32xf32> to vector<8x32xf32>
      %cst_32 = arith.constant 0.000000e+00 : f32
      %66 = vector.broadcast %cst_32 : f32 to vector<8x32xf32>
      %67 = arith.cmpf ogt, %65, %66 : vector<8x32xf32>
      %cst_33 = arith.constant 1.000000e-01 : f32
      %68 = vector.broadcast %cst_33 : f32 to vector<8x32xf32>
      %69 = arith.mulf %65, %68 : vector<8x32xf32>
      %70 = arith.select %67, %65, %69 : vector<8x32xi1>, vector<8x32xf32>
      %71 = arith.truncf %70 : vector<8x32xf32> to vector<8x32xbf16>
      %cst_34 = arith.constant 0.000000e+00 : bf16
      %72 = vector.broadcast %cst_34 : bf16 to vector<8x12xbf16>
      %73 = tpu.concatenate %63, %71, %72 in 1 : vector<8x12xbf16>, vector<8x32xbf16>, vector<8x12xbf16> -> vector<8x56xbf16>
      %c0_35 = arith.constant 0 : index
      %c0_36 = arith.constant 0 : index
      %c0_37 = arith.constant 0 : index
      %74 = vector.load %arg10[%c0_35, %c0_36, %c0_37] : memref<1x8x56xbf16, #tpu.memory_space<vmem>>, vector<1x8x56xbf16>
      %75 = vector.shape_cast %74 : vector<1x8x56xbf16> to vector<8x56xbf16>
      %76 = vector.shape_cast %73 : vector<8x56xbf16> to vector<1x8x56xbf16>
      tpu.vector_store %arg10[%c0_35, %c0_36, %c0_37], %76 {strides = array<i32>} : memref<1x8x56xbf16, #tpu.memory_space<vmem>>, vector<1x8x56xbf16>,
    } else {
    }
    %3 = arith.index_cast %arg1 : i32 to index
    %c0 = arith.constant 0 : index
    %c0_1 = arith.constant 0 : index
    %4 = vector.load %arg10[%3, %c0, %c0_1] : memref<1x8x56xbf16, #tpu.memory_space<vmem>>, vector<1x8x56xbf16>
    %5 = vector.shape_cast %4 : vector<1x8x56xbf16> to vector<8x56xbf16>
    %6 = vector.extract_strided_slice %5 {offsets = [0, 0], sizes = [8, 36], strides = [1, 1]} : vector<8x56xbf16> to vector<8x36xbf16>
    %7 = vector.extract_strided_slice %5 {offsets = [0, 5], sizes = [8, 36], strides = [1, 1]} : vector<8x56xbf16> to vector<8x36xbf16>
    %8 = vector.extract_strided_slice %5 {offsets = [0, 10], sizes = [8, 36], strides = [1, 1]} : vector<8x56xbf16> to vector<8x36xbf16>
    %9 = vector.extract_strided_slice %5 {offsets = [0, 15], sizes = [8, 36], strides = [1, 1]} : vector<8x56xbf16> to vector<8x36xbf16>
    %10 = vector.extract_strided_slice %5 {offsets = [0, 20], sizes = [8, 36], strides = [1, 1]} : vector<8x56xbf16> to vector<8x36xbf16>
    %11 = tpu.concatenate %6, %7, %8, %9, %10 in 0 : vector<8x36xbf16>, vector<8x36xbf16>, vector<8x36xbf16>, vector<8x36xbf16>, vector<8x36xbf16> -> vector<40x36xbf16>
    %c0_2 = arith.constant 0 : index
    %c0_3 = arith.constant 0 : index
    %12 = vector.load %arg3[%c0_2, %c0_3] : memref<8x40xbf16, #tpu.memory_space<vmem>>, vector<8x40xbf16>
    %cst = arith.constant dense<0.000000e+00> : vector<8x36xf32>
    %13 = tpu.matmul %12, %11, %cst {dimension_numbers = #tpu.dot_dimension_numbers<[1], [0], [0], [1], [0, 0, 1, 1], [], []>} : vector<8x40xbf16>, vector<40x36xbf16>, vector<8x36xf32> -> vector<8x36xf32>
    %c0_4 = arith.constant 0 : index
    %c0_5 = arith.constant 0 : index
    %14 = vector.load %arg4[%c0_4, %c0_5] : memref<8x1xf32, #tpu.memory_space<vmem>>, vector<8x1xf32>
    %15 = vector.broadcast %14 : vector<8x1xf32> to vector<8x36xf32>
    %16 = arith.addf %13, %15 : vector<8x36xf32>
    %cst_6 = arith.constant 0.000000e+00 : f32
    %17 = vector.broadcast %cst_6 : f32 to vector<8x36xf32>
    %18 = arith.cmpf ogt, %16, %17 : vector<8x36xf32>
    %cst_7 = arith.constant 1.000000e-01 : f32
    %19 = vector.broadcast %cst_7 : f32 to vector<8x36xf32>
    %20 = arith.mulf %16, %19 : vector<8x36xf32>
    %21 = arith.select %18, %16, %20 : vector<8x36xi1>, vector<8x36xf32>
    %22 = tpu.iota {dimensions = array<i32: 1>} : vector<8x36xi32>
    %c32_i32 = arith.constant 32 : i32
    %23 = arith.muli %arg1, %c32_i32 : i32
    %c2_i32 = arith.constant 2 : i32
    %24 = arith.subi %23, %c2_i32 : i32
    %25 = vector.broadcast %24 : i32 to vector<8x36xi32>
    %26 = arith.addi %22, %25 : vector<8x36xi32>
    %c0_i32_8 = arith.constant 0 : i32
    %27 = vector.broadcast %c0_i32_8 : i32 to vector<8x36xi32>
    %28 = arith.cmpi sge, %26, %27 : vector<8x36xi32>
    %c32_i32_9 = arith.constant 32 : i32
    %29 = vector.broadcast %c32_i32_9 : i32 to vector<8x36xi32>
    %30 = arith.cmpi slt, %26, %29 : vector<8x36xi32>
    %31 = arith.andi %28, %30 : vector<8x36xi1>
    %cst_10 = arith.constant 0.000000e+00 : f32
    %32 = vector.broadcast %cst_10 : f32 to vector<8x36xf32>
    %33 = arith.select %31, %21, %32 : vector<8x36xi1>, vector<8x36xf32>
    %34 = arith.truncf %33 : vector<8x36xf32> to vector<8x36xbf16>
    %35 = vector.extract_strided_slice %34 {offsets = [0, 0], sizes = [8, 32], strides = [1, 1]} : vector<8x36xbf16> to vector<8x32xbf16>
    %36 = vector.extract_strided_slice %34 {offsets = [0, 1], sizes = [8, 32], strides = [1, 1]} : vector<8x36xbf16> to vector<8x32xbf16>
    %37 = vector.extract_strided_slice %34 {offsets = [0, 2], sizes = [8, 32], strides = [1, 1]} : vector<8x36xbf16> to vector<8x32xbf16>
    %38 = vector.extract_strided_slice %34 {offsets = [0, 3], sizes = [8, 32], strides = [1, 1]} : vector<8x36xbf16> to vector<8x32xbf16>
    %39 = vector.extract_strided_slice %34 {offsets = [0, 4], sizes = [8, 32], strides = [1, 1]} : vector<8x36xbf16> to vector<8x32xbf16>
    %40 = tpu.concatenate %35, %36, %37, %38, %39 in 0 : vector<8x32xbf16>, vector<8x32xbf16>, vector<8x32xbf16>, vector<8x32xbf16>, vector<8x32xbf16> -> vector<40x32xbf16>
    %c0_11 = arith.constant 0 : index
    %c0_12 = arith.constant 0 : index
    %41 = vector.load %arg5[%c0_11, %c0_12] : memref<8x40xbf16, #tpu.memory_space<vmem>>, vector<8x40xbf16>
    %cst_13 = arith.constant dense<0.000000e+00> : vector<8x32xf32>
    %42 = tpu.matmul %41, %40, %cst_13 {dimension_numbers = #tpu.dot_dimension_numbers<[1], [0], [0], [1], [0, 0, 1, 1], [], []>} : vector<8x40xbf16>, vector<40x32xbf16>, vector<8x32xf32> -> vector<8x32xf32>
    %c0_14 = arith.constant 0 : index
    %c0_15 = arith.constant 0 : index
    %43 = vector.load %arg6[%c0_14, %c0_15] : memref<8x1xf32, #tpu.memory_space<vmem>>, vector<8x1xf32>
    %44 = vector.broadcast %43 : vector<8x1xf32> to vector<8x32xf32>
    %45 = arith.addf %42, %44 : vector<8x32xf32>
    %c0_16 = arith.constant 0 : index
    %c0_17 = arith.constant 0 : index
    %c0_18 = arith.constant 0 : index
    %46 = vector.load %arg7[%c0_16, %c0_17, %c0_18] : memref<1x8x32xf32, #tpu.memory_space<vmem>>, vector<1x8x32xf32>
    %47 = vector.shape_cast %46 : vector<1x8x32xf32> to vector<8x32xf32>
    %48 = arith.addf %45, %47 : vector<8x32xf32>
    %c0_19 = arith.constant 0 : index
    %c0_20 = arith.constant 0 : index
    %c0_21 = arith.constant 0 : index
    %49 = vector.load %arg8[%c0_19, %c0_20, %c0_21] : memref<1x8x32xf32, #tpu.memory_space<vmem>>, vector<1x8x32xf32>
    %50 = vector.shape_cast %49 : vector<1x8x32xf32> to vector<8x32xf32>
    %51 = arith.addf %48, %50 : vector<8x32xf32>
    %cst_22 = arith.constant 5.000000e-01 : f32
    %52 = vector.broadcast %cst_22 : f32 to vector<8x32xf32>
    %53 = arith.mulf %51, %52 : vector<8x32xf32>
    %cst_23 = arith.constant 0.000000e+00 : f32
    %54 = vector.broadcast %cst_23 : f32 to vector<8x32xf32>
    %55 = arith.cmpf ogt, %53, %54 : vector<8x32xf32>
    %cst_24 = arith.constant 0.00999999977 : f32
    %56 = vector.broadcast %cst_24 : f32 to vector<8x32xf32>
    %57 = arith.mulf %53, %56 : vector<8x32xf32>
    %58 = arith.select %55, %53, %57 : vector<8x32xi1>, vector<8x32xf32>
    %59 = arith.truncf %58 : vector<8x32xf32> to vector<8x32xbf16>
    %c0_25 = arith.constant 0 : index
    %c0_26 = arith.constant 0 : index
    %c0_27 = arith.constant 0 : index
    %60 = vector.load %arg9[%c0_25, %c0_26, %c0_27] : memref<1x8x32xbf16, #tpu.memory_space<vmem>>, vector<1x8x32xbf16>
    %61 = vector.shape_cast %60 : vector<1x8x32xbf16> to vector<8x32xbf16>
    %62 = vector.shape_cast %59 : vector<8x32xbf16> to vector<1x8x32xbf16>
    tpu.vector_store %arg9[%c0_25, %c0_26, %c0_27], %62 {strides = array<i32>} : memref<1x8x32xbf16, #tpu.memory_space<vmem>>, vector<1x8x32xbf16>,
    return
  }
  func.func @transform_0(%arg0: i32, %arg1: i32) -> (i32, i32, i32) {
    %c0_i32 = arith.constant 0 : i32
    %c0_i32_0 = arith.constant 0 : i32
    %c0_i32_1 = arith.constant 0 : i32
    return %arg0, %c0_i32, %c0_i32_0 : i32, i32, i32
  }
  func.func @transform_1(%arg0: i32, %arg1: i32) -> (i32, i32) {
    %c0_i32 = arith.constant 0 : i32
    %c0_i32_0 = arith.constant 0 : i32
    %c0_i32_1 = arith.constant 0 : i32
    return %c0_i32, %c0_i32_0 : i32, i32
  }
  func.func @transform_2(%arg0: i32, %arg1: i32) -> (i32, i32) {
    %c0_i32 = arith.constant 0 : i32
    %c0_i32_0 = arith.constant 0 : i32
    %c0_i32_1 = arith.constant 0 : i32
    return %c0_i32, %c0_i32_0 : i32, i32
  }
  func.func @transform_3(%arg0: i32, %arg1: i32) -> (i32, i32) {
    %c0_i32 = arith.constant 0 : i32
    %c0_i32_0 = arith.constant 0 : i32
    %c0_i32_1 = arith.constant 0 : i32
    return %c0_i32, %c0_i32_0 : i32, i32
  }
  func.func @transform_4(%arg0: i32, %arg1: i32) -> (i32, i32) {
    %c0_i32 = arith.constant 0 : i32
    %c0_i32_0 = arith.constant 0 : i32
    %c0_i32_1 = arith.constant 0 : i32
    return %c0_i32, %c0_i32_0 : i32, i32
  }
  func.func @transform_5(%arg0: i32, %arg1: i32) -> (i32, i32, i32) {
    %c0_i32 = arith.constant 0 : i32
    %c0_i32_0 = arith.constant 0 : i32
    return %arg0, %c0_i32, %arg1 : i32, i32, i32
  }
  func.func @transform_6(%arg0: i32, %arg1: i32) -> (i32, i32, i32) {
    %c0_i32 = arith.constant 0 : i32
    %c0_i32_0 = arith.constant 0 : i32
    return %arg0, %c0_i32, %arg1 : i32, i32, i32
  }
  func.func @transform_7(%arg0: i32, %arg1: i32) -> (i32, i32, i32) {
    %c0_i32 = arith.constant 0 : i32
    %c0_i32_0 = arith.constant 0 : i32
    return %arg0, %c0_i32, %arg1 : i32, i32, i32
  }
}

module attributes {stable_mosaic.version = 11 : i64} {
  func.func @_linear_kernel(%arg0: i32, %arg1: i32, %arg2: memref<16x32xbf16, #tpu.memory_space<vmem>>, %arg3: memref<32x16xbf16, #tpu.memory_space<vmem>>, %arg4: memref<1x16xf32, #tpu.memory_space<vmem>>, %arg5: memref<16x16xf32, #tpu.memory_space<vmem>>, %arg6: memref<16x16xf32, #tpu.memory_space<vmem>>) attributes {dimension_semantics = [#tpu.dimension_semantics<parallel>, #tpu.dimension_semantics<arbitrary>], iteration_bounds = array<i64: 1, 1>, scalar_prefetch = 0 : i64, scratch_operands = 1 : i64, tpu.core_type = #tpu.core_type<tc>, window_params = [{transform_indices = @transform_0, window_bounds = array<i64: 16, 32>}, {transform_indices = @transform_1, window_bounds = array<i64: 32, 16>}, {pipeline_mode = #tpu.pipeline_mode<synchronous>, transform_indices = @transform_2, window_bounds = array<i64: 1, 16>}, {transform_indices = @transform_3, window_bounds = array<i64: 16, 16>}]} {
    %c0_i32 = arith.constant 0 : i32
    %0 = arith.cmpi eq, %arg1, %c0_i32 : i32
    %1 = arith.extui %0 : i1 to i32
    %c0_i32_0 = arith.constant 0 : i32
    %2 = arith.cmpi ne, %1, %c0_i32_0 : i32
    scf.if %2 {
      %cst_10 = arith.constant 0.000000e+00 : f32
      %12 = vector.broadcast %cst_10 : f32 to vector<16x16xf32>
      %c0_11 = arith.constant 0 : index
      %c0_12 = arith.constant 0 : index
      %13 = vector.load %arg6[%c0_11, %c0_12] : memref<16x16xf32, #tpu.memory_space<vmem>>, vector<16x16xf32>
      tpu.vector_store %arg6[%c0_11, %c0_12], %12 {strides = array<i32>} : memref<16x16xf32, #tpu.memory_space<vmem>>, vector<16x16xf32>,
    } else {
    }
    %c0 = arith.constant 0 : index
    %c0_1 = arith.constant 0 : index
    %3 = vector.load %arg6[%c0, %c0_1] : memref<16x16xf32, #tpu.memory_space<vmem>>, vector<16x16xf32>
    %c0_2 = arith.constant 0 : index
    %c0_3 = arith.constant 0 : index
    %4 = vector.load %arg2[%c0_2, %c0_3] : memref<16x32xbf16, #tpu.memory_space<vmem>>, vector<16x32xbf16>
    %c0_4 = arith.constant 0 : index
    %c0_5 = arith.constant 0 : index
    %5 = vector.load %arg3[%c0_4, %c0_5] : memref<32x16xbf16, #tpu.memory_space<vmem>>, vector<32x16xbf16>
    %cst = arith.constant dense<0.000000e+00> : vector<16x16xf32>
    %6 = tpu.matmul %4, %5, %cst {dimension_numbers = #tpu.dot_dimension_numbers<[1], [0], [0], [1], [0, 0, 1, 1], [], []>} : vector<16x32xbf16>, vector<32x16xbf16>, vector<16x16xf32> -> vector<16x16xf32>
    %7 = arith.addf %3, %6 : vector<16x16xf32>
    %c0_6 = arith.constant 0 : index
    %c0_7 = arith.constant 0 : index
    %8 = vector.load %arg6[%c0_6, %c0_7] : memref<16x16xf32, #tpu.memory_space<vmem>>, vector<16x16xf32>
    tpu.vector_store %arg6[%c0_6, %c0_7], %7 {strides = array<i32>} : memref<16x16xf32, #tpu.memory_space<vmem>>, vector<16x16xf32>,
    %c0_i32_8 = arith.constant 0 : i32
    %9 = arith.cmpi eq, %arg1, %c0_i32_8 : i32
    %10 = arith.extui %9 : i1 to i32
    %c0_i32_9 = arith.constant 0 : i32
    %11 = arith.cmpi ne, %10, %c0_i32_9 : i32
    scf.if %11 {
      %c0_10 = arith.constant 0 : index
      %c0_11 = arith.constant 0 : index
      %12 = vector.load %arg6[%c0_10, %c0_11] : memref<16x16xf32, #tpu.memory_space<vmem>>, vector<16x16xf32>
      %c0_12 = arith.constant 0 : index
      %c0_13 = arith.constant 0 : index
      %13 = vector.load %arg4[%c0_12, %c0_13] : memref<1x16xf32, #tpu.memory_space<vmem>>, vector<1x16xf32>
      %14 = vector.broadcast %13 : vector<1x16xf32> to vector<16x16xf32>
      %15 = arith.addf %12, %14 : vector<16x16xf32>
      %c0_14 = arith.constant 0 : index
      %c0_15 = arith.constant 0 : index
      %16 = vector.load %arg5[%c0_14, %c0_15] : memref<16x16xf32, #tpu.memory_space<vmem>>, vector<16x16xf32>
      tpu.vector_store %arg5[%c0_14, %c0_15], %15 {strides = array<i32>} : memref<16x16xf32, #tpu.memory_space<vmem>>, vector<16x16xf32>,
    } else {
    }
    return
  }
  func.func @transform_0(%arg0: i32, %arg1: i32) -> (i32, i32) {
    %c0_i32 = arith.constant 0 : i32
    return %arg0, %arg1 : i32, i32
  }
  func.func @transform_1(%arg0: i32, %arg1: i32) -> (i32, i32) {
    %c0_i32 = arith.constant 0 : i32
    %c0_i32_0 = arith.constant 0 : i32
    return %arg1, %c0_i32 : i32, i32
  }
  func.func @transform_2(%arg0: i32, %arg1: i32) -> (i32, i32) {
    %c0_i32 = arith.constant 0 : i32
    %c0_i32_0 = arith.constant 0 : i32
    %c0_i32_1 = arith.constant 0 : i32
    return %c0_i32, %c0_i32_0 : i32, i32
  }
  func.func @transform_3(%arg0: i32, %arg1: i32) -> (i32, i32) {
    %c0_i32 = arith.constant 0 : i32
    %c0_i32_0 = arith.constant 0 : i32
    return %arg0, %c0_i32 : i32, i32
  }
}

</mosaic_0001>

<bundles_post_ra>
// kernel: tpu_custom_call.1
= control target key start
LH: loop header
LB: loop body
LE: loop exit
PB: predicated region body
PF: predicated region fallthrough
CT: control target
= control target key end

     0   :  { %6 = vsyncpa [#allocation3], 0  ;;  %s501_s0 = inlined_call_operand.hbm [shape: f32[16,128], index: 0, kind: input, shape index: {}]   ;;  %s502_s1 = inlined_call_operand.hbm [shape: f32[8,128], index: 1, kind: output, shape index: {}]  }
   0x1   :  { %7 = vsyncpa [#allocation4], 0  ;;  %s381_s6 = smov 0   ;;  %s383_s7 = smov 0  }
   0x2   :  { %s385_s8 = smov 0   ;;  %s387_s9 = smov 0  }
   0x3   :  { %s389_s10 = smov 0   ;;  %s391_s11 = smov 0  }
   0x4   :  { %s393_s12 = smov 0  }
   0x5 LB: > { %s22_s13 = sadd.s32 1, %s359_s10  ;;  %s25_s14 = sadd.s32 1, %s363_s11  ;;  %s367_s12 = sphi %s393_s12, %s13_s12   ;;  %s363_s11 = sphi %s391_s11, %s517_s11   ;;  %s359_s10 = sphi %s389_s10, %s516_s10   ;;  %s355_s9 = sphi %s387_s9, %s515_s9   ;;  %s351_s8 = sphi %s385_s8, %s514_s8   ;;  %s347_s7 = sphi %s383_s7, %s513_s7   ;;  %s343_s6 = sphi %s381_s6, %s512_s6  }
   0x6   : > { %p23_p0 = scmp.ge.s32.totalorder %s22_s13, 2  ;;  %s175_s15 = sadd.s32 4294967295, %s367_s12  }
   0x7   : > { %p45_p1 = scmp.ne.s32.totalorder %s347_s7, %s343_s6  ;;  %p46_p2 = scmp.eq.s32.totalorder %s175_s15, 0 }
   0x8   : > { %s519_s13 = smov (%p23_p0, %s22_s13), 0  ;;  %s521_s14 = smov (!%p23_p0, %s25_s14), %s363_s11 }
   0x9   : > { %p176_p3 = scmp.ge.s32.totalorder %s367_s12, 1  ;;  %p27_p4 = scmp.ge.s32.totalorder %s521_s14, 2 }
   0xa   : > { %p77_p5 = scmp.lt.s32.totalorder %s367_s12, 5  ;;  %s32_s16 = sadd.s32 1, %s351_s8 }
   0xb   : > { %p421_p6 = por %p46_p2, %p45_p1  ;;  %s523_s14 = smov (%p27_p4, %s521_s14), 0 }
   0xc   : > { %p427_p7 = pnand %p176_p3, %p77_p5  ;;  %s177_s19 = sshll.u32 %s355_s9, 7 }
   0xd   : > { %s506_s17 = scalar_select %p421_p6, 1, 0 }
   0xe   : > { %s507_s18 = scalar_select %p427_p7, 1, 0 }
   0xf   : > { %s29_s20 = ssub.s32 %s363_s11, %s523_s14  ;;  %p189_p9 = pneg %p427_p7 }
  0x10   : > { %p30_p8 = scmp.eq.s32.totalorder %s29_s20, 0  ;;  %s90_s23 = scalar_lea.hbm %s501_s0, %s177_s19 }
  0x11   : > { %s369_s24 = smov [#allocation2]   ;;  %p443_p10 = pnand %p189_p9, %p421_p6 }
  0x12   : > { %s92_s25 = sshll.u32 %s369_s24, 4  ;;  %s253_s28 = scalar_lea.hbm %s90_s23, 128  ;;  %s93_s25 = int_to_ptr.vmem [resolvable:$true] %s92_s25 }
  0x13   : > { %s439_s26 = scalar_select %p30_p8, %s351_s8, %s32_s16  }
  0x14   : > { %p254_p11 = scmp.ne.s32.totalorder %s90_s23, %s253_s28  ;;  %p255_p12 = pneg %p443_p10 }
  0x15   : > { %s258_s2 = scalar_lea.hbm %s501_s0, 256  ;;  %p259_p1 = scmp.lt.s32.totalorder %s90_s23, %s501_s0 }
  0x16   : > { %p256_p13 = pnand %p255_p12, %p254_p11  ;;  %p260_p2 = scmp.lt.s32.totalorder %s258_s2, %s253_s28 }
  0x18   : > { %p257_p0 = pneg %p256_p13  ;;  %p261_p3 = por %p260_p2, %p259_p1 }
  0x1a   : > { %p262_p4 = pnand %p261_p3, %p257_p0 }
  0x1c   : > { %265 = shalt.err (!%p262_p4)
}
  0x1d   : > { %s266_s5 = scalar_lea.vmem %s93_s25, 128  ;;  %p274_p6 = scmp.lt.s32.totalorder %s93_s25, %s93_s25 }
  0x1e   : > { %p267_p5 = scmp.ne.s32.totalorder %s93_s25, %s266_s5  ;;  %p275_p7 = scmp.lt.s32.totalorder %s266_s5, %s266_s5 }
  0x20   : > { %p269_p8 = pnand %p267_p5, %p255_p12  ;;  %p276_p11 = por %p275_p7, %p274_p6 }
  0x22   : > { %p270_p9 = pneg %p269_p8 }
  0x24   : > { %p277_p13 = pnand %p276_p11, %p270_p9 }
  0x26   : > { %280 = shalt.err (!%p277_p13)
}
  0x27   : > { %192 = dma.hbm_to_vmem [thread:$0]  (!%p443_p10), %s90_s23, 128, %s93_s25, [#allocation3]  }
  0x28   : > { %p509_p1 = scmp.ne.s32.totalorder %s507_s18, 0 }
  0x29   : > { %p510_p2 = scmp.ne.s32.totalorder (!%p509_p1), %s506_s17, 0 }
  0x2a   : > { %105 = sbr.rel (%p509_p1) target bundleno = 63 (0x3f), region = 24 }
  0x2f   : > { %334 = dma.done.wait (%p510_p2), [#allocation3], 128  }
  0x30   : > { %336 = vsyncadd (%p510_p2), [#allocation3], 4294967168  ;;  %s370_s6 = smov [#allocation5]   ;;  %v115_v0 = vld [vmem:[#allocation2] sm:$0xff]  ;;  %p465_p6 = scmp.eq.s32.totalorder %s175_s15, 3 }
  0x31   : > { %s125_s9 = sshll.u32 %s370_s6, 4  ;;  %v116_v1 = vadd.f32 1.0, %v115_v0  ;;  %s126_s9 = int_to_ptr.vmem [resolvable:$true] %s125_s9 }
  0x32   : > { %s281_s16 = scalar_lea.vmem %s126_s9, 128  ;;  %p288_p0 = scmp.lt.s32.totalorder %s126_s9, %s126_s9 }
  0x33   : > { %117 = vst [vmem:[#allocation5] sm:$0xff] %v116_v1  ;;  %p282_p7 = scmp.ne.s32.totalorder %s126_s9, %s281_s16  ;;  %p289_p3 = scmp.lt.s32.totalorder %s281_s16, %s281_s16 }
  0x35   : > { %p283_p10 = pnand %p282_p7, %p465_p6  ;;  %p290_p4 = por %p289_p3, %p288_p0 }
  0x37   : > { %p284_p12 = pneg %p283_p10 }
  0x39   : > { %p291_p5 = pnand %p290_p4, %p284_p12 }
  0x3b   : > { %294 = shalt.err (!%p291_p5)
}
  0x3c   : > { %186 = dma.vmem_to_hbm [thread:$0]  (%p465_p6), %s126_s9, 128, %s502_s1, [#allocation4]  }
  0x3d   : > { %338 = dma.done.wait (%p465_p6), [#allocation4], 128  }
  0x3e   : > { %340 = vsyncadd (%p465_p6), [#allocation4], 4294967168 }
  0x3f PF: > { %s13_s12 = sadd.s32 1, %s367_s12   ;;  %s512_s6 = smov %s347_s7 }
  0x40   : > { %p10_p8 = scmp.ge.s32.totalorder %s13_s12, 6   ;;  %s513_s7 = smov %s351_s8 }
  0x41   : > { %s514_s8 = smov %s439_s26  ;;  %s515_s9 = smov %s363_s11 }
  0x42   : > { %s516_s10 = smov %s519_s13  ;;  %s517_s11 = smov %s523_s14 }
  0x43   :  { %12 = sbr.rel (!%p10_p8) target bundleno = 5 (0x5), region = 54 }
  0x48   :  { %138 = vsyncpa [#allocation3], 1 }
  0x49   :  { %140 = vsyncpa [#allocation3 + $0x1], 1 }
  0x4a   :  { %141 = vsyncpa [#allocation4], 1 }
  0x4b   :  { %143 = vsyncpa [#allocation4 + $0x1], 1 }

// kernel: run.16
= control target key start
LH: loop header
LB: loop body
LE: loop exit
PB: predicated region body
PF: predicated region fallthrough
CT: control target
= control target key end

     0   :  { %s549_s12 = smov 0   ;;  %s551_s13 = smov 0   ;;  %s610_s0 = inlined_call_operand.vmem [shape: f32[2,8,8], index: 0, kind: input, shape index: {}]   ;;  %s611_s1 = inlined_call_operand.vmem [shape: bf16[32,24], index: 1, kind: input, shape index: {}]   ;;  %s612_s2 = inlined_call_operand.vmem [shape: f32[32,1], index: 2, kind: input, shape index: {}]   ;;  %s613_s3 = inlined_call_operand.vmem [shape: bf16[2,32,8], index: 3, kind: output, shape index: {}]  }
   0x1   :  { %s553_s14 = smov 0  }
   0x2 LB: > { %s25_s15 = sadd.s32 1, %s519_s13  ;;  %p435_p0 = scmp.ge.s32.totalorder %s523_s14, 1  ;;  %s523_s14 = sphi %s553_s14, %s13_s14   ;;  %s519_s13 = sphi %s551_s13, %s615_s13   ;;  %s515_s12 = sphi %s549_s12, %s614_s12  }
   0x3   : > { %p27_p1 = scmp.ge.s32.totalorder %s25_s15, 2  ;;  %p150_p2 = scmp.lt.s32.totalorder %s523_s14, 3 }
   0x5   : > { %s617_s15 = smov (%p27_p1, %s25_s15), 0  ;;  %p151_p3 = pnand %p435_p0, %p150_p2 }
   0x6   : > { %p176_p4 = scmp.lt.s32.totalorder (!%p151_p3), %s515_s12, 1  ;;  %s525_s20 = smov (!%p151_p3), 1  }
   0x7   : > { %154 = sbr.rel (%p151_p3) target bundleno = 475 (0x1db), region = 32  ;;  %s527_s23 = smov (!%p151_p3), 127  }
   0x8   : > { %s528_s24 = smov (!%p151_p3), 126  }
   0xc   : > { %s619_s12 = smov (!%p176_p4, %s515_s12), 1  ;;  %vm198_vm0 = vcmask 7168   ;;  %vm202_vm1 = vcmask 72704   ;;  %vm205_vm2 = vcmask 76800   ;;  %v499_v5 = vld [vmem:[%s611_s1] sm:$0xff]   ;;  %vm260_vm3 = vcmask 195584  }
   0xd   : > { %s436_s16 = sshll.u32 %s619_s12, 3  ;;  %463 = vmatprep.mubr.msk.bf16.mxu0 %vm260_vm3, %v499_v5  ;;  %v526_v6 = vmov 0   ;;  %v226_v9 = vld [vmem:[%s612_s2] sm:$0xff]  ;;  %v227_v10 = vld [vmem:[%s612_s2 + $0x8] sm:$0xff]  ;;  %v228_v11 = vld [vmem:[%s612_s2 + $0x10] sm:$0xff]  ;;  %vm217_vm4 = vcmask 1043456  }
   0xe   : > { %s179_s19 = scalar_lea.vmem %s610_s0, %s436_s16  ;;  %496 = vset.pattern.permute.xlu1 %v526_v6  ;;  %497 = vset.pattern.permute.xlu0 %v526_v6  ;;  %v229_v12 = vld [vmem:[%s612_s2 + $0x18] sm:$0xff]  ;;  %v500_v17 = vld [vmem:[%s611_s1 + $0x8] sm:$0xff]   ;;  %s450_s8 = sshll.u32 %s619_s12, 4  ;;  %vm347_vm6 = vcmask 60416  }
   0xf   : > { %v193_v0 = vld [vmem:[%s179_s19] sm:$0xff]  ;;  %s187_s11 = scalar_lea.vmem %s613_s3, %s450_s8 }
  0x10   : > { %v194_v1 = vpack.c.bf16 %v193_v0, %v193_v0 }
  0x12   : > { %196 = vrot.lane.b32.xlu0 %v194_v1, %s525_s20 }
  0x84   : > { %v197_v2 = vpop.permute.xlu0 %196 }
  0x85   : > { %v201_v3 = vsel %vm198_vm0, 0, %v197_v2 }
  0x86   : > { %v203_v4 = vsel %vm202_vm1, %v201_v3, 0 }
  0x87   : > { %206 = vst.msk [vmem:[#allocation2] sm:$0xf] %vm205_vm2, %v203_v4 }
  0x8e   : > { %v209_v7 = vld [vmem:[#allocation2] sm:$0xf] }
  0x8f   : > { %v439_v8 = vcombine.low %v209_v7, %v209_v7 }
  0x91   : > { %213 = vrot.lane.b32.xlu1 %v439_v8, %s527_s23  ;;  %215 = vrot.lane.b32.xlu0 %v439_v8, %s528_s24 }
  0x95   : > { %232 = vperm.xlu1 %496, %v226_v9   ;;  %237 = vperm.xlu0 %497, %v227_v10  }
  0x99   : > { %242 = vperm.xlu1 %496, %v228_v11  }
  0x9d   : > { %247 = vperm.xlu1 %496, %v229_v12  }
 0x103   : > { %v214_v13 = vpop.permute.xlu1 %213  ;;  %v216_v14 = vpop.permute.xlu0 %215 }
 0x104   : > { %467 = vmatprep.subr.msk.bf16.mxu0 %vm217_vm4, %v216_v14  ;;  %v268_v15 = vsel %vm217_vm4, %v216_v14, 0  ;;  %v220_v16 = vsel %vm217_vm4, %v209_v7, %v214_v13 }
 0x105   : > { %460 = vmatpush3.bf16.msra.mxu0 %v268_v15 }
 0x106   : > { %461 = vmatprep.subr.bf16.mxu0 %v220_v16 }
 0x109   : > { %462 = vmatpush3.bf16.msra.mxu0 %v220_v16 }
 0x10c   : > { %464 = vmatmul.mubr.msk.bf16.vlgmr.msra.gmra.mxu0 %vm260_vm3, %v500_v17 }
 0x110   : > { %v233_v18 = vpop.permute.xlu1 %232  ;;  %v238_v27 = vpop.permute.xlu0 %237 }
 0x114   : > { %v243_v19 = vpop.permute.xlu1 %242 }
 0x118   : > { %v248_v23 = vpop.permute.xlu1 %247 }
 0x1cc   : > { %v465_v20 = vpop.f32.mrf.mxu0 }
 0x1cd   : > { %v313_v21 = vadd.f32 %v465_v20, %v243_v19 }
 0x1ce   : > { %v304_v22 = vpop.f32.mrf.mxu0 }
 0x1cf   : > { %vm321_vm5 = vcmp.gt.f32.partialorder %v313_v21, 0.0  ;;  %v325_v24 = vmul.f32 0.1, %v313_v21  ;;  %v305_v25 = vadd.f32 %v304_v22, %v233_v18 }
 0x1d0   : > { %v466_v26 = vpop.f32.mrf.mxu0 }
 0x1d1   : > { %v329_v28 = vsel %vm321_vm5, %v313_v21, %v325_v24  ;;  %vm319_vm7 = vcmp.gt.f32.partialorder %v305_v25, 0.0  ;;  %v323_v29 = vmul.f32 0.1, %v305_v25  ;;  %v316_v30 = vadd.f32 %v466_v26, %v248_v23 }
 0x1d2   : > { %v453_v31 = vpack.c.bf16 %v329_v28, %v329_v28  ;;  %v307_v32 = vpop.f32.mrf.mxu0 }
 0x1d3   : > { %v327_v33 = vsel %vm319_vm7, %v305_v25, %v323_v29  ;;  %vm322_vm8 = vcmp.gt.f32.partialorder %v316_v30, 0.0  ;;  %v326_v34 = vmul.f32 0.1, %v316_v30  ;;  %v308_v35 = vadd.f32 %v307_v32, %v238_v27 }
 0x1d4   : > { %350 = vst.msk [vmem:[%s187_s11 + $0x8] sm:$0xf] %vm347_vm6, %v453_v31  ;;  %v451_v36 = vpack.c.bf16 %v327_v33, %v327_v33 }
 0x1d5   : > { %v330_v37 = vsel %vm322_vm8, %v316_v30, %v326_v34  ;;  %vm320_vm9 = vcmp.gt.f32.partialorder %v308_v35, 0.0  ;;  %v324_v38 = vmul.f32 0.1, %v308_v35 }
 0x1d6   : > { %348 = vst.msk [vmem:[%s187_s11] sm:$0xf] %vm347_vm6, %v451_v36  ;;  %v454_v39 = vpack.c.bf16 %v330_v37, %v330_v37 }
 0x1d7   : > { %v328_v40 = vsel %vm320_vm9, %v308_v35, %v324_v38 }
 0x1d8   : > { %351 = vst.msk [vmem:[%s187_s11 + $0xc] sm:$0xf] %vm347_vm6, %v454_v39  ;;  %v452_v41 = vpack.c.bf16 %v328_v40, %v328_v40 }
 0x1da   : > { %349 = vst.msk [vmem:[%s187_s11 + $0x4] sm:$0xf] %vm347_vm6, %v452_v41 }
 0x1db PF: > { %s13_s14 = sadd.s32 1, %s523_s14   ;;  %s614_s12 = smov %s519_s13 }
 0x1dc   : > { %p10_p5 = scmp.ge.s32.totalorder %s13_s14, 4   ;;  %s615_s13 = smov %s617_s15 }
 0x1de   :  { %12 = sbr.rel (!%p10_p5) target bundleno = 2 (0x2), region = 67 }

// kernel: run.17
= control target key start
LH: loop header
LB: loop body
LE: loop exit
PB: predicated region body
PF: predicated region fallthrough
CT: control target
= control target key end

     0   :  { %s584_s12 = smov 0   ;;  %s586_s13 = smov 0   ;;  %s641_s0 = inlined_call_operand.vmem [shape: bf16[2,32,8], index: 0, kind: input, shape index: {}]   ;;  %s642_s1 = inlined_call_operand.vmem [shape: bf16[32,96], index: 1, kind: input, shape index: {}]   ;;  %s643_s2 = inlined_call_operand.vmem [shape: f32[32,1], index: 2, kind: input, shape index: {}]   ;;  %s644_s3 = inlined_call_operand.vmem [shape: f32[2,32,8], index: 3, kind: output, shape index: {}]  }
   0x1   :  { %s588_s14 = smov 0  }
   0x2 LB: > { %s25_s15 = sadd.s32 1, %s554_s13  ;;  %p455_p0 = scmp.ge.s32.totalorder %s558_s14, 1  ;;  %s558_s14 = sphi %s588_s14, %s13_s14   ;;  %s554_s13 = sphi %s586_s13, %s646_s13   ;;  %s550_s12 = sphi %s584_s12, %s645_s12  }
   0x3   : > { %p27_p1 = scmp.ge.s32.totalorder %s25_s15, 2  ;;  %p151_p2 = scmp.lt.s32.totalorder %s558_s14, 3 }
   0x5   : > { %s648_s15 = smov (%p27_p1, %s25_s15), 0  ;;  %p152_p3 = pnand %p455_p0, %p151_p2 }
   0x6   : > { %p178_p4 = scmp.lt.s32.totalorder (!%p152_p3), %s550_s12, 1  ;;  %s560_s20 = smov (!%p152_p3), 1  }
   0x7   : > { %155 = sbr.rel (%p152_p3) target bundleno = 484 (0x1e4), region = 32  ;;  %s561_s21 = smov (!%p152_p3), 126  }
   0x8   : > { %s562_s22 = smov (!%p152_p3), 127  }
   0xc   : > { %s650_s12 = smov (!%p178_p4, %s550_s12), 1  ;;  %vm214_vm0 = vcmask 7168   ;;  %vm220_vm1 = vcmask 72704   ;;  %vm237_vm2 = vcmask 76800   ;;  %v534_v14 = vld [vmem:[%s642_s1] sm:$0xff]   ;;  %vm311_vm3 = vcmask 785408  }
   0xd   : > { %s474_s16 = sshll.u32 %s650_s12, 4  ;;  %496 = vmatprep.mubr.msk.bf16.mxu0 %vm311_vm3, %v534_v14  ;;  %v278_v15 = vld [vmem:[%s643_s2 + $0x8] sm:$0xff]  ;;  %v277_v16 = vld [vmem:[%s643_s2] sm:$0xff]  ;;  %v563_v17 = vmov 0   ;;  %v279_v18 = vld [vmem:[%s643_s2 + $0x10] sm:$0xff]  ;;  %s475_s8 = sshll.u32 %s650_s12, 5 }
   0xe   : > { %s182_s19 = scalar_lea.vmem %s641_s0, %s474_s16  ;;  %529 = vset.pattern.permute.xlu1 %v563_v17  ;;  %528 = vset.pattern.permute.xlu0 %v563_v17  ;;  %v280_v19 = vld [vmem:[%s643_s2 + $0x18] sm:$0xff]  ;;  %v535_v24 = vld [vmem:[%s642_s1 + $0x8] sm:$0xff]   ;;  %s190_s11 = scalar_lea.vmem %s644_s3, %s475_s8  ;;  %vm367_vm4 = vcmask 64512  }
   0xf   : > { %v530_v0 = vld [vmem:[%s182_s19 + $0x8] sm:$0xff]   ;;  %v531_v1 = vld [vmem:[%s182_s19] sm:$0xff]  }
  0x10   : > { %212 = vrot.lane.b32.xlu0 %v530_v0, %s560_s20 }
  0x14   : > { %210 = vrot.lane.b32.xlu0 %v531_v1, %s560_s20 }
  0x82   : > { %v213_v2 = vpop.permute.xlu0 %212 }
  0x83   : > { %v219_v3 = vsel %vm214_vm0, 0, %v213_v2 }
  0x84   : > { %v222_v4 = vsel %vm220_vm1, %v219_v3, 0 }
  0x85   : > { %v464_v5 = vcombine.low %v222_v4, %v222_v4  ;;  %v465_v6 = vcombine.high %v222_v4, %v222_v4 }
  0x86   : > { %v211_v7 = vpop.permute.xlu0 %210 }
  0x87   : > { %240 = vst.msk [vmem:[#allocation2 + $0x8] sm:$0xf] %vm237_vm2, %v464_v5  ;;  %241 = vst.msk [vmem:[#allocation2 + $0xc] sm:$0xf] %vm237_vm2, %v465_v6  ;;  %v217_v8 = vsel %vm214_vm0, 0, %v211_v7 }
  0x88   : > { %v221_v9 = vsel %vm220_vm1, %v217_v8, 0 }
  0x89   : > { %v462_v10 = vcombine.low %v221_v9, %v221_v9  ;;  %v463_v11 = vcombine.high %v221_v9, %v221_v9 }
  0x8b   : > { %238 = vst.msk [vmem:[#allocation2] sm:$0xf] %vm237_vm2, %v462_v10  ;;  %239 = vst.msk [vmem:[#allocation2 + $0x4] sm:$0xf] %vm237_vm2, %v463_v11 }
  0x8e   : > { %v532_v12 = vld [vmem:[#allocation2 + $0x8] sm:$0xff]  }
  0x8f   : > { %269 = vrot.lane.b32.xlu1 %v532_v12, %s561_s21  ;;  %263 = vrot.lane.b32.xlu0 %v532_v12, %s562_s22 }
  0x92   : > { %v533_v13 = vld [vmem:[#allocation2] sm:$0xff]  }
  0x93   : > { %267 = vrot.lane.b32.xlu1 %v533_v13, %s561_s21  ;;  %283 = vperm.xlu0 %528, %v277_v16  }
  0x97   : > { %261 = vrot.lane.b32.xlu1 %v533_v13, %s562_s22  ;;  %298 = vperm.xlu0 %528, %v280_v19  }
  0x9b   : > { %288 = vperm.xlu1 %529, %v278_v15  }
  0x9f   : > { %293 = vperm.xlu1 %529, %v279_v18  }
 0x101   : > { %v270_v20 = vpop.permute.xlu1 %269  ;;  %v264_v22 = vpop.permute.xlu0 %263 }
 0x102   : > { %484 = vmatprep.subr.bf16.mxu0 %v270_v20 }
 0x103   : > { %485 = vmatpush3.bf16.msra.mxu0 %v270_v20 }
 0x105   : > { %v268_v21 = vpop.permute.xlu1 %267 }
 0x106   : > { %486 = vmatprep.subr.bf16.mxu0 %v268_v21 }
 0x107   : > { %487 = vmatpush3.bf16.msra.mxu0 %v268_v21 }
 0x108   : > { %488 = vmatprep.subr.bf16.mxu0 %v264_v22 }
 0x109   : > { %v262_v23 = vpop.permute.xlu1 %261 }
 0x10b   : > { %489 = vmatpush3.bf16.msra.mxu0 %v264_v22 }
 0x10c   : > { %490 = vmatprep.subr.bf16.mxu0 %v262_v23 }
 0x10e   : > { %v284_v26 = vpop.permute.xlu0 %283 }
 0x10f   : > { %491 = vmatpush3.bf16.msra.mxu0 %v262_v23 }
 0x110   : > { %492 = vmatprep.subr.bf16.mxu0 %v532_v12 }
 0x112   : > { %v299_v32 = vpop.permute.xlu0 %298 }
 0x113   : > { %493 = vmatpush3.bf16.msra.mxu0 %v532_v12 }
 0x114   : > { %494 = vmatprep.subr.bf16.mxu0 %v533_v13 }
 0x116   : > { %v289_v25 = vpop.permute.xlu1 %288 }
 0x117   : > { %495 = vmatpush3.bf16.msra.mxu0 %v533_v13 }
 0x11a   : > { %497 = vmatmul.mubr.msk.bf16.vlgmr.msra.gmra.mxu0 %vm311_vm3, %v535_v24  ;;  %v294_v27 = vpop.permute.xlu1 %293 }
 0x1da   : > { %v498_v28 = vpop.f32.mrf.mxu0 }
 0x1db   : > { %v361_v29 = vadd.f32 %v498_v28, %v294_v27 }
 0x1dc   : > { %v352_v30 = vpop.f32.mrf.mxu0 }
 0x1dd   : > { %370 = vst.msk [vmem:[%s190_s11 + $0x10] sm:$0xff] %vm367_vm4, %v361_v29  ;;  %v353_v31 = vadd.f32 %v352_v30, %v284_v26 }
 0x1de   : > { %v499_v33 = vpop.f32.mrf.mxu0 }
 0x1df   : > { %368 = vst.msk [vmem:[%s190_s11] sm:$0xff] %vm367_vm4, %v353_v31  ;;  %v364_v34 = vadd.f32 %v499_v33, %v299_v32 }
 0x1e0   : > { %v355_v35 = vpop.f32.mrf.mxu0 }
 0x1e1   : > { %371 = vst.msk [vmem:[%s190_s11 + $0x18] sm:$0xff] %vm367_vm4, %v364_v34  ;;  %v356_v36 = vadd.f32 %v355_v35, %v289_v25 }
 0x1e3   : > { %369 = vst.msk [vmem:[%s190_s11 + $0x8] sm:$0xff] %vm367_vm4, %v356_v36 }
 0x1e4 PF: > { %s13_s14 = sadd.s32 1, %s558_s14   ;;  %s645_s12 = smov %s554_s13 }
 0x1e5   : > { %p10_p5 = scmp.ge.s32.totalorder %s13_s14, 4   ;;  %s646_s13 = smov %s648_s15 }
 0x1e7   :  { %12 = sbr.rel (!%p10_p5) target bundleno = 2 (0x2), region = 67 }

// kernel: run.18
= control target key start
LH: loop header
LB: loop body
LE: loop exit
PB: predicated region body
PF: predicated region fallthrough
CT: control target
= control target key end

     0   :  { %s763_s21 = smov 0   ;;  %s765_s22 = smov 0   ;;  %s847_s0 = inlined_call_operand.vmem [shape: f32[2,16,16], index: 0, kind: input, shape index: {}, may-alias: {0,5}]   ;;  %s848_s1 = inlined_call_operand.vmem [shape: bf16[16,48], index: 1, kind: input, shape index: {}]   ;;  %s849_s2 = inlined_call_operand.vmem [shape: f32[16,1], index: 2, kind: input, shape index: {}]   ;;  %s850_s3 = inlined_call_operand.vmem [shape: bf16[16,48], index: 3, kind: input, shape index: {}]   ;;  %s851_s4 = inlined_call_operand.vmem [shape: f32[16,1], index: 4, kind: input, shape index: {}]   ;;  %s852_s5 = inlined_call_operand.vmem [shape: f32[2,16,16], index: 5, kind: input, shape index: {}, may-alias: {0,5}]   ;;  %s853_s6 = inlined_call_operand.vmem [shape: f32[2,16,16], index: 6, kind: output, shape index: {}]  }
   0x1   :  { %s767_s23 = smov 0  }
   0x2 LB: > { %s28_s24 = sadd.s32 1, %s716_s22  ;;  %p613_p0 = scmp.ge.s32.totalorder %s720_s23, 1  ;;  %s720_s23 = sphi %s767_s23, %s16_s23   ;;  %s716_s22 = sphi %s765_s22, %s857_s22   ;;  %s712_s21 = sphi %s763_s21, %s856_s21  }
   0x3   : > { %p30_p1 = scmp.ge.s32.totalorder %s28_s24, 2  ;;  %p241_p2 = scmp.lt.s32.totalorder %s720_s23, 3 }
   0x5   : > { %s859_s24 = smov (%p30_p1, %s28_s24), 0  ;;  %p242_p3 = pnand %p613_p0, %p241_p2 }
   0x6   : > { %p282_p4 = scmp.lt.s32.totalorder (!%p242_p3), %s712_s21, 1  ;;  %s722_s29 = smov (!%p242_p3), 2  }
   0x7   : > { %245 = sbr.rel (%p242_p3) target bundleno = 807 (0x327), region = 44  ;;  %s726_s30 = smov (!%p242_p3), 127  }
   0x8   : > { %s727_s7 = smov (!%p242_p3), 126  }
   0xc   : > { %s861_s21 = smov (!%p282_p4, %s712_s21), 1  ;;  %v723_v7 = vmov 0.0   ;;  %vm320_vm2 = vcmask 15360   ;;  %vm324_vm3 = vcmask 146432   ;;  %vm333_vm4 = vcmask 158720   ;;  %v355_v15 = vld [vmem:[%s849_s2] sm:$0xff] }
   0xd   : > { %s781_s25 = sshll.u32 %s861_s21, 4  ;;  %643 = vmatprep.subr.bf16.mxu0 %v723_v7  ;;  %653 = vmatprep.subr.bf16.mxu1 %v723_v7  ;;  %vm724_vm5 = vmmov 0   ;;  %v725_v14 = vmov 0   ;;  %v356_v16 = vld [vmem:[%s849_s2 + $0x8] sm:$0xff]  ;;  %v444_v17 = vld [vmem:[%s851_s4] sm:$0xff]  ;;  %vm372_vm6 = vcmask 392192   ;;  %v423_v21 = vlaneseq }
   0xe   : > { %s286_s28 = scalar_lea.vmem %s847_s0, %s781_s25  ;;  %649 = vmatprep.mubr.msk.bf16.mxu0 %vm724_vm5, %v723_v7  ;;  %659 = vmatprep.mubr.msk.bf16.mxu1 %vm724_vm5, %v723_v7  ;;  %v696_v20 = vld [vmem:[%s848_s1] sm:$0xff]   ;;  %v445_v41 = vld [vmem:[%s851_s4 + $0x8] sm:$0xff]  ;;  %s294_s26 = scalar_lea.vmem %s852_s5, %s781_s25  ;;  %vm509_vm13 = vcmask 130048  }
   0xf   : > { %v308_v0 = vld [vmem:[%s286_s28] sm:$0xff]  ;;  %v309_v1 = vld [vmem:[%s286_s28 + $0x8] sm:$0xff]  ;;  %694 = vset.pattern.permute.xlu0 %v725_v14  ;;  %693 = vset.pattern.permute.xlu1 %v725_v14  ;;  %v424_v22 = vand.u32 127, %v423_v21 }
  0x10   : > { %vm310_vm0 = vcmp.gt.f32.partialorder %v308_v0, 0.0  ;;  %vm311_vm1 = vcmp.gt.f32.partialorder %v309_v1, 0.0  ;;  %v312_v2 = vmul.f32 0.1, %v308_v0  ;;  %v313_v3 = vmul.f32 0.1, %v309_v1 }
  0x11   : > { %v428_v25 = vadd.s32 4294967295, %v424_v22  ;;  %v697_v44 = vld [vmem:[%s850_s3] sm:$0xff]   ;;  %v506_v53 = vld [vmem:[%s294_s26 + $0x8] sm:$0xff] }
  0x12   : > { %v314_v4 = vsel %vm310_vm0, %v308_v0, %v312_v2  ;;  %v315_v5 = vsel %vm311_vm1, %v309_v1, %v313_v3  ;;  %v505_v47 = vld [vmem:[%s294_s26] sm:$0xff] }
  0x13   : > { %v316_v6 = vpack.c.bf16 %v315_v5, %v314_v4  ;;  %vm429_vm8 = vcmp.ge.s32.totalorder %v428_v25, 0  ;;  %vm430_vm9 = vcmp.lt.s32.totalorder %v428_v25, 16 }
  0x14   : > { %vm808_vm11 = vmand %vm429_vm8, %vm430_vm9 }
  0x15   : > { %318 = vrot.lane.b32.xlu0 %v316_v6, %s722_s29  ;;  %vm626_vm12 = vmpackc.low %vm808_vm11, %vm808_vm11  ;;  %s302_s29 = scalar_lea.vmem %s853_s6, %s781_s25 }
  0x87   : > { %v319_v8 = vpop.permute.xlu0 %318 }
  0x88   : > { %v323_v9 = vsel %vm320_vm2, 0, %v319_v8 }
  0x89   : > { %v325_v10 = vsel %vm324_vm3, %v323_v9, 0 }
  0x8a   : > { %v620_v11 = vcombine.low %v325_v10, %v325_v10  ;;  %v621_v12 = vcombine.high %v325_v10, %v325_v10 }
  0x8c   : > { %334 = vst.msk [vmem:[#allocation2] sm:$0xf] %vm333_vm4, %v620_v11  ;;  %335 = vst.msk [vmem:[#allocation2 + $0x4] sm:$0xf] %vm333_vm4, %v621_v12 }
  0x93   : > { %v695_v13 = vld [vmem:[#allocation2] sm:$0xff]  }
  0x94   : > { %347 = vrot.lane.b32.xlu1 %v695_v13, %s726_s30  ;;  %350 = vrot.lane.b32.xlu0 %v695_v13, %s727_s7 }
  0x98   : > { %359 = vperm.xlu1 %693, %v355_v15   ;;  %364 = vperm.xlu0 %694, %v356_v16  }
  0x9c   : > { %448 = vperm.xlu0 %694, %v444_v17  }
 0x106   : > { %v351_v18 = vpop.permute.xlu0 %350  ;;  %v348_v19 = vpop.permute.xlu1 %347 }
 0x107   : > { %644 = vmatpush3.bf16.msra.mxu0 %v351_v18 }
 0x108   : > { %645 = vmatprep.subr.bf16.mxu0 %v723_v7 }
 0x10b   : > { %646 = vmatpush3.bf16.msra.mxu0 %v348_v19 }
 0x10c   : > { %647 = vmatprep.subr.bf16.mxu0 %v723_v7 }
 0x10f   : > { %648 = vmatpush3.bf16.msra.mxu0 %v695_v13 }
 0x112   : > { %650 = vmatmul.mubr.msk.bf16.vlgmr.msra.gmra.mxu0 %vm372_vm6, %v696_v20 }
 0x113   : > { %v360_v23 = vpop.permute.xlu1 %359  ;;  %v365_v29 = vpop.permute.xlu0 %364 }
 0x117   : > { %v449_v45 = vpop.permute.xlu0 %448 }
 0x1d2   : > { %v410_v24 = vpop.f32.mrf.mxu0 }
 0x1d3   : > { %v411_v26 = vadd.f32 %v410_v24, %v360_v23 }
 0x1d4   : > { %v651_v27 = vpop.f32.mrf.mxu0 }
 0x1d5   : > { %v419_v28 = vmul.f32 0.1, %v411_v26  ;;  %vm417_vm7 = vcmp.gt.f32.partialorder %v411_v26, 0.0 }
 0x1d6   : > { %v413_v30 = vpop.f32.mrf.mxu0 }
 0x1d7   : > { %v414_v31 = vadd.f32 %v413_v30, %v365_v29  ;;  %v421_v33 = vsel %vm417_vm7, %v411_v26, %v419_v28 }
 0x1d8   : > { %v652_v32 = vpop.f32.mrf.mxu0  ;;  %v432_v38 = vsel %vm808_vm11, %v421_v33, 0.0 }
 0x1d9   : > { %vm418_vm10 = vcmp.gt.f32.partialorder %v414_v31, 0.0  ;;  %v420_v34 = vmul.f32 0.1, %v414_v31 }
 0x1db   : > { %v422_v36 = vsel %vm418_vm10, %v414_v31, %v420_v34 }
 0x1dc   : > { %v627_v37 = vpack.c.bf16 %v422_v36, %v421_v33  ;;  %v433_v39 = vsel %vm808_vm11, %v422_v36, 0.0 }
 0x1dd   : > { %v434_v40 = vpack.c.bf16 %v433_v39, %v432_v38 }
 0x1df   : > { %439 = vrot.lane.b32.xlu1 %v434_v40, %s727_s7 }
 0x1e3   : > { %436 = vrot.lane.b32.xlu1 %v434_v40, %s726_s30 }
 0x1e7   : > { %453 = vperm.xlu1 %693, %v445_v41  }
 0x251   : > { %v440_v42 = vpop.permute.xlu1 %439 }
 0x252   : > { %654 = vmatpush3.bf16.msra.mxu1 %v440_v42 }
 0x253   : > { %655 = vmatprep.subr.bf16.mxu1 %v723_v7 }
 0x255   : > { %v437_v43 = vpop.permute.xlu1 %436 }
 0x256   : > { %656 = vmatpush3.bf16.msra.mxu1 %v437_v43 }
 0x257   : > { %657 = vmatprep.subr.bf16.mxu1 %v723_v7 }
 0x25a   : > { %658 = vmatpush3.bf16.msk.msra.mxu1 %vm626_vm12, %v627_v37 }
 0x25d   : > { %660 = vmatmul.mubr.msk.bf16.vlgmr.msra.gmra.mxu1 %vm372_vm6, %v697_v44 }
 0x262   : > { %v454_v51 = vpop.permute.xlu1 %453 }
 0x31d   : > { %v498_v46 = vpop.f32.mrf.mxu1 }
 0x31e   : > { %v499_v48 = vadd.f32 %v498_v46, %v449_v45 }
 0x31f   : > { %v661_v49 = vpop.f32.mrf.mxu1 }
 0x320   : > { %v507_v50 = vadd.f32 %v505_v47, %v499_v48 }
 0x321   : > { %v501_v52 = vpop.f32.mrf.mxu1 }
 0x322   : > { %510 = vst.msk [vmem:[%s302_s29] sm:$0xff] %vm509_vm13, %v507_v50  ;;  %v502_v54 = vadd.f32 %v501_v52, %v454_v51 }
 0x323   : > { %v662_v55 = vpop.f32.mrf.mxu1 }
 0x324   : > { %v508_v56 = vadd.f32 %v506_v53, %v502_v54 }
 0x326   : > { %511 = vst.msk [vmem:[%s302_s29 + $0x8] sm:$0xff] %vm509_vm13, %v508_v56 }
 0x327 PF: > { %s16_s23 = sadd.s32 1, %s720_s23   ;;  %s856_s21 = smov %s716_s22 }
 0x328   : > { %p13_p5 = scmp.ge.s32.totalorder %s16_s23, 4   ;;  %s857_s22 = smov %s859_s24 }
 0x32a   :  { %15 = sbr.rel (!%p13_p5) target bundleno = 2 (0x2), region = 82 }

// kernel: run.19
= control target key start
LH: loop header
LB: loop body
LE: loop exit
PB: predicated region body
PF: predicated region fallthrough
CT: control target
= control target key end

     0   :  { %s767_s21 = smov 0   ;;  %s769_s22 = smov 0   ;;  %s847_s0 = inlined_call_operand.vmem [shape: f32[2,16,16], index: 0, kind: input, shape index: {}, may-alias: {0,5}]   ;;  %s848_s1 = inlined_call_operand.vmem [shape: bf16[16,48], index: 1, kind: input, shape index: {}]   ;;  %s849_s2 = inlined_call_operand.vmem [shape: f32[16,1], index: 2, kind: input, shape index: {}]   ;;  %s850_s3 = inlined_call_operand.vmem [shape: bf16[16,48], index: 3, kind: input, shape index: {}]   ;;  %s851_s4 = inlined_call_operand.vmem [shape: f32[16,1], index: 4, kind: input, shape index: {}]   ;;  %s852_s5 = inlined_call_operand.vmem [shape: f32[2,16,16], index: 5, kind: input, shape index: {}, may-alias: {0,5}]   ;;  %s853_s6 = inlined_call_operand.vmem [shape: f32[2,16,16], index: 6, kind: output, shape index: {}]  }
   0x1   :  { %s771_s23 = smov 0  }
   0x2 LB: > { %s28_s24 = sadd.s32 1, %s718_s22  ;;  %p613_p0 = scmp.ge.s32.totalorder %s722_s23, 1  ;;  %s722_s23 = sphi %s771_s23, %s16_s23   ;;  %s718_s22 = sphi %s769_s22, %s857_s22   ;;  %s714_s21 = sphi %s767_s21, %s856_s21  }
   0x3   : > { %p30_p1 = scmp.ge.s32.totalorder %s28_s24, 2  ;;  %p241_p2 = scmp.lt.s32.totalorder %s722_s23, 3 }
   0x5   : > { %s859_s24 = smov (%p30_p1, %s28_s24), 0  ;;  %p242_p3 = pnand %p613_p0, %p241_p2 }
   0x6   : > { %p282_p4 = scmp.lt.s32.totalorder (!%p242_p3), %s714_s21, 1  ;;  %s724_s29 = smov (!%p242_p3), 4  }
   0x7   : > { %245 = sbr.rel (%p242_p3) target bundleno = 807 (0x327), region = 44  ;;  %s728_s30 = smov (!%p242_p3), 125  }
   0x8   : > { %s729_s7 = smov (!%p242_p3), 122   ;;  %s730_s16 = smov (!%p242_p3), 126  }
   0x9   : > { %s731_s17 = smov (!%p242_p3), 127  }
   0xc   : > { %s861_s21 = smov (!%p282_p4, %s714_s21), 1  ;;  %v725_v7 = vmov 0.0   ;;  %vm320_vm2 = vcmask 31744   ;;  %vm324_vm3 = vcmask 162816   ;;  %vm333_vm4 = vcmask 191488   ;;  %v355_v15 = vld [vmem:[%s849_s2] sm:$0xff] }
   0xd   : > { %s785_s25 = sshll.u32 %s861_s21, 4  ;;  %643 = vmatprep.subr.bf16.mxu0 %v725_v7  ;;  %653 = vmatprep.subr.bf16.mxu1 %v725_v7  ;;  %vm726_vm5 = vmmov 0   ;;  %v727_v14 = vmov 0   ;;  %v356_v16 = vld [vmem:[%s849_s2 + $0x8] sm:$0xff]  ;;  %v444_v17 = vld [vmem:[%s851_s4] sm:$0xff]  ;;  %vm372_vm6 = vcmask 392192   ;;  %v423_v21 = vlaneseq }
   0xe   : > { %s286_s28 = scalar_lea.vmem %s847_s0, %s785_s25  ;;  %649 = vmatprep.mubr.msk.bf16.mxu0 %vm726_vm5, %v725_v7  ;;  %659 = vmatprep.mubr.msk.bf16.mxu1 %vm726_vm5, %v725_v7  ;;  %v698_v20 = vld [vmem:[%s848_s1] sm:$0xff]   ;;  %v445_v41 = vld [vmem:[%s851_s4 + $0x8] sm:$0xff]  ;;  %vm509_vm13 = vcmask 130048  }
   0xf   : > { %v308_v0 = vld [vmem:[%s286_s28] sm:$0xff]  ;;  %v309_v1 = vld [vmem:[%s286_s28 + $0x8] sm:$0xff]  ;;  %696 = vset.pattern.permute.xlu0 %v727_v14  ;;  %695 = vset.pattern.permute.xlu1 %v727_v14  ;;  %v424_v22 = vand.u32 127, %v423_v21  ;;  %s294_s28 = scalar_lea.vmem %s852_s5, %s785_s25 }
  0x10   : > { %vm310_vm0 = vcmp.gt.f32.partialorder %v308_v0, 0.0  ;;  %vm311_vm1 = vcmp.gt.f32.partialorder %v309_v1, 0.0  ;;  %v312_v2 = vmul.f32 0.1, %v308_v0  ;;  %v313_v3 = vmul.f32 0.1, %v309_v1 }
  0x11   : > { %v428_v25 = vadd.s32 4294967295, %v424_v22  ;;  %v699_v44 = vld [vmem:[%s850_s3] sm:$0xff]   ;;  %v506_v53 = vld [vmem:[%s294_s28 + $0x8] sm:$0xff] }
  0x12   : > { %v314_v4 = vsel %vm310_vm0, %v308_v0, %v312_v2  ;;  %v315_v5 = vsel %vm311_vm1, %v309_v1, %v313_v3  ;;  %v505_v47 = vld [vmem:[%s294_s28] sm:$0xff] }
  0x13   : > { %v316_v6 = vpack.c.bf16 %v315_v5, %v314_v4  ;;  %vm429_vm8 = vcmp.ge.s32.totalorder %v428_v25, 0  ;;  %vm430_vm9 = vcmp.lt.s32.totalorder %v428_v25, 16 }
  0x14   : > { %vm810_vm11 = vmand %vm429_vm8, %vm430_vm9 }
  0x15   : > { %318 = vrot.lane.b32.xlu0 %v316_v6, %s724_s29  ;;  %vm626_vm12 = vmpackc.low %vm810_vm11, %vm810_vm11 }
  0x87   : > { %v319_v8 = vpop.permute.xlu0 %318 }
  0x88   : > { %v323_v9 = vsel %vm320_vm2, 0, %v319_v8 }
  0x89   : > { %v325_v10 = vsel %vm324_vm3, %v323_v9, 0 }
  0x8a   : > { %v620_v11 = vcombine.low %v325_v10, %v325_v10  ;;  %v621_v12 = vcombine.high %v325_v10, %v325_v10 }
  0x8c   : > { %334 = vst.msk [vmem:[#allocation2] sm:$0xf] %vm333_vm4, %v620_v11  ;;  %335 = vst.msk [vmem:[#allocation2 + $0x4] sm:$0xf] %vm333_vm4, %v621_v12 }
  0x93   : > { %v697_v13 = vld [vmem:[#allocation2] sm:$0xff]  }
  0x94   : > { %347 = vrot.lane.b32.xlu1 %v697_v13, %s728_s30  ;;  %350 = vrot.lane.b32.xlu0 %v697_v13, %s729_s7  ;;  %s302_s7 = scalar_lea.vmem %s853_s6, %s785_s25 }
  0x98   : > { %359 = vperm.xlu1 %695, %v355_v15   ;;  %364 = vperm.xlu0 %696, %v356_v16  }
  0x9c   : > { %448 = vperm.xlu0 %696, %v444_v17  }
 0x106   : > { %v351_v18 = vpop.permute.xlu0 %350  ;;  %v348_v19 = vpop.permute.xlu1 %347 }
 0x107   : > { %644 = vmatpush3.bf16.msra.mxu0 %v351_v18 }
 0x108   : > { %645 = vmatprep.subr.bf16.mxu0 %v725_v7 }
 0x10b   : > { %646 = vmatpush3.bf16.msra.mxu0 %v348_v19 }
 0x10c   : > { %647 = vmatprep.subr.bf16.mxu0 %v725_v7 }
 0x10f   : > { %648 = vmatpush3.bf16.msra.mxu0 %v697_v13 }
 0x112   : > { %650 = vmatmul.mubr.msk.bf16.vlgmr.msra.gmra.mxu0 %vm372_vm6, %v698_v20 }
 0x113   : > { %v360_v23 = vpop.permute.xlu1 %359  ;;  %v365_v29 = vpop.permute.xlu0 %364 }
 0x117   : > { %v449_v45 = vpop.permute.xlu0 %448 }
 0x1d2   : > { %v410_v24 = vpop.f32.mrf.mxu0 }
 0x1d3   : > { %v411_v26 = vadd.f32 %v410_v24, %v360_v23 }
 0x1d4   : > { %v651_v27 = vpop.f32.mrf.mxu0 }
 0x1d5   : > { %v419_v28 = vmul.f32 0.1, %v411_v26  ;;  %vm417_vm7 = vcmp.gt.f32.partialorder %v411_v26, 0.0 }
 0x1d6   : > { %v413_v30 = vpop.f32.mrf.mxu0 }
 0x1d7   : > { %v414_v31 = vadd.f32 %v413_v30, %v365_v29  ;;  %v421_v33 = vsel %vm417_vm7, %v411_v26, %v419_v28 }
 0x1d8   : > { %v652_v32 = vpop.f32.mrf.mxu0  ;;  %v432_v38 = vsel %vm810_vm11, %v421_v33, 0.0 }
 0x1d9   : > { %vm418_vm10 = vcmp.gt.f32.partialorder %v414_v31, 0.0  ;;  %v420_v34 = vmul.f32 0.1, %v414_v31 }
 0x1db   : > { %v422_v36 = vsel %vm418_vm10, %v414_v31, %v420_v34 }
 0x1dc   : > { %v627_v37 = vpack.c.bf16 %v422_v36, %v421_v33  ;;  %v433_v39 = vsel %vm810_vm11, %v422_v36, 0.0 }
 0x1dd   : > { %v434_v40 = vpack.c.bf16 %v433_v39, %v432_v38 }
 0x1df   : > { %439 = vrot.lane.b32.xlu1 %v434_v40, %s730_s16 }
 0x1e3   : > { %436 = vrot.lane.b32.xlu1 %v434_v40, %s731_s17 }
 0x1e7   : > { %453 = vperm.xlu1 %695, %v445_v41  }
 0x251   : > { %v440_v42 = vpop.permute.xlu1 %439 }
 0x252   : > { %654 = vmatpush3.bf16.msra.mxu1 %v440_v42 }
 0x253   : > { %655 = vmatprep.subr.bf16.mxu1 %v725_v7 }
 0x255   : > { %v437_v43 = vpop.permute.xlu1 %436 }
 0x256   : > { %656 = vmatpush3.bf16.msra.mxu1 %v437_v43 }
 0x257   : > { %657 = vmatprep.subr.bf16.mxu1 %v725_v7 }
 0x25a   : > { %658 = vmatpush3.bf16.msk.msra.mxu1 %vm626_vm12, %v627_v37 }
 0x25d   : > { %660 = vmatmul.mubr.msk.bf16.vlgmr.msra.gmra.mxu1 %vm372_vm6, %v699_v44 }
 0x262   : > { %v454_v51 = vpop.permute.xlu1 %453 }
 0x31d   : > { %v498_v46 = vpop.f32.mrf.mxu1 }
 0x31e   : > { %v499_v48 = vadd.f32 %v498_v46, %v449_v45 }
 0x31f   : > { %v661_v49 = vpop.f32.mrf.mxu1 }
 0x320   : > { %v507_v50 = vadd.f32 %v505_v47, %v499_v48 }
 0x321   : > { %v501_v52 = vpop.f32.mrf.mxu1 }
 0x322   : > { %510 = vst.msk [vmem:[%s302_s7] sm:$0xff] %vm509_vm13, %v507_v50  ;;  %v502_v54 = vadd.f32 %v501_v52, %v454_v51 }
 0x323   : > { %v662_v55 = vpop.f32.mrf.mxu1 }
 0x324   : > { %v508_v56 = vadd.f32 %v506_v53, %v502_v54 }
 0x326   : > { %511 = vst.msk [vmem:[%s302_s7 + $0x8] sm:$0xff] %vm509_vm13, %v508_v56 }
 0x327 PF: > { %s16_s23 = sadd.s32 1, %s722_s23   ;;  %s856_s21 = smov %s718_s22 }
 0x328   : > { %p13_p5 = scmp.ge.s32.totalorder %s16_s23, 4   ;;  %s857_s22 = smov %s859_s24 }
 0x32a   :  { %15 = sbr.rel (!%p13_p5) target bundleno = 2 (0x2), region = 82 }

// kernel: run.20
= control target key start
LH: loop header
LB: loop body
LE: loop exit
PB: predicated region body
PF: predicated region fallthrough
CT: control target
= control target key end

     0   :  { %s767_s21 = smov 0   ;;  %s769_s22 = smov 0   ;;  %s847_s0 = inlined_call_operand.vmem [shape: f32[2,16,16], index: 0, kind: input, shape index: {}, may-alias: {0,5}]   ;;  %s848_s1 = inlined_call_operand.vmem [shape: bf16[16,48], index: 1, kind: input, shape index: {}]   ;;  %s849_s2 = inlined_call_operand.vmem [shape: f32[16,1], index: 2, kind: input, shape index: {}]   ;;  %s850_s3 = inlined_call_operand.vmem [shape: bf16[16,48], index: 3, kind: input, shape index: {}]   ;;  %s851_s4 = inlined_call_operand.vmem [shape: f32[16,1], index: 4, kind: input, shape index: {}]   ;;  %s852_s5 = inlined_call_operand.vmem [shape: f32[2,16,16], index: 5, kind: input, shape index: {}, may-alias: {0,5}]   ;;  %s853_s6 = inlined_call_operand.vmem [shape: f32[2,16,16], index: 6, kind: output, shape index: {}]  }
   0x1   :  { %s771_s23 = smov 0  }
   0x2 LB: > { %s28_s24 = sadd.s32 1, %s718_s22  ;;  %p613_p0 = scmp.ge.s32.totalorder %s722_s23, 1  ;;  %s722_s23 = sphi %s771_s23, %s16_s23   ;;  %s718_s22 = sphi %s769_s22, %s857_s22   ;;  %s714_s21 = sphi %s767_s21, %s856_s21  }
   0x3   : > { %p30_p1 = scmp.ge.s32.totalorder %s28_s24, 2  ;;  %p241_p2 = scmp.lt.s32.totalorder %s722_s23, 3 }
   0x5   : > { %s859_s24 = smov (%p30_p1, %s28_s24), 0  ;;  %p242_p3 = pnand %p613_p0, %p241_p2 }
   0x6   : > { %p282_p4 = scmp.lt.s32.totalorder (!%p242_p3), %s714_s21, 1  ;;  %s724_s29 = smov (!%p242_p3), 6  }
   0x7   : > { %245 = sbr.rel (%p242_p3) target bundleno = 807 (0x327), region = 44  ;;  %s728_s30 = smov (!%p242_p3), 123  }
   0x8   : > { %s729_s7 = smov (!%p242_p3), 118   ;;  %s730_s16 = smov (!%p242_p3), 126  }
   0x9   : > { %s731_s17 = smov (!%p242_p3), 127  }
   0xc   : > { %s861_s21 = smov (!%p282_p4, %s714_s21), 1  ;;  %v725_v7 = vmov 0.0   ;;  %vm320_vm2 = vcmask 48128   ;;  %vm324_vm3 = vcmask 179200   ;;  %vm333_vm4 = vcmask 224256   ;;  %v355_v15 = vld [vmem:[%s849_s2] sm:$0xff] }
   0xd   : > { %s785_s25 = sshll.u32 %s861_s21, 4  ;;  %643 = vmatprep.subr.bf16.mxu0 %v725_v7  ;;  %653 = vmatprep.subr.bf16.mxu1 %v725_v7  ;;  %vm726_vm5 = vmmov 0   ;;  %v727_v14 = vmov 0   ;;  %v356_v16 = vld [vmem:[%s849_s2 + $0x8] sm:$0xff]  ;;  %v444_v17 = vld [vmem:[%s851_s4] sm:$0xff]  ;;  %vm372_vm6 = vcmask 392192   ;;  %v423_v21 = vlaneseq }
   0xe   : > { %s286_s28 = scalar_lea.vmem %s847_s0, %s785_s25  ;;  %649 = vmatprep.mubr.msk.bf16.mxu0 %vm726_vm5, %v725_v7  ;;  %659 = vmatprep.mubr.msk.bf16.mxu1 %vm726_vm5, %v725_v7  ;;  %v698_v20 = vld [vmem:[%s848_s1] sm:$0xff]   ;;  %v445_v41 = vld [vmem:[%s851_s4 + $0x8] sm:$0xff]  ;;  %vm509_vm13 = vcmask 130048  }
   0xf   : > { %v308_v0 = vld [vmem:[%s286_s28] sm:$0xff]  ;;  %v309_v1 = vld [vmem:[%s286_s28 + $0x8] sm:$0xff]  ;;  %696 = vset.pattern.permute.xlu0 %v727_v14  ;;  %695 = vset.pattern.permute.xlu1 %v727_v14  ;;  %v424_v22 = vand.u32 127, %v423_v21  ;;  %s294_s28 = scalar_lea.vmem %s852_s5, %s785_s25 }
  0x10   : > { %vm310_vm0 = vcmp.gt.f32.partialorder %v308_v0, 0.0  ;;  %vm311_vm1 = vcmp.gt.f32.partialorder %v309_v1, 0.0  ;;  %v312_v2 = vmul.f32 0.1, %v308_v0  ;;  %v313_v3 = vmul.f32 0.1, %v309_v1 }
  0x11   : > { %v428_v25 = vadd.s32 4294967295, %v424_v22  ;;  %v699_v44 = vld [vmem:[%s850_s3] sm:$0xff]   ;;  %v506_v53 = vld [vmem:[%s294_s28 + $0x8] sm:$0xff] }
  0x12   : > { %v314_v4 = vsel %vm310_vm0, %v308_v0, %v312_v2  ;;  %v315_v5 = vsel %vm311_vm1, %v309_v1, %v313_v3  ;;  %v505_v47 = vld [vmem:[%s294_s28] sm:$0xff] }
  0x13   : > { %v316_v6 = vpack.c.bf16 %v315_v5, %v314_v4  ;;  %vm429_vm8 = vcmp.ge.s32.totalorder %v428_v25, 0  ;;  %vm430_vm9 = vcmp.lt.s32.totalorder %v428_v25, 16 }
  0x14   : > { %vm810_vm11 = vmand %vm429_vm8, %vm430_vm9 }
  0x15   : > { %318 = vrot.lane.b32.xlu0 %v316_v6, %s724_s29  ;;  %vm626_vm12 = vmpackc.low %vm810_vm11, %vm810_vm11 }
  0x87   : > { %v319_v8 = vpop.permute.xlu0 %318 }
  0x88   : > { %v323_v9 = vsel %vm320_vm2, 0, %v319_v8 }
  0x89   : > { %v325_v10 = vsel %vm324_vm3, %v323_v9, 0 }
  0x8a   : > { %v620_v11 = vcombine.low %v325_v10, %v325_v10  ;;  %v621_v12 = vcombine.high %v325_v10, %v325_v10 }
  0x8c   : > { %334 = vst.msk [vmem:[#allocation2] sm:$0xf] %vm333_vm4, %v620_v11  ;;  %335 = vst.msk [vmem:[#allocation2 + $0x4] sm:$0xf] %vm333_vm4, %v621_v12 }
  0x93   : > { %v697_v13 = vld [vmem:[#allocation2] sm:$0xff]  }
  0x94   : > { %347 = vrot.lane.b32.xlu1 %v697_v13, %s728_s30  ;;  %350 = vrot.lane.b32.xlu0 %v697_v13, %s729_s7  ;;  %s302_s7 = scalar_lea.vmem %s853_s6, %s785_s25 }
  0x98   : > { %359 = vperm.xlu1 %695, %v355_v15   ;;  %364 = vperm.xlu0 %696, %v356_v16  }
  0x9c   : > { %448 = vperm.xlu0 %696, %v444_v17  }
 0x106   : > { %v351_v18 = vpop.permute.xlu0 %350  ;;  %v348_v19 = vpop.permute.xlu1 %347 }
 0x107   : > { %644 = vmatpush3.bf16.msra.mxu0 %v351_v18 }
 0x108   : > { %645 = vmatprep.subr.bf16.mxu0 %v725_v7 }
 0x10b   : > { %646 = vmatpush3.bf16.msra.mxu0 %v348_v19 }
 0x10c   : > { %647 = vmatprep.subr.bf16.mxu0 %v725_v7 }
 0x10f   : > { %648 = vmatpush3.bf16.msra.mxu0 %v697_v13 }
 0x112   : > { %650 = vmatmul.mubr.msk.bf16.vlgmr.msra.gmra.mxu0 %vm372_vm6, %v698_v20 }
 0x113   : > { %v360_v23 = vpop.permute.xlu1 %359  ;;  %v365_v29 = vpop.permute.xlu0 %364 }
 0x117   : > { %v449_v45 = vpop.permute.xlu0 %448 }
 0x1d2   : > { %v410_v24 = vpop.f32.mrf.mxu0 }
 0x1d3   : > { %v411_v26 = vadd.f32 %v410_v24, %v360_v23 }
 0x1d4   : > { %v651_v27 = vpop.f32.mrf.mxu0 }
 0x1d5   : > { %v419_v28 = vmul.f32 0.1, %v411_v26  ;;  %vm417_vm7 = vcmp.gt.f32.partialorder %v411_v26, 0.0 }
 0x1d6   : > { %v413_v30 = vpop.f32.mrf.mxu0 }
 0x1d7   : > { %v414_v31 = vadd.f32 %v413_v30, %v365_v29  ;;  %v421_v33 = vsel %vm417_vm7, %v411_v26, %v419_v28 }
 0x1d8   : > { %v652_v32 = vpop.f32.mrf.mxu0  ;;  %v432_v38 = vsel %vm810_vm11, %v421_v33, 0.0 }
 0x1d9   : > { %vm418_vm10 = vcmp.gt.f32.partialorder %v414_v31, 0.0  ;;  %v420_v34 = vmul.f32 0.1, %v414_v31 }
 0x1db   : > { %v422_v36 = vsel %vm418_vm10, %v414_v31, %v420_v34 }
 0x1dc   : > { %v627_v37 = vpack.c.bf16 %v422_v36, %v421_v33  ;;  %v433_v39 = vsel %vm810_vm11, %v422_v36, 0.0 }
 0x1dd   : > { %v434_v40 = vpack.c.bf16 %v433_v39, %v432_v38 }
 0x1df   : > { %439 = vrot.lane.b32.xlu1 %v434_v40, %s730_s16 }
 0x1e3   : > { %436 = vrot.lane.b32.xlu1 %v434_v40, %s731_s17 }
 0x1e7   : > { %453 = vperm.xlu1 %695, %v445_v41  }
 0x251   : > { %v440_v42 = vpop.permute.xlu1 %439 }
 0x252   : > { %654 = vmatpush3.bf16.msra.mxu1 %v440_v42 }
 0x253   : > { %655 = vmatprep.subr.bf16.mxu1 %v725_v7 }
 0x255   : > { %v437_v43 = vpop.permute.xlu1 %436 }
 0x256   : > { %656 = vmatpush3.bf16.msra.mxu1 %v437_v43 }
 0x257   : > { %657 = vmatprep.subr.bf16.mxu1 %v725_v7 }
 0x25a   : > { %658 = vmatpush3.bf16.msk.msra.mxu1 %vm626_vm12, %v627_v37 }
 0x25d   : > { %660 = vmatmul.mubr.msk.bf16.vlgmr.msra.gmra.mxu1 %vm372_vm6, %v699_v44 }
 0x262   : > { %v454_v51 = vpop.permute.xlu1 %453 }
 0x31d   : > { %v498_v46 = vpop.f32.mrf.mxu1 }
 0x31e   : > { %v499_v48 = vadd.f32 %v498_v46, %v449_v45 }
 0x31f   : > { %v661_v49 = vpop.f32.mrf.mxu1 }
 0x320   : > { %v507_v50 = vadd.f32 %v505_v47, %v499_v48 }
 0x321   : > { %v501_v52 = vpop.f32.mrf.mxu1 }
 0x322   : > { %510 = vst.msk [vmem:[%s302_s7] sm:$0xff] %vm509_vm13, %v507_v50  ;;  %v502_v54 = vadd.f32 %v501_v52, %v454_v51 }
 0x323   : > { %v662_v55 = vpop.f32.mrf.mxu1 }
 0x324   : > { %v508_v56 = vadd.f32 %v506_v53, %v502_v54 }
 0x326   : > { %511 = vst.msk [vmem:[%s302_s7 + $0x8] sm:$0xff] %vm509_vm13, %v508_v56 }
 0x327 PF: > { %s16_s23 = sadd.s32 1, %s722_s23   ;;  %s856_s21 = smov %s718_s22 }
 0x328   : > { %p13_p5 = scmp.ge.s32.totalorder %s16_s23, 4   ;;  %s857_s22 = smov %s859_s24 }
 0x32a   :  { %15 = sbr.rel (!%p13_p5) target bundleno = 2 (0x2), region = 82 }

// kernel: run.21
= control target key start
LH: loop header
LB: loop body
LE: loop exit
PB: predicated region body
PF: predicated region fallthrough
CT: control target
= control target key end

     0   :  { %s791_s21 = smov 0   ;;  %s793_s22 = smov 0   ;;  %s883_s0 = inlined_call_operand.vmem [shape: f32[2,16,16], index: 0, kind: input, shape index: {}, may-alias: {0,5}]   ;;  %s884_s1 = inlined_call_operand.vmem [shape: bf16[16,80], index: 1, kind: input, shape index: {}]   ;;  %s885_s2 = inlined_call_operand.vmem [shape: f32[16,1], index: 2, kind: input, shape index: {}]   ;;  %s886_s3 = inlined_call_operand.vmem [shape: bf16[16,80], index: 3, kind: input, shape index: {}]   ;;  %s887_s4 = inlined_call_operand.vmem [shape: f32[16,1], index: 4, kind: input, shape index: {}]   ;;  %s888_s5 = inlined_call_operand.vmem [shape: f32[2,16,16], index: 5, kind: input, shape index: {}, may-alias: {0,5}]   ;;  %s889_s6 = inlined_call_operand.vmem [shape: f32[2,16,16], index: 6, kind: output, shape index: {}]  }
   0x1   :  { %s795_s23 = smov 0  }
   0x2 LB: > { %s28_s24 = sadd.s32 1, %s742_s22  ;;  %p625_p0 = scmp.ge.s32.totalorder %s746_s23, 1  ;;  %s746_s23 = sphi %s795_s23, %s16_s23   ;;  %s742_s22 = sphi %s793_s22, %s893_s22   ;;  %s738_s21 = sphi %s791_s21, %s892_s21  }
   0x3   : > { %p30_p1 = scmp.ge.s32.totalorder %s28_s24, 2  ;;  %p241_p2 = scmp.lt.s32.totalorder %s746_s23, 3 }
   0x5   : > { %s895_s24 = smov (%p30_p1, %s28_s24), 0  ;;  %p242_p3 = pnand %p625_p0, %p241_p2 }
   0x6   : > { %p282_p4 = scmp.lt.s32.totalorder (!%p242_p3), %s738_s21, 1  ;;  %s748_s29 = smov (!%p242_p3), 4  }
   0x7   : > { %245 = sbr.rel (%p242_p3) target bundleno = 823 (0x337), region = 44  ;;  %s750_s30 = smov (!%p242_p3), 125  }
   0x8   : > { %s751_s7 = smov (!%p242_p3), 124   ;;  %s752_s8 = smov (!%p242_p3), 126  }
   0x9   : > { %s753_s9 = smov (!%p242_p3), 127  }
   0xc   : > { %s897_s21 = smov (!%p282_p4, %s738_s21), 1  ;;  %v749_v7 = vmov 0.0   ;;  %vm320_vm2 = vcmask 31744   ;;  %vm324_vm3 = vcmask 162816   ;;  %vm333_vm4 = vcmask 191488   ;;  %v361_v14 = vld [vmem:[%s885_s2] sm:$0xff] }
   0xd   : > { %s809_s25 = sshll.u32 %s897_s21, 4  ;;  %659 = vmatprep.subr.bf16.mxu0 %v749_v7  ;;  %673 = vmatprep.subr.bf16.mxu1 %v749_v7  ;;  %vm754_vm5 = vmmov 0   ;;  %v362_v15 = vld [vmem:[%s885_s2 + $0x8] sm:$0xff]  ;;  %v755_v16 = vmov 0   ;;  %v722_v21 = vld [vmem:[%s884_s1] sm:$0xff]   ;;  %vm378_vm6 = vcmask 654336   ;;  %v429_v22 = vlaneseq }
   0xe   : > { %s286_s28 = scalar_lea.vmem %s883_s0, %s809_s25  ;;  %669 = vmatprep.mubr.msk.bf16.mxu0 %vm754_vm5, %v749_v7  ;;  %683 = vmatprep.mubr.msk.bf16.mxu1 %vm754_vm5, %v749_v7  ;;  %v456_v42 = vld [vmem:[%s887_s4] sm:$0xff]  ;;  %v457_v43 = vld [vmem:[%s887_s4 + $0x8] sm:$0xff]  ;;  %vm521_vm13 = vcmask 130048  }
   0xf   : > { %v308_v0 = vld [vmem:[%s286_s28] sm:$0xff]  ;;  %v309_v1 = vld [vmem:[%s286_s28 + $0x8] sm:$0xff]  ;;  %719 = vset.pattern.permute.xlu1 %v755_v16  ;;  %720 = vset.pattern.permute.xlu0 %v755_v16  ;;  %v430_v23 = vand.u32 127, %v429_v22  ;;  %s294_s28 = scalar_lea.vmem %s888_s5, %s809_s25 }
  0x10   : > { %vm310_vm0 = vcmp.gt.f32.partialorder %v308_v0, 0.0  ;;  %vm311_vm1 = vcmp.gt.f32.partialorder %v309_v1, 0.0  ;;  %v312_v2 = vmul.f32 0.1, %v308_v0  ;;  %v313_v3 = vmul.f32 0.1, %v309_v1 }
  0x11   : > { %v434_v26 = vadd.s32 4294967294, %v430_v23  ;;  %v723_v48 = vld [vmem:[%s886_s3] sm:$0xff]   ;;  %v518_v57 = vld [vmem:[%s294_s28 + $0x8] sm:$0xff] }
  0x12   : > { %v314_v4 = vsel %vm310_vm0, %v308_v0, %v312_v2  ;;  %v315_v5 = vsel %vm311_vm1, %v309_v1, %v313_v3  ;;  %v517_v51 = vld [vmem:[%s294_s28] sm:$0xff] }
  0x13   : > { %v316_v6 = vpack.c.bf16 %v315_v5, %v314_v4  ;;  %vm435_vm8 = vcmp.ge.s32.totalorder %v434_v26, 0  ;;  %vm436_vm9 = vcmp.lt.s32.totalorder %v434_v26, 16 }
  0x14   : > { %vm837_vm10 = vmand %vm435_vm8, %vm436_vm9 }
  0x15   : > { %318 = vrot.lane.b32.xlu0 %v316_v6, %s748_s29  ;;  %vm638_vm12 = vmpackc.low %vm837_vm10, %vm837_vm10 }
  0x87   : > { %v319_v8 = vpop.permute.xlu0 %318 }
  0x88   : > { %v323_v9 = vsel %vm320_vm2, 0, %v319_v8 }
  0x89   : > { %v325_v10 = vsel %vm324_vm3, %v323_v9, 0 }
  0x8a   : > { %v632_v11 = vcombine.low %v325_v10, %v325_v10  ;;  %v633_v12 = vcombine.high %v325_v10, %v325_v10 }
  0x8c   : > { %334 = vst.msk [vmem:[#allocation2] sm:$0xf] %vm333_vm4, %v632_v11  ;;  %335 = vst.msk [vmem:[#allocation2 + $0x4] sm:$0xf] %vm333_vm4, %v633_v12 }
  0x93   : > { %v721_v13 = vld [vmem:[#allocation2] sm:$0xff]  }
  0x94   : > { %353 = vrot.lane.b32.xlu1 %v721_v13, %s750_s30  ;;  %356 = vrot.lane.b32.xlu0 %v721_v13, %s751_s7 }
  0x98   : > { %350 = vrot.lane.b32.xlu1 %v721_v13, %s752_s8  ;;  %347 = vrot.lane.b32.xlu0 %v721_v13, %s753_s9 }
  0x9c   : > { %365 = vperm.xlu1 %719, %v361_v14   ;;  %370 = vperm.xlu0 %720, %v362_v15  }
 0x106   : > { %v357_v17 = vpop.permute.xlu0 %356  ;;  %v354_v18 = vpop.permute.xlu1 %353 }
 0x107   : > { %660 = vmatpush3.bf16.msra.mxu0 %v357_v17 }
 0x108   : > { %661 = vmatprep.subr.bf16.mxu0 %v749_v7 }
 0x10a   : > { %v351_v19 = vpop.permute.xlu1 %350  ;;  %v348_v20 = vpop.permute.xlu0 %347 }
 0x10b   : > { %662 = vmatpush3.bf16.msra.mxu0 %v354_v18 }
 0x10c   : > { %663 = vmatprep.subr.bf16.mxu0 %v749_v7 }
 0x10f   : > { %664 = vmatpush3.bf16.msra.mxu0 %v351_v19 }
 0x110   : > { %665 = vmatprep.subr.bf16.mxu0 %v749_v7 }
 0x113   : > { %666 = vmatpush3.bf16.msra.mxu0 %v348_v20 }
 0x114   : > { %667 = vmatprep.subr.bf16.mxu0 %v749_v7 }
 0x117   : > { %668 = vmatpush3.bf16.msra.mxu0 %v721_v13  ;;  %v366_v24 = vpop.permute.xlu1 %365  ;;  %v371_v29 = vpop.permute.xlu0 %370 }
 0x11a   : > { %670 = vmatmul.mubr.msk.bf16.vlgmr.msra.gmra.mxu0 %vm378_vm6, %v722_v21 }
 0x1da   : > { %v416_v25 = vpop.f32.mrf.mxu0 }
 0x1db   : > { %v417_v27 = vadd.f32 %v416_v25, %v366_v24 }
 0x1dc   : > { %v671_v28 = vpop.f32.mrf.mxu0 }
 0x1dd   : > { %v425_v30 = vmul.f32 0.1, %v417_v27  ;;  %vm423_vm7 = vcmp.gt.f32.partialorder %v417_v27, 0.0 }
 0x1de   : > { %v419_v31 = vpop.f32.mrf.mxu0 }
 0x1df   : > { %v420_v32 = vadd.f32 %v419_v31, %v371_v29  ;;  %v427_v34 = vsel %vm423_vm7, %v417_v27, %v425_v30 }
 0x1e0   : > { %v672_v33 = vpop.f32.mrf.mxu0  ;;  %v438_v38 = vsel %vm837_vm10, %v427_v34, 0.0 }
 0x1e1   : > { %vm424_vm11 = vcmp.gt.f32.partialorder %v420_v32, 0.0  ;;  %v426_v36 = vmul.f32 0.1, %v420_v32 }
 0x1e3   : > { %v428_v37 = vsel %vm424_vm11, %v420_v32, %v426_v36 }
 0x1e4   : > { %v439_v39 = vsel %vm837_vm10, %v428_v37, 0.0  ;;  %v639_v40 = vpack.c.bf16 %v428_v37, %v427_v34 }
 0x1e5   : > { %v440_v41 = vpack.c.bf16 %v439_v39, %v438_v38 }
 0x1e7   : > { %445 = vrot.lane.b32.xlu0 %v440_v41, %s752_s8  ;;  %451 = vrot.lane.b32.xlu1 %v440_v41, %s751_s7  ;;  %s302_s7 = scalar_lea.vmem %s889_s6, %s809_s25 }
 0x1eb   : > { %460 = vperm.xlu0 %720, %v456_v42   ;;  %448 = vrot.lane.b32.xlu1 %v440_v41, %s750_s30 }
 0x1ef   : > { %442 = vrot.lane.b32.xlu1 %v440_v41, %s753_s9 }
 0x1f3   : > { %465 = vperm.xlu1 %719, %v457_v43  }
 0x259   : > { %v452_v44 = vpop.permute.xlu1 %451  ;;  %v446_v46 = vpop.permute.xlu0 %445 }
 0x25a   : > { %674 = vmatpush3.bf16.msra.mxu1 %v452_v44 }
 0x25b   : > { %675 = vmatprep.subr.bf16.mxu1 %v749_v7 }
 0x25d   : > { %v449_v45 = vpop.permute.xlu1 %448 }
 0x25e   : > { %676 = vmatpush3.bf16.msra.mxu1 %v449_v45 }
 0x25f   : > { %677 = vmatprep.subr.bf16.mxu1 %v749_v7 }
 0x261   : > { %v443_v47 = vpop.permute.xlu1 %442 }
 0x262   : > { %678 = vmatpush3.bf16.msra.mxu1 %v446_v46 }
 0x263   : > { %679 = vmatprep.subr.bf16.mxu1 %v749_v7 }
 0x266   : > { %680 = vmatpush3.bf16.msra.mxu1 %v443_v47  ;;  %v461_v49 = vpop.permute.xlu0 %460 }
 0x267   : > { %681 = vmatprep.subr.bf16.mxu1 %v749_v7 }
 0x26a   : > { %682 = vmatpush3.bf16.msk.msra.mxu1 %vm638_vm12, %v639_v40 }
 0x26d   : > { %684 = vmatmul.mubr.msk.bf16.vlgmr.msra.gmra.mxu1 %vm378_vm6, %v723_v48 }
 0x26e   : > { %v466_v55 = vpop.permute.xlu1 %465 }
 0x32d   : > { %v510_v50 = vpop.f32.mrf.mxu1 }
 0x32e   : > { %v511_v52 = vadd.f32 %v510_v50, %v461_v49 }
 0x32f   : > { %v685_v53 = vpop.f32.mrf.mxu1 }
 0x330   : > { %v519_v54 = vadd.f32 %v517_v51, %v511_v52 }
 0x331   : > { %v513_v56 = vpop.f32.mrf.mxu1 }
 0x332   : > { %522 = vst.msk [vmem:[%s302_s7] sm:$0xff] %vm521_vm13, %v519_v54  ;;  %v514_v58 = vadd.f32 %v513_v56, %v466_v55 }
 0x333   : > { %v686_v59 = vpop.f32.mrf.mxu1 }
 0x334   : > { %v520_v60 = vadd.f32 %v518_v57, %v514_v58 }
 0x336   : > { %523 = vst.msk [vmem:[%s302_s7 + $0x8] sm:$0xff] %vm521_vm13, %v520_v60 }
 0x337 PF: > { %s16_s23 = sadd.s32 1, %s746_s23   ;;  %s892_s21 = smov %s742_s22 }
 0x338   : > { %p13_p5 = scmp.ge.s32.totalorder %s16_s23, 4   ;;  %s893_s22 = smov %s895_s24 }
 0x33a   :  { %15 = sbr.rel (!%p13_p5) target bundleno = 2 (0x2), region = 82 }

// kernel: run.22
= control target key start
LH: loop header
LB: loop body
LE: loop exit
PB: predicated region body
PF: predicated region fallthrough
CT: control target
= control target key end

     0   :  { %s797_s21 = smov 0   ;;  %s799_s22 = smov 0   ;;  %s883_s0 = inlined_call_operand.vmem [shape: f32[2,16,16], index: 0, kind: input, shape index: {}, may-alias: {0,5}]   ;;  %s884_s1 = inlined_call_operand.vmem [shape: bf16[16,80], index: 1, kind: input, shape index: {}]   ;;  %s885_s2 = inlined_call_operand.vmem [shape: f32[16,1], index: 2, kind: input, shape index: {}]   ;;  %s886_s3 = inlined_call_operand.vmem [shape: bf16[16,80], index: 3, kind: input, shape index: {}]   ;;  %s887_s4 = inlined_call_operand.vmem [shape: f32[16,1], index: 4, kind: input, shape index: {}]   ;;  %s888_s5 = inlined_call_operand.vmem [shape: f32[2,16,16], index: 5, kind: input, shape index: {}, may-alias: {0,5}]   ;;  %s889_s6 = inlined_call_operand.vmem [shape: f32[2,16,16], index: 6, kind: output, shape index: {}]  }
   0x1   :  { %s801_s23 = smov 0  }
   0x2 LB: > { %s28_s24 = sadd.s32 1, %s745_s22  ;;  %p625_p0 = scmp.ge.s32.totalorder %s749_s23, 1  ;;  %s749_s23 = sphi %s801_s23, %s16_s23   ;;  %s745_s22 = sphi %s799_s22, %s893_s22   ;;  %s741_s21 = sphi %s797_s21, %s892_s21  }
   0x3   : > { %p30_p1 = scmp.ge.s32.totalorder %s28_s24, 2  ;;  %p241_p2 = scmp.lt.s32.totalorder %s749_s23, 3 }
   0x5   : > { %s895_s24 = smov (%p30_p1, %s28_s24), 0  ;;  %p242_p3 = pnand %p625_p0, %p241_p2 }
   0x6   : > { %p282_p4 = scmp.lt.s32.totalorder (!%p242_p3), %s741_s21, 1  ;;  %s751_s29 = smov (!%p242_p3), 8  }
   0x7   : > { %245 = sbr.rel (%p242_p3) target bundleno = 823 (0x337), region = 44  ;;  %s753_s30 = smov (!%p242_p3), 119  }
   0x8   : > { %s754_s7 = smov (!%p242_p3), 116   ;;  %s755_s8 = smov (!%p242_p3), 122  }
   0x9   : > { %s756_s9 = smov (!%p242_p3), 125   ;;  %s759_s16 = smov (!%p242_p3), 126  }
   0xa   : > { %s760_s17 = smov (!%p242_p3), 124   ;;  %s761_s20 = smov (!%p242_p3), 127  }
   0xc   : > { %s897_s21 = smov (!%p282_p4, %s741_s21), 1  ;;  %v752_v7 = vmov 0.0   ;;  %vm320_vm2 = vcmask 64512   ;;  %vm324_vm3 = vcmask 195584   ;;  %vm333_vm4 = vcmask 257024   ;;  %v361_v14 = vld [vmem:[%s885_s2] sm:$0xff] }
   0xd   : > { %s815_s25 = sshll.u32 %s897_s21, 4  ;;  %659 = vmatprep.subr.bf16.mxu0 %v752_v7  ;;  %673 = vmatprep.subr.bf16.mxu1 %v752_v7  ;;  %vm757_vm5 = vmmov 0   ;;  %v362_v15 = vld [vmem:[%s885_s2 + $0x8] sm:$0xff]  ;;  %v758_v16 = vmov 0   ;;  %v725_v21 = vld [vmem:[%s884_s1] sm:$0xff]   ;;  %vm378_vm6 = vcmask 654336   ;;  %v429_v22 = vlaneseq }
   0xe   : > { %s286_s28 = scalar_lea.vmem %s883_s0, %s815_s25  ;;  %669 = vmatprep.mubr.msk.bf16.mxu0 %vm757_vm5, %v752_v7  ;;  %683 = vmatprep.mubr.msk.bf16.mxu1 %vm757_vm5, %v752_v7  ;;  %v456_v42 = vld [vmem:[%s887_s4] sm:$0xff]  ;;  %v457_v43 = vld [vmem:[%s887_s4 + $0x8] sm:$0xff]  ;;  %s302_s10 = scalar_lea.vmem %s889_s6, %s815_s25  ;;  %vm521_vm13 = vcmask 130048  }
   0xf   : > { %v308_v0 = vld [vmem:[%s286_s28] sm:$0xff]  ;;  %v309_v1 = vld [vmem:[%s286_s28 + $0x8] sm:$0xff]  ;;  %722 = vset.pattern.permute.xlu1 %v758_v16  ;;  %723 = vset.pattern.permute.xlu0 %v758_v16  ;;  %v430_v23 = vand.u32 127, %v429_v22 }
  0x10   : > { %vm310_vm0 = vcmp.gt.f32.partialorder %v308_v0, 0.0  ;;  %vm311_vm1 = vcmp.gt.f32.partialorder %v309_v1, 0.0  ;;  %v312_v2 = vmul.f32 0.1, %v308_v0  ;;  %v313_v3 = vmul.f32 0.1, %v309_v1 }
  0x11   : > { %v434_v26 = vadd.s32 4294967294, %v430_v23  ;;  %v726_v48 = vld [vmem:[%s886_s3] sm:$0xff]  }
  0x12   : > { %v314_v4 = vsel %vm310_vm0, %v308_v0, %v312_v2  ;;  %v315_v5 = vsel %vm311_vm1, %v309_v1, %v313_v3 }
  0x13   : > { %v316_v6 = vpack.c.bf16 %v315_v5, %v314_v4  ;;  %vm435_vm8 = vcmp.ge.s32.totalorder %v434_v26, 0  ;;  %vm436_vm9 = vcmp.lt.s32.totalorder %v434_v26, 16 }
  0x14   : > { %vm840_vm10 = vmand %vm435_vm8, %vm436_vm9 }
  0x15   : > { %318 = vrot.lane.b32.xlu0 %v316_v6, %s751_s29  ;;  %vm638_vm12 = vmpackc.low %vm840_vm10, %vm840_vm10 }
  0x87   : > { %v319_v8 = vpop.permute.xlu0 %318 }
  0x88   : > { %v323_v9 = vsel %vm320_vm2, 0, %v319_v8 }
  0x89   : > { %v325_v10 = vsel %vm324_vm3, %v323_v9, 0 }
  0x8a   : > { %v632_v11 = vcombine.low %v325_v10, %v325_v10  ;;  %v633_v12 = vcombine.high %v325_v10, %v325_v10 }
  0x8c   : > { %334 = vst.msk [vmem:[#allocation2] sm:$0xf] %vm333_vm4, %v632_v11  ;;  %335 = vst.msk [vmem:[#allocation2 + $0x4] sm:$0xf] %vm333_vm4, %v633_v12 }
  0x93   : > { %v724_v13 = vld [vmem:[#allocation2] sm:$0xff]  }
  0x94   : > { %353 = vrot.lane.b32.xlu1 %v724_v13, %s753_s30  ;;  %356 = vrot.lane.b32.xlu0 %v724_v13, %s754_s7  ;;  %s294_s7 = scalar_lea.vmem %s888_s5, %s815_s25 }
  0x95   : > { %v517_v51 = vld [vmem:[%s294_s7] sm:$0xff]  ;;  %v518_v57 = vld [vmem:[%s294_s7 + $0x8] sm:$0xff] }
  0x98   : > { %350 = vrot.lane.b32.xlu1 %v724_v13, %s755_s8  ;;  %347 = vrot.lane.b32.xlu0 %v724_v13, %s756_s9 }
  0x9c   : > { %365 = vperm.xlu1 %722, %v361_v14   ;;  %370 = vperm.xlu0 %723, %v362_v15  }
 0x106   : > { %v357_v17 = vpop.permute.xlu0 %356  ;;  %v354_v18 = vpop.permute.xlu1 %353 }
 0x107   : > { %660 = vmatpush3.bf16.msra.mxu0 %v357_v17 }
 0x108   : > { %661 = vmatprep.subr.bf16.mxu0 %v752_v7 }
 0x10a   : > { %v351_v19 = vpop.permute.xlu1 %350  ;;  %v348_v20 = vpop.permute.xlu0 %347 }
 0x10b   : > { %662 = vmatpush3.bf16.msra.mxu0 %v354_v18 }
 0x10c   : > { %663 = vmatprep.subr.bf16.mxu0 %v752_v7 }
 0x10f   : > { %664 = vmatpush3.bf16.msra.mxu0 %v351_v19 }
 0x110   : > { %665 = vmatprep.subr.bf16.mxu0 %v752_v7 }
 0x113   : > { %666 = vmatpush3.bf16.msra.mxu0 %v348_v20 }
 0x114   : > { %667 = vmatprep.subr.bf16.mxu0 %v752_v7 }
 0x117   : > { %668 = vmatpush3.bf16.msra.mxu0 %v724_v13  ;;  %v366_v24 = vpop.permute.xlu1 %365  ;;  %v371_v29 = vpop.permute.xlu0 %370 }
 0x11a   : > { %670 = vmatmul.mubr.msk.bf16.vlgmr.msra.gmra.mxu0 %vm378_vm6, %v725_v21 }
 0x1da   : > { %v416_v25 = vpop.f32.mrf.mxu0 }
 0x1db   : > { %v417_v27 = vadd.f32 %v416_v25, %v366_v24 }
 0x1dc   : > { %v671_v28 = vpop.f32.mrf.mxu0 }
 0x1dd   : > { %v425_v30 = vmul.f32 0.1, %v417_v27  ;;  %vm423_vm7 = vcmp.gt.f32.partialorder %v417_v27, 0.0 }
 0x1de   : > { %v419_v31 = vpop.f32.mrf.mxu0 }
 0x1df   : > { %v420_v32 = vadd.f32 %v419_v31, %v371_v29  ;;  %v427_v34 = vsel %vm423_vm7, %v417_v27, %v425_v30 }
 0x1e0   : > { %v672_v33 = vpop.f32.mrf.mxu0  ;;  %v438_v38 = vsel %vm840_vm10, %v427_v34, 0.0 }
 0x1e1   : > { %vm424_vm11 = vcmp.gt.f32.partialorder %v420_v32, 0.0  ;;  %v426_v36 = vmul.f32 0.1, %v420_v32 }
 0x1e3   : > { %v428_v37 = vsel %vm424_vm11, %v420_v32, %v426_v36 }
 0x1e4   : > { %v439_v39 = vsel %vm840_vm10, %v428_v37, 0.0  ;;  %v639_v40 = vpack.c.bf16 %v428_v37, %v427_v34 }
 0x1e5   : > { %v440_v41 = vpack.c.bf16 %v439_v39, %v438_v38 }
 0x1e7   : > { %445 = vrot.lane.b32.xlu0 %v440_v41, %s759_s16  ;;  %451 = vrot.lane.b32.xlu1 %v440_v41, %s760_s17 }
 0x1eb   : > { %460 = vperm.xlu0 %723, %v456_v42   ;;  %448 = vrot.lane.b32.xlu1 %v440_v41, %s756_s9 }
 0x1ef   : > { %442 = vrot.lane.b32.xlu1 %v440_v41, %s761_s20 }
 0x1f3   : > { %465 = vperm.xlu1 %722, %v457_v43  }
 0x259   : > { %v452_v44 = vpop.permute.xlu1 %451  ;;  %v446_v46 = vpop.permute.xlu0 %445 }
 0x25a   : > { %674 = vmatpush3.bf16.msra.mxu1 %v452_v44 }
 0x25b   : > { %675 = vmatprep.subr.bf16.mxu1 %v752_v7 }
 0x25d   : > { %v449_v45 = vpop.permute.xlu1 %448 }
 0x25e   : > { %676 = vmatpush3.bf16.msra.mxu1 %v449_v45 }
 0x25f   : > { %677 = vmatprep.subr.bf16.mxu1 %v752_v7 }
 0x261   : > { %v443_v47 = vpop.permute.xlu1 %442 }
 0x262   : > { %678 = vmatpush3.bf16.msra.mxu1 %v446_v46 }
 0x263   : > { %679 = vmatprep.subr.bf16.mxu1 %v752_v7 }
 0x266   : > { %680 = vmatpush3.bf16.msra.mxu1 %v443_v47  ;;  %v461_v49 = vpop.permute.xlu0 %460 }
 0x267   : > { %681 = vmatprep.subr.bf16.mxu1 %v752_v7 }
 0x26a   : > { %682 = vmatpush3.bf16.msk.msra.mxu1 %vm638_vm12, %v639_v40 }
 0x26d   : > { %684 = vmatmul.mubr.msk.bf16.vlgmr.msra.gmra.mxu1 %vm378_vm6, %v726_v48 }
 0x26e   : > { %v466_v55 = vpop.permute.xlu1 %465 }
 0x32d   : > { %v510_v50 = vpop.f32.mrf.mxu1 }
 0x32e   : > { %v511_v52 = vadd.f32 %v510_v50, %v461_v49 }
 0x32f   : > { %v685_v53 = vpop.f32.mrf.mxu1 }
 0x330   : > { %v519_v54 = vadd.f32 %v517_v51, %v511_v52 }
 0x331   : > { %v513_v56 = vpop.f32.mrf.mxu1 }
 0x332   : > { %522 = vst.msk [vmem:[%s302_s10] sm:$0xff] %vm521_vm13, %v519_v54  ;;  %v514_v58 = vadd.f32 %v513_v56, %v466_v55 }
 0x333   : > { %v686_v59 = vpop.f32.mrf.mxu1 }
 0x334   : > { %v520_v60 = vadd.f32 %v518_v57, %v514_v58 }
 0x336   : > { %523 = vst.msk [vmem:[%s302_s10 + $0x8] sm:$0xff] %vm521_vm13, %v520_v60 }
 0x337 PF: > { %s16_s23 = sadd.s32 1, %s749_s23   ;;  %s892_s21 = smov %s745_s22 }
 0x338   : > { %p13_p5 = scmp.ge.s32.totalorder %s16_s23, 4   ;;  %s893_s22 = smov %s895_s24 }
 0x33a   :  { %15 = sbr.rel (!%p13_p5) target bundleno = 2 (0x2), region = 82 }

// kernel: run.23
= control target key start
LH: loop header
LB: loop body
LE: loop exit
PB: predicated region body
PF: predicated region fallthrough
CT: control target
= control target key end

     0   :  { %s907_s24 = smov 0   ;;  %s909_s25 = smov 0   ;;  %s998_s0 = inlined_call_operand.vmem [shape: f32[2,16,16], index: 0, kind: input, shape index: {}, may-alias: {0,5}]   ;;  %s999_s1 = inlined_call_operand.vmem [shape: bf16[16,80], index: 1, kind: input, shape index: {}]   ;;  %s1000_s2 = inlined_call_operand.vmem [shape: f32[16,1], index: 2, kind: input, shape index: {}]   ;;  %s1001_s3 = inlined_call_operand.vmem [shape: bf16[16,80], index: 3, kind: input, shape index: {}]   ;;  %s1002_s4 = inlined_call_operand.vmem [shape: f32[16,1], index: 4, kind: input, shape index: {}]   ;;  %s1003_s5 = inlined_call_operand.vmem [shape: f32[2,16,16], index: 5, kind: input, shape index: {}, may-alias: {0,5}]   ;;  %s1004_s6 = inlined_call_operand.vmem [shape: f32[2,16,16], index: 6, kind: input, shape index: {}]   ;;  %s1005_s7 = inlined_call_operand.vmem [shape: bf16[2,16,16], index: 7, kind: output, shape index: {}]  }
   0x1   :  { %s911_s26 = smov 0  }
   0x2 LB: > { %s29_s27 = sadd.s32 1, %s849_s25  ;;  %p721_p0 = scmp.ge.s32.totalorder %s853_s26, 1  ;;  %s853_s26 = sphi %s911_s26, %s17_s26   ;;  %s849_s25 = sphi %s909_s25, %s1009_s25   ;;  %s845_s24 = sphi %s907_s24, %s1008_s24  }
   0x3   : > { %p31_p1 = scmp.ge.s32.totalorder %s29_s27, 2  ;;  %p281_p2 = scmp.lt.s32.totalorder %s853_s26, 3 }
   0x5   : > { %s1011_s27 = smov (%p31_p1, %s29_s27), 0  ;;  %p282_p3 = pnand %p721_p0, %p281_p2 }
   0x6   : > { %p332_p4 = scmp.lt.s32.totalorder (!%p282_p3), %s845_s24, 1  ;;  %s855_s9 = smov (!%p282_p3), 12  }
   0x7   : > { %285 = sbr.rel (%p282_p3) target bundleno = 832 (0x340), region = 48  ;;  %s857_s10 = smov (!%p282_p3), 113  }
   0x8   : > { %s858_s11 = smov (!%p282_p3), 108   ;;  %s859_s12 = smov (!%p282_p3), 118  }
   0x9   : > { %s860_s13 = smov (!%p282_p3), 123   ;;  %s863_s20 = smov (!%p282_p3), 126  }
   0xa   : > { %s864_s21 = smov (!%p282_p3), 124   ;;  %s865_s29 = smov (!%p282_p3), 125  }
   0xb   : > { %s866_s30 = smov (!%p282_p3), 127  }
   0xc   : > { %s1013_s24 = smov (!%p332_p4, %s845_s24), 1  ;;  %v856_v7 = vmov 0.0   ;;  %vm378_vm2 = vcmask 97280   ;;  %vm382_vm3 = vcmask 228352   ;;  %vm391_vm4 = vcmask 322560   ;;  %v419_v14 = vld [vmem:[%s1000_s2] sm:$0xff] }
   0xd   : > { %s928_s28 = sshll.u32 %s1013_s24, 4  ;;  %762 = vmatprep.subr.bf16.mxu0 %v856_v7  ;;  %776 = vmatprep.subr.bf16.mxu1 %v856_v7  ;;  %vm861_vm5 = vmmov 0   ;;  %v420_v15 = vld [vmem:[%s1000_s2 + $0x8] sm:$0xff]  ;;  %v862_v16 = vmov 0   ;;  %v829_v21 = vld [vmem:[%s999_s1] sm:$0xff]   ;;  %vm436_vm6 = vcmask 654336   ;;  %v487_v22 = vlaneseq }
   0xe   : > { %s336_s8 = scalar_lea.vmem %s998_s0, %s928_s28  ;;  %772 = vmatprep.mubr.msk.bf16.mxu0 %vm861_vm5, %v856_v7  ;;  %786 = vmatprep.mubr.msk.bf16.mxu1 %vm861_vm5, %v856_v7  ;;  %v514_v42 = vld [vmem:[%s1002_s4] sm:$0xff]  ;;  %v515_v43 = vld [vmem:[%s1002_s4 + $0x8] sm:$0xff]  ;;  %s344_s14 = scalar_lea.vmem %s1003_s5, %s928_s28  ;;  %vm599_vm14 = vcmask 125952  }
   0xf   : > { %v366_v0 = vld [vmem:[%s336_s8] sm:$0xff]  ;;  %v367_v1 = vld [vmem:[%s336_s8 + $0x8] sm:$0xff]  ;;  %826 = vset.pattern.permute.xlu1 %v862_v16  ;;  %827 = vset.pattern.permute.xlu0 %v862_v16  ;;  %v488_v23 = vand.u32 127, %v487_v22  ;;  %s352_s17 = scalar_lea.vmem %s1004_s6, %s928_s28  ;;  %s747_s18 = sshll.u32 %s1013_s24, 3 }
  0x10   : > { %vm368_vm0 = vcmp.gt.f32.partialorder %v366_v0, 0.0  ;;  %vm369_vm1 = vcmp.gt.f32.partialorder %v367_v1, 0.0  ;;  %v370_v2 = vmul.f32 0.1, %v366_v0  ;;  %v371_v3 = vmul.f32 0.1, %v367_v1 }
  0x11   : > { %v492_v26 = vadd.s32 4294967294, %v488_v23  ;;  %v830_v48 = vld [vmem:[%s1001_s3] sm:$0xff]   ;;  %v576_v58 = vld [vmem:[%s344_s14 + $0x8] sm:$0xff] }
  0x12   : > { %v372_v4 = vsel %vm368_vm0, %v366_v0, %v370_v2  ;;  %v373_v5 = vsel %vm369_vm1, %v367_v1, %v371_v3  ;;  %v575_v51 = vld [vmem:[%s344_s14] sm:$0xff]  ;;  %v580_v61 = vld [vmem:[%s352_s17 + $0x8] sm:$0xff] }
  0x13   : > { %v374_v6 = vpack.c.bf16 %v373_v5, %v372_v4  ;;  %vm493_vm8 = vcmp.ge.s32.totalorder %v492_v26, 0  ;;  %vm494_vm9 = vcmp.lt.s32.totalorder %v492_v26, 16  ;;  %v579_v53 = vld [vmem:[%s352_s17] sm:$0xff] }
  0x14   : > { %vm952_vm10 = vmand %vm493_vm8, %vm494_vm9 }
  0x15   : > { %376 = vrot.lane.b32.xlu0 %v374_v6, %s855_s9  ;;  %vm736_vm12 = vmpackc.low %vm952_vm10, %vm952_vm10 }
  0x87   : > { %v377_v8 = vpop.permute.xlu0 %376 }
  0x88   : > { %v381_v9 = vsel %vm378_vm2, 0, %v377_v8 }
  0x89   : > { %v383_v10 = vsel %vm382_vm3, %v381_v9, 0 }
  0x8a   : > { %v730_v11 = vcombine.low %v383_v10, %v383_v10  ;;  %v731_v12 = vcombine.high %v383_v10, %v383_v10 }
  0x8c   : > { %392 = vst.msk [vmem:[#allocation2] sm:$0xf] %vm391_vm4, %v730_v11  ;;  %393 = vst.msk [vmem:[#allocation2 + $0x4] sm:$0xf] %vm391_vm4, %v731_v12 }
  0x93   : > { %v828_v13 = vld [vmem:[#allocation2] sm:$0xff]  }
  0x94   : > { %411 = vrot.lane.b32.xlu1 %v828_v13, %s857_s10  ;;  %414 = vrot.lane.b32.xlu0 %v828_v13, %s858_s11 }
  0x98   : > { %408 = vrot.lane.b32.xlu1 %v828_v13, %s859_s12  ;;  %405 = vrot.lane.b32.xlu0 %v828_v13, %s860_s13 }
  0x9c   : > { %423 = vperm.xlu1 %826, %v419_v14   ;;  %428 = vperm.xlu0 %827, %v420_v15  }
 0x106   : > { %v415_v17 = vpop.permute.xlu0 %414  ;;  %v412_v18 = vpop.permute.xlu1 %411 }
 0x107   : > { %763 = vmatpush3.bf16.msra.mxu0 %v415_v17 }
 0x108   : > { %764 = vmatprep.subr.bf16.mxu0 %v856_v7 }
 0x10a   : > { %v409_v19 = vpop.permute.xlu1 %408  ;;  %v406_v20 = vpop.permute.xlu0 %405 }
 0x10b   : > { %765 = vmatpush3.bf16.msra.mxu0 %v412_v18 }
 0x10c   : > { %766 = vmatprep.subr.bf16.mxu0 %v856_v7 }
 0x10f   : > { %767 = vmatpush3.bf16.msra.mxu0 %v409_v19 }
 0x110   : > { %768 = vmatprep.subr.bf16.mxu0 %v856_v7 }
 0x113   : > { %769 = vmatpush3.bf16.msra.mxu0 %v406_v20 }
 0x114   : > { %770 = vmatprep.subr.bf16.mxu0 %v856_v7 }
 0x117   : > { %771 = vmatpush3.bf16.msra.mxu0 %v828_v13  ;;  %v424_v24 = vpop.permute.xlu1 %423  ;;  %v429_v29 = vpop.permute.xlu0 %428 }
 0x11a   : > { %773 = vmatmul.mubr.msk.bf16.vlgmr.msra.gmra.mxu0 %vm436_vm6, %v829_v21 }
 0x1da   : > { %v474_v25 = vpop.f32.mrf.mxu0 }
 0x1db   : > { %v475_v27 = vadd.f32 %v474_v25, %v424_v24 }
 0x1dc   : > { %v774_v28 = vpop.f32.mrf.mxu0 }
 0x1dd   : > { %v483_v30 = vmul.f32 0.1, %v475_v27  ;;  %vm481_vm7 = vcmp.gt.f32.partialorder %v475_v27, 0.0 }
 0x1de   : > { %v477_v31 = vpop.f32.mrf.mxu0 }
 0x1df   : > { %v478_v32 = vadd.f32 %v477_v31, %v429_v29  ;;  %v485_v34 = vsel %vm481_vm7, %v475_v27, %v483_v30 }
 0x1e0   : > { %v775_v33 = vpop.f32.mrf.mxu0  ;;  %v496_v38 = vsel %vm952_vm10, %v485_v34, 0.0 }
 0x1e1   : > { %vm482_vm11 = vcmp.gt.f32.partialorder %v478_v32, 0.0  ;;  %v484_v36 = vmul.f32 0.1, %v478_v32 }
 0x1e3   : > { %v486_v37 = vsel %vm482_vm11, %v478_v32, %v484_v36 }
 0x1e4   : > { %v497_v39 = vsel %vm952_vm10, %v486_v37, 0.0  ;;  %v737_v40 = vpack.c.bf16 %v486_v37, %v485_v34 }
 0x1e5   : > { %v498_v41 = vpack.c.bf16 %v497_v39, %v496_v38 }
 0x1e7   : > { %503 = vrot.lane.b32.xlu0 %v498_v41, %s863_s20  ;;  %509 = vrot.lane.b32.xlu1 %v498_v41, %s864_s21  ;;  %s360_s20 = scalar_lea.vmem %s1005_s7, %s747_s18 }
 0x1eb   : > { %518 = vperm.xlu0 %827, %v514_v42   ;;  %506 = vrot.lane.b32.xlu1 %v498_v41, %s865_s29 }
 0x1ef   : > { %500 = vrot.lane.b32.xlu1 %v498_v41, %s866_s30 }
 0x1f3   : > { %523 = vperm.xlu1 %826, %v515_v43  }
 0x259   : > { %v510_v44 = vpop.permute.xlu1 %509  ;;  %v504_v46 = vpop.permute.xlu0 %503 }
 0x25a   : > { %777 = vmatpush3.bf16.msra.mxu1 %v510_v44 }
 0x25b   : > { %778 = vmatprep.subr.bf16.mxu1 %v856_v7 }
 0x25d   : > { %v507_v45 = vpop.permute.xlu1 %506 }
 0x25e   : > { %779 = vmatpush3.bf16.msra.mxu1 %v507_v45 }
 0x25f   : > { %780 = vmatprep.subr.bf16.mxu1 %v856_v7 }
 0x261   : > { %v501_v47 = vpop.permute.xlu1 %500 }
 0x262   : > { %781 = vmatpush3.bf16.msra.mxu1 %v504_v46 }
 0x263   : > { %782 = vmatprep.subr.bf16.mxu1 %v856_v7 }
 0x266   : > { %783 = vmatpush3.bf16.msra.mxu1 %v501_v47  ;;  %v519_v49 = vpop.permute.xlu0 %518 }
 0x267   : > { %784 = vmatprep.subr.bf16.mxu1 %v856_v7 }
 0x26a   : > { %785 = vmatpush3.bf16.msk.msra.mxu1 %vm736_vm12, %v737_v40 }
 0x26d   : > { %787 = vmatmul.mubr.msk.bf16.vlgmr.msra.gmra.mxu1 %vm436_vm6, %v830_v48 }
 0x26e   : > { %v524_v56 = vpop.permute.xlu1 %523 }
 0x32d   : > { %v568_v50 = vpop.f32.mrf.mxu1 }
 0x32e   : > { %v569_v52 = vadd.f32 %v568_v50, %v519_v49 }
 0x32f   : > { %v788_v54 = vpop.f32.mrf.mxu1 }
 0x330   : > { %v577_v55 = vadd.f32 %v575_v51, %v569_v52 }
 0x331   : > { %v571_v57 = vpop.f32.mrf.mxu1 }
 0x332   : > { %v581_v59 = vadd.f32 %v579_v53, %v577_v55  ;;  %v572_v60 = vadd.f32 %v571_v57, %v524_v56 }
 0x333   : > { %v789_v62 = vpop.f32.mrf.mxu1 }
 0x334   : > { %v583_v63 = vmul.f32 0.5, %v581_v59  ;;  %v578_v0 = vadd.f32 %v576_v58, %v572_v60 }
 0x336   : > { %vm585_vm13 = vcmp.gt.f32.partialorder %v583_v63, 0.0  ;;  %v587_v1 = vmul.f32 0.1, %v583_v63  ;;  %v582_v2 = vadd.f32 %v580_v61, %v578_v0 }
 0x338   : > { %v589_v3 = vsel %vm585_vm13, %v583_v63, %v587_v1  ;;  %v584_v4 = vmul.f32 0.5, %v582_v2 }
 0x339   : > { %v748_v5 = vpack.c.bf16 %v589_v3, %v589_v3 }
 0x33a   : > { %vm586_vm15 = vcmp.gt.f32.partialorder %v584_v4, 0.0  ;;  %v588_v6 = vmul.f32 0.1, %v584_v4 }
 0x33b   : > { %600 = vst.msk [vmem:[%s360_s20] sm:$0xf] %vm599_vm14, %v748_v5 }
 0x33c   : > { %v590_v7 = vsel %vm586_vm15, %v584_v4, %v588_v6 }
 0x33d   : > { %v749_v8 = vpack.c.bf16 %v590_v7, %v590_v7 }
 0x33f   : > { %601 = vst.msk [vmem:[%s360_s20 + $0x4] sm:$0xf] %vm599_vm14, %v749_v8 }
 0x340 PF: > { %s17_s26 = sadd.s32 1, %s853_s26   ;;  %s1008_s24 = smov %s849_s25 }
 0x341   : > { %p14_p5 = scmp.ge.s32.totalorder %s17_s26, 4   ;;  %s1009_s25 = smov %s1011_s27 }
 0x343   :  { %16 = sbr.rel (!%p14_p5) target bundleno = 2 (0x2), region = 89 }

// kernel: run.24
= control target key start
LH: loop header
LB: loop body
LE: loop exit
PB: predicated region body
PF: predicated region fallthrough
CT: control target
= control target key end

     0   :  { %s502_s12 = smov 0   ;;  %s504_s13 = smov 0   ;;  %s548_s0 = inlined_call_operand.vmem [shape: bf16[2,16,16], index: 0, kind: input, shape index: {}]   ;;  %s549_s1 = inlined_call_operand.vmem [shape: bf16[16,48], index: 1, kind: input, shape index: {}]   ;;  %s550_s2 = inlined_call_operand.vmem [shape: f32[16,1], index: 2, kind: input, shape index: {}]   ;;  %s551_s3 = inlined_call_operand.vmem [shape: f32[2,16,16], index: 3, kind: output, shape index: {}]  }
   0x1   :  { %s506_s14 = smov 0  }
   0x2 LB: > { %s25_s15 = sadd.s32 1, %s470_s13  ;;  %p388_p0 = scmp.ge.s32.totalorder %s474_s14, 1  ;;  %s474_s14 = sphi %s506_s14, %s13_s14   ;;  %s470_s13 = sphi %s504_s13, %s553_s13   ;;  %s466_s12 = sphi %s502_s12, %s552_s12  }
   0x3   : > { %p27_p1 = scmp.ge.s32.totalorder %s25_s15, 2  ;;  %p151_p2 = scmp.lt.s32.totalorder %s474_s14, 3 }
   0x5   : > { %s555_s15 = smov (%p27_p1, %s25_s15), 0  ;;  %p152_p3 = pnand %p388_p0, %p151_p2 }
   0x6   : > { %p178_p4 = scmp.lt.s32.totalorder (!%p152_p3), %s466_s12, 1  ;;  %s476_s20 = smov (!%p152_p3), 1  }
   0x7   : > { %155 = sbr.rel (%p152_p3) target bundleno = 469 (0x1d5), region = 32  ;;  %s480_s21 = smov (!%p152_p3), 127  }
   0x8   : > { %s481_s22 = smov (!%p152_p3), 126  }
   0xc   : > { %s557_s12 = smov (!%p178_p4, %s466_s12), 1  ;;  %v477_v1 = vmov 0.0   ;;  %vm205_vm0 = vcmask 7168   ;;  %vm209_vm1 = vcmask 138240   ;;  %vm218_vm2 = vcmask 142336   ;;  %v240_v9 = vld [vmem:[%s550_s2] sm:$0xff] }
   0xd   : > { %s401_s16 = sshll.u32 %s557_s12, 3  ;;  %407 = vmatprep.subr.bf16.mxu0 %v477_v1  ;;  %vm478_vm3 = vmmov 0   ;;  %v479_v8 = vmov 0   ;;  %v241_v10 = vld [vmem:[%s550_s2 + $0x8] sm:$0xff]  ;;  %v451_v13 = vld [vmem:[%s549_s1] sm:$0xff]   ;;  %vm257_vm4 = vcmask 392192  }
   0xe   : > { %s182_s19 = scalar_lea.vmem %s548_s0, %s401_s16  ;;  %413 = vmatprep.mubr.msk.bf16.mxu0 %vm478_vm3, %v477_v1  ;;  %447 = vset.pattern.permute.xlu1 %v479_v8  ;;  %s402_s29 = sshll.u32 %s557_s12, 4  ;;  %vm302_vm5 = vcmask 130048  }
   0xf   : > { %v449_v0 = vld [vmem:[%s182_s19] sm:$0xff]   ;;  %448 = vset.pattern.permute.xlu0 %v479_v8  ;;  %s190_s5 = scalar_lea.vmem %s551_s3, %s402_s29 }
  0x10   : > { %203 = vrot.lane.b32.xlu0 %v449_v0, %s476_s20 }
  0x82   : > { %v204_v2 = vpop.permute.xlu0 %203 }
  0x83   : > { %v208_v3 = vsel %vm205_vm0, 0, %v204_v2 }
  0x84   : > { %v210_v4 = vsel %vm209_vm1, %v208_v3, 0 }
  0x85   : > { %v394_v5 = vcombine.low %v210_v4, %v210_v4  ;;  %v395_v6 = vcombine.high %v210_v4, %v210_v4 }
  0x87   : > { %219 = vst.msk [vmem:[#allocation2] sm:$0xf] %vm218_vm2, %v394_v5  ;;  %220 = vst.msk [vmem:[#allocation2 + $0x4] sm:$0xf] %vm218_vm2, %v395_v6 }
  0x8e   : > { %v450_v7 = vld [vmem:[#allocation2] sm:$0xff]  }
  0x8f   : > { %232 = vrot.lane.b32.xlu1 %v450_v7, %s480_s21  ;;  %235 = vrot.lane.b32.xlu0 %v450_v7, %s481_s22 }
  0x93   : > { %244 = vperm.xlu1 %447, %v240_v9   ;;  %249 = vperm.xlu0 %448, %v241_v10  }
 0x101   : > { %v236_v11 = vpop.permute.xlu0 %235  ;;  %v233_v12 = vpop.permute.xlu1 %232 }
 0x102   : > { %408 = vmatpush3.bf16.msra.mxu0 %v236_v11 }
 0x103   : > { %409 = vmatprep.subr.bf16.mxu0 %v477_v1 }
 0x106   : > { %410 = vmatpush3.bf16.msra.mxu0 %v233_v12 }
 0x107   : > { %411 = vmatprep.subr.bf16.mxu0 %v477_v1 }
 0x10a   : > { %412 = vmatpush3.bf16.msra.mxu0 %v450_v7 }
 0x10d   : > { %414 = vmatmul.mubr.msk.bf16.vlgmr.msra.gmra.mxu0 %vm257_vm4, %v451_v13 }
 0x10e   : > { %v245_v14 = vpop.permute.xlu1 %244  ;;  %v250_v18 = vpop.permute.xlu0 %249 }
 0x1cd   : > { %v295_v15 = vpop.f32.mrf.mxu0 }
 0x1ce   : > { %v296_v16 = vadd.f32 %v295_v15, %v245_v14 }
 0x1cf   : > { %v415_v17 = vpop.f32.mrf.mxu0 }
 0x1d0   : > { %303 = vst.msk [vmem:[%s190_s5] sm:$0xff] %vm302_vm5, %v296_v16 }
 0x1d1   : > { %v298_v19 = vpop.f32.mrf.mxu0 }
 0x1d2   : > { %v299_v20 = vadd.f32 %v298_v19, %v250_v18 }
 0x1d3   : > { %v416_v21 = vpop.f32.mrf.mxu0 }
 0x1d4   : > { %304 = vst.msk [vmem:[%s190_s5 + $0x8] sm:$0xff] %vm302_vm5, %v299_v20 }
 0x1d5 PF: > { %s13_s14 = sadd.s32 1, %s474_s14   ;;  %s552_s12 = smov %s470_s13 }
 0x1d6   : > { %p10_p5 = scmp.ge.s32.totalorder %s13_s14, 4   ;;  %s553_s13 = smov %s555_s15 }
 0x1d8   :  { %12 = sbr.rel (!%p10_p5) target bundleno = 2 (0x2), region = 67 }

// kernel: run.25
= control target key start
LH: loop header
LB: loop body
LE: loop exit
PB: predicated region body
PF: predicated region fallthrough
CT: control target
= control target key end

     0   :  { %s688_s21 = smov 0   ;;  %s690_s22 = smov 0   ;;  %s751_s0 = inlined_call_operand.vmem [shape: f32[2,8,32], index: 0, kind: input, shape index: {}, may-alias: {0,5}]   ;;  %s752_s1 = inlined_call_operand.vmem [shape: bf16[8,24], index: 1, kind: input, shape index: {}]   ;;  %s753_s2 = inlined_call_operand.vmem [shape: f32[8,1], index: 2, kind: input, shape index: {}]   ;;  %s754_s3 = inlined_call_operand.vmem [shape: bf16[8,24], index: 3, kind: input, shape index: {}]   ;;  %s755_s4 = inlined_call_operand.vmem [shape: f32[8,1], index: 4, kind: input, shape index: {}]   ;;  %s756_s5 = inlined_call_operand.vmem [shape: f32[2,8,32], index: 5, kind: input, shape index: {}, may-alias: {0,5}]   ;;  %s757_s6 = inlined_call_operand.vmem [shape: f32[2,8,32], index: 6, kind: output, shape index: {}]  }
   0x1   :  { %s692_s23 = smov 0  }
   0x2 LB: > { %s28_s24 = sadd.s32 1, %s641_s22  ;;  %p559_p0 = scmp.ge.s32.totalorder %s645_s23, 1  ;;  %s645_s23 = sphi %s692_s23, %s16_s23   ;;  %s641_s22 = sphi %s690_s22, %s759_s22   ;;  %s637_s21 = sphi %s688_s21, %s758_s21  }
   0x3   : > { %p30_p1 = scmp.ge.s32.totalorder %s28_s24, 2  ;;  %p239_p2 = scmp.lt.s32.totalorder %s645_s23, 3 }
   0x5   : > { %s761_s24 = smov (%p30_p1, %s28_s24), 0  ;;  %p240_p3 = pnand %p559_p0, %p239_p2 }
   0x6   : > { %p277_p4 = scmp.lt.s32.totalorder (!%p240_p3), %s637_s21, 1  ;;  %s647_s29 = smov (!%p240_p3), 2  }
   0x7   : > { %243 = sbr.rel (%p240_p3) target bundleno = 794 (0x31a), region = 44  ;;  %s651_s30 = smov (!%p240_p3), 127  }
   0x8   : > { %s652_s7 = smov (!%p240_p3), 126  }
   0xc   : > { %s763_s21 = smov (!%p277_p4, %s637_s21), 1  ;;  %vm308_vm1 = vcmask 15360   ;;  %vm312_vm2 = vcmask 277504   ;;  %vm315_vm3 = vcmask 289792   ;;  %v648_v5 = vmov 0.0   ;;  %v333_v11 = vld [vmem:[%s753_s2] sm:$0xff] }
   0xd   : > { %s706_s25 = sshll.u32 %s763_s21, 3  ;;  %574 = vmatprep.subr.bf16.mxu0 %v648_v5  ;;  %582 = vmatprep.subr.bf16.mxu1 %v648_v5  ;;  %vm649_vm4 = vmmov 0   ;;  %v650_v8 = vmov 0   ;;  %vm327_vm5 = vcmask 1043456   ;;  %v332_v16 = vld [vmem:[%s752_s1] sm:$0xf]  ;;  %v389_v17 = vlaneseq }
   0xe   : > { %s280_s28 = scalar_lea.vmem %s751_s0, %s706_s25  ;;  %578 = vmatprep.mubr.msk.bf16.mxu0 %vm649_vm4, %v648_v5  ;;  %586 = vmatprep.mubr.msk.bf16.mxu1 %vm649_vm4, %v648_v5  ;;  %vm339_vm6 = vcmask 195584   ;;  %v411_v31 = vld [vmem:[%s755_s4] sm:$0xff]  ;;  %s287_s18 = scalar_lea.vmem %s756_s5, %s706_s25  ;;  %vm465_vm11 = vcmask 261120  }
   0xf   : > { %v300_v0 = vld [vmem:[%s280_s28] sm:$0xff]  ;;  %620 = vset.pattern.permute.xlu1 %v650_v8  ;;  %621 = vset.pattern.permute.xlu0 %v650_v8  ;;  %v390_v18 = vand.u32 127, %v389_v17  ;;  %s294_s21 = scalar_lea.vmem %s757_s6, %s706_s25 }
  0x10   : > { %vm301_vm0 = vcmp.gt.f32.partialorder %v300_v0, 0.0  ;;  %v302_v1 = vmul.f32 0.1, %v300_v0  ;;  %v410_v36 = vld [vmem:[%s754_s3] sm:$0xf] }
  0x11   : > { %v394_v19 = vadd.s32 4294967295, %v390_v18  ;;  %v463_v39 = vld [vmem:[%s287_s18] sm:$0xff] }
  0x12   : > { %v303_v2 = vsel %vm301_vm0, %v300_v0, %v302_v1 }
  0x13   : > { %v304_v3 = vpack.c.bf16 %v303_v2, %v303_v2  ;;  %vm395_vm7 = vcmp.ge.s32.totalorder %v394_v19, 0  ;;  %vm396_vm8 = vcmp.lt.s32.totalorder %v394_v19, 32 }
  0x14   : > { %vm397_vm10 = vmand %vm395_vm7, %vm396_vm8 }
  0x15   : > { %306 = vrot.lane.b32.xlu0 %v304_v3, %s647_s29 }
  0x87   : > { %v307_v4 = vpop.permute.xlu0 %306 }
  0x88   : > { %v311_v6 = vsel %vm308_vm1, 0, %v307_v4 }
  0x89   : > { %v313_v7 = vsel %vm312_vm2, %v311_v6, 0 }
  0x8a   : > { %316 = vst.msk [vmem:[#allocation2] sm:$0xf] %vm315_vm3, %v313_v7 }
  0x91   : > { %v319_v9 = vld [vmem:[#allocation2] sm:$0xf] }
  0x92   : > { %v563_v10 = vcombine.low %v319_v9, %v319_v9 }
  0x94   : > { %323 = vrot.lane.b32.xlu1 %v563_v10, %s651_s30  ;;  %325 = vrot.lane.b32.xlu0 %v563_v10, %s652_s7 }
  0x98   : > { %336 = vperm.xlu1 %620, %v333_v11  }
 0x106   : > { %v326_v12 = vpop.permute.xlu0 %325  ;;  %v324_v14 = vpop.permute.xlu1 %323 }
 0x107   : > { %v344_v13 = vsel %vm327_vm5, %v326_v12, 0  ;;  %v330_v15 = vsel %vm327_vm5, %v319_v9, %v324_v14 }
 0x108   : > { %575 = vmatpush3.bf16.msra.mxu0 %v344_v13 }
 0x109   : > { %576 = vmatprep.subr.bf16.mxu0 %v648_v5 }
 0x10c   : > { %577 = vmatpush3.bf16.msra.mxu0 %v330_v15 }
 0x10f   : > { %579 = vmatmul.mubr.msk.bf16.vlgmr.msra.gmra.mxu0 %vm339_vm6, %v332_v16 }
 0x113   : > { %v337_v20 = vpop.permute.xlu1 %336 }
 0x1cf   : > { %v380_v21 = vpop.f32.mrf.mxu0 }
 0x1d0   : > { %v381_v22 = vadd.f32 %v380_v21, %v337_v20 }
 0x1d1   : > { %v580_v23 = vpop.f32.mrf.mxu0 }
 0x1d2   : > { %vm386_vm9 = vcmp.gt.f32.partialorder %v381_v22, 0.0  ;;  %v387_v24 = vmul.f32 0.1, %v381_v22 }
 0x1d3   : > { %v383_v25 = vpop.f32.mrf.mxu0 }
 0x1d4   : > { %v388_v26 = vsel %vm386_vm9, %v381_v22, %v387_v24 }
 0x1d5   : > { %v581_v27 = vpop.f32.mrf.mxu0  ;;  %v398_v28 = vsel %vm397_vm10, %v388_v26, 0.0 }
 0x1d6   : > { %v399_v29 = vpack.c.bf16 %v398_v28, %v398_v28 }
 0x1d8   : > { %404 = vrot.lane.b32.xlu0 %v399_v29, %s652_s7  ;;  %v401_v30 = vrot.slane %v399_v29, 4 }
 0x1da   : > { %402 = vrot.lane.b32.xlu1 %v401_v30, %s651_s30 }
 0x1dc   : > { %414 = vperm.xlu0 %621, %v411_v31  }
 0x24a   : > { %v405_v32 = vpop.permute.xlu0 %404 }
 0x24b   : > { %v421_v33 = vsel %vm327_vm5, %v405_v32, 0 }
 0x24c   : > { %583 = vmatpush3.bf16.msra.mxu1 %v421_v33  ;;  %v403_v34 = vpop.permute.xlu1 %402 }
 0x24d   : > { %584 = vmatprep.subr.bf16.mxu1 %v648_v5  ;;  %v408_v35 = vsel %vm327_vm5, %v399_v29, %v403_v34 }
 0x250   : > { %585 = vmatpush3.bf16.msra.mxu1 %v408_v35 }
 0x253   : > { %587 = vmatmul.mubr.msk.bf16.vlgmr.msra.gmra.mxu1 %vm339_vm6, %v410_v36 }
 0x257   : > { %v415_v37 = vpop.permute.xlu0 %414 }
 0x313   : > { %v457_v38 = vpop.f32.mrf.mxu1 }
 0x314   : > { %v458_v40 = vadd.f32 %v457_v38, %v415_v37 }
 0x315   : > { %v588_v41 = vpop.f32.mrf.mxu1 }
 0x316   : > { %v464_v42 = vadd.f32 %v463_v39, %v458_v40 }
 0x317   : > { %v460_v43 = vpop.f32.mrf.mxu1 }
 0x318   : > { %466 = vst.msk [vmem:[%s294_s21] sm:$0xff] %vm465_vm11, %v464_v42 }
 0x319   : > { %v589_v44 = vpop.f32.mrf.mxu1 }
 0x31a PF: > { %s16_s23 = sadd.s32 1, %s645_s23   ;;  %s758_s21 = smov %s641_s22 }
 0x31b   : > { %p13_p5 = scmp.ge.s32.totalorder %s16_s23, 4   ;;  %s759_s22 = smov %s761_s24 }
 0x31d   :  { %15 = sbr.rel (!%p13_p5) target bundleno = 2 (0x2), region = 82 }

// kernel: run.26
= control target key start
LH: loop header
LB: loop body
LE: loop exit
PB: predicated region body
PF: predicated region fallthrough
CT: control target
= control target key end

     0   :  { %s692_s21 = smov 0   ;;  %s694_s22 = smov 0   ;;  %s751_s0 = inlined_call_operand.vmem [shape: f32[2,8,32], index: 0, kind: input, shape index: {}, may-alias: {0,5}]   ;;  %s752_s1 = inlined_call_operand.vmem [shape: bf16[8,24], index: 1, kind: input, shape index: {}]   ;;  %s753_s2 = inlined_call_operand.vmem [shape: f32[8,1], index: 2, kind: input, shape index: {}]   ;;  %s754_s3 = inlined_call_operand.vmem [shape: bf16[8,24], index: 3, kind: input, shape index: {}]   ;;  %s755_s4 = inlined_call_operand.vmem [shape: f32[8,1], index: 4, kind: input, shape index: {}]   ;;  %s756_s5 = inlined_call_operand.vmem [shape: f32[2,8,32], index: 5, kind: input, shape index: {}, may-alias: {0,5}]   ;;  %s757_s6 = inlined_call_operand.vmem [shape: f32[2,8,32], index: 6, kind: output, shape index: {}]  }
   0x1   :  { %s696_s23 = smov 0  }
   0x2 LB: > { %s28_s24 = sadd.s32 1, %s643_s22  ;;  %p559_p0 = scmp.ge.s32.totalorder %s647_s23, 1  ;;  %s647_s23 = sphi %s696_s23, %s16_s23   ;;  %s643_s22 = sphi %s694_s22, %s759_s22   ;;  %s639_s21 = sphi %s692_s21, %s758_s21  }
   0x3   : > { %p30_p1 = scmp.ge.s32.totalorder %s28_s24, 2  ;;  %p239_p2 = scmp.lt.s32.totalorder %s647_s23, 3 }
   0x5   : > { %s761_s24 = smov (%p30_p1, %s28_s24), 0  ;;  %p240_p3 = pnand %p559_p0, %p239_p2 }
   0x6   : > { %p277_p4 = scmp.lt.s32.totalorder (!%p240_p3), %s639_s21, 1  ;;  %s649_s29 = smov (!%p240_p3), 4  }
   0x7   : > { %243 = sbr.rel (%p240_p3) target bundleno = 794 (0x31a), region = 44  ;;  %s653_s30 = smov (!%p240_p3), 125  }
   0x8   : > { %s654_s7 = smov (!%p240_p3), 122   ;;  %s655_s12 = smov (!%p240_p3), 126  }
   0x9   : > { %s656_s15 = smov (!%p240_p3), 127  }
   0xc   : > { %s763_s21 = smov (!%p277_p4, %s639_s21), 1  ;;  %vm308_vm1 = vcmask 31744   ;;  %vm312_vm2 = vcmask 293888   ;;  %vm315_vm3 = vcmask 322560   ;;  %v650_v5 = vmov 0.0   ;;  %v333_v11 = vld [vmem:[%s753_s2] sm:$0xff] }
   0xd   : > { %s710_s25 = sshll.u32 %s763_s21, 3  ;;  %574 = vmatprep.subr.bf16.mxu0 %v650_v5  ;;  %582 = vmatprep.subr.bf16.mxu1 %v650_v5  ;;  %vm651_vm4 = vmmov 0   ;;  %v652_v8 = vmov 0   ;;  %vm327_vm5 = vcmask 1043456   ;;  %v332_v16 = vld [vmem:[%s752_s1] sm:$0xf]  ;;  %v389_v17 = vlaneseq }
   0xe   : > { %s280_s28 = scalar_lea.vmem %s751_s0, %s710_s25  ;;  %578 = vmatprep.mubr.msk.bf16.mxu0 %vm651_vm4, %v650_v5  ;;  %586 = vmatprep.mubr.msk.bf16.mxu1 %vm651_vm4, %v650_v5  ;;  %vm339_vm6 = vcmask 195584   ;;  %v411_v31 = vld [vmem:[%s755_s4] sm:$0xff]  ;;  %s287_s20 = scalar_lea.vmem %s756_s5, %s710_s25  ;;  %vm465_vm11 = vcmask 261120  }
   0xf   : > { %v300_v0 = vld [vmem:[%s280_s28] sm:$0xff]  ;;  %622 = vset.pattern.permute.xlu1 %v652_v8  ;;  %623 = vset.pattern.permute.xlu0 %v652_v8  ;;  %v390_v18 = vand.u32 127, %v389_v17  ;;  %s294_s27 = scalar_lea.vmem %s757_s6, %s710_s25 }
  0x10   : > { %vm301_vm0 = vcmp.gt.f32.partialorder %v300_v0, 0.0  ;;  %v302_v1 = vmul.f32 0.1, %v300_v0  ;;  %v410_v36 = vld [vmem:[%s754_s3] sm:$0xf] }
  0x11   : > { %v394_v19 = vadd.s32 4294967295, %v390_v18  ;;  %v463_v39 = vld [vmem:[%s287_s20] sm:$0xff] }
  0x12   : > { %v303_v2 = vsel %vm301_vm0, %v300_v0, %v302_v1 }
  0x13   : > { %v304_v3 = vpack.c.bf16 %v303_v2, %v303_v2  ;;  %vm395_vm7 = vcmp.ge.s32.totalorder %v394_v19, 0  ;;  %vm396_vm8 = vcmp.lt.s32.totalorder %v394_v19, 32 }
  0x14   : > { %vm397_vm10 = vmand %vm395_vm7, %vm396_vm8 }
  0x15   : > { %306 = vrot.lane.b32.xlu0 %v304_v3, %s649_s29 }
  0x87   : > { %v307_v4 = vpop.permute.xlu0 %306 }
  0x88   : > { %v311_v6 = vsel %vm308_vm1, 0, %v307_v4 }
  0x89   : > { %v313_v7 = vsel %vm312_vm2, %v311_v6, 0 }
  0x8a   : > { %316 = vst.msk [vmem:[#allocation2] sm:$0xf] %vm315_vm3, %v313_v7 }
  0x91   : > { %v319_v9 = vld [vmem:[#allocation2] sm:$0xf] }
  0x92   : > { %v563_v10 = vcombine.low %v319_v9, %v319_v9 }
  0x94   : > { %323 = vrot.lane.b32.xlu1 %v563_v10, %s653_s30  ;;  %325 = vrot.lane.b32.xlu0 %v563_v10, %s654_s7 }
  0x98   : > { %336 = vperm.xlu1 %622, %v333_v11  }
 0x106   : > { %v326_v12 = vpop.permute.xlu0 %325  ;;  %v324_v14 = vpop.permute.xlu1 %323 }
 0x107   : > { %v344_v13 = vsel %vm327_vm5, %v326_v12, 0  ;;  %v330_v15 = vsel %vm327_vm5, %v319_v9, %v324_v14 }
 0x108   : > { %575 = vmatpush3.bf16.msra.mxu0 %v344_v13 }
 0x109   : > { %576 = vmatprep.subr.bf16.mxu0 %v650_v5 }
 0x10c   : > { %577 = vmatpush3.bf16.msra.mxu0 %v330_v15 }
 0x10f   : > { %579 = vmatmul.mubr.msk.bf16.vlgmr.msra.gmra.mxu0 %vm339_vm6, %v332_v16 }
 0x113   : > { %v337_v20 = vpop.permute.xlu1 %336 }
 0x1cf   : > { %v380_v21 = vpop.f32.mrf.mxu0 }
 0x1d0   : > { %v381_v22 = vadd.f32 %v380_v21, %v337_v20 }
 0x1d1   : > { %v580_v23 = vpop.f32.mrf.mxu0 }
 0x1d2   : > { %vm386_vm9 = vcmp.gt.f32.partialorder %v381_v22, 0.0  ;;  %v387_v24 = vmul.f32 0.1, %v381_v22 }
 0x1d3   : > { %v383_v25 = vpop.f32.mrf.mxu0 }
 0x1d4   : > { %v388_v26 = vsel %vm386_vm9, %v381_v22, %v387_v24 }
 0x1d5   : > { %v581_v27 = vpop.f32.mrf.mxu0  ;;  %v398_v28 = vsel %vm397_vm10, %v388_v26, 0.0 }
 0x1d6   : > { %v399_v29 = vpack.c.bf16 %v398_v28, %v398_v28 }
 0x1d8   : > { %404 = vrot.lane.b32.xlu0 %v399_v29, %s655_s12  ;;  %v401_v30 = vrot.slane %v399_v29, 4 }
 0x1da   : > { %402 = vrot.lane.b32.xlu1 %v401_v30, %s656_s15 }
 0x1dc   : > { %414 = vperm.xlu0 %623, %v411_v31  }
 0x24a   : > { %v405_v32 = vpop.permute.xlu0 %404 }
 0x24b   : > { %v421_v33 = vsel %vm327_vm5, %v405_v32, 0 }
 0x24c   : > { %583 = vmatpush3.bf16.msra.mxu1 %v421_v33  ;;  %v403_v34 = vpop.permute.xlu1 %402 }
 0x24d   : > { %584 = vmatprep.subr.bf16.mxu1 %v650_v5  ;;  %v408_v35 = vsel %vm327_vm5, %v399_v29, %v403_v34 }
 0x250   : > { %585 = vmatpush3.bf16.msra.mxu1 %v408_v35 }
 0x253   : > { %587 = vmatmul.mubr.msk.bf16.vlgmr.msra.gmra.mxu1 %vm339_vm6, %v410_v36 }
 0x257   : > { %v415_v37 = vpop.permute.xlu0 %414 }
 0x313   : > { %v457_v38 = vpop.f32.mrf.mxu1 }
 0x314   : > { %v458_v40 = vadd.f32 %v457_v38, %v415_v37 }
 0x315   : > { %v588_v41 = vpop.f32.mrf.mxu1 }
 0x316   : > { %v464_v42 = vadd.f32 %v463_v39, %v458_v40 }
 0x317   : > { %v460_v43 = vpop.f32.mrf.mxu1 }
 0x318   : > { %466 = vst.msk [vmem:[%s294_s27] sm:$0xff] %vm465_vm11, %v464_v42 }
 0x319   : > { %v589_v44 = vpop.f32.mrf.mxu1 }
 0x31a PF: > { %s16_s23 = sadd.s32 1, %s647_s23   ;;  %s758_s21 = smov %s643_s22 }
 0x31b   : > { %p13_p5 = scmp.ge.s32.totalorder %s16_s23, 4   ;;  %s759_s22 = smov %s761_s24 }
 0x31d   :  { %15 = sbr.rel (!%p13_p5) target bundleno = 2 (0x2), region = 82 }

// kernel: run.27
= control target key start
LH: loop header
LB: loop body
LE: loop exit
PB: predicated region body
PF: predicated region fallthrough
CT: control target
= control target key end

     0   :  { %s692_s21 = smov 0   ;;  %s694_s22 = smov 0   ;;  %s751_s0 = inlined_call_operand.vmem [shape: f32[2,8,32], index: 0, kind: input, shape index: {}, may-alias: {0,5}]   ;;  %s752_s1 = inlined_call_operand.vmem [shape: bf16[8,24], index: 1, kind: input, shape index: {}]   ;;  %s753_s2 = inlined_call_operand.vmem [shape: f32[8,1], index: 2, kind: input, shape index: {}]   ;;  %s754_s3 = inlined_call_operand.vmem [shape: bf16[8,24], index: 3, kind: input, shape index: {}]   ;;  %s755_s4 = inlined_call_operand.vmem [shape: f32[8,1], index: 4, kind: input, shape index: {}]   ;;  %s756_s5 = inlined_call_operand.vmem [shape: f32[2,8,32], index: 5, kind: input, shape index: {}, may-alias: {0,5}]   ;;  %s757_s6 = inlined_call_operand.vmem [shape: f32[2,8,32], index: 6, kind: output, shape index: {}]  }
   0x1   :  { %s696_s23 = smov 0  }
   0x2 LB: > { %s28_s24 = sadd.s32 1, %s643_s22  ;;  %p559_p0 = scmp.ge.s32.totalorder %s647_s23, 1  ;;  %s647_s23 = sphi %s696_s23, %s16_s23   ;;  %s643_s22 = sphi %s694_s22, %s759_s22   ;;  %s639_s21 = sphi %s692_s21, %s758_s21  }
   0x3   : > { %p30_p1 = scmp.ge.s32.totalorder %s28_s24, 2  ;;  %p239_p2 = scmp.lt.s32.totalorder %s647_s23, 3 }
   0x5   : > { %s761_s24 = smov (%p30_p1, %s28_s24), 0  ;;  %p240_p3 = pnand %p559_p0, %p239_p2 }
   0x6   : > { %p277_p4 = scmp.lt.s32.totalorder (!%p240_p3), %s639_s21, 1  ;;  %s649_s29 = smov (!%p240_p3), 6  }
   0x7   : > { %243 = sbr.rel (%p240_p3) target bundleno = 794 (0x31a), region = 44  ;;  %s653_s30 = smov (!%p240_p3), 123  }
   0x8   : > { %s654_s7 = smov (!%p240_p3), 118   ;;  %s655_s12 = smov (!%p240_p3), 126  }
   0x9   : > { %s656_s15 = smov (!%p240_p3), 127  }
   0xc   : > { %s763_s21 = smov (!%p277_p4, %s639_s21), 1  ;;  %vm308_vm1 = vcmask 48128   ;;  %vm312_vm2 = vcmask 310272   ;;  %vm315_vm3 = vcmask 355328   ;;  %v650_v5 = vmov 0.0   ;;  %v333_v11 = vld [vmem:[%s753_s2] sm:$0xff] }
   0xd   : > { %s710_s25 = sshll.u32 %s763_s21, 3  ;;  %574 = vmatprep.subr.bf16.mxu0 %v650_v5  ;;  %582 = vmatprep.subr.bf16.mxu1 %v650_v5  ;;  %vm651_vm4 = vmmov 0   ;;  %v652_v8 = vmov 0   ;;  %vm327_vm5 = vcmask 1043456   ;;  %v332_v16 = vld [vmem:[%s752_s1] sm:$0xf]  ;;  %v389_v17 = vlaneseq }
   0xe   : > { %s280_s28 = scalar_lea.vmem %s751_s0, %s710_s25  ;;  %578 = vmatprep.mubr.msk.bf16.mxu0 %vm651_vm4, %v650_v5  ;;  %586 = vmatprep.mubr.msk.bf16.mxu1 %vm651_vm4, %v650_v5  ;;  %vm339_vm6 = vcmask 195584   ;;  %v411_v31 = vld [vmem:[%s755_s4] sm:$0xff]  ;;  %s287_s20 = scalar_lea.vmem %s756_s5, %s710_s25  ;;  %vm465_vm11 = vcmask 261120  }
   0xf   : > { %v300_v0 = vld [vmem:[%s280_s28] sm:$0xff]  ;;  %622 = vset.pattern.permute.xlu1 %v652_v8  ;;  %623 = vset.pattern.permute.xlu0 %v652_v8  ;;  %v390_v18 = vand.u32 127, %v389_v17  ;;  %s294_s27 = scalar_lea.vmem %s757_s6, %s710_s25 }
  0x10   : > { %vm301_vm0 = vcmp.gt.f32.partialorder %v300_v0, 0.0  ;;  %v302_v1 = vmul.f32 0.1, %v300_v0  ;;  %v410_v36 = vld [vmem:[%s754_s3] sm:$0xf] }
  0x11   : > { %v394_v19 = vadd.s32 4294967295, %v390_v18  ;;  %v463_v39 = vld [vmem:[%s287_s20] sm:$0xff] }
  0x12   : > { %v303_v2 = vsel %vm301_vm0, %v300_v0, %v302_v1 }
  0x13   : > { %v304_v3 = vpack.c.bf16 %v303_v2, %v303_v2  ;;  %vm395_vm7 = vcmp.ge.s32.totalorder %v394_v19, 0  ;;  %vm396_vm8 = vcmp.lt.s32.totalorder %v394_v19, 32 }
  0x14   : > { %vm397_vm10 = vmand %vm395_vm7, %vm396_vm8 }
  0x15   : > { %306 = vrot.lane.b32.xlu0 %v304_v3, %s649_s29 }
  0x87   : > { %v307_v4 = vpop.permute.xlu0 %306 }
  0x88   : > { %v311_v6 = vsel %vm308_vm1, 0, %v307_v4 }
  0x89   : > { %v313_v7 = vsel %vm312_vm2, %v311_v6, 0 }
  0x8a   : > { %316 = vst.msk [vmem:[#allocation2] sm:$0xf] %vm315_vm3, %v313_v7 }
  0x91   : > { %v319_v9 = vld [vmem:[#allocation2] sm:$0xf] }
  0x92   : > { %v563_v10 = vcombine.low %v319_v9, %v319_v9 }
  0x94   : > { %323 = vrot.lane.b32.xlu1 %v563_v10, %s653_s30  ;;  %325 = vrot.lane.b32.xlu0 %v563_v10, %s654_s7 }
  0x98   : > { %336 = vperm.xlu1 %622, %v333_v11  }
 0x106   : > { %v326_v12 = vpop.permute.xlu0 %325  ;;  %v324_v14 = vpop.permute.xlu1 %323 }
 0x107   : > { %v344_v13 = vsel %vm327_vm5, %v326_v12, 0  ;;  %v330_v15 = vsel %vm327_vm5, %v319_v9, %v324_v14 }
 0x108   : > { %575 = vmatpush3.bf16.msra.mxu0 %v344_v13 }
 0x109   : > { %576 = vmatprep.subr.bf16.mxu0 %v650_v5 }
 0x10c   : > { %577 = vmatpush3.bf16.msra.mxu0 %v330_v15 }
 0x10f   : > { %579 = vmatmul.mubr.msk.bf16.vlgmr.msra.gmra.mxu0 %vm339_vm6, %v332_v16 }
 0x113   : > { %v337_v20 = vpop.permute.xlu1 %336 }
 0x1cf   : > { %v380_v21 = vpop.f32.mrf.mxu0 }
 0x1d0   : > { %v381_v22 = vadd.f32 %v380_v21, %v337_v20 }
 0x1d1   : > { %v580_v23 = vpop.f32.mrf.mxu0 }
 0x1d2   : > { %vm386_vm9 = vcmp.gt.f32.partialorder %v381_v22, 0.0  ;;  %v387_v24 = vmul.f32 0.1, %v381_v22 }
 0x1d3   : > { %v383_v25 = vpop.f32.mrf.mxu0 }
 0x1d4   : > { %v388_v26 = vsel %vm386_vm9, %v381_v22, %v387_v24 }
 0x1d5   : > { %v581_v27 = vpop.f32.mrf.mxu0  ;;  %v398_v28 = vsel %vm397_vm10, %v388_v26, 0.0 }
 0x1d6   : > { %v399_v29 = vpack.c.bf16 %v398_v28, %v398_v28 }
 0x1d8   : > { %404 = vrot.lane.b32.xlu0 %v399_v29, %s655_s12  ;;  %v401_v30 = vrot.slane %v399_v29, 4 }
 0x1da   : > { %402 = vrot.lane.b32.xlu1 %v401_v30, %s656_s15 }
 0x1dc   : > { %414 = vperm.xlu0 %623, %v411_v31  }
 0x24a   : > { %v405_v32 = vpop.permute.xlu0 %404 }
 0x24b   : > { %v421_v33 = vsel %vm327_vm5, %v405_v32, 0 }
 0x24c   : > { %583 = vmatpush3.bf16.msra.mxu1 %v421_v33  ;;  %v403_v34 = vpop.permute.xlu1 %402 }
 0x24d   : > { %584 = vmatprep.subr.bf16.mxu1 %v650_v5  ;;  %v408_v35 = vsel %vm327_vm5, %v399_v29, %v403_v34 }
 0x250   : > { %585 = vmatpush3.bf16.msra.mxu1 %v408_v35 }
 0x253   : > { %587 = vmatmul.mubr.msk.bf16.vlgmr.msra.gmra.mxu1 %vm339_vm6, %v410_v36 }
 0x257   : > { %v415_v37 = vpop.permute.xlu0 %414 }
 0x313   : > { %v457_v38 = vpop.f32.mrf.mxu1 }
 0x314   : > { %v458_v40 = vadd.f32 %v457_v38, %v415_v37 }
 0x315   : > { %v588_v41 = vpop.f32.mrf.mxu1 }
 0x316   : > { %v464_v42 = vadd.f32 %v463_v39, %v458_v40 }
 0x317   : > { %v460_v43 = vpop.f32.mrf.mxu1 }
 0x318   : > { %466 = vst.msk [vmem:[%s294_s27] sm:$0xff] %vm465_vm11, %v464_v42 }
 0x319   : > { %v589_v44 = vpop.f32.mrf.mxu1 }
 0x31a PF: > { %s16_s23 = sadd.s32 1, %s647_s23   ;;  %s758_s21 = smov %s643_s22 }
 0x31b   : > { %p13_p5 = scmp.ge.s32.totalorder %s16_s23, 4   ;;  %s759_s22 = smov %s761_s24 }
 0x31d   :  { %15 = sbr.rel (!%p13_p5) target bundleno = 2 (0x2), region = 82 }

// kernel: run.28
= control target key start
LH: loop header
LB: loop body
LE: loop exit
PB: predicated region body
PF: predicated region fallthrough
CT: control target
= control target key end

     0   :  { %s714_s21 = smov 0   ;;  %s716_s22 = smov 0   ;;  %s791_s0 = inlined_call_operand.vmem [shape: f32[2,8,32], index: 0, kind: input, shape index: {}, may-alias: {0,5}]   ;;  %s792_s1 = inlined_call_operand.vmem [shape: bf16[8,40], index: 1, kind: input, shape index: {}]   ;;  %s793_s2 = inlined_call_operand.vmem [shape: f32[8,1], index: 2, kind: input, shape index: {}]   ;;  %s794_s3 = inlined_call_operand.vmem [shape: bf16[8,40], index: 3, kind: input, shape index: {}]   ;;  %s795_s4 = inlined_call_operand.vmem [shape: f32[8,1], index: 4, kind: input, shape index: {}]   ;;  %s796_s5 = inlined_call_operand.vmem [shape: f32[2,8,32], index: 5, kind: input, shape index: {}, may-alias: {0,5}]   ;;  %s797_s6 = inlined_call_operand.vmem [shape: f32[2,8,32], index: 6, kind: output, shape index: {}]  }
   0x1   :  { %s718_s23 = smov 0  }
   0x2 LB: > { %s28_s24 = sadd.s32 1, %s665_s22  ;;  %p575_p0 = scmp.ge.s32.totalorder %s669_s23, 1  ;;  %s669_s23 = sphi %s718_s23, %s16_s23   ;;  %s665_s22 = sphi %s716_s22, %s799_s22   ;;  %s661_s21 = sphi %s714_s21, %s798_s21  }
   0x3   : > { %p30_p1 = scmp.ge.s32.totalorder %s28_s24, 2  ;;  %p239_p2 = scmp.lt.s32.totalorder %s669_s23, 3 }
   0x5   : > { %s801_s24 = smov (%p30_p1, %s28_s24), 0  ;;  %p240_p3 = pnand %p575_p0, %p239_p2 }
   0x6   : > { %p277_p4 = scmp.lt.s32.totalorder (!%p240_p3), %s661_s21, 1  ;;  %s671_s29 = smov (!%p240_p3), 4  }
   0x7   : > { %243 = sbr.rel (%p240_p3) target bundleno = 802 (0x322), region = 44  ;;  %s674_s30 = smov (!%p240_p3), 126  }
   0x8   : > { %s675_s7 = smov (!%p240_p3), 124   ;;  %s677_s8 = smov (!%p240_p3), 125  }
   0x9   : > { %s678_s9 = smov (!%p240_p3), 127  }
   0xc   : > { %s803_s21 = smov (!%p277_p4, %s661_s21), 1  ;;  %vm308_vm1 = vcmask 31744   ;;  %vm312_vm2 = vcmask 293888   ;;  %vm315_vm3 = vcmask 322560   ;;  %v672_v5 = vmov 0.0   ;;  %v341_v11 = vld [vmem:[%s793_s2] sm:$0xff] }
   0xd   : > { %s732_s25 = sshll.u32 %s803_s21, 3  ;;  %592 = vmatprep.subr.bf16.mxu0 %v672_v5  ;;  %602 = vmatprep.subr.bf16.mxu1 %v672_v5  ;;  %vm673_vm4 = vmmov 0   ;;  %v676_v10 = vmov 0   ;;  %vm331_vm5 = vcmask 1043456   ;;  %v340_v19 = vld [vmem:[%s792_s1] sm:$0xf]  ;;  %v397_v20 = vlaneseq }
   0xe   : > { %s280_s28 = scalar_lea.vmem %s791_s0, %s732_s25  ;;  %598 = vmatprep.mubr.msk.bf16.mxu0 %vm673_vm4, %v672_v5  ;;  %608 = vmatprep.mubr.msk.bf16.mxu1 %vm673_vm4, %v672_v5  ;;  %vm347_vm6 = vcmask 326656   ;;  %v427_v34 = vld [vmem:[%s795_s4] sm:$0xff]  ;;  %s287_s20 = scalar_lea.vmem %s796_s5, %s732_s25  ;;  %vm481_vm11 = vcmask 261120  }
   0xf   : > { %v300_v0 = vld [vmem:[%s280_s28] sm:$0xff]  ;;  %644 = vset.pattern.permute.xlu1 %v676_v10  ;;  %645 = vset.pattern.permute.xlu0 %v676_v10  ;;  %v398_v21 = vand.u32 127, %v397_v20  ;;  %s294_s27 = scalar_lea.vmem %s797_s6, %s732_s25 }
  0x10   : > { %vm301_vm0 = vcmp.gt.f32.partialorder %v300_v0, 0.0  ;;  %v302_v1 = vmul.f32 0.1, %v300_v0  ;;  %v426_v42 = vld [vmem:[%s794_s3] sm:$0xf] }
  0x11   : > { %v402_v22 = vadd.s32 4294967294, %v398_v21  ;;  %v479_v45 = vld [vmem:[%s287_s20] sm:$0xff] }
  0x12   : > { %v303_v2 = vsel %vm301_vm0, %v300_v0, %v302_v1 }
  0x13   : > { %v304_v3 = vpack.c.bf16 %v303_v2, %v303_v2  ;;  %vm403_vm7 = vcmp.ge.s32.totalorder %v402_v22, 0  ;;  %vm404_vm8 = vcmp.lt.s32.totalorder %v402_v22, 32 }
  0x14   : > { %vm405_vm10 = vmand %vm403_vm7, %vm404_vm8 }
  0x15   : > { %306 = vrot.lane.b32.xlu0 %v304_v3, %s671_s29 }
  0x87   : > { %v307_v4 = vpop.permute.xlu0 %306 }
  0x88   : > { %v311_v6 = vsel %vm308_vm1, 0, %v307_v4 }
  0x89   : > { %v313_v7 = vsel %vm312_vm2, %v311_v6, 0 }
  0x8a   : > { %316 = vst.msk [vmem:[#allocation2] sm:$0xf] %vm315_vm3, %v313_v7 }
  0x91   : > { %v319_v8 = vld [vmem:[#allocation2] sm:$0xf] }
  0x92   : > { %v579_v9 = vcombine.low %v319_v8, %v319_v8 }
  0x94   : > { %325 = vrot.lane.b32.xlu1 %v579_v9, %s674_s30  ;;  %329 = vrot.lane.b32.xlu0 %v579_v9, %s675_s7 }
  0x98   : > { %327 = vrot.lane.b32.xlu1 %v579_v9, %s677_s8  ;;  %323 = vrot.lane.b32.xlu0 %v579_v9, %s678_s9 }
  0x9c   : > { %344 = vperm.xlu1 %644, %v341_v11  }
 0x106   : > { %v326_v12 = vpop.permute.xlu1 %325  ;;  %v330_v13 = vpop.permute.xlu0 %329 }
 0x107   : > { %v352_v14 = vsel %vm331_vm5, %v330_v13, 0 }
 0x108   : > { %593 = vmatpush3.bf16.msra.mxu0 %v352_v14 }
 0x109   : > { %594 = vmatprep.subr.bf16.mxu0 %v672_v5 }
 0x10a   : > { %v328_v15 = vpop.permute.xlu1 %327  ;;  %v324_v17 = vpop.permute.xlu0 %323 }
 0x10b   : > { %v338_v16 = vsel %vm331_vm5, %v326_v12, %v328_v15  ;;  %v334_v18 = vsel %vm331_vm5, %v319_v8, %v324_v17 }
 0x10c   : > { %595 = vmatpush3.bf16.msra.mxu0 %v338_v16 }
 0x10d   : > { %596 = vmatprep.subr.bf16.mxu0 %v672_v5 }
 0x110   : > { %597 = vmatpush3.bf16.msra.mxu0 %v334_v18 }
 0x113   : > { %599 = vmatmul.mubr.msk.bf16.vlgmr.msra.gmra.mxu0 %vm347_vm6, %v340_v19 }
 0x117   : > { %v345_v23 = vpop.permute.xlu1 %344 }
 0x1d3   : > { %v388_v24 = vpop.f32.mrf.mxu0 }
 0x1d4   : > { %v389_v25 = vadd.f32 %v388_v24, %v345_v23 }
 0x1d5   : > { %v600_v26 = vpop.f32.mrf.mxu0 }
 0x1d6   : > { %vm394_vm9 = vcmp.gt.f32.partialorder %v389_v25, 0.0  ;;  %v395_v27 = vmul.f32 0.1, %v389_v25 }
 0x1d7   : > { %v391_v28 = vpop.f32.mrf.mxu0 }
 0x1d8   : > { %v396_v29 = vsel %vm394_vm9, %v389_v25, %v395_v27 }
 0x1d9   : > { %v406_v30 = vsel %vm405_vm10, %v396_v29, 0.0  ;;  %v601_v31 = vpop.f32.mrf.mxu0 }
 0x1da   : > { %v407_v32 = vpack.c.bf16 %v406_v30, %v406_v30 }
 0x1dc   : > { %412 = vrot.lane.b32.xlu1 %v407_v32, %s674_s30  ;;  %416 = vrot.lane.b32.xlu0 %v407_v32, %s675_s7  ;;  %v409_v33 = vrot.slane %v407_v32, 4 }
 0x1e0   : > { %410 = vrot.lane.b32.xlu1 %v409_v33, %s678_s9  ;;  %414 = vrot.lane.b32.xlu0 %v409_v33, %s677_s8 }
 0x1e4   : > { %430 = vperm.xlu0 %645, %v427_v34  }
 0x24e   : > { %v413_v35 = vpop.permute.xlu1 %412  ;;  %v417_v36 = vpop.permute.xlu0 %416 }
 0x24f   : > { %v437_v37 = vsel %vm331_vm5, %v417_v36, 0 }
 0x250   : > { %603 = vmatpush3.bf16.msra.mxu1 %v437_v37 }
 0x251   : > { %604 = vmatprep.subr.bf16.mxu1 %v672_v5 }
 0x252   : > { %v415_v38 = vpop.permute.xlu0 %414  ;;  %v411_v40 = vpop.permute.xlu1 %410 }
 0x253   : > { %v424_v39 = vsel %vm331_vm5, %v413_v35, %v415_v38  ;;  %v420_v41 = vsel %vm331_vm5, %v407_v32, %v411_v40 }
 0x254   : > { %605 = vmatpush3.bf16.msra.mxu1 %v424_v39 }
 0x255   : > { %606 = vmatprep.subr.bf16.mxu1 %v672_v5 }
 0x258   : > { %607 = vmatpush3.bf16.msra.mxu1 %v420_v41 }
 0x25b   : > { %609 = vmatmul.mubr.msk.bf16.vlgmr.msra.gmra.mxu1 %vm347_vm6, %v426_v42 }
 0x25f   : > { %v431_v43 = vpop.permute.xlu0 %430 }
 0x31b   : > { %v473_v44 = vpop.f32.mrf.mxu1 }
 0x31c   : > { %v474_v46 = vadd.f32 %v473_v44, %v431_v43 }
 0x31d   : > { %v610_v47 = vpop.f32.mrf.mxu1 }
 0x31e   : > { %v480_v48 = vadd.f32 %v479_v45, %v474_v46 }
 0x31f   : > { %v476_v49 = vpop.f32.mrf.mxu1 }
 0x320   : > { %482 = vst.msk [vmem:[%s294_s27] sm:$0xff] %vm481_vm11, %v480_v48 }
 0x321   : > { %v611_v50 = vpop.f32.mrf.mxu1 }
 0x322 PF: > { %s16_s23 = sadd.s32 1, %s669_s23   ;;  %s798_s21 = smov %s665_s22 }
 0x323   : > { %p13_p5 = scmp.ge.s32.totalorder %s16_s23, 4   ;;  %s799_s22 = smov %s801_s24 }
 0x325   :  { %15 = sbr.rel (!%p13_p5) target bundleno = 2 (0x2), region = 82 }

// kernel: run.31
= control target key start
LH: loop header
LB: loop body
LE: loop exit
PB: predicated region body
PF: predicated region fallthrough
CT: control target
= control target key end

     0   :  { %v176_v1 = vmov 0.0   ;;  %vm177_vm0 = vmmov 0   ;;  %vm20_vm1 = vcmask 130048   ;;  %s222_s0 = inlined_call_operand.vmem [shape: bf16[16,32], index: 0, kind: input, shape index: {}]   ;;  %s223_s1 = inlined_call_operand.vmem [shape: bf16[32,16], index: 1, kind: input, shape index: {}]   ;;  %s224_s2 = inlined_call_operand.vmem [shape: f32[1,16], index: 2, kind: input, shape index: {}]   ;;  %s225_s3 = inlined_call_operand.hbm [shape: f32[16,16], index: 3, kind: output, shape index: {}]  }
   0x1   :  { %v151_v0 = vld [vmem:[%s223_s1 + $0x8] sm:$0xff]   ;;  %138 = vmatprep.subr.bf16.mxu0 %v176_v1  ;;  %v152_v2 = vld [vmem:[%s223_s1] sm:$0xff]   ;;  %142 = vmatprep.mubr.msk.bf16.mxu0 %vm177_vm0, %v176_v1 }
   0x2   :  { %139 = vmatpush3.bf16.msra.mxu0 %v151_v0 }
   0x3   :  { %140 = vmatprep.subr.bf16.mxu0 %v176_v1 }
   0x4   :  { %8 = vsyncpa [#allocation4], 0  ;;  %21 = vst.msk [vmem:[#allocation2] sm:$0xff] %vm20_vm1, %v176_v1  ;;  %v153_v3 = vld [vmem:[%s222_s0] sm:$0xff]   ;;  %vm48_vm2 = vcmask 261120   ;;  %s178_s0 = smov [#allocation3]  }
   0x5   :  { %22 = vst.msk [vmem:[#allocation2 + $0x8] sm:$0xff] %vm20_vm1, %v176_v1  ;;  %v134_v12 = vld [vmem:[%s224_s2] ss:$0 sm:$0xff]  ;;  %s119_s19 = sshll.u32 %s178_s0, 4  ;;  %s120_s19 = int_to_ptr.vmem [resolvable:$true] %s119_s19 }
   0x6   :  { %141 = vmatpush3.bf16.msra.mxu0 %v152_v2  ;;  %s154_s20 = scalar_lea.vmem %s120_s19, 256  ;;  %p159_p1 = scmp.lt.s32.totalorder %s120_s19, %s120_s19 }
   0x7   :  { %p155_p0 = scmp.ne.s32.totalorder %s120_s19, %s154_s20  ;;  %p160_p2 = scmp.lt.s32.totalorder %s154_s20, %s154_s20 }
   0x9   :  { %143 = vmatmul.mubr.msk.bf16.vlgmr.msra.gmra.mxu0 %vm48_vm2, %v153_v3  ;;  %p161_p3 = por %p160_p2, %p159_p1 }
   0xb   :  { %v23_v4 = vld [vmem:[#allocation2] sm:$0xff]  ;;  %p162_p4 = pnand %p161_p3, %p155_p0 }
   0xc   :  { %v24_v8 = vld [vmem:[#allocation2 + $0x8] sm:$0xff] }
  0xc9   :  { %v86_v5 = vpop.f32.mrf.mxu0 }
  0xca   :  { %v93_v6 = vadd.f32 %v86_v5, %v23_v4 }
  0xcb   :  { %v144_v7 = vpop.f32.mrf.mxu0 }
  0xcc   :  { %96 = vst.msk [vmem:[#allocation2] sm:$0xff] %vm20_vm1, %v93_v6 }
  0xcd   :  { %v89_v9 = vpop.f32.mrf.mxu0 }
  0xce   :  { %v94_v10 = vadd.f32 %v89_v9, %v24_v8 }
  0xcf   :  { %v145_v11 = vpop.f32.mrf.mxu0 }
  0xd0   :  { %97 = vst.msk [vmem:[#allocation2 + $0x8] sm:$0xff] %vm20_vm1, %v94_v10 }
  0xd3   :  { %v101_v13 = vld [vmem:[#allocation2] sm:$0xff] }
  0xd4   :  { %v110_v14 = vadd.f32 %v134_v12, %v101_v13 }
  0xd6   :  { %112 = vst.msk [vmem:[#allocation3] sm:$0xff] %vm20_vm1, %v110_v14 }
  0xd7   :  { %v102_v15 = vld [vmem:[#allocation2 + $0x8] sm:$0xff] }
  0xd8   :  { %v111_v16 = vadd.f32 %v134_v12, %v102_v15 }
  0xda   :  { %113 = vst.msk [vmem:[#allocation3 + $0x8] sm:$0xff] %vm20_vm1, %v111_v16 }
  0xdb   :  { %165 = shalt.err (!%p162_p4)
}
  0xdc   :  { %s179_s21 = smov 128   ;;  %s180_s2 = smov 8  }
  0xdd   :  { %125 = dma.vmem_to_hbm [thread:$0]  %s120_s19, 256, %s225_s3, [#allocation4], %s179_s21, %s179_s21, %s180_s2  }
  0xde   :  { %174 = dma.done.wait [#allocation4], 256  }
  0xdf   :  { %175 = vsyncadd [#allocation4], 4294967040 }
  0xe0   :  { %129 = vsyncpa [#allocation4], 1 }

// kernel: run.29
= control target key start
LH: loop header
LB: loop body
LE: loop exit
PB: predicated region body
PF: predicated region fallthrough
CT: control target
= control target key end

     0   :  { %s720_s21 = smov 0   ;;  %s722_s22 = smov 0   ;;  %s792_s0 = inlined_call_operand.vmem [shape: f32[2,8,32], index: 0, kind: input, shape index: {}, may-alias: {0,5}]   ;;  %s793_s1 = inlined_call_operand.vmem [shape: bf16[8,40], index: 1, kind: input, shape index: {}]   ;;  %s794_s2 = inlined_call_operand.vmem [shape: f32[8,1], index: 2, kind: input, shape index: {}]   ;;  %s795_s3 = inlined_call_operand.vmem [shape: bf16[8,40], index: 3, kind: input, shape index: {}]   ;;  %s796_s4 = inlined_call_operand.vmem [shape: f32[8,1], index: 4, kind: input, shape index: {}]   ;;  %s797_s5 = inlined_call_operand.vmem [shape: f32[2,8,32], index: 5, kind: input, shape index: {}, may-alias: {0,5}]   ;;  %s798_s6 = inlined_call_operand.vmem [shape: f32[2,8,32], index: 6, kind: output, shape index: {}]  }
   0x1   :  { %s724_s23 = smov 0  }
   0x2 LB: > { %s28_s24 = sadd.s32 1, %s668_s22  ;;  %p575_p0 = scmp.ge.s32.totalorder %s672_s23, 1  ;;  %s672_s23 = sphi %s724_s23, %s16_s23   ;;  %s668_s22 = sphi %s722_s22, %s800_s22   ;;  %s664_s21 = sphi %s720_s21, %s799_s21  }
   0x3   : > { %p30_p1 = scmp.ge.s32.totalorder %s28_s24, 2  ;;  %p239_p2 = scmp.lt.s32.totalorder %s672_s23, 3 }
   0x5   : > { %s802_s24 = smov (%p30_p1, %s28_s24), 0  ;;  %p240_p3 = pnand %p575_p0, %p239_p2 }
   0x6   : > { %p277_p4 = scmp.lt.s32.totalorder (!%p240_p3), %s664_s21, 1  ;;  %s674_s29 = smov (!%p240_p3), 8  }
   0x7   : > { %243 = sbr.rel (%p240_p3) target bundleno = 802 (0x322), region = 44  ;;  %s677_s30 = smov (!%p240_p3), 122  }
   0x8   : > { %s678_s7 = smov (!%p240_p3), 116   ;;  %s680_s8 = smov (!%p240_p3), 119  }
   0x9   : > { %s681_s9 = smov (!%p240_p3), 125   ;;  %s682_s14 = smov (!%p240_p3), 126  }
   0xa   : > { %s683_s15 = smov (!%p240_p3), 124   ;;  %s684_s16 = smov (!%p240_p3), 127  }
   0xc   : > { %s804_s21 = smov (!%p277_p4, %s664_s21), 1  ;;  %vm308_vm1 = vcmask 64512   ;;  %vm312_vm2 = vcmask 326656   ;;  %vm315_vm3 = vcmask 388096   ;;  %v675_v5 = vmov 0.0   ;;  %v341_v11 = vld [vmem:[%s794_s2] sm:$0xff] }
   0xd   : > { %s738_s25 = sshll.u32 %s804_s21, 3  ;;  %592 = vmatprep.subr.bf16.mxu0 %v675_v5  ;;  %602 = vmatprep.subr.bf16.mxu1 %v675_v5  ;;  %vm676_vm4 = vmmov 0   ;;  %v679_v10 = vmov 0   ;;  %vm331_vm5 = vcmask 1043456   ;;  %v340_v19 = vld [vmem:[%s793_s1] sm:$0xf]  ;;  %v397_v20 = vlaneseq }
   0xe   : > { %s280_s28 = scalar_lea.vmem %s792_s0, %s738_s25  ;;  %598 = vmatprep.mubr.msk.bf16.mxu0 %vm676_vm4, %v675_v5  ;;  %608 = vmatprep.mubr.msk.bf16.mxu1 %vm676_vm4, %v675_v5  ;;  %v427_v34 = vld [vmem:[%s796_s4] sm:$0xff]  ;;  %s287_s27 = scalar_lea.vmem %s797_s5, %s738_s25  ;;  %vm481_vm10 = vcmask 261120  }
   0xf   : > { %v300_v0 = vld [vmem:[%s280_s28] sm:$0xff]  ;;  %647 = vset.pattern.permute.xlu1 %v679_v10  ;;  %648 = vset.pattern.permute.xlu0 %v679_v10  ;;  %v398_v21 = vand.u32 127, %v397_v20 }
  0x10   : > { %vm301_vm0 = vcmp.gt.f32.partialorder %v300_v0, 0.0  ;;  %v302_v1 = vmul.f32 0.1, %v300_v0  ;;  %v426_v42 = vld [vmem:[%s795_s3] sm:$0xf] }
  0x11   : > { %v402_v22 = vadd.s32 4294967294, %v398_v21  ;;  %v479_v45 = vld [vmem:[%s287_s27] sm:$0xff] }
  0x12   : > { %v303_v2 = vsel %vm301_vm0, %v300_v0, %v302_v1 }
  0x13   : > { %v304_v3 = vpack.c.bf16 %v303_v2, %v303_v2  ;;  %vm403_vm6 = vcmp.ge.s32.totalorder %v402_v22, 0  ;;  %vm404_vm7 = vcmp.lt.s32.totalorder %v402_v22, 32 }
  0x14   : > { %vm405_vm9 = vmand %vm403_vm6, %vm404_vm7 }
  0x15   : > { %306 = vrot.lane.b32.xlu0 %v304_v3, %s674_s29 }
  0x87   : > { %v307_v4 = vpop.permute.xlu0 %306 }
  0x88   : > { %v311_v6 = vsel %vm308_vm1, 0, %v307_v4 }
  0x89   : > { %v313_v7 = vsel %vm312_vm2, %v311_v6, 0 }
  0x8a   : > { %316 = vst.msk [vmem:[#allocation2] sm:$0xf] %vm315_vm3, %v313_v7 }
  0x91   : > { %v319_v8 = vld [vmem:[#allocation2] sm:$0xf] }
  0x92   : > { %v579_v9 = vcombine.low %v319_v8, %v319_v8 }
  0x94   : > { %325 = vrot.lane.b32.xlu1 %v579_v9, %s677_s30  ;;  %329 = vrot.lane.b32.xlu0 %v579_v9, %s678_s7  ;;  %s294_s30 = scalar_lea.vmem %s798_s6, %s738_s25 }
  0x98   : > { %327 = vrot.lane.b32.xlu1 %v579_v9, %s680_s8  ;;  %323 = vrot.lane.b32.xlu0 %v579_v9, %s681_s9 }
  0x9c   : > { %344 = vperm.xlu1 %647, %v341_v11  }
 0x106   : > { %v326_v12 = vpop.permute.xlu1 %325  ;;  %v330_v13 = vpop.permute.xlu0 %329 }
 0x107   : > { %v352_v14 = vsel %vm331_vm5, %v330_v13, 0 }
 0x108   : > { %593 = vmatpush3.bf16.msra.mxu0 %v352_v14 }
 0x109   : > { %594 = vmatprep.subr.bf16.mxu0 %v675_v5 }
 0x10a   : > { %v328_v15 = vpop.permute.xlu1 %327  ;;  %v324_v17 = vpop.permute.xlu0 %323 }
 0x10b   : > { %v338_v16 = vsel %vm331_vm5, %v326_v12, %v328_v15  ;;  %v334_v18 = vsel %vm331_vm5, %v319_v8, %v324_v17 }
 0x10c   : > { %595 = vmatpush3.bf16.msra.mxu0 %v338_v16 }
 0x10d   : > { %596 = vmatprep.subr.bf16.mxu0 %v675_v5 }
 0x110   : > { %597 = vmatpush3.bf16.msra.mxu0 %v334_v18 }
 0x113   : > { %599 = vmatmul.mubr.msk.bf16.vlgmr.msra.gmra.mxu0 %vm312_vm2, %v340_v19 }
 0x117   : > { %v345_v23 = vpop.permute.xlu1 %344 }
 0x1d3   : > { %v388_v24 = vpop.f32.mrf.mxu0 }
 0x1d4   : > { %v389_v25 = vadd.f32 %v388_v24, %v345_v23 }
 0x1d5   : > { %v600_v26 = vpop.f32.mrf.mxu0 }
 0x1d6   : > { %vm394_vm8 = vcmp.gt.f32.partialorder %v389_v25, 0.0  ;;  %v395_v27 = vmul.f32 0.1, %v389_v25 }
 0x1d7   : > { %v391_v28 = vpop.f32.mrf.mxu0 }
 0x1d8   : > { %v396_v29 = vsel %vm394_vm8, %v389_v25, %v395_v27 }
 0x1d9   : > { %v406_v30 = vsel %vm405_vm9, %v396_v29, 0.0  ;;  %v601_v31 = vpop.f32.mrf.mxu0 }
 0x1da   : > { %v407_v32 = vpack.c.bf16 %v406_v30, %v406_v30 }
 0x1dc   : > { %412 = vrot.lane.b32.xlu1 %v407_v32, %s682_s14  ;;  %416 = vrot.lane.b32.xlu0 %v407_v32, %s683_s15  ;;  %v409_v33 = vrot.slane %v407_v32, 4 }
 0x1e0   : > { %410 = vrot.lane.b32.xlu1 %v409_v33, %s684_s16  ;;  %414 = vrot.lane.b32.xlu0 %v409_v33, %s681_s9 }
 0x1e4   : > { %430 = vperm.xlu0 %648, %v427_v34  }
 0x24e   : > { %v413_v35 = vpop.permute.xlu1 %412  ;;  %v417_v36 = vpop.permute.xlu0 %416 }
 0x24f   : > { %v437_v37 = vsel %vm331_vm5, %v417_v36, 0 }
 0x250   : > { %603 = vmatpush3.bf16.msra.mxu1 %v437_v37 }
 0x251   : > { %604 = vmatprep.subr.bf16.mxu1 %v675_v5 }
 0x252   : > { %v415_v38 = vpop.permute.xlu0 %414  ;;  %v411_v40 = vpop.permute.xlu1 %410 }
 0x253   : > { %v424_v39 = vsel %vm331_vm5, %v413_v35, %v415_v38  ;;  %v420_v41 = vsel %vm331_vm5, %v407_v32, %v411_v40 }
 0x254   : > { %605 = vmatpush3.bf16.msra.mxu1 %v424_v39 }
 0x255   : > { %606 = vmatprep.subr.bf16.mxu1 %v675_v5 }
 0x258   : > { %607 = vmatpush3.bf16.msra.mxu1 %v420_v41 }
 0x25b   : > { %609 = vmatmul.mubr.msk.bf16.vlgmr.msra.gmra.mxu1 %vm312_vm2, %v426_v42 }
 0x25f   : > { %v431_v43 = vpop.permute.xlu0 %430 }
 0x31b   : > { %v473_v44 = vpop.f32.mrf.mxu1 }
 0x31c   : > { %v474_v46 = vadd.f32 %v473_v44, %v431_v43 }
 0x31d   : > { %v610_v47 = vpop.f32.mrf.mxu1 }
 0x31e   : > { %v480_v48 = vadd.f32 %v479_v45, %v474_v46 }
 0x31f   : > { %v476_v49 = vpop.f32.mrf.mxu1 }
 0x320   : > { %482 = vst.msk [vmem:[%s294_s30] sm:$0xff] %vm481_vm10, %v480_v48 }
 0x321   : > { %v611_v50 = vpop.f32.mrf.mxu1 }
 0x322 PF: > { %s16_s23 = sadd.s32 1, %s672_s23   ;;  %s799_s21 = smov %s668_s22 }
 0x323   : > { %p13_p5 = scmp.ge.s32.totalorder %s16_s23, 4   ;;  %s800_s22 = smov %s802_s24 }
 0x325   :  { %15 = sbr.rel (!%p13_p5) target bundleno = 2 (0x2), region = 82 }

// kernel: run.30
= control target key start
LH: loop header
LB: loop body
LE: loop exit
PB: predicated region body
PF: predicated region fallthrough
CT: control target
= control target key end

     0   :  { %s805_s24 = smov 0   ;;  %s807_s25 = smov 0   ;;  %s881_s0 = inlined_call_operand.vmem [shape: f32[2,8,32], index: 0, kind: input, shape index: {}, may-alias: {0,5}]   ;;  %s882_s1 = inlined_call_operand.vmem [shape: bf16[8,40], index: 1, kind: input, shape index: {}]   ;;  %s883_s2 = inlined_call_operand.vmem [shape: f32[8,1], index: 2, kind: input, shape index: {}]   ;;  %s884_s3 = inlined_call_operand.vmem [shape: bf16[8,40], index: 3, kind: input, shape index: {}]   ;;  %s885_s4 = inlined_call_operand.vmem [shape: f32[8,1], index: 4, kind: input, shape index: {}]   ;;  %s886_s5 = inlined_call_operand.vmem [shape: f32[2,8,32], index: 5, kind: input, shape index: {}, may-alias: {0,5}]   ;;  %s887_s6 = inlined_call_operand.vmem [shape: f32[2,8,32], index: 6, kind: input, shape index: {}]   ;;  %s888_s7 = inlined_call_operand.vmem [shape: bf16[2,8,32], index: 7, kind: output, shape index: {}]  }
   0x1   :  { %s809_s26 = smov 0  }
   0x2 LB: > { %s29_s27 = sadd.s32 1, %s747_s25  ;;  %p652_p0 = scmp.ge.s32.totalorder %s751_s26, 1  ;;  %s751_s26 = sphi %s809_s26, %s17_s26   ;;  %s747_s25 = sphi %s807_s25, %s890_s25   ;;  %s743_s24 = sphi %s805_s24, %s889_s24  }
   0x3   : > { %p31_p1 = scmp.ge.s32.totalorder %s29_s27, 2  ;;  %p278_p2 = scmp.lt.s32.totalorder %s751_s26, 3 }
   0x5   : > { %s892_s27 = smov (%p31_p1, %s29_s27), 0  ;;  %p279_p3 = pnand %p652_p0, %p278_p2 }
   0x6   : > { %p325_p4 = scmp.lt.s32.totalorder (!%p279_p3), %s743_s24, 1  ;;  %s753_s9 = smov (!%p279_p3), 12  }
   0x7   : > { %282 = sbr.rel (%p279_p3) target bundleno = 810 (0x32a), region = 48  ;;  %s756_s10 = smov (!%p279_p3), 118  }
   0x8   : > { %s757_s11 = smov (!%p279_p3), 108   ;;  %s759_s12 = smov (!%p279_p3), 113  }
   0x9   : > { %s760_s13 = smov (!%p279_p3), 123   ;;  %s761_s18 = smov (!%p279_p3), 126  }
   0xa   : > { %s762_s19 = smov (!%p279_p3), 124   ;;  %s763_s20 = smov (!%p279_p3), 127  }
   0xb   : > { %s764_s21 = smov (!%p279_p3), 125  }
   0xc   : > { %s894_s24 = smov (!%p325_p4, %s743_s24), 1  ;;  %vm363_vm1 = vcmask 97280   ;;  %vm367_vm2 = vcmask 359424   ;;  %vm370_vm3 = vcmask 453632   ;;  %v754_v5 = vmov 0.0   ;;  %v396_v11 = vld [vmem:[%s883_s2] sm:$0xff] }
   0xd   : > { %s826_s28 = sshll.u32 %s894_s24, 3  ;;  %670 = vmatprep.subr.bf16.mxu0 %v754_v5  ;;  %680 = vmatprep.subr.bf16.mxu1 %v754_v5  ;;  %vm755_vm4 = vmmov 0   ;;  %v758_v10 = vmov 0   ;;  %vm386_vm5 = vcmask 1043456   ;;  %v395_v19 = vld [vmem:[%s882_s1] sm:$0xf]  ;;  %v452_v20 = vlaneseq }
   0xe   : > { %s328_s8 = scalar_lea.vmem %s881_s0, %s826_s28  ;;  %676 = vmatprep.mubr.msk.bf16.mxu0 %vm755_vm4, %v754_v5  ;;  %686 = vmatprep.mubr.msk.bf16.mxu1 %vm755_vm4, %v754_v5  ;;  %vm402_vm6 = vcmask 326656   ;;  %v482_v34 = vld [vmem:[%s885_s4] sm:$0xff]  ;;  %s656_s14 = sshll.u32 %s894_s24, 2  ;;  %vm543_vm12 = vcmask 257024  }
   0xf   : > { %v355_v0 = vld [vmem:[%s328_s8] sm:$0xff]  ;;  %726 = vset.pattern.permute.xlu1 %v758_v10  ;;  %727 = vset.pattern.permute.xlu0 %v758_v10  ;;  %v453_v21 = vand.u32 127, %v452_v20  ;;  %s349_s17 = scalar_lea.vmem %s888_s7, %s656_s14 }
  0x10   : > { %vm356_vm0 = vcmp.gt.f32.partialorder %v355_v0, 0.0  ;;  %v357_v1 = vmul.f32 0.1, %v355_v0  ;;  %v481_v42 = vld [vmem:[%s884_s3] sm:$0xf] }
  0x11   : > { %v457_v22 = vadd.s32 4294967294, %v453_v21 }
  0x12   : > { %v358_v2 = vsel %vm356_vm0, %v355_v0, %v357_v1 }
  0x13   : > { %v359_v3 = vpack.c.bf16 %v358_v2, %v358_v2  ;;  %vm458_vm7 = vcmp.ge.s32.totalorder %v457_v22, 0  ;;  %vm459_vm8 = vcmp.lt.s32.totalorder %v457_v22, 32 }
  0x14   : > { %vm460_vm10 = vmand %vm458_vm7, %vm459_vm8 }
  0x15   : > { %361 = vrot.lane.b32.xlu0 %v359_v3, %s753_s9 }
  0x87   : > { %v362_v4 = vpop.permute.xlu0 %361 }
  0x88   : > { %v366_v6 = vsel %vm363_vm1, 0, %v362_v4 }
  0x89   : > { %v368_v7 = vsel %vm367_vm2, %v366_v6, 0 }
  0x8a   : > { %371 = vst.msk [vmem:[#allocation2] sm:$0xf] %vm370_vm3, %v368_v7 }
  0x91   : > { %v374_v8 = vld [vmem:[#allocation2] sm:$0xf] }
  0x92   : > { %v657_v9 = vcombine.low %v374_v8, %v374_v8 }
  0x94   : > { %380 = vrot.lane.b32.xlu1 %v657_v9, %s756_s10  ;;  %384 = vrot.lane.b32.xlu0 %v657_v9, %s757_s11  ;;  %s335_s10 = scalar_lea.vmem %s886_s5, %s826_s28 }
  0x95   : > { %v534_v45 = vld [vmem:[%s335_s10] sm:$0xff] }
  0x98   : > { %382 = vrot.lane.b32.xlu1 %v657_v9, %s759_s12  ;;  %378 = vrot.lane.b32.xlu0 %v657_v9, %s760_s13  ;;  %s342_s13 = scalar_lea.vmem %s887_s6, %s826_s28 }
  0x99   : > { %v536_v47 = vld [vmem:[%s342_s13] sm:$0xff] }
  0x9c   : > { %399 = vperm.xlu1 %726, %v396_v11  }
 0x106   : > { %v381_v12 = vpop.permute.xlu1 %380  ;;  %v385_v13 = vpop.permute.xlu0 %384 }
 0x107   : > { %v407_v14 = vsel %vm386_vm5, %v385_v13, 0 }
 0x108   : > { %671 = vmatpush3.bf16.msra.mxu0 %v407_v14 }
 0x109   : > { %672 = vmatprep.subr.bf16.mxu0 %v754_v5 }
 0x10a   : > { %v383_v15 = vpop.permute.xlu1 %382  ;;  %v379_v17 = vpop.permute.xlu0 %378 }
 0x10b   : > { %v393_v16 = vsel %vm386_vm5, %v381_v12, %v383_v15  ;;  %v389_v18 = vsel %vm386_vm5, %v374_v8, %v379_v17 }
 0x10c   : > { %673 = vmatpush3.bf16.msra.mxu0 %v393_v16 }
 0x10d   : > { %674 = vmatprep.subr.bf16.mxu0 %v754_v5 }
 0x110   : > { %675 = vmatpush3.bf16.msra.mxu0 %v389_v18 }
 0x113   : > { %677 = vmatmul.mubr.msk.bf16.vlgmr.msra.gmra.mxu0 %vm402_vm6, %v395_v19 }
 0x117   : > { %v400_v23 = vpop.permute.xlu1 %399 }
 0x1d3   : > { %v443_v24 = vpop.f32.mrf.mxu0 }
 0x1d4   : > { %v444_v25 = vadd.f32 %v443_v24, %v400_v23 }
 0x1d5   : > { %v678_v26 = vpop.f32.mrf.mxu0 }
 0x1d6   : > { %vm449_vm9 = vcmp.gt.f32.partialorder %v444_v25, 0.0  ;;  %v450_v27 = vmul.f32 0.1, %v444_v25 }
 0x1d7   : > { %v446_v28 = vpop.f32.mrf.mxu0 }
 0x1d8   : > { %v451_v29 = vsel %vm449_vm9, %v444_v25, %v450_v27 }
 0x1d9   : > { %v461_v30 = vsel %vm460_vm10, %v451_v29, 0.0  ;;  %v679_v31 = vpop.f32.mrf.mxu0 }
 0x1da   : > { %v462_v32 = vpack.c.bf16 %v461_v30, %v461_v30 }
 0x1dc   : > { %467 = vrot.lane.b32.xlu1 %v462_v32, %s761_s18  ;;  %471 = vrot.lane.b32.xlu0 %v462_v32, %s762_s19  ;;  %v464_v33 = vrot.slane %v462_v32, 4 }
 0x1e0   : > { %465 = vrot.lane.b32.xlu1 %v464_v33, %s763_s20  ;;  %469 = vrot.lane.b32.xlu0 %v464_v33, %s764_s21 }
 0x1e4   : > { %485 = vperm.xlu0 %727, %v482_v34  }
 0x24e   : > { %v468_v35 = vpop.permute.xlu1 %467  ;;  %v472_v36 = vpop.permute.xlu0 %471 }
 0x24f   : > { %v492_v37 = vsel %vm386_vm5, %v472_v36, 0 }
 0x250   : > { %681 = vmatpush3.bf16.msra.mxu1 %v492_v37 }
 0x251   : > { %682 = vmatprep.subr.bf16.mxu1 %v754_v5 }
 0x252   : > { %v470_v38 = vpop.permute.xlu0 %469  ;;  %v466_v40 = vpop.permute.xlu1 %465 }
 0x253   : > { %v479_v39 = vsel %vm386_vm5, %v468_v35, %v470_v38  ;;  %v475_v41 = vsel %vm386_vm5, %v462_v32, %v466_v40 }
 0x254   : > { %683 = vmatpush3.bf16.msra.mxu1 %v479_v39 }
 0x255   : > { %684 = vmatprep.subr.bf16.mxu1 %v754_v5 }
 0x258   : > { %685 = vmatpush3.bf16.msra.mxu1 %v475_v41 }
 0x25b   : > { %687 = vmatmul.mubr.msk.bf16.vlgmr.msra.gmra.mxu1 %vm402_vm6, %v481_v42 }
 0x25f   : > { %v486_v43 = vpop.permute.xlu0 %485 }
 0x31b   : > { %v528_v44 = vpop.f32.mrf.mxu1 }
 0x31c   : > { %v529_v46 = vadd.f32 %v528_v44, %v486_v43 }
 0x31d   : > { %v688_v48 = vpop.f32.mrf.mxu1 }
 0x31e   : > { %v535_v49 = vadd.f32 %v534_v45, %v529_v46 }
 0x31f   : > { %v531_v50 = vpop.f32.mrf.mxu1 }
 0x320   : > { %v537_v51 = vadd.f32 %v536_v47, %v535_v49 }
 0x321   : > { %v689_v52 = vpop.f32.mrf.mxu1 }
 0x322   : > { %v538_v53 = vmul.f32 0.5, %v537_v51 }
 0x324   : > { %vm539_vm11 = vcmp.gt.f32.partialorder %v538_v53, 0.0  ;;  %v540_v54 = vmul.f32 0.01, %v538_v53 }
 0x326   : > { %v541_v55 = vsel %vm539_vm11, %v538_v53, %v540_v54 }
 0x327   : > { %v542_v56 = vpack.c.bf16 %v541_v55, %v541_v55 }
 0x329   : > { %544 = vst.msk [vmem:[%s349_s17] sm:$0xf] %vm543_vm12, %v542_v56 }
 0x32a PF: > { %s17_s26 = sadd.s32 1, %s751_s26   ;;  %s889_s24 = smov %s747_s25 }
 0x32b   : > { %p14_p5 = scmp.ge.s32.totalorder %s17_s26, 4   ;;  %s890_s25 = smov %s892_s27 }
 0x32d   :  { %16 = sbr.rel (!%p14_p5) target bundleno = 2 (0x2), region = 89 }

</bundles_post_ra>
